<compile_context>
chip_gen: v7x
topology: tpu7x:2x2x1
jax: 0.10.0
libtpu: 0.0.40
codegen_flags: <defaults>
</compile_context>

<pallas_src>
import numpy as np
import jax
import jax.numpy as jnp
from jax import lax
from jax.experimental import pallas as pl
from jax.experimental.pallas import tpu as pltpu

LANES = 128

# conv1 geometry: 28x28 input, padding=1 -> 30 rows x 32 cols (row pitch padded
# to 32 so every padded image row is exactly 4 sublane rows), flattened row-major.
W1P = 32
A1 = 968                      # >= 28*32 + 2*32 + 2 (last tap read), multiple of 8

# conv2 geometry: pooled1 (14x14) zero-padded to 16x16, flattened row-major.
W2P = 16
A2R = 264                     # 256 rows + 8 guard rows (taps read up to +34)
Z2 = 14 * W2P                 # 224 conv2 output rows (14 rows at 16-col pitch)

# pooled2 output: 7x7 spatial at an 8-wide row pitch (column q'=7 masked to 0)
P2_ROWS = 56
FC_K = P2_ROWS * LANES        # 7168


# ----------------------------------------------------------------------------
# Fused conv1 + pool1 + conv2 + pool2 kernel (B images per grid step)
# ----------------------------------------------------------------------------
def _fused_conv_kernel(x_ref, w1_ref, b1_ref, w2_ref, b2_ref, o_ref,
                       xb_ref, a2_ref, p1_ref, p2_ref):
    # x_ref : (B, A1, 1)        f32   flattened zero-padded 30x32 images
    # w1_ref: (9, 128)          f32   per-tap conv1 weights (Cout 16 -> 128)
    # b1_ref: (1, 128)          f32
    # w2_ref: (3, 384, 128)     bf16  conv2 weights, kw taps stacked along Cin
    # b2_ref: (1, 128)          f32
    # o_ref : (B, 56, 128)      bf16  pooled conv2 activation (FC input rows)
    # scratches: xb (A1,128) f32, a2 (264,128) bf16, p1 (32,128) f32,
    #            p2 (112,128) f32
    nb = x_ref.shape[0]

    # Hoisted constants (loaded / built once per grid step).
    w1_rows = [w1_ref[t:t + 1, :] for t in range(9)]          # 9 x (1,128)
    b1v = b1_ref[...]
    b2v = b2_ref[...]
    ridx = lax.broadcasted_iota(jnp.int32, (P2_ROWS, LANES), 0)
    keep = (ridx % 8) < 7                                     # mask q'=7 rows

    @pl.loop(0, nb)
    def _(b):
        # Stage image b: single lane-broadcast of the flattened padded image.
        xb_ref[...] = jnp.broadcast_to(x_ref[b], (A1, LANES))
        # Zero the conv2 input buffer (covers all spatial-pad / guard rows).
        a2_ref[...] = jnp.zeros_like(a2_ref)

        # ---- conv1 + bias + ReLU + 2x2 maxpool, one pooled row per chunk ----
        # Each chunk = 64 conv output rows (2 image rows x 32-col pitch); the
        # f32 accumulator is 8 vregs and stays register resident.
        for i in range(14):
            base = i * 64
            acc = xb_ref[base:base + 64, :] * w1_rows[0]
            for t in range(1, 9):
                kh, kw = divmod(t, 3)
                s = base + kh * W1P + kw
                acc = acc + xb_ref[s:s + 64, :] * w1_rows[t]
            act = jnp.maximum(acc + b1v, 0.0)
            # max over the two image rows (h direction) ...
            p1_ref[...] = jnp.maximum(act[0:32, :], act[32:64, :])
            # ... then over adjacent columns (w direction) via stride-2 reads.
            pooled = jnp.maximum(p1_ref[pl.ds(0, 14, stride=2), :],
                                 p1_ref[pl.ds(1, 14, stride=2), :])
            # Embed the 14 valid pooled columns at the padded 16-wide offsets
            # of the conv2 input ((i+1)*16 + 1 .. +14).
            a2_ref[17 + i * 16:31 + i * 16, :] = pooled.astype(jnp.bfloat16)

        # ---- conv2 + bias + ReLU: 3 MXU matmuls with K=384 (kw taps stacked)
        acc2 = jnp.zeros((Z2, LANES), jnp.float32)
        for kh in range(3):
            s = kh * W2P
            op = jnp.concatenate(
                [a2_ref[s + 0:s + 0 + Z2, :],
                 a2_ref[s + 1:s + 1 + Z2, :],
                 a2_ref[s + 2:s + 2 + Z2, :]], axis=1)        # (224, 384) bf16
            acc2 = acc2 + jnp.dot(op, w2_ref[kh],
                                  preferred_element_type=jnp.float32)
        act2 = jnp.maximum(acc2 + b2v, 0.0)

        # ---- 2x2 maxpool of the 14x14 conv2 map (rows at 16-wide pitch) ----
        a3 = act2.reshape(7, 32, LANES)
        p2_ref[...] = jnp.maximum(a3[:, 0:16, :],
                                  a3[:, 16:32, :]).reshape(112, LANES)
        pooled2 = jnp.maximum(p2_ref[pl.ds(0, 56, stride=2), :],
                              p2_ref[pl.ds(1, 56, stride=2), :])
        # Zero the garbage q'=7 rows (invalid conv2 columns 14/15).
        o_ref[b] = jnp.where(keep, pooled2, 0.0).astype(o_ref.dtype)


# ----------------------------------------------------------------------------
# FC kernel: single K block (6272 useful of 7168), one MXU burst per M tile
# ----------------------------------------------------------------------------
def _fc_kernel(x_ref, w_ref, b_ref, o_ref):
    o_ref[...] = (jnp.dot(x_ref[...], w_ref[...],
                          preferred_element_type=jnp.float32)
                  + b_ref[...]).astype(o_ref.dtype)


# ----------------------------------------------------------------------------
# pallas_call wrappers
# ----------------------------------------------------------------------------
def _fused_conv_stage(x, w1, b1, w2, b2, block_b):
    n = x.shape[0]
    return pl.pallas_call(
        _fused_conv_kernel,
        out_shape=jax.ShapeDtypeStruct((n, P2_ROWS, LANES), jnp.bfloat16),
        grid=(n // block_b,),
        in_specs=[
            pl.BlockSpec((block_b, A1, 1), lambda g: (g, 0, 0)),
            pl.BlockSpec((9, LANES), lambda g: (0, 0)),
            pl.BlockSpec((1, LANES), lambda g: (0, 0)),
            pl.BlockSpec((3, 3 * LANES, LANES), lambda g: (0, 0, 0)),
            pl.BlockSpec((1, LANES), lambda g: (0, 0)),
        ],
        out_specs=pl.BlockSpec((block_b, P2_ROWS, LANES), lambda g: (g, 0, 0)),
        scratch_shapes=[
            pltpu.VMEM((A1, LANES), jnp.float32),       # lane-broadcast image
            pltpu.VMEM((A2R, LANES), jnp.bfloat16),     # padded conv2 input
            pltpu.VMEM((32, LANES), jnp.float32),       # pool1 staging
            pltpu.VMEM((112, LANES), jnp.float32),      # pool2 staging
        ],
        compiler_params=pltpu.CompilerParams(
            dimension_semantics=("parallel",)),
    )(x, w1, b1, w2, b2)


def _fc_stage(x, w, b):
    m = x.shape[0]
    tm = m if m <= 128 else next(t for t in (128, 64, 32, 16, 8) if m % t == 0)
    return pl.pallas_call(
        _fc_kernel,
        out_shape=jax.ShapeDtypeStruct((m, LANES), jnp.float32),
        grid=(m // tm,),
        in_specs=[
            pl.BlockSpec((tm, FC_K), lambda i: (i, 0)),
            pl.BlockSpec((FC_K, LANES), lambda i: (0, 0)),
            pl.BlockSpec((1, LANES), lambda i: (0, 0)),
        ],
        out_specs=pl.BlockSpec((tm, LANES), lambda i: (i, 0)),
        compiler_params=pltpu.CompilerParams(
            dimension_semantics=("parallel",)),
    )(x, w, b)


# ----------------------------------------------------------------------------
# Parameters (PyTorch layout) and one-time prep into kernel-friendly layout
# ----------------------------------------------------------------------------
def init_params(key):
    k = jax.random.split(key, 6)
    scale = 0.05
    return {
        "conv1_w": scale * jax.random.normal(k[0], (16, 1, 3, 3), jnp.float32),
        "conv1_b": scale * jax.random.normal(k[1], (16,), jnp.float32),
        "conv2_w": scale * jax.random.normal(k[2], (32, 16, 3, 3), jnp.float32),
        "conv2_b": scale * jax.random.normal(k[3], (32,), jnp.float32),
        "fc_w": scale * jax.random.normal(k[4], (10, 32 * 7 * 7), jnp.float32),
        "fc_b": scale * jax.random.normal(k[5], (10,), jnp.float32),
    }


def prepare_params(params):
    """One-time weight permutation / 128-lane padding / bf16 casts."""
    f32, bf16 = jnp.float32, jnp.bfloat16

    w1 = params["conv1_w"].astype(f32)                          # (16,1,3,3)
    w1m = jnp.transpose(w1[:, 0], (1, 2, 0)).reshape(9, 16)     # (tap, cout)
    w1p = jnp.zeros((9, LANES), f32).at[:, :16].set(w1m)
    b1p = jnp.zeros((1, LANES), f32).at[0, :16].set(
        params["conv1_b"].astype(f32))

    w2 = params["conv2_w"].astype(f32)                          # (32,16,3,3)
    w2m = jnp.transpose(w2, (2, 3, 1, 0))                       # (kh,kw,ci,co)
    w2p = (jnp.zeros((3, 3, LANES, LANES), f32)
           .at[:, :, :16, :32].set(w2m)
           .reshape(3, 3 * LANES, LANES).astype(bf16))          # (3, 384, 128)
    b2p = jnp.zeros((1, LANES), f32).at[0, :32].set(
        params["conv2_b"].astype(f32))

    # FC weight: input index in kernel layout is (p*8 + q')*128 + c
    fcw = params["fc_w"].astype(f32)                            # (10, 1568)
    fc4 = jnp.transpose(fcw.reshape(10, 32, 7, 7), (2, 3, 1, 0))  # (p,q,c,o)
    wfc = (jnp.zeros((7, 8, LANES, LANES), f32)
           .at[:, :7, :32, :10].set(fc4)
           .reshape(FC_K, LANES).astype(bf16))
    bfc = jnp.zeros((1, LANES), f32).at[0, :10].set(
        params["fc_b"].astype(f32))

    return {"w1": w1p, "b1": b1p, "w2": w2p, "b2": b2p, "wfc": wfc, "bfc": bfc}


# ----------------------------------------------------------------------------
# Forward pass
# ----------------------------------------------------------------------------
@jax.jit
def simple_cnn_forward(x_nchw, prep):
    """x_nchw: (N, 1, 28, 28) float32 -> logits (N, 10)."""
    n = x_nchw.shape[0]
    # Input glue: zero-pad spatially to 30x32, flatten row-major, pad tail.
    img = x_nchw[:, 0].astype(jnp.float32)                     # (n, 28, 28)
    imgp = jnp.pad(img, ((0, 0), (1, 1), (1, 3)))              # (n, 30, 32)
    flat = jnp.pad(imgp.reshape(n, 30 * W1P),
                   ((0, 0), (0, A1 - 30 * W1P)))               # (n, A1)

    bb = min(8, n)                                             # images / step
    n_pad = ((n + bb - 1) // bb) * bb
    if n_pad != n:
        flat = jnp.pad(flat, ((0, n_pad - n), (0, 0)))
    xk = flat[:, :, None]                                      # (n_pad, A1, 1)

    pooled = _fused_conv_stage(xk, prep["w1"], prep["b1"],
                               prep["w2"], prep["b2"], bb)     # (n_pad,56,128)
    logits = _fc_stage(pooled.reshape(n_pad, FC_K),
                       prep["wfc"], prep["bfc"])               # (n_pad, 128)
    return logits[:n, :10]


# ----------------------------------------------------------------------------
# Pure-JAX reference (sanity check only)
# ----------------------------------------------------------------------------
def _reference_forward(x_nchw, params):
    x = jnp.transpose(x_nchw, (0, 2, 3, 1))
    dn = ("NHWC", "HWIO", "NHWC")
    y = lax.conv_general_dilated(
        x, jnp.transpose(params["conv1_w"], (2, 3, 1, 0)), (1, 1),
        ((1, 1), (1, 1)), dimension_numbers=dn) + params["conv1_b"]
    y = jax.nn.relu(y)
    y = lax.reduce_window(y, -jnp.inf, lax.max, (1, 2, 2, 1), (1, 2, 2, 1),
                          "VALID")
    y = lax.conv_general_dilated(
        y, jnp.transpose(params["conv2_w"], (2, 3, 1, 0)), (1, 1),
        ((1, 1), (1, 1)), dimension_numbers=dn) + params["conv2_b"]
    y = jax.nn.relu(y)
    y = lax.reduce_window(y, -jnp.inf, lax.max, (1, 2, 2, 1), (1, 2, 2, 1),
                          "VALID")
    flat = jnp.transpose(y, (0, 3, 1, 2)).reshape(x.shape[0], -1)
    return flat @ params["fc_w"].T + params["fc_b"]


if __name__ == "__main__":
    key = jax.random.PRNGKey(0)
    k_param, k_input = jax.random.split(key)

    params = init_params(k_param)
    prep = prepare_params(params)
    # MNIST-shaped input: the fc layer (32*7*7) fixes spatial size to 28x28.
    x = jax.random.normal(k_input, (2, 1, 28, 28), jnp.float32)

    logits = simple_cnn_forward(x, prep)
    jax.block_until_ready(logits)
    assert logits.shape == (2, 10)

    ref = _reference_forward(x, params)
    np.testing.assert_allclose(np.asarray(logits), np.asarray(ref),
                               atol=5e-2, rtol=0.0)
    print("KERNEL_OK")
</pallas_src>

<mosaic_0001>
module attributes {stable_mosaic.version = 11 : i64} {
  func.func @_fc_kernel(%arg0: i32, %arg1: memref<2x7168xbf16, #tpu.memory_space<vmem>>, %arg2: memref<7168x128xbf16, #tpu.memory_space<vmem>>, %arg3: memref<1x128xf32, #tpu.memory_space<vmem>>, %arg4: memref<2x128xf32, #tpu.memory_space<vmem>>) attributes {dimension_semantics = [#tpu.dimension_semantics<parallel>], iteration_bounds = array<i64: 1>, scalar_prefetch = 0 : i64, scratch_operands = 0 : i64, tpu.core_type = #tpu.core_type<tc>, window_params = [{transform_indices = @transform_0, window_bounds = array<i64: 2, 7168>}, {pipeline_mode = #tpu.pipeline_mode<synchronous>, transform_indices = @transform_1, window_bounds = array<i64: 7168, 128>}, {pipeline_mode = #tpu.pipeline_mode<synchronous>, transform_indices = @transform_2, window_bounds = array<i64: 1, 128>}, {transform_indices = @transform_3, window_bounds = array<i64: 2, 128>}]} {
    %c0 = arith.constant 0 : index
    %c0_0 = arith.constant 0 : index
    %0 = vector.load %arg1[%c0, %c0_0] : memref<2x7168xbf16, #tpu.memory_space<vmem>>, vector<2x7168xbf16>
    %c0_1 = arith.constant 0 : index
    %c0_2 = arith.constant 0 : index
    %1 = vector.load %arg2[%c0_1, %c0_2] : memref<7168x128xbf16, #tpu.memory_space<vmem>>, vector<7168x128xbf16>
    %cst = arith.constant dense<0.000000e+00> : vector<2x128xf32>
    %2 = tpu.matmul %0, %1, %cst {dimension_numbers = #tpu.dot_dimension_numbers<[1], [0], [0], [1], [0, 0, 1, 1], [], []>} : vector<2x7168xbf16>, vector<7168x128xbf16>, vector<2x128xf32> -> vector<2x128xf32>
    %c0_3 = arith.constant 0 : index
    %c0_4 = arith.constant 0 : index
    %3 = vector.load %arg3[%c0_3, %c0_4] : memref<1x128xf32, #tpu.memory_space<vmem>>, vector<1x128xf32>
    %4 = vector.broadcast %3 : vector<1x128xf32> to vector<2x128xf32>
    %5 = arith.addf %2, %4 : vector<2x128xf32>
    %c0_5 = arith.constant 0 : index
    %c0_6 = arith.constant 0 : index
    %6 = vector.load %arg4[%c0_5, %c0_6] : memref<2x128xf32, #tpu.memory_space<vmem>>, vector<2x128xf32>
    tpu.vector_store %arg4[%c0_5, %c0_6], %5 {strides = array<i32>} : memref<2x128xf32, #tpu.memory_space<vmem>>, vector<2x128xf32>,
    return
  }
  func.func @transform_0(%arg0: i32) -> (i32, i32) {
    %c0_i32 = arith.constant 0 : i32
    %c0_i32_0 = arith.constant 0 : i32
    return %arg0, %c0_i32 : i32, i32
  }
  func.func @transform_1(%arg0: i32) -> (i32, i32) {
    %c0_i32 = arith.constant 0 : i32
    %c0_i32_0 = arith.constant 0 : i32
    %c0_i32_1 = arith.constant 0 : i32
    return %c0_i32, %c0_i32_0 : i32, i32
  }
  func.func @transform_2(%arg0: i32) -> (i32, i32) {
    %c0_i32 = arith.constant 0 : i32
    %c0_i32_0 = arith.constant 0 : i32
    %c0_i32_1 = arith.constant 0 : i32
    return %c0_i32, %c0_i32_0 : i32, i32
  }
  func.func @transform_3(%arg0: i32) -> (i32, i32) {
    %c0_i32 = arith.constant 0 : i32
    %c0_i32_0 = arith.constant 0 : i32
    return %arg0, %c0_i32 : i32, i32
  }
}

module attributes {stable_mosaic.version = 11 : i64} {
  func.func @_fused_conv_kernel(%arg0: i32, %arg1: memref<2x968x1xf32, #tpu.memory_space<vmem>>, %arg2: memref<9x128xf32, #tpu.memory_space<vmem>>, %arg3: memref<1x128xf32, #tpu.memory_space<vmem>>, %arg4: memref<3x384x128xbf16, #tpu.memory_space<vmem>>, %arg5: memref<1x128xf32, #tpu.memory_space<vmem>>, %arg6: memref<2x56x128xbf16, #tpu.memory_space<vmem>>, %arg7: memref<968x128xf32, #tpu.memory_space<vmem>>, %arg8: memref<264x128xbf16, #tpu.memory_space<vmem>>, %arg9: memref<32x128xf32, #tpu.memory_space<vmem>>, %arg10: memref<112x128xf32, #tpu.memory_space<vmem>>) attributes {dimension_semantics = [#tpu.dimension_semantics<parallel>], iteration_bounds = array<i64: 1>, scalar_prefetch = 0 : i64, scratch_operands = 4 : i64, tpu.core_type = #tpu.core_type<tc>, window_params = [{transform_indices = @transform_0, window_bounds = array<i64: 2, 968, 1>}, {pipeline_mode = #tpu.pipeline_mode<synchronous>, transform_indices = @transform_1, window_bounds = array<i64: 9, 128>}, {pipeline_mode = #tpu.pipeline_mode<synchronous>, transform_indices = @transform_2, window_bounds = array<i64: 1, 128>}, {pipeline_mode = #tpu.pipeline_mode<synchronous>, transform_indices = @transform_3, window_bounds = array<i64: 3, 384, 128>}, {pipeline_mode = #tpu.pipeline_mode<synchronous>, transform_indices = @transform_4, window_bounds = array<i64: 1, 128>}, {transform_indices = @transform_5, window_bounds = array<i64: 2, 56, 128>}]} {
    %c0 = arith.constant 0 : index
    %c0_0 = arith.constant 0 : index
    %0 = vector.load %arg2[%c0, %c0_0] : memref<9x128xf32, #tpu.memory_space<vmem>>, vector<1x128xf32>
    %c1 = arith.constant 1 : index
    %c0_1 = arith.constant 0 : index
    %1 = vector.load %arg2[%c1, %c0_1] : memref<9x128xf32, #tpu.memory_space<vmem>>, vector<1x128xf32>
    %c2 = arith.constant 2 : index
    %c0_2 = arith.constant 0 : index
    %2 = vector.load %arg2[%c2, %c0_2] : memref<9x128xf32, #tpu.memory_space<vmem>>, vector<1x128xf32>
    %c3 = arith.constant 3 : index
    %c0_3 = arith.constant 0 : index
    %3 = vector.load %arg2[%c3, %c0_3] : memref<9x128xf32, #tpu.memory_space<vmem>>, vector<1x128xf32>
    %c4 = arith.constant 4 : index
    %c0_4 = arith.constant 0 : index
    %4 = vector.load %arg2[%c4, %c0_4] : memref<9x128xf32, #tpu.memory_space<vmem>>, vector<1x128xf32>
    %c5 = arith.constant 5 : index
    %c0_5 = arith.constant 0 : index
    %5 = vector.load %arg2[%c5, %c0_5] : memref<9x128xf32, #tpu.memory_space<vmem>>, vector<1x128xf32>
    %c6 = arith.constant 6 : index
    %c0_6 = arith.constant 0 : index
    %6 = vector.load %arg2[%c6, %c0_6] : memref<9x128xf32, #tpu.memory_space<vmem>>, vector<1x128xf32>
    %c7 = arith.constant 7 : index
    %c0_7 = arith.constant 0 : index
    %7 = vector.load %arg2[%c7, %c0_7] : memref<9x128xf32, #tpu.memory_space<vmem>>, vector<1x128xf32>
    %c8 = arith.constant 8 : index
    %c0_8 = arith.constant 0 : index
    %8 = vector.load %arg2[%c8, %c0_8] : memref<9x128xf32, #tpu.memory_space<vmem>>, vector<1x128xf32>
    %c0_9 = arith.constant 0 : index
    %c0_10 = arith.constant 0 : index
    %9 = vector.load %arg3[%c0_9, %c0_10] : memref<1x128xf32, #tpu.memory_space<vmem>>, vector<1x128xf32>
    %c0_11 = arith.constant 0 : index
    %c0_12 = arith.constant 0 : index
    %10 = vector.load %arg5[%c0_11, %c0_12] : memref<1x128xf32, #tpu.memory_space<vmem>>, vector<1x128xf32>
    %11 = tpu.iota {dimensions = array<i32: 0>} : vector<56x128xi32>
    %c8_i32 = arith.constant 8 : i32
    %c0_i32 = arith.constant 0 : i32
    %12 = arith.cmpi eq, %c8_i32, %c0_i32 : i32
    %c1_i32 = arith.constant 1 : i32
    %13 = arith.select %12, %c1_i32, %c8_i32 : i32
    %14 = vector.broadcast %13 : i32 to vector<56x128xi32>
    %15 = arith.remsi %11, %14 : vector<56x128xi32>
    %c0_i32_13 = arith.constant 0 : i32
    %16 = vector.broadcast %c0_i32_13 : i32 to vector<56x128xi32>
    %17 = arith.cmpi ne, %15, %16 : vector<56x128xi32>
    %c0_i32_14 = arith.constant 0 : i32
    %18 = vector.broadcast %c0_i32_14 : i32 to vector<56x128xi32>
    %19 = arith.cmpi slt, %15, %18 : vector<56x128xi32>
    %c0_i32_15 = arith.constant 0 : i32
    %20 = arith.cmpi slt, %13, %c0_i32_15 : i32
    %21 = vector.broadcast %20 : i1 to vector<56x128xi1>
    %22 = vector.broadcast %21 : vector<56x128xi1> to vector<56x128xi1>
    %23 = arith.xori %19, %22 : vector<56x128xi1>
    %24 = arith.andi %23, %17 : vector<56x128xi1>
    %25 = vector.broadcast %13 : i32 to vector<56x128xi32>
    %26 = arith.addi %15, %25 : vector<56x128xi32>
    %27 = arith.select %24, %26, %15 : vector<56x128xi1>, vector<56x128xi32>
    %c7_i32 = arith.constant 7 : i32
    %28 = vector.broadcast %c7_i32 : i32 to vector<56x128xi32>
    %29 = arith.cmpi slt, %27, %28 : vector<56x128xi32>
    %c0_i32_16 = arith.constant 0 : i32
    %c2_i32 = arith.constant 2 : i32
    %30 = arith.addi %c0_i32_16, %c2_i32 : i32
    %c1_i32_17 = arith.constant 1 : i32
    scf.for %arg11 = %c0_i32_16 to %30 step %c1_i32_17  : i32 {
      %c1_i32_19 = arith.constant 1 : i32
      %31 = arith.muli %arg11, %c1_i32_19 : i32
      %c0_i32_20 = arith.constant 0 : i32
      %32 = arith.addi %c0_i32_20, %31 : i32
      %33 = arith.index_cast %32 : i32 to index
      %c0_21 = arith.constant 0 : index
      %c0_22 = arith.constant 0 : index
      %34 = vector.load %arg1[%33, %c0_21, %c0_22] : memref<2x968x1xf32, #tpu.memory_space<vmem>>, vector<1x968x1xf32>
      %35 = vector.shape_cast %34 : vector<1x968x1xf32> to vector<968x1xf32>
      %36 = vector.shape_cast %35 : vector<968x1xf32> to vector<968x1xf32>
      %37 = vector.broadcast %36 : vector<968x1xf32> to vector<968x128xf32>
      %c0_23 = arith.constant 0 : index
      %c0_24 = arith.constant 0 : index
      %38 = vector.load %arg7[%c0_23, %c0_24] : memref<968x128xf32, #tpu.memory_space<vmem>>, vector<968x128xf32>
      tpu.vector_store %arg7[%c0_23, %c0_24], %37 {strides = array<i32>} : memref<968x128xf32, #tpu.memory_space<vmem>>, vector<968x128xf32>,
      %cst = arith.constant 0.000000e+00 : bf16
      %39 = vector.broadcast %cst : bf16 to vector<264x128xbf16>
      %c0_25 = arith.constant 0 : index
      %c0_26 = arith.constant 0 : index
      %40 = vector.load %arg8[%c0_25, %c0_26] : memref<264x128xbf16, #tpu.memory_space<vmem>>, vector<264x128xbf16>
      tpu.vector_store %arg8[%c0_25, %c0_26], %39 {strides = array<i32>} : memref<264x128xbf16, #tpu.memory_space<vmem>>, vector<264x128xbf16>,
      %c0_27 = arith.constant 0 : index
      %c0_28 = arith.constant 0 : index
      %41 = vector.load %arg7[%c0_27, %c0_28] : memref<968x128xf32, #tpu.memory_space<vmem>>, vector<64x128xf32>
      %42 = vector.broadcast %0 : vector<1x128xf32> to vector<64x128xf32>
      %43 = arith.mulf %41, %42 : vector<64x128xf32>
      %c1_29 = arith.constant 1 : index
      %c0_30 = arith.constant 0 : index
      %44 = vector.load %arg7[%c1_29, %c0_30] : memref<968x128xf32, #tpu.memory_space<vmem>>, vector<64x128xf32>
      %45 = vector.broadcast %1 : vector<1x128xf32> to vector<64x128xf32>
      %46 = arith.mulf %44, %45 : vector<64x128xf32>
      %47 = arith.addf %43, %46 : vector<64x128xf32>
      %c2_31 = arith.constant 2 : index
      %c0_32 = arith.constant 0 : index
      %48 = vector.load %arg7[%c2_31, %c0_32] : memref<968x128xf32, #tpu.memory_space<vmem>>, vector<64x128xf32>
      %49 = vector.broadcast %2 : vector<1x128xf32> to vector<64x128xf32>
      %50 = arith.mulf %48, %49 : vector<64x128xf32>
      %51 = arith.addf %47, %50 : vector<64x128xf32>
      %c32 = arith.constant 32 : index
      %c0_33 = arith.constant 0 : index
      %52 = vector.load %arg7[%c32, %c0_33] : memref<968x128xf32, #tpu.memory_space<vmem>>, vector<64x128xf32>
      %53 = vector.broadcast %3 : vector<1x128xf32> to vector<64x128xf32>
      %54 = arith.mulf %52, %53 : vector<64x128xf32>
      %55 = arith.addf %51, %54 : vector<64x128xf32>
      %c33 = arith.constant 33 : index
      %c0_34 = arith.constant 0 : index
      %56 = vector.load %arg7[%c33, %c0_34] : memref<968x128xf32, #tpu.memory_space<vmem>>, vector<64x128xf32>
      %57 = vector.broadcast %4 : vector<1x128xf32> to vector<64x128xf32>
      %58 = arith.mulf %56, %57 : vector<64x128xf32>
      %59 = arith.addf %55, %58 : vector<64x128xf32>
      %c34 = arith.constant 34 : index
      %c0_35 = arith.constant 0 : index
      %60 = vector.load %arg7[%c34, %c0_35] : memref<968x128xf32, #tpu.memory_space<vmem>>, vector<64x128xf32>
      %61 = vector.broadcast %5 : vector<1x128xf32> to vector<64x128xf32>
      %62 = arith.mulf %60, %61 : vector<64x128xf32>
      %63 = arith.addf %59, %62 : vector<64x128xf32>
      %c64 = arith.constant 64 : index
      %c0_36 = arith.constant 0 : index
      %64 = vector.load %arg7[%c64, %c0_36] : memref<968x128xf32, #tpu.memory_space<vmem>>, vector<64x128xf32>
      %65 = vector.broadcast %6 : vector<1x128xf32> to vector<64x128xf32>
      %66 = arith.mulf %64, %65 : vector<64x128xf32>
      %67 = arith.addf %63, %66 : vector<64x128xf32>
      %c65 = arith.constant 65 : index
      %c0_37 = arith.constant 0 : index
      %68 = vector.load %arg7[%c65, %c0_37] : memref<968x128xf32, #tpu.memory_space<vmem>>, vector<64x128xf32>
      %69 = vector.broadcast %7 : vector<1x128xf32> to vector<64x128xf32>
      %70 = arith.mulf %68, %69 : vector<64x128xf32>
      %71 = arith.addf %67, %70 : vector<64x128xf32>
      %c66 = arith.constant 66 : index
      %c0_38 = arith.constant 0 : index
      %72 = vector.load %arg7[%c66, %c0_38] : memref<968x128xf32, #tpu.memory_space<vmem>>, vector<64x128xf32>
      %73 = vector.broadcast %8 : vector<1x128xf32> to vector<64x128xf32>
      %74 = arith.mulf %72, %73 : vector<64x128xf32>
      %75 = arith.addf %71, %74 : vector<64x128xf32>
      %76 = vector.broadcast %9 : vector<1x128xf32> to vector<64x128xf32>
      %77 = arith.addf %75, %76 : vector<64x128xf32>
      %cst_39 = arith.constant 0.000000e+00 : f32
      %78 = vector.broadcast %cst_39 : f32 to vector<64x128xf32>
      %79 = arith.maximumf %77, %78 : vector<64x128xf32>
      %80 = vector.extract_strided_slice %79 {offsets = [0, 0], sizes = [32, 128], strides = [1, 1]} : vector<64x128xf32> to vector<32x128xf32>
      %81 = vector.extract_strided_slice %79 {offsets = [32, 0], sizes = [32, 128], strides = [1, 1]} : vector<64x128xf32> to vector<32x128xf32>
      %82 = arith.maximumf %80, %81 : vector<32x128xf32>
      %c0_40 = arith.constant 0 : index
      %c0_41 = arith.constant 0 : index
      %83 = vector.load %arg9[%c0_40, %c0_41] : memref<32x128xf32, #tpu.memory_space<vmem>>, vector<32x128xf32>
      tpu.vector_store %arg9[%c0_40, %c0_41], %82 {strides = array<i32>} : memref<32x128xf32, #tpu.memory_space<vmem>>, vector<32x128xf32>,
      %c0_42 = arith.constant 0 : index
      %c0_43 = arith.constant 0 : index
      %84 = tpu.strided_load %arg9[%c0_42, %c0_43] {strides = array<i32: 2, 1>} : memref<32x128xf32, #tpu.memory_space<vmem>>, vector<14x128xf32>
      %c1_44 = arith.constant 1 : index
      %c0_45 = arith.constant 0 : index
      %85 = tpu.strided_load %arg9[%c1_44, %c0_45] {strides = array<i32: 2, 1>} : memref<32x128xf32, #tpu.memory_space<vmem>>, vector<14x128xf32>
      %86 = arith.maximumf %84, %85 : vector<14x128xf32>
      %87 = arith.truncf %86 : vector<14x128xf32> to vector<14x128xbf16>
      %c17 = arith.constant 17 : index
      %c0_46 = arith.constant 0 : index
      %88 = vector.load %arg8[%c17, %c0_46] : memref<264x128xbf16, #tpu.memory_space<vmem>>, vector<14x128xbf16>
      tpu.vector_store %arg8[%c17, %c0_46], %87 {strides = array<i32>} : memref<264x128xbf16, #tpu.memory_space<vmem>>, vector<14x128xbf16>,
      %c64_47 = arith.constant 64 : index
      %c0_48 = arith.constant 0 : index
      %89 = vector.load %arg7[%c64_47, %c0_48] : memref<968x128xf32, #tpu.memory_space<vmem>>, vector<64x128xf32>
      %90 = vector.broadcast %0 : vector<1x128xf32> to vector<64x128xf32>
      %91 = arith.mulf %89, %90 : vector<64x128xf32>
      %c65_49 = arith.constant 65 : index
      %c0_50 = arith.constant 0 : index
      %92 = vector.load %arg7[%c65_49, %c0_50] : memref<968x128xf32, #tpu.memory_space<vmem>>, vector<64x128xf32>
      %93 = vector.broadcast %1 : vector<1x128xf32> to vector<64x128xf32>
      %94 = arith.mulf %92, %93 : vector<64x128xf32>
      %95 = arith.addf %91, %94 : vector<64x128xf32>
      %c66_51 = arith.constant 66 : index
      %c0_52 = arith.constant 0 : index
      %96 = vector.load %arg7[%c66_51, %c0_52] : memref<968x128xf32, #tpu.memory_space<vmem>>, vector<64x128xf32>
      %97 = vector.broadcast %2 : vector<1x128xf32> to vector<64x128xf32>
      %98 = arith.mulf %96, %97 : vector<64x128xf32>
      %99 = arith.addf %95, %98 : vector<64x128xf32>
      %c96 = arith.constant 96 : index
      %c0_53 = arith.constant 0 : index
      %100 = vector.load %arg7[%c96, %c0_53] : memref<968x128xf32, #tpu.memory_space<vmem>>, vector<64x128xf32>
      %101 = vector.broadcast %3 : vector<1x128xf32> to vector<64x128xf32>
      %102 = arith.mulf %100, %101 : vector<64x128xf32>
      %103 = arith.addf %99, %102 : vector<64x128xf32>
      %c97 = arith.constant 97 : index
      %c0_54 = arith.constant 0 : index
      %104 = vector.load %arg7[%c97, %c0_54] : memref<968x128xf32, #tpu.memory_space<vmem>>, vector<64x128xf32>
      %105 = vector.broadcast %4 : vector<1x128xf32> to vector<64x128xf32>
      %106 = arith.mulf %104, %105 : vector<64x128xf32>
      %107 = arith.addf %103, %106 : vector<64x128xf32>
      %c98 = arith.constant 98 : index
      %c0_55 = arith.constant 0 : index
      %108 = vector.load %arg7[%c98, %c0_55] : memref<968x128xf32, #tpu.memory_space<vmem>>, vector<64x128xf32>
      %109 = vector.broadcast %5 : vector<1x128xf32> to vector<64x128xf32>
      %110 = arith.mulf %108, %109 : vector<64x128xf32>
      %111 = arith.addf %107, %110 : vector<64x128xf32>
      %c128 = arith.constant 128 : index
      %c0_56 = arith.constant 0 : index
      %112 = vector.load %arg7[%c128, %c0_56] : memref<968x128xf32, #tpu.memory_space<vmem>>, vector<64x128xf32>
      %113 = vector.broadcast %6 : vector<1x128xf32> to vector<64x128xf32>
      %114 = arith.mulf %112, %113 : vector<64x128xf32>
      %115 = arith.addf %111, %114 : vector<64x128xf32>
      %c129 = arith.constant 129 : index
      %c0_57 = arith.constant 0 : index
      %116 = vector.load %arg7[%c129, %c0_57] : memref<968x128xf32, #tpu.memory_space<vmem>>, vector<64x128xf32>
      %117 = vector.broadcast %7 : vector<1x128xf32> to vector<64x128xf32>
      %118 = arith.mulf %116, %117 : vector<64x128xf32>
      %119 = arith.addf %115, %118 : vector<64x128xf32>
      %c130 = arith.constant 130 : index
      %c0_58 = arith.constant 0 : index
      %120 = vector.load %arg7[%c130, %c0_58] : memref<968x128xf32, #tpu.memory_space<vmem>>, vector<64x128xf32>
      %121 = vector.broadcast %8 : vector<1x128xf32> to vector<64x128xf32>
      %122 = arith.mulf %120, %121 : vector<64x128xf32>
      %123 = arith.addf %119, %122 : vector<64x128xf32>
      %124 = vector.broadcast %9 : vector<1x128xf32> to vector<64x128xf32>
      %125 = arith.addf %123, %124 : vector<64x128xf32>
      %cst_59 = arith.constant 0.000000e+00 : f32
      %126 = vector.broadcast %cst_59 : f32 to vector<64x128xf32>
      %127 = arith.maximumf %125, %126 : vector<64x128xf32>
      %128 = vector.extract_strided_slice %127 {offsets = [0, 0], sizes = [32, 128], strides = [1, 1]} : vector<64x128xf32> to vector<32x128xf32>
      %129 = vector.extract_strided_slice %127 {offsets = [32, 0], sizes = [32, 128], strides = [1, 1]} : vector<64x128xf32> to vector<32x128xf32>
      %130 = arith.maximumf %128, %129 : vector<32x128xf32>
      %c0_60 = arith.constant 0 : index
      %c0_61 = arith.constant 0 : index
      %131 = vector.load %arg9[%c0_60, %c0_61] : memref<32x128xf32, #tpu.memory_space<vmem>>, vector<32x128xf32>
      tpu.vector_store %arg9[%c0_60, %c0_61], %130 {strides = array<i32>} : memref<32x128xf32, #tpu.memory_space<vmem>>, vector<32x128xf32>,
      %c0_62 = arith.constant 0 : index
      %c0_63 = arith.constant 0 : index
      %132 = tpu.strided_load %arg9[%c0_62, %c0_63] {strides = array<i32: 2, 1>} : memref<32x128xf32, #tpu.memory_space<vmem>>, vector<14x128xf32>
      %c1_64 = arith.constant 1 : index
      %c0_65 = arith.constant 0 : index
      %133 = tpu.strided_load %arg9[%c1_64, %c0_65] {strides = array<i32: 2, 1>} : memref<32x128xf32, #tpu.memory_space<vmem>>, vector<14x128xf32>
      %134 = arith.maximumf %132, %133 : vector<14x128xf32>
      %135 = arith.truncf %134 : vector<14x128xf32> to vector<14x128xbf16>
      %c33_66 = arith.constant 33 : index
      %c0_67 = arith.constant 0 : index
      %136 = vector.load %arg8[%c33_66, %c0_67] : memref<264x128xbf16, #tpu.memory_space<vmem>>, vector<14x128xbf16>
      tpu.vector_store %arg8[%c33_66, %c0_67], %135 {strides = array<i32>} : memref<264x128xbf16, #tpu.memory_space<vmem>>, vector<14x128xbf16>,
      %c128_68 = arith.constant 128 : index
      %c0_69 = arith.constant 0 : index
      %137 = vector.load %arg7[%c128_68, %c0_69] : memref<968x128xf32, #tpu.memory_space<vmem>>, vector<64x128xf32>
      %138 = vector.broadcast %0 : vector<1x128xf32> to vector<64x128xf32>
      %139 = arith.mulf %137, %138 : vector<64x128xf32>
      %c129_70 = arith.constant 129 : index
      %c0_71 = arith.constant 0 : index
      %140 = vector.load %arg7[%c129_70, %c0_71] : memref<968x128xf32, #tpu.memory_space<vmem>>, vector<64x128xf32>
      %141 = vector.broadcast %1 : vector<1x128xf32> to vector<64x128xf32>
      %142 = arith.mulf %140, %141 : vector<64x128xf32>
      %143 = arith.addf %139, %142 : vector<64x128xf32>
      %c130_72 = arith.constant 130 : index
      %c0_73 = arith.constant 0 : index
      %144 = vector.load %arg7[%c130_72, %c0_73] : memref<968x128xf32, #tpu.memory_space<vmem>>, vector<64x128xf32>
      %145 = vector.broadcast %2 : vector<1x128xf32> to vector<64x128xf32>
      %146 = arith.mulf %144, %145 : vector<64x128xf32>
      %147 = arith.addf %143, %146 : vector<64x128xf32>
      %c160 = arith.constant 160 : index
      %c0_74 = arith.constant 0 : index
      %148 = vector.load %arg7[%c160, %c0_74] : memref<968x128xf32, #tpu.memory_space<vmem>>, vector<64x128xf32>
      %149 = vector.broadcast %3 : vector<1x128xf32> to vector<64x128xf32>
      %150 = arith.mulf %148, %149 : vector<64x128xf32>
      %151 = arith.addf %147, %150 : vector<64x128xf32>
      %c161 = arith.constant 161 : index
      %c0_75 = arith.constant 0 : index
      %152 = vector.load %arg7[%c161, %c0_75] : memref<968x128xf32, #tpu.memory_space<vmem>>, vector<64x128xf32>
      %153 = vector.broadcast %4 : vector<1x128xf32> to vector<64x128xf32>
      %154 = arith.mulf %152, %153 : vector<64x128xf32>
      %155 = arith.addf %151, %154 : vector<64x128xf32>
      %c162 = arith.constant 162 : index
      %c0_76 = arith.constant 0 : index
      %156 = vector.load %arg7[%c162, %c0_76] : memref<968x128xf32, #tpu.memory_space<vmem>>, vector<64x128xf32>
      %157 = vector.broadcast %5 : vector<1x128xf32> to vector<64x128xf32>
      %158 = arith.mulf %156, %157 : vector<64x128xf32>
      %159 = arith.addf %155, %158 : vector<64x128xf32>
      %c192 = arith.constant 192 : index
      %c0_77 = arith.constant 0 : index
      %160 = vector.load %arg7[%c192, %c0_77] : memref<968x128xf32, #tpu.memory_space<vmem>>, vector<64x128xf32>
      %161 = vector.broadcast %6 : vector<1x128xf32> to vector<64x128xf32>
      %162 = arith.mulf %160, %161 : vector<64x128xf32>
      %163 = arith.addf %159, %162 : vector<64x128xf32>
      %c193 = arith.constant 193 : index
      %c0_78 = arith.constant 0 : index
      %164 = vector.load %arg7[%c193, %c0_78] : memref<968x128xf32, #tpu.memory_space<vmem>>, vector<64x128xf32>
      %165 = vector.broadcast %7 : vector<1x128xf32> to vector<64x128xf32>
      %166 = arith.mulf %164, %165 : vector<64x128xf32>
      %167 = arith.addf %163, %166 : vector<64x128xf32>
      %c194 = arith.constant 194 : index
      %c0_79 = arith.constant 0 : index
      %168 = vector.load %arg7[%c194, %c0_79] : memref<968x128xf32, #tpu.memory_space<vmem>>, vector<64x128xf32>
      %169 = vector.broadcast %8 : vector<1x128xf32> to vector<64x128xf32>
      %170 = arith.mulf %168, %169 : vector<64x128xf32>
      %171 = arith.addf %167, %170 : vector<64x128xf32>
      %172 = vector.broadcast %9 : vector<1x128xf32> to vector<64x128xf32>
      %173 = arith.addf %171, %172 : vector<64x128xf32>
      %cst_80 = arith.constant 0.000000e+00 : f32
      %174 = vector.broadcast %cst_80 : f32 to vector<64x128xf32>
      %175 = arith.maximumf %173, %174 : vector<64x128xf32>
      %176 = vector.extract_strided_slice %175 {offsets = [0, 0], sizes = [32, 128], strides = [1, 1]} : vector<64x128xf32> to vector<32x128xf32>
      %177 = vector.extract_strided_slice %175 {offsets = [32, 0], sizes = [32, 128], strides = [1, 1]} : vector<64x128xf32> to vector<32x128xf32>
      %178 = arith.maximumf %176, %177 : vector<32x128xf32>
      %c0_81 = arith.constant 0 : index
      %c0_82 = arith.constant 0 : index
      %179 = vector.load %arg9[%c0_81, %c0_82] : memref<32x128xf32, #tpu.memory_space<vmem>>, vector<32x128xf32>
      tpu.vector_store %arg9[%c0_81, %c0_82], %178 {strides = array<i32>} : memref<32x128xf32, #tpu.memory_space<vmem>>, vector<32x128xf32>,
      %c0_83 = arith.constant 0 : index
      %c0_84 = arith.constant 0 : index
      %180 = tpu.strided_load %arg9[%c0_83, %c0_84] {strides = array<i32: 2, 1>} : memref<32x128xf32, #tpu.memory_space<vmem>>, vector<14x128xf32>
      %c1_85 = arith.constant 1 : index
      %c0_86 = arith.constant 0 : index
      %181 = tpu.strided_load %arg9[%c1_85, %c0_86] {strides = array<i32: 2, 1>} : memref<32x128xf32, #tpu.memory_space<vmem>>, vector<14x128xf32>
      %182 = arith.maximumf %180, %181 : vector<14x128xf32>
      %183 = arith.truncf %182 : vector<14x128xf32> to vector<14x128xbf16>
      %c49 = arith.constant 49 : index
      %c0_87 = arith.constant 0 : index
      %184 = vector.load %arg8[%c49, %c0_87] : memref<264x128xbf16, #tpu.memory_space<vmem>>, vector<14x128xbf16>
      tpu.vector_store %arg8[%c49, %c0_87], %183 {strides = array<i32>} : memref<264x128xbf16, #tpu.memory_space<vmem>>, vector<14x128xbf16>,
      %c192_88 = arith.constant 192 : index
      %c0_89 = arith.constant 0 : index
      %185 = vector.load %arg7[%c192_88, %c0_89] : memref<968x128xf32, #tpu.memory_space<vmem>>, vector<64x128xf32>
      %186 = vector.broadcast %0 : vector<1x128xf32> to vector<64x128xf32>
      %187 = arith.mulf %185, %186 : vector<64x128xf32>
      %c193_90 = arith.constant 193 : index
      %c0_91 = arith.constant 0 : index
      %188 = vector.load %arg7[%c193_90, %c0_91] : memref<968x128xf32, #tpu.memory_space<vmem>>, vector<64x128xf32>
      %189 = vector.broadcast %1 : vector<1x128xf32> to vector<64x128xf32>
      %190 = arith.mulf %188, %189 : vector<64x128xf32>
      %191 = arith.addf %187, %190 : vector<64x128xf32>
      %c194_92 = arith.constant 194 : index
      %c0_93 = arith.constant 0 : index
      %192 = vector.load %arg7[%c194_92, %c0_93] : memref<968x128xf32, #tpu.memory_space<vmem>>, vector<64x128xf32>
      %193 = vector.broadcast %2 : vector<1x128xf32> to vector<64x128xf32>
      %194 = arith.mulf %192, %193 : vector<64x128xf32>
      %195 = arith.addf %191, %194 : vector<64x128xf32>
      %c224 = arith.constant 224 : index
      %c0_94 = arith.constant 0 : index
      %196 = vector.load %arg7[%c224, %c0_94] : memref<968x128xf32, #tpu.memory_space<vmem>>, vector<64x128xf32>
      %197 = vector.broadcast %3 : vector<1x128xf32> to vector<64x128xf32>
      %198 = arith.mulf %196, %197 : vector<64x128xf32>
      %199 = arith.addf %195, %198 : vector<64x128xf32>
      %c225 = arith.constant 225 : index
      %c0_95 = arith.constant 0 : index
      %200 = vector.load %arg7[%c225, %c0_95] : memref<968x128xf32, #tpu.memory_space<vmem>>, vector<64x128xf32>
      %201 = vector.broadcast %4 : vector<1x128xf32> to vector<64x128xf32>
      %202 = arith.mulf %200, %201 : vector<64x128xf32>
      %203 = arith.addf %199, %202 : vector<64x128xf32>
      %c226 = arith.constant 226 : index
      %c0_96 = arith.constant 0 : index
      %204 = vector.load %arg7[%c226, %c0_96] : memref<968x128xf32, #tpu.memory_space<vmem>>, vector<64x128xf32>
      %205 = vector.broadcast %5 : vector<1x128xf32> to vector<64x128xf32>
      %206 = arith.mulf %204, %205 : vector<64x128xf32>
      %207 = arith.addf %203, %206 : vector<64x128xf32>
      %c256 = arith.constant 256 : index
      %c0_97 = arith.constant 0 : index
      %208 = vector.load %arg7[%c256, %c0_97] : memref<968x128xf32, #tpu.memory_space<vmem>>, vector<64x128xf32>
      %209 = vector.broadcast %6 : vector<1x128xf32> to vector<64x128xf32>
      %210 = arith.mulf %208, %209 : vector<64x128xf32>
      %211 = arith.addf %207, %210 : vector<64x128xf32>
      %c257 = arith.constant 257 : index
      %c0_98 = arith.constant 0 : index
      %212 = vector.load %arg7[%c257, %c0_98] : memref<968x128xf32, #tpu.memory_space<vmem>>, vector<64x128xf32>
      %213 = vector.broadcast %7 : vector<1x128xf32> to vector<64x128xf32>
      %214 = arith.mulf %212, %213 : vector<64x128xf32>
      %215 = arith.addf %211, %214 : vector<64x128xf32>
      %c258 = arith.constant 258 : index
      %c0_99 = arith.constant 0 : index
      %216 = vector.load %arg7[%c258, %c0_99] : memref<968x128xf32, #tpu.memory_space<vmem>>, vector<64x128xf32>
      %217 = vector.broadcast %8 : vector<1x128xf32> to vector<64x128xf32>
      %218 = arith.mulf %216, %217 : vector<64x128xf32>
      %219 = arith.addf %215, %218 : vector<64x128xf32>
      %220 = vector.broadcast %9 : vector<1x128xf32> to vector<64x128xf32>
      %221 = arith.addf %219, %220 : vector<64x128xf32>
      %cst_100 = arith.constant 0.000000e+00 : f32
      %222 = vector.broadcast %cst_100 : f32 to vector<64x128xf32>
      %223 = arith.maximumf %221, %222 : vector<64x128xf32>
      %224 = vector.extract_strided_slice %223 {offsets = [0, 0], sizes = [32, 128], strides = [1, 1]} : vector<64x128xf32> to vector<32x128xf32>
      %225 = vector.extract_strided_slice %223 {offsets = [32, 0], sizes = [32, 128], strides = [1, 1]} : vector<64x128xf32> to vector<32x128xf32>
      %226 = arith.maximumf %224, %225 : vector<32x128xf32>
      %c0_101 = arith.constant 0 : index
      %c0_102 = arith.constant 0 : index
      %227 = vector.load %arg9[%c0_101, %c0_102] : memref<32x128xf32, #tpu.memory_space<vmem>>, vector<32x128xf32>
      tpu.vector_store %arg9[%c0_101, %c0_102], %226 {strides = array<i32>} : memref<32x128xf32, #tpu.memory_space<vmem>>, vector<32x128xf32>,
      %c0_103 = arith.constant 0 : index
      %c0_104 = arith.constant 0 : index
      %228 = tpu.strided_load %arg9[%c0_103, %c0_104] {strides = array<i32: 2, 1>} : memref<32x128xf32, #tpu.memory_space<vmem>>, vector<14x128xf32>
      %c1_105 = arith.constant 1 : index
      %c0_106 = arith.constant 0 : index
      %229 = tpu.strided_load %arg9[%c1_105, %c0_106] {strides = array<i32: 2, 1>} : memref<32x128xf32, #tpu.memory_space<vmem>>, vector<14x128xf32>
      %230 = arith.maximumf %228, %229 : vector<14x128xf32>
      %231 = arith.truncf %230 : vector<14x128xf32> to vector<14x128xbf16>
      %c65_107 = arith.constant 65 : index
      %c0_108 = arith.constant 0 : index
      %232 = vector.load %arg8[%c65_107, %c0_108] : memref<264x128xbf16, #tpu.memory_space<vmem>>, vector<14x128xbf16>
      tpu.vector_store %arg8[%c65_107, %c0_108], %231 {strides = array<i32>} : memref<264x128xbf16, #tpu.memory_space<vmem>>, vector<14x128xbf16>,
      %c256_109 = arith.constant 256 : index
      %c0_110 = arith.constant 0 : index
      %233 = vector.load %arg7[%c256_109, %c0_110] : memref<968x128xf32, #tpu.memory_space<vmem>>, vector<64x128xf32>
      %234 = vector.broadcast %0 : vector<1x128xf32> to vector<64x128xf32>
      %235 = arith.mulf %233, %234 : vector<64x128xf32>
      %c257_111 = arith.constant 257 : index
      %c0_112 = arith.constant 0 : index
      %236 = vector.load %arg7[%c257_111, %c0_112] : memref<968x128xf32, #tpu.memory_space<vmem>>, vector<64x128xf32>
      %237 = vector.broadcast %1 : vector<1x128xf32> to vector<64x128xf32>
      %238 = arith.mulf %236, %237 : vector<64x128xf32>
      %239 = arith.addf %235, %238 : vector<64x128xf32>
      %c258_113 = arith.constant 258 : index
      %c0_114 = arith.constant 0 : index
      %240 = vector.load %arg7[%c258_113, %c0_114] : memref<968x128xf32, #tpu.memory_space<vmem>>, vector<64x128xf32>
      %241 = vector.broadcast %2 : vector<1x128xf32> to vector<64x128xf32>
      %242 = arith.mulf %240, %241 : vector<64x128xf32>
      %243 = arith.addf %239, %242 : vector<64x128xf32>
      %c288 = arith.constant 288 : index
      %c0_115 = arith.constant 0 : index
      %244 = vector.load %arg7[%c288, %c0_115] : memref<968x128xf32, #tpu.memory_space<vmem>>, vector<64x128xf32>
      %245 = vector.broadcast %3 : vector<1x128xf32> to vector<64x128xf32>
      %246 = arith.mulf %244, %245 : vector<64x128xf32>
      %247 = arith.addf %243, %246 : vector<64x128xf32>
      %c289 = arith.constant 289 : index
      %c0_116 = arith.constant 0 : index
      %248 = vector.load %arg7[%c289, %c0_116] : memref<968x128xf32, #tpu.memory_space<vmem>>, vector<64x128xf32>
      %249 = vector.broadcast %4 : vector<1x128xf32> to vector<64x128xf32>
      %250 = arith.mulf %248, %249 : vector<64x128xf32>
      %251 = arith.addf %247, %250 : vector<64x128xf32>
      %c290 = arith.constant 290 : index
      %c0_117 = arith.constant 0 : index
      %252 = vector.load %arg7[%c290, %c0_117] : memref<968x128xf32, #tpu.memory_space<vmem>>, vector<64x128xf32>
      %253 = vector.broadcast %5 : vector<1x128xf32> to vector<64x128xf32>
      %254 = arith.mulf %252, %253 : vector<64x128xf32>
      %255 = arith.addf %251, %254 : vector<64x128xf32>
      %c320 = arith.constant 320 : index
      %c0_118 = arith.constant 0 : index
      %256 = vector.load %arg7[%c320, %c0_118] : memref<968x128xf32, #tpu.memory_space<vmem>>, vector<64x128xf32>
      %257 = vector.broadcast %6 : vector<1x128xf32> to vector<64x128xf32>
      %258 = arith.mulf %256, %257 : vector<64x128xf32>
      %259 = arith.addf %255, %258 : vector<64x128xf32>
      %c321 = arith.constant 321 : index
      %c0_119 = arith.constant 0 : index
      %260 = vector.load %arg7[%c321, %c0_119] : memref<968x128xf32, #tpu.memory_space<vmem>>, vector<64x128xf32>
      %261 = vector.broadcast %7 : vector<1x128xf32> to vector<64x128xf32>
      %262 = arith.mulf %260, %261 : vector<64x128xf32>
      %263 = arith.addf %259, %262 : vector<64x128xf32>
      %c322 = arith.constant 322 : index
      %c0_120 = arith.constant 0 : index
      %264 = vector.load %arg7[%c322, %c0_120] : memref<968x128xf32, #tpu.memory_space<vmem>>, vector<64x128xf32>
      %265 = vector.broadcast %8 : vector<1x128xf32> to vector<64x128xf32>
      %266 = arith.mulf %264, %265 : vector<64x128xf32>
      %267 = arith.addf %263, %266 : vector<64x128xf32>
      %268 = vector.broadcast %9 : vector<1x128xf32> to vector<64x128xf32>
      %269 = arith.addf %267, %268 : vector<64x128xf32>
      %cst_121 = arith.constant 0.000000e+00 : f32
      %270 = vector.broadcast %cst_121 : f32 to vector<64x128xf32>
      %271 = arith.maximumf %269, %270 : vector<64x128xf32>
      %272 = vector.extract_strided_slice %271 {offsets = [0, 0], sizes = [32, 128], strides = [1, 1]} : vector<64x128xf32> to vector<32x128xf32>
      %273 = vector.extract_strided_slice %271 {offsets = [32, 0], sizes = [32, 128], strides = [1, 1]} : vector<64x128xf32> to vector<32x128xf32>
      %274 = arith.maximumf %272, %273 : vector<32x128xf32>
      %c0_122 = arith.constant 0 : index
      %c0_123 = arith.constant 0 : index
      %275 = vector.load %arg9[%c0_122, %c0_123] : memref<32x128xf32, #tpu.memory_space<vmem>>, vector<32x128xf32>
      tpu.vector_store %arg9[%c0_122, %c0_123], %274 {strides = array<i32>} : memref<32x128xf32, #tpu.memory_space<vmem>>, vector<32x128xf32>,
      %c0_124 = arith.constant 0 : index
      %c0_125 = arith.constant 0 : index
      %276 = tpu.strided_load %arg9[%c0_124, %c0_125] {strides = array<i32: 2, 1>} : memref<32x128xf32, #tpu.memory_space<vmem>>, vector<14x128xf32>
      %c1_126 = arith.constant 1 : index
      %c0_127 = arith.constant 0 : index
      %277 = tpu.strided_load %arg9[%c1_126, %c0_127] {strides = array<i32: 2, 1>} : memref<32x128xf32, #tpu.memory_space<vmem>>, vector<14x128xf32>
      %278 = arith.maximumf %276, %277 : vector<14x128xf32>
      %279 = arith.truncf %278 : vector<14x128xf32> to vector<14x128xbf16>
      %c81 = arith.constant 81 : index
      %c0_128 = arith.constant 0 : index
      %280 = vector.load %arg8[%c81, %c0_128] : memref<264x128xbf16, #tpu.memory_space<vmem>>, vector<14x128xbf16>
      tpu.vector_store %arg8[%c81, %c0_128], %279 {strides = array<i32>} : memref<264x128xbf16, #tpu.memory_space<vmem>>, vector<14x128xbf16>,
      %c320_129 = arith.constant 320 : index
      %c0_130 = arith.constant 0 : index
      %281 = vector.load %arg7[%c320_129, %c0_130] : memref<968x128xf32, #tpu.memory_space<vmem>>, vector<64x128xf32>
      %282 = vector.broadcast %0 : vector<1x128xf32> to vector<64x128xf32>
      %283 = arith.mulf %281, %282 : vector<64x128xf32>
      %c321_131 = arith.constant 321 : index
      %c0_132 = arith.constant 0 : index
      %284 = vector.load %arg7[%c321_131, %c0_132] : memref<968x128xf32, #tpu.memory_space<vmem>>, vector<64x128xf32>
      %285 = vector.broadcast %1 : vector<1x128xf32> to vector<64x128xf32>
      %286 = arith.mulf %284, %285 : vector<64x128xf32>
      %287 = arith.addf %283, %286 : vector<64x128xf32>
      %c322_133 = arith.constant 322 : index
      %c0_134 = arith.constant 0 : index
      %288 = vector.load %arg7[%c322_133, %c0_134] : memref<968x128xf32, #tpu.memory_space<vmem>>, vector<64x128xf32>
      %289 = vector.broadcast %2 : vector<1x128xf32> to vector<64x128xf32>
      %290 = arith.mulf %288, %289 : vector<64x128xf32>
      %291 = arith.addf %287, %290 : vector<64x128xf32>
      %c352 = arith.constant 352 : index
      %c0_135 = arith.constant 0 : index
      %292 = vector.load %arg7[%c352, %c0_135] : memref<968x128xf32, #tpu.memory_space<vmem>>, vector<64x128xf32>
      %293 = vector.broadcast %3 : vector<1x128xf32> to vector<64x128xf32>
      %294 = arith.mulf %292, %293 : vector<64x128xf32>
      %295 = arith.addf %291, %294 : vector<64x128xf32>
      %c353 = arith.constant 353 : index
      %c0_136 = arith.constant 0 : index
      %296 = vector.load %arg7[%c353, %c0_136] : memref<968x128xf32, #tpu.memory_space<vmem>>, vector<64x128xf32>
      %297 = vector.broadcast %4 : vector<1x128xf32> to vector<64x128xf32>
      %298 = arith.mulf %296, %297 : vector<64x128xf32>
      %299 = arith.addf %295, %298 : vector<64x128xf32>
      %c354 = arith.constant 354 : index
      %c0_137 = arith.constant 0 : index
      %300 = vector.load %arg7[%c354, %c0_137] : memref<968x128xf32, #tpu.memory_space<vmem>>, vector<64x128xf32>
      %301 = vector.broadcast %5 : vector<1x128xf32> to vector<64x128xf32>
      %302 = arith.mulf %300, %301 : vector<64x128xf32>
      %303 = arith.addf %299, %302 : vector<64x128xf32>
      %c384 = arith.constant 384 : index
      %c0_138 = arith.constant 0 : index
      %304 = vector.load %arg7[%c384, %c0_138] : memref<968x128xf32, #tpu.memory_space<vmem>>, vector<64x128xf32>
      %305 = vector.broadcast %6 : vector<1x128xf32> to vector<64x128xf32>
      %306 = arith.mulf %304, %305 : vector<64x128xf32>
      %307 = arith.addf %303, %306 : vector<64x128xf32>
      %c385 = arith.constant 385 : index
      %c0_139 = arith.constant 0 : index
      %308 = vector.load %arg7[%c385, %c0_139] : memref<968x128xf32, #tpu.memory_space<vmem>>, vector<64x128xf32>
      %309 = vector.broadcast %7 : vector<1x128xf32> to vector<64x128xf32>
      %310 = arith.mulf %308, %309 : vector<64x128xf32>
      %311 = arith.addf %307, %310 : vector<64x128xf32>
      %c386 = arith.constant 386 : index
      %c0_140 = arith.constant 0 : index
      %312 = vector.load %arg7[%c386, %c0_140] : memref<968x128xf32, #tpu.memory_space<vmem>>, vector<64x128xf32>
      %313 = vector.broadcast %8 : vector<1x128xf32> to vector<64x128xf32>
      %314 = arith.mulf %312, %313 : vector<64x128xf32>
      %315 = arith.addf %311, %314 : vector<64x128xf32>
      %316 = vector.broadcast %9 : vector<1x128xf32> to vector<64x128xf32>
      %317 = arith.addf %315, %316 : vector<64x128xf32>
      %cst_141 = arith.constant 0.000000e+00 : f32
      %318 = vector.broadcast %cst_141 : f32 to vector<64x128xf32>
      %319 = arith.maximumf %317, %318 : vector<64x128xf32>
      %320 = vector.extract_strided_slice %319 {offsets = [0, 0], sizes = [32, 128], strides = [1, 1]} : vector<64x128xf32> to vector<32x128xf32>
      %321 = vector.extract_strided_slice %319 {offsets = [32, 0], sizes = [32, 128], strides = [1, 1]} : vector<64x128xf32> to vector<32x128xf32>
      %322 = arith.maximumf %320, %321 : vector<32x128xf32>
      %c0_142 = arith.constant 0 : index
      %c0_143 = arith.constant 0 : index
      %323 = vector.load %arg9[%c0_142, %c0_143] : memref<32x128xf32, #tpu.memory_space<vmem>>, vector<32x128xf32>
      tpu.vector_store %arg9[%c0_142, %c0_143], %322 {strides = array<i32>} : memref<32x128xf32, #tpu.memory_space<vmem>>, vector<32x128xf32>,
      %c0_144 = arith.constant 0 : index
      %c0_145 = arith.constant 0 : index
      %324 = tpu.strided_load %arg9[%c0_144, %c0_145] {strides = array<i32: 2, 1>} : memref<32x128xf32, #tpu.memory_space<vmem>>, vector<14x128xf32>
      %c1_146 = arith.constant 1 : index
      %c0_147 = arith.constant 0 : index
      %325 = tpu.strided_load %arg9[%c1_146, %c0_147] {strides = array<i32: 2, 1>} : memref<32x128xf32, #tpu.memory_space<vmem>>, vector<14x128xf32>
      %326 = arith.maximumf %324, %325 : vector<14x128xf32>
      %327 = arith.truncf %326 : vector<14x128xf32> to vector<14x128xbf16>
      %c97_148 = arith.constant 97 : index
      %c0_149 = arith.constant 0 : index
      %328 = vector.load %arg8[%c97_148, %c0_149] : memref<264x128xbf16, #tpu.memory_space<vmem>>, vector<14x128xbf16>
      tpu.vector_store %arg8[%c97_148, %c0_149], %327 {strides = array<i32>} : memref<264x128xbf16, #tpu.memory_space<vmem>>, vector<14x128xbf16>,
      %c384_150 = arith.constant 384 : index
      %c0_151 = arith.constant 0 : index
      %329 = vector.load %arg7[%c384_150, %c0_151] : memref<968x128xf32, #tpu.memory_space<vmem>>, vector<64x128xf32>
      %330 = vector.broadcast %0 : vector<1x128xf32> to vector<64x128xf32>
      %331 = arith.mulf %329, %330 : vector<64x128xf32>
      %c385_152 = arith.constant 385 : index
      %c0_153 = arith.constant 0 : index
      %332 = vector.load %arg7[%c385_152, %c0_153] : memref<968x128xf32, #tpu.memory_space<vmem>>, vector<64x128xf32>
      %333 = vector.broadcast %1 : vector<1x128xf32> to vector<64x128xf32>
      %334 = arith.mulf %332, %333 : vector<64x128xf32>
      %335 = arith.addf %331, %334 : vector<64x128xf32>
      %c386_154 = arith.constant 386 : index
      %c0_155 = arith.constant 0 : index
      %336 = vector.load %arg7[%c386_154, %c0_155] : memref<968x128xf32, #tpu.memory_space<vmem>>, vector<64x128xf32>
      %337 = vector.broadcast %2 : vector<1x128xf32> to vector<64x128xf32>
      %338 = arith.mulf %336, %337 : vector<64x128xf32>
      %339 = arith.addf %335, %338 : vector<64x128xf32>
      %c416 = arith.constant 416 : index
      %c0_156 = arith.constant 0 : index
      %340 = vector.load %arg7[%c416, %c0_156] : memref<968x128xf32, #tpu.memory_space<vmem>>, vector<64x128xf32>
      %341 = vector.broadcast %3 : vector<1x128xf32> to vector<64x128xf32>
      %342 = arith.mulf %340, %341 : vector<64x128xf32>
      %343 = arith.addf %339, %342 : vector<64x128xf32>
      %c417 = arith.constant 417 : index
      %c0_157 = arith.constant 0 : index
      %344 = vector.load %arg7[%c417, %c0_157] : memref<968x128xf32, #tpu.memory_space<vmem>>, vector<64x128xf32>
      %345 = vector.broadcast %4 : vector<1x128xf32> to vector<64x128xf32>
      %346 = arith.mulf %344, %345 : vector<64x128xf32>
      %347 = arith.addf %343, %346 : vector<64x128xf32>
      %c418 = arith.constant 418 : index
      %c0_158 = arith.constant 0 : index
      %348 = vector.load %arg7[%c418, %c0_158] : memref<968x128xf32, #tpu.memory_space<vmem>>, vector<64x128xf32>
      %349 = vector.broadcast %5 : vector<1x128xf32> to vector<64x128xf32>
      %350 = arith.mulf %348, %349 : vector<64x128xf32>
      %351 = arith.addf %347, %350 : vector<64x128xf32>
      %c448 = arith.constant 448 : index
      %c0_159 = arith.constant 0 : index
      %352 = vector.load %arg7[%c448, %c0_159] : memref<968x128xf32, #tpu.memory_space<vmem>>, vector<64x128xf32>
      %353 = vector.broadcast %6 : vector<1x128xf32> to vector<64x128xf32>
      %354 = arith.mulf %352, %353 : vector<64x128xf32>
      %355 = arith.addf %351, %354 : vector<64x128xf32>
      %c449 = arith.constant 449 : index
      %c0_160 = arith.constant 0 : index
      %356 = vector.load %arg7[%c449, %c0_160] : memref<968x128xf32, #tpu.memory_space<vmem>>, vector<64x128xf32>
      %357 = vector.broadcast %7 : vector<1x128xf32> to vector<64x128xf32>
      %358 = arith.mulf %356, %357 : vector<64x128xf32>
      %359 = arith.addf %355, %358 : vector<64x128xf32>
      %c450 = arith.constant 450 : index
      %c0_161 = arith.constant 0 : index
      %360 = vector.load %arg7[%c450, %c0_161] : memref<968x128xf32, #tpu.memory_space<vmem>>, vector<64x128xf32>
      %361 = vector.broadcast %8 : vector<1x128xf32> to vector<64x128xf32>
      %362 = arith.mulf %360, %361 : vector<64x128xf32>
      %363 = arith.addf %359, %362 : vector<64x128xf32>
      %364 = vector.broadcast %9 : vector<1x128xf32> to vector<64x128xf32>
      %365 = arith.addf %363, %364 : vector<64x128xf32>
      %cst_162 = arith.constant 0.000000e+00 : f32
      %366 = vector.broadcast %cst_162 : f32 to vector<64x128xf32>
      %367 = arith.maximumf %365, %366 : vector<64x128xf32>
      %368 = vector.extract_strided_slice %367 {offsets = [0, 0], sizes = [32, 128], strides = [1, 1]} : vector<64x128xf32> to vector<32x128xf32>
      %369 = vector.extract_strided_slice %367 {offsets = [32, 0], sizes = [32, 128], strides = [1, 1]} : vector<64x128xf32> to vector<32x128xf32>
      %370 = arith.maximumf %368, %369 : vector<32x128xf32>
      %c0_163 = arith.constant 0 : index
      %c0_164 = arith.constant 0 : index
      %371 = vector.load %arg9[%c0_163, %c0_164] : memref<32x128xf32, #tpu.memory_space<vmem>>, vector<32x128xf32>
      tpu.vector_store %arg9[%c0_163, %c0_164], %370 {strides = array<i32>} : memref<32x128xf32, #tpu.memory_space<vmem>>, vector<32x128xf32>,
      %c0_165 = arith.constant 0 : index
      %c0_166 = arith.constant 0 : index
      %372 = tpu.strided_load %arg9[%c0_165, %c0_166] {strides = array<i32: 2, 1>} : memref<32x128xf32, #tpu.memory_space<vmem>>, vector<14x128xf32>
      %c1_167 = arith.constant 1 : index
      %c0_168 = arith.constant 0 : index
      %373 = tpu.strided_load %arg9[%c1_167, %c0_168] {strides = array<i32: 2, 1>} : memref<32x128xf32, #tpu.memory_space<vmem>>, vector<14x128xf32>
      %374 = arith.maximumf %372, %373 : vector<14x128xf32>
      %375 = arith.truncf %374 : vector<14x128xf32> to vector<14x128xbf16>
      %c113 = arith.constant 113 : index
      %c0_169 = arith.constant 0 : index
      %376 = vector.load %arg8[%c113, %c0_169] : memref<264x128xbf16, #tpu.memory_space<vmem>>, vector<14x128xbf16>
      tpu.vector_store %arg8[%c113, %c0_169], %375 {strides = array<i32>} : memref<264x128xbf16, #tpu.memory_space<vmem>>, vector<14x128xbf16>,
      %c448_170 = arith.constant 448 : index
      %c0_171 = arith.constant 0 : index
      %377 = vector.load %arg7[%c448_170, %c0_171] : memref<968x128xf32, #tpu.memory_space<vmem>>, vector<64x128xf32>
      %378 = vector.broadcast %0 : vector<1x128xf32> to vector<64x128xf32>
      %379 = arith.mulf %377, %378 : vector<64x128xf32>
      %c449_172 = arith.constant 449 : index
      %c0_173 = arith.constant 0 : index
      %380 = vector.load %arg7[%c449_172, %c0_173] : memref<968x128xf32, #tpu.memory_space<vmem>>, vector<64x128xf32>
      %381 = vector.broadcast %1 : vector<1x128xf32> to vector<64x128xf32>
      %382 = arith.mulf %380, %381 : vector<64x128xf32>
      %383 = arith.addf %379, %382 : vector<64x128xf32>
      %c450_174 = arith.constant 450 : index
      %c0_175 = arith.constant 0 : index
      %384 = vector.load %arg7[%c450_174, %c0_175] : memref<968x128xf32, #tpu.memory_space<vmem>>, vector<64x128xf32>
      %385 = vector.broadcast %2 : vector<1x128xf32> to vector<64x128xf32>
      %386 = arith.mulf %384, %385 : vector<64x128xf32>
      %387 = arith.addf %383, %386 : vector<64x128xf32>
      %c480 = arith.constant 480 : index
      %c0_176 = arith.constant 0 : index
      %388 = vector.load %arg7[%c480, %c0_176] : memref<968x128xf32, #tpu.memory_space<vmem>>, vector<64x128xf32>
      %389 = vector.broadcast %3 : vector<1x128xf32> to vector<64x128xf32>
      %390 = arith.mulf %388, %389 : vector<64x128xf32>
      %391 = arith.addf %387, %390 : vector<64x128xf32>
      %c481 = arith.constant 481 : index
      %c0_177 = arith.constant 0 : index
      %392 = vector.load %arg7[%c481, %c0_177] : memref<968x128xf32, #tpu.memory_space<vmem>>, vector<64x128xf32>
      %393 = vector.broadcast %4 : vector<1x128xf32> to vector<64x128xf32>
      %394 = arith.mulf %392, %393 : vector<64x128xf32>
      %395 = arith.addf %391, %394 : vector<64x128xf32>
      %c482 = arith.constant 482 : index
      %c0_178 = arith.constant 0 : index
      %396 = vector.load %arg7[%c482, %c0_178] : memref<968x128xf32, #tpu.memory_space<vmem>>, vector<64x128xf32>
      %397 = vector.broadcast %5 : vector<1x128xf32> to vector<64x128xf32>
      %398 = arith.mulf %396, %397 : vector<64x128xf32>
      %399 = arith.addf %395, %398 : vector<64x128xf32>
      %c512 = arith.constant 512 : index
      %c0_179 = arith.constant 0 : index
      %400 = vector.load %arg7[%c512, %c0_179] : memref<968x128xf32, #tpu.memory_space<vmem>>, vector<64x128xf32>
      %401 = vector.broadcast %6 : vector<1x128xf32> to vector<64x128xf32>
      %402 = arith.mulf %400, %401 : vector<64x128xf32>
      %403 = arith.addf %399, %402 : vector<64x128xf32>
      %c513 = arith.constant 513 : index
      %c0_180 = arith.constant 0 : index
      %404 = vector.load %arg7[%c513, %c0_180] : memref<968x128xf32, #tpu.memory_space<vmem>>, vector<64x128xf32>
      %405 = vector.broadcast %7 : vector<1x128xf32> to vector<64x128xf32>
      %406 = arith.mulf %404, %405 : vector<64x128xf32>
      %407 = arith.addf %403, %406 : vector<64x128xf32>
      %c514 = arith.constant 514 : index
      %c0_181 = arith.constant 0 : index
      %408 = vector.load %arg7[%c514, %c0_181] : memref<968x128xf32, #tpu.memory_space<vmem>>, vector<64x128xf32>
      %409 = vector.broadcast %8 : vector<1x128xf32> to vector<64x128xf32>
      %410 = arith.mulf %408, %409 : vector<64x128xf32>
      %411 = arith.addf %407, %410 : vector<64x128xf32>
      %412 = vector.broadcast %9 : vector<1x128xf32> to vector<64x128xf32>
      %413 = arith.addf %411, %412 : vector<64x128xf32>
      %cst_182 = arith.constant 0.000000e+00 : f32
      %414 = vector.broadcast %cst_182 : f32 to vector<64x128xf32>
      %415 = arith.maximumf %413, %414 : vector<64x128xf32>
      %416 = vector.extract_strided_slice %415 {offsets = [0, 0], sizes = [32, 128], strides = [1, 1]} : vector<64x128xf32> to vector<32x128xf32>
      %417 = vector.extract_strided_slice %415 {offsets = [32, 0], sizes = [32, 128], strides = [1, 1]} : vector<64x128xf32> to vector<32x128xf32>
      %418 = arith.maximumf %416, %417 : vector<32x128xf32>
      %c0_183 = arith.constant 0 : index
      %c0_184 = arith.constant 0 : index
      %419 = vector.load %arg9[%c0_183, %c0_184] : memref<32x128xf32, #tpu.memory_space<vmem>>, vector<32x128xf32>
      tpu.vector_store %arg9[%c0_183, %c0_184], %418 {strides = array<i32>} : memref<32x128xf32, #tpu.memory_space<vmem>>, vector<32x128xf32>,
      %c0_185 = arith.constant 0 : index
      %c0_186 = arith.constant 0 : index
      %420 = tpu.strided_load %arg9[%c0_185, %c0_186] {strides = array<i32: 2, 1>} : memref<32x128xf32, #tpu.memory_space<vmem>>, vector<14x128xf32>
      %c1_187 = arith.constant 1 : index
      %c0_188 = arith.constant 0 : index
      %421 = tpu.strided_load %arg9[%c1_187, %c0_188] {strides = array<i32: 2, 1>} : memref<32x128xf32, #tpu.memory_space<vmem>>, vector<14x128xf32>
      %422 = arith.maximumf %420, %421 : vector<14x128xf32>
      %423 = arith.truncf %422 : vector<14x128xf32> to vector<14x128xbf16>
      %c129_189 = arith.constant 129 : index
      %c0_190 = arith.constant 0 : index
      %424 = vector.load %arg8[%c129_189, %c0_190] : memref<264x128xbf16, #tpu.memory_space<vmem>>, vector<14x128xbf16>
      tpu.vector_store %arg8[%c129_189, %c0_190], %423 {strides = array<i32>} : memref<264x128xbf16, #tpu.memory_space<vmem>>, vector<14x128xbf16>,
      %c512_191 = arith.constant 512 : index
      %c0_192 = arith.constant 0 : index
      %425 = vector.load %arg7[%c512_191, %c0_192] : memref<968x128xf32, #tpu.memory_space<vmem>>, vector<64x128xf32>
      %426 = vector.broadcast %0 : vector<1x128xf32> to vector<64x128xf32>
      %427 = arith.mulf %425, %426 : vector<64x128xf32>
      %c513_193 = arith.constant 513 : index
      %c0_194 = arith.constant 0 : index
      %428 = vector.load %arg7[%c513_193, %c0_194] : memref<968x128xf32, #tpu.memory_space<vmem>>, vector<64x128xf32>
      %429 = vector.broadcast %1 : vector<1x128xf32> to vector<64x128xf32>
      %430 = arith.mulf %428, %429 : vector<64x128xf32>
      %431 = arith.addf %427, %430 : vector<64x128xf32>
      %c514_195 = arith.constant 514 : index
      %c0_196 = arith.constant 0 : index
      %432 = vector.load %arg7[%c514_195, %c0_196] : memref<968x128xf32, #tpu.memory_space<vmem>>, vector<64x128xf32>
      %433 = vector.broadcast %2 : vector<1x128xf32> to vector<64x128xf32>
      %434 = arith.mulf %432, %433 : vector<64x128xf32>
      %435 = arith.addf %431, %434 : vector<64x128xf32>
      %c544 = arith.constant 544 : index
      %c0_197 = arith.constant 0 : index
      %436 = vector.load %arg7[%c544, %c0_197] : memref<968x128xf32, #tpu.memory_space<vmem>>, vector<64x128xf32>
      %437 = vector.broadcast %3 : vector<1x128xf32> to vector<64x128xf32>
      %438 = arith.mulf %436, %437 : vector<64x128xf32>
      %439 = arith.addf %435, %438 : vector<64x128xf32>
      %c545 = arith.constant 545 : index
      %c0_198 = arith.constant 0 : index
      %440 = vector.load %arg7[%c545, %c0_198] : memref<968x128xf32, #tpu.memory_space<vmem>>, vector<64x128xf32>
      %441 = vector.broadcast %4 : vector<1x128xf32> to vector<64x128xf32>
      %442 = arith.mulf %440, %441 : vector<64x128xf32>
      %443 = arith.addf %439, %442 : vector<64x128xf32>
      %c546 = arith.constant 546 : index
      %c0_199 = arith.constant 0 : index
      %444 = vector.load %arg7[%c546, %c0_199] : memref<968x128xf32, #tpu.memory_space<vmem>>, vector<64x128xf32>
      %445 = vector.broadcast %5 : vector<1x128xf32> to vector<64x128xf32>
      %446 = arith.mulf %444, %445 : vector<64x128xf32>
      %447 = arith.addf %443, %446 : vector<64x128xf32>
      %c576 = arith.constant 576 : index
      %c0_200 = arith.constant 0 : index
      %448 = vector.load %arg7[%c576, %c0_200] : memref<968x128xf32, #tpu.memory_space<vmem>>, vector<64x128xf32>
      %449 = vector.broadcast %6 : vector<1x128xf32> to vector<64x128xf32>
      %450 = arith.mulf %448, %449 : vector<64x128xf32>
      %451 = arith.addf %447, %450 : vector<64x128xf32>
      %c577 = arith.constant 577 : index
      %c0_201 = arith.constant 0 : index
      %452 = vector.load %arg7[%c577, %c0_201] : memref<968x128xf32, #tpu.memory_space<vmem>>, vector<64x128xf32>
      %453 = vector.broadcast %7 : vector<1x128xf32> to vector<64x128xf32>
      %454 = arith.mulf %452, %453 : vector<64x128xf32>
      %455 = arith.addf %451, %454 : vector<64x128xf32>
      %c578 = arith.constant 578 : index
      %c0_202 = arith.constant 0 : index
      %456 = vector.load %arg7[%c578, %c0_202] : memref<968x128xf32, #tpu.memory_space<vmem>>, vector<64x128xf32>
      %457 = vector.broadcast %8 : vector<1x128xf32> to vector<64x128xf32>
      %458 = arith.mulf %456, %457 : vector<64x128xf32>
      %459 = arith.addf %455, %458 : vector<64x128xf32>
      %460 = vector.broadcast %9 : vector<1x128xf32> to vector<64x128xf32>
      %461 = arith.addf %459, %460 : vector<64x128xf32>
      %cst_203 = arith.constant 0.000000e+00 : f32
      %462 = vector.broadcast %cst_203 : f32 to vector<64x128xf32>
      %463 = arith.maximumf %461, %462 : vector<64x128xf32>
      %464 = vector.extract_strided_slice %463 {offsets = [0, 0], sizes = [32, 128], strides = [1, 1]} : vector<64x128xf32> to vector<32x128xf32>
      %465 = vector.extract_strided_slice %463 {offsets = [32, 0], sizes = [32, 128], strides = [1, 1]} : vector<64x128xf32> to vector<32x128xf32>
      %466 = arith.maximumf %464, %465 : vector<32x128xf32>
      %c0_204 = arith.constant 0 : index
      %c0_205 = arith.constant 0 : index
      %467 = vector.load %arg9[%c0_204, %c0_205] : memref<32x128xf32, #tpu.memory_space<vmem>>, vector<32x128xf32>
      tpu.vector_store %arg9[%c0_204, %c0_205], %466 {strides = array<i32>} : memref<32x128xf32, #tpu.memory_space<vmem>>, vector<32x128xf32>,
      %c0_206 = arith.constant 0 : index
      %c0_207 = arith.constant 0 : index
      %468 = tpu.strided_load %arg9[%c0_206, %c0_207] {strides = array<i32: 2, 1>} : memref<32x128xf32, #tpu.memory_space<vmem>>, vector<14x128xf32>
      %c1_208 = arith.constant 1 : index
      %c0_209 = arith.constant 0 : index
      %469 = tpu.strided_load %arg9[%c1_208, %c0_209] {strides = array<i32: 2, 1>} : memref<32x128xf32, #tpu.memory_space<vmem>>, vector<14x128xf32>
      %470 = arith.maximumf %468, %469 : vector<14x128xf32>
      %471 = arith.truncf %470 : vector<14x128xf32> to vector<14x128xbf16>
      %c145 = arith.constant 145 : index
      %c0_210 = arith.constant 0 : index
      %472 = vector.load %arg8[%c145, %c0_210] : memref<264x128xbf16, #tpu.memory_space<vmem>>, vector<14x128xbf16>
      tpu.vector_store %arg8[%c145, %c0_210], %471 {strides = array<i32>} : memref<264x128xbf16, #tpu.memory_space<vmem>>, vector<14x128xbf16>,
      %c576_211 = arith.constant 576 : index
      %c0_212 = arith.constant 0 : index
      %473 = vector.load %arg7[%c576_211, %c0_212] : memref<968x128xf32, #tpu.memory_space<vmem>>, vector<64x128xf32>
      %474 = vector.broadcast %0 : vector<1x128xf32> to vector<64x128xf32>
      %475 = arith.mulf %473, %474 : vector<64x128xf32>
      %c577_213 = arith.constant 577 : index
      %c0_214 = arith.constant 0 : index
      %476 = vector.load %arg7[%c577_213, %c0_214] : memref<968x128xf32, #tpu.memory_space<vmem>>, vector<64x128xf32>
      %477 = vector.broadcast %1 : vector<1x128xf32> to vector<64x128xf32>
      %478 = arith.mulf %476, %477 : vector<64x128xf32>
      %479 = arith.addf %475, %478 : vector<64x128xf32>
      %c578_215 = arith.constant 578 : index
      %c0_216 = arith.constant 0 : index
      %480 = vector.load %arg7[%c578_215, %c0_216] : memref<968x128xf32, #tpu.memory_space<vmem>>, vector<64x128xf32>
      %481 = vector.broadcast %2 : vector<1x128xf32> to vector<64x128xf32>
      %482 = arith.mulf %480, %481 : vector<64x128xf32>
      %483 = arith.addf %479, %482 : vector<64x128xf32>
      %c608 = arith.constant 608 : index
      %c0_217 = arith.constant 0 : index
      %484 = vector.load %arg7[%c608, %c0_217] : memref<968x128xf32, #tpu.memory_space<vmem>>, vector<64x128xf32>
      %485 = vector.broadcast %3 : vector<1x128xf32> to vector<64x128xf32>
      %486 = arith.mulf %484, %485 : vector<64x128xf32>
      %487 = arith.addf %483, %486 : vector<64x128xf32>
      %c609 = arith.constant 609 : index
      %c0_218 = arith.constant 0 : index
      %488 = vector.load %arg7[%c609, %c0_218] : memref<968x128xf32, #tpu.memory_space<vmem>>, vector<64x128xf32>
      %489 = vector.broadcast %4 : vector<1x128xf32> to vector<64x128xf32>
      %490 = arith.mulf %488, %489 : vector<64x128xf32>
      %491 = arith.addf %487, %490 : vector<64x128xf32>
      %c610 = arith.constant 610 : index
      %c0_219 = arith.constant 0 : index
      %492 = vector.load %arg7[%c610, %c0_219] : memref<968x128xf32, #tpu.memory_space<vmem>>, vector<64x128xf32>
      %493 = vector.broadcast %5 : vector<1x128xf32> to vector<64x128xf32>
      %494 = arith.mulf %492, %493 : vector<64x128xf32>
      %495 = arith.addf %491, %494 : vector<64x128xf32>
      %c640 = arith.constant 640 : index
      %c0_220 = arith.constant 0 : index
      %496 = vector.load %arg7[%c640, %c0_220] : memref<968x128xf32, #tpu.memory_space<vmem>>, vector<64x128xf32>
      %497 = vector.broadcast %6 : vector<1x128xf32> to vector<64x128xf32>
      %498 = arith.mulf %496, %497 : vector<64x128xf32>
      %499 = arith.addf %495, %498 : vector<64x128xf32>
      %c641 = arith.constant 641 : index
      %c0_221 = arith.constant 0 : index
      %500 = vector.load %arg7[%c641, %c0_221] : memref<968x128xf32, #tpu.memory_space<vmem>>, vector<64x128xf32>
      %501 = vector.broadcast %7 : vector<1x128xf32> to vector<64x128xf32>
      %502 = arith.mulf %500, %501 : vector<64x128xf32>
      %503 = arith.addf %499, %502 : vector<64x128xf32>
      %c642 = arith.constant 642 : index
      %c0_222 = arith.constant 0 : index
      %504 = vector.load %arg7[%c642, %c0_222] : memref<968x128xf32, #tpu.memory_space<vmem>>, vector<64x128xf32>
      %505 = vector.broadcast %8 : vector<1x128xf32> to vector<64x128xf32>
      %506 = arith.mulf %504, %505 : vector<64x128xf32>
      %507 = arith.addf %503, %506 : vector<64x128xf32>
      %508 = vector.broadcast %9 : vector<1x128xf32> to vector<64x128xf32>
      %509 = arith.addf %507, %508 : vector<64x128xf32>
      %cst_223 = arith.constant 0.000000e+00 : f32
      %510 = vector.broadcast %cst_223 : f32 to vector<64x128xf32>
      %511 = arith.maximumf %509, %510 : vector<64x128xf32>
      %512 = vector.extract_strided_slice %511 {offsets = [0, 0], sizes = [32, 128], strides = [1, 1]} : vector<64x128xf32> to vector<32x128xf32>
      %513 = vector.extract_strided_slice %511 {offsets = [32, 0], sizes = [32, 128], strides = [1, 1]} : vector<64x128xf32> to vector<32x128xf32>
      %514 = arith.maximumf %512, %513 : vector<32x128xf32>
      %c0_224 = arith.constant 0 : index
      %c0_225 = arith.constant 0 : index
      %515 = vector.load %arg9[%c0_224, %c0_225] : memref<32x128xf32, #tpu.memory_space<vmem>>, vector<32x128xf32>
      tpu.vector_store %arg9[%c0_224, %c0_225], %514 {strides = array<i32>} : memref<32x128xf32, #tpu.memory_space<vmem>>, vector<32x128xf32>,
      %c0_226 = arith.constant 0 : index
      %c0_227 = arith.constant 0 : index
      %516 = tpu.strided_load %arg9[%c0_226, %c0_227] {strides = array<i32: 2, 1>} : memref<32x128xf32, #tpu.memory_space<vmem>>, vector<14x128xf32>
      %c1_228 = arith.constant 1 : index
      %c0_229 = arith.constant 0 : index
      %517 = tpu.strided_load %arg9[%c1_228, %c0_229] {strides = array<i32: 2, 1>} : memref<32x128xf32, #tpu.memory_space<vmem>>, vector<14x128xf32>
      %518 = arith.maximumf %516, %517 : vector<14x128xf32>
      %519 = arith.truncf %518 : vector<14x128xf32> to vector<14x128xbf16>
      %c161_230 = arith.constant 161 : index
      %c0_231 = arith.constant 0 : index
      %520 = vector.load %arg8[%c161_230, %c0_231] : memref<264x128xbf16, #tpu.memory_space<vmem>>, vector<14x128xbf16>
      tpu.vector_store %arg8[%c161_230, %c0_231], %519 {strides = array<i32>} : memref<264x128xbf16, #tpu.memory_space<vmem>>, vector<14x128xbf16>,
      %c640_232 = arith.constant 640 : index
      %c0_233 = arith.constant 0 : index
      %521 = vector.load %arg7[%c640_232, %c0_233] : memref<968x128xf32, #tpu.memory_space<vmem>>, vector<64x128xf32>
      %522 = vector.broadcast %0 : vector<1x128xf32> to vector<64x128xf32>
      %523 = arith.mulf %521, %522 : vector<64x128xf32>
      %c641_234 = arith.constant 641 : index
      %c0_235 = arith.constant 0 : index
      %524 = vector.load %arg7[%c641_234, %c0_235] : memref<968x128xf32, #tpu.memory_space<vmem>>, vector<64x128xf32>
      %525 = vector.broadcast %1 : vector<1x128xf32> to vector<64x128xf32>
      %526 = arith.mulf %524, %525 : vector<64x128xf32>
      %527 = arith.addf %523, %526 : vector<64x128xf32>
      %c642_236 = arith.constant 642 : index
      %c0_237 = arith.constant 0 : index
      %528 = vector.load %arg7[%c642_236, %c0_237] : memref<968x128xf32, #tpu.memory_space<vmem>>, vector<64x128xf32>
      %529 = vector.broadcast %2 : vector<1x128xf32> to vector<64x128xf32>
      %530 = arith.mulf %528, %529 : vector<64x128xf32>
      %531 = arith.addf %527, %530 : vector<64x128xf32>
      %c672 = arith.constant 672 : index
      %c0_238 = arith.constant 0 : index
      %532 = vector.load %arg7[%c672, %c0_238] : memref<968x128xf32, #tpu.memory_space<vmem>>, vector<64x128xf32>
      %533 = vector.broadcast %3 : vector<1x128xf32> to vector<64x128xf32>
      %534 = arith.mulf %532, %533 : vector<64x128xf32>
      %535 = arith.addf %531, %534 : vector<64x128xf32>
      %c673 = arith.constant 673 : index
      %c0_239 = arith.constant 0 : index
      %536 = vector.load %arg7[%c673, %c0_239] : memref<968x128xf32, #tpu.memory_space<vmem>>, vector<64x128xf32>
      %537 = vector.broadcast %4 : vector<1x128xf32> to vector<64x128xf32>
      %538 = arith.mulf %536, %537 : vector<64x128xf32>
      %539 = arith.addf %535, %538 : vector<64x128xf32>
      %c674 = arith.constant 674 : index
      %c0_240 = arith.constant 0 : index
      %540 = vector.load %arg7[%c674, %c0_240] : memref<968x128xf32, #tpu.memory_space<vmem>>, vector<64x128xf32>
      %541 = vector.broadcast %5 : vector<1x128xf32> to vector<64x128xf32>
      %542 = arith.mulf %540, %541 : vector<64x128xf32>
      %543 = arith.addf %539, %542 : vector<64x128xf32>
      %c704 = arith.constant 704 : index
      %c0_241 = arith.constant 0 : index
      %544 = vector.load %arg7[%c704, %c0_241] : memref<968x128xf32, #tpu.memory_space<vmem>>, vector<64x128xf32>
      %545 = vector.broadcast %6 : vector<1x128xf32> to vector<64x128xf32>
      %546 = arith.mulf %544, %545 : vector<64x128xf32>
      %547 = arith.addf %543, %546 : vector<64x128xf32>
      %c705 = arith.constant 705 : index
      %c0_242 = arith.constant 0 : index
      %548 = vector.load %arg7[%c705, %c0_242] : memref<968x128xf32, #tpu.memory_space<vmem>>, vector<64x128xf32>
      %549 = vector.broadcast %7 : vector<1x128xf32> to vector<64x128xf32>
      %550 = arith.mulf %548, %549 : vector<64x128xf32>
      %551 = arith.addf %547, %550 : vector<64x128xf32>
      %c706 = arith.constant 706 : index
      %c0_243 = arith.constant 0 : index
      %552 = vector.load %arg7[%c706, %c0_243] : memref<968x128xf32, #tpu.memory_space<vmem>>, vector<64x128xf32>
      %553 = vector.broadcast %8 : vector<1x128xf32> to vector<64x128xf32>
      %554 = arith.mulf %552, %553 : vector<64x128xf32>
      %555 = arith.addf %551, %554 : vector<64x128xf32>
      %556 = vector.broadcast %9 : vector<1x128xf32> to vector<64x128xf32>
      %557 = arith.addf %555, %556 : vector<64x128xf32>
      %cst_244 = arith.constant 0.000000e+00 : f32
      %558 = vector.broadcast %cst_244 : f32 to vector<64x128xf32>
      %559 = arith.maximumf %557, %558 : vector<64x128xf32>
      %560 = vector.extract_strided_slice %559 {offsets = [0, 0], sizes = [32, 128], strides = [1, 1]} : vector<64x128xf32> to vector<32x128xf32>
      %561 = vector.extract_strided_slice %559 {offsets = [32, 0], sizes = [32, 128], strides = [1, 1]} : vector<64x128xf32> to vector<32x128xf32>
      %562 = arith.maximumf %560, %561 : vector<32x128xf32>
      %c0_245 = arith.constant 0 : index
      %c0_246 = arith.constant 0 : index
      %563 = vector.load %arg9[%c0_245, %c0_246] : memref<32x128xf32, #tpu.memory_space<vmem>>, vector<32x128xf32>
      tpu.vector_store %arg9[%c0_245, %c0_246], %562 {strides = array<i32>} : memref<32x128xf32, #tpu.memory_space<vmem>>, vector<32x128xf32>,
      %c0_247 = arith.constant 0 : index
      %c0_248 = arith.constant 0 : index
      %564 = tpu.strided_load %arg9[%c0_247, %c0_248] {strides = array<i32: 2, 1>} : memref<32x128xf32, #tpu.memory_space<vmem>>, vector<14x128xf32>
      %c1_249 = arith.constant 1 : index
      %c0_250 = arith.constant 0 : index
      %565 = tpu.strided_load %arg9[%c1_249, %c0_250] {strides = array<i32: 2, 1>} : memref<32x128xf32, #tpu.memory_space<vmem>>, vector<14x128xf32>
      %566 = arith.maximumf %564, %565 : vector<14x128xf32>
      %567 = arith.truncf %566 : vector<14x128xf32> to vector<14x128xbf16>
      %c177 = arith.constant 177 : index
      %c0_251 = arith.constant 0 : index
      %568 = vector.load %arg8[%c177, %c0_251] : memref<264x128xbf16, #tpu.memory_space<vmem>>, vector<14x128xbf16>
      tpu.vector_store %arg8[%c177, %c0_251], %567 {strides = array<i32>} : memref<264x128xbf16, #tpu.memory_space<vmem>>, vector<14x128xbf16>,
      %c704_252 = arith.constant 704 : index
      %c0_253 = arith.constant 0 : index
      %569 = vector.load %arg7[%c704_252, %c0_253] : memref<968x128xf32, #tpu.memory_space<vmem>>, vector<64x128xf32>
      %570 = vector.broadcast %0 : vector<1x128xf32> to vector<64x128xf32>
      %571 = arith.mulf %569, %570 : vector<64x128xf32>
      %c705_254 = arith.constant 705 : index
      %c0_255 = arith.constant 0 : index
      %572 = vector.load %arg7[%c705_254, %c0_255] : memref<968x128xf32, #tpu.memory_space<vmem>>, vector<64x128xf32>
      %573 = vector.broadcast %1 : vector<1x128xf32> to vector<64x128xf32>
      %574 = arith.mulf %572, %573 : vector<64x128xf32>
      %575 = arith.addf %571, %574 : vector<64x128xf32>
      %c706_256 = arith.constant 706 : index
      %c0_257 = arith.constant 0 : index
      %576 = vector.load %arg7[%c706_256, %c0_257] : memref<968x128xf32, #tpu.memory_space<vmem>>, vector<64x128xf32>
      %577 = vector.broadcast %2 : vector<1x128xf32> to vector<64x128xf32>
      %578 = arith.mulf %576, %577 : vector<64x128xf32>
      %579 = arith.addf %575, %578 : vector<64x128xf32>
      %c736 = arith.constant 736 : index
      %c0_258 = arith.constant 0 : index
      %580 = vector.load %arg7[%c736, %c0_258] : memref<968x128xf32, #tpu.memory_space<vmem>>, vector<64x128xf32>
      %581 = vector.broadcast %3 : vector<1x128xf32> to vector<64x128xf32>
      %582 = arith.mulf %580, %581 : vector<64x128xf32>
      %583 = arith.addf %579, %582 : vector<64x128xf32>
      %c737 = arith.constant 737 : index
      %c0_259 = arith.constant 0 : index
      %584 = vector.load %arg7[%c737, %c0_259] : memref<968x128xf32, #tpu.memory_space<vmem>>, vector<64x128xf32>
      %585 = vector.broadcast %4 : vector<1x128xf32> to vector<64x128xf32>
      %586 = arith.mulf %584, %585 : vector<64x128xf32>
      %587 = arith.addf %583, %586 : vector<64x128xf32>
      %c738 = arith.constant 738 : index
      %c0_260 = arith.constant 0 : index
      %588 = vector.load %arg7[%c738, %c0_260] : memref<968x128xf32, #tpu.memory_space<vmem>>, vector<64x128xf32>
      %589 = vector.broadcast %5 : vector<1x128xf32> to vector<64x128xf32>
      %590 = arith.mulf %588, %589 : vector<64x128xf32>
      %591 = arith.addf %587, %590 : vector<64x128xf32>
      %c768 = arith.constant 768 : index
      %c0_261 = arith.constant 0 : index
      %592 = vector.load %arg7[%c768, %c0_261] : memref<968x128xf32, #tpu.memory_space<vmem>>, vector<64x128xf32>
      %593 = vector.broadcast %6 : vector<1x128xf32> to vector<64x128xf32>
      %594 = arith.mulf %592, %593 : vector<64x128xf32>
      %595 = arith.addf %591, %594 : vector<64x128xf32>
      %c769 = arith.constant 769 : index
      %c0_262 = arith.constant 0 : index
      %596 = vector.load %arg7[%c769, %c0_262] : memref<968x128xf32, #tpu.memory_space<vmem>>, vector<64x128xf32>
      %597 = vector.broadcast %7 : vector<1x128xf32> to vector<64x128xf32>
      %598 = arith.mulf %596, %597 : vector<64x128xf32>
      %599 = arith.addf %595, %598 : vector<64x128xf32>
      %c770 = arith.constant 770 : index
      %c0_263 = arith.constant 0 : index
      %600 = vector.load %arg7[%c770, %c0_263] : memref<968x128xf32, #tpu.memory_space<vmem>>, vector<64x128xf32>
      %601 = vector.broadcast %8 : vector<1x128xf32> to vector<64x128xf32>
      %602 = arith.mulf %600, %601 : vector<64x128xf32>
      %603 = arith.addf %599, %602 : vector<64x128xf32>
      %604 = vector.broadcast %9 : vector<1x128xf32> to vector<64x128xf32>
      %605 = arith.addf %603, %604 : vector<64x128xf32>
      %cst_264 = arith.constant 0.000000e+00 : f32
      %606 = vector.broadcast %cst_264 : f32 to vector<64x128xf32>
      %607 = arith.maximumf %605, %606 : vector<64x128xf32>
      %608 = vector.extract_strided_slice %607 {offsets = [0, 0], sizes = [32, 128], strides = [1, 1]} : vector<64x128xf32> to vector<32x128xf32>
      %609 = vector.extract_strided_slice %607 {offsets = [32, 0], sizes = [32, 128], strides = [1, 1]} : vector<64x128xf32> to vector<32x128xf32>
      %610 = arith.maximumf %608, %609 : vector<32x128xf32>
      %c0_265 = arith.constant 0 : index
      %c0_266 = arith.constant 0 : index
      %611 = vector.load %arg9[%c0_265, %c0_266] : memref<32x128xf32, #tpu.memory_space<vmem>>, vector<32x128xf32>
      tpu.vector_store %arg9[%c0_265, %c0_266], %610 {strides = array<i32>} : memref<32x128xf32, #tpu.memory_space<vmem>>, vector<32x128xf32>,
      %c0_267 = arith.constant 0 : index
      %c0_268 = arith.constant 0 : index
      %612 = tpu.strided_load %arg9[%c0_267, %c0_268] {strides = array<i32: 2, 1>} : memref<32x128xf32, #tpu.memory_space<vmem>>, vector<14x128xf32>
      %c1_269 = arith.constant 1 : index
      %c0_270 = arith.constant 0 : index
      %613 = tpu.strided_load %arg9[%c1_269, %c0_270] {strides = array<i32: 2, 1>} : memref<32x128xf32, #tpu.memory_space<vmem>>, vector<14x128xf32>
      %614 = arith.maximumf %612, %613 : vector<14x128xf32>
      %615 = arith.truncf %614 : vector<14x128xf32> to vector<14x128xbf16>
      %c193_271 = arith.constant 193 : index
      %c0_272 = arith.constant 0 : index
      %616 = vector.load %arg8[%c193_271, %c0_272] : memref<264x128xbf16, #tpu.memory_space<vmem>>, vector<14x128xbf16>
      tpu.vector_store %arg8[%c193_271, %c0_272], %615 {strides = array<i32>} : memref<264x128xbf16, #tpu.memory_space<vmem>>, vector<14x128xbf16>,
      %c768_273 = arith.constant 768 : index
      %c0_274 = arith.constant 0 : index
      %617 = vector.load %arg7[%c768_273, %c0_274] : memref<968x128xf32, #tpu.memory_space<vmem>>, vector<64x128xf32>
      %618 = vector.broadcast %0 : vector<1x128xf32> to vector<64x128xf32>
      %619 = arith.mulf %617, %618 : vector<64x128xf32>
      %c769_275 = arith.constant 769 : index
      %c0_276 = arith.constant 0 : index
      %620 = vector.load %arg7[%c769_275, %c0_276] : memref<968x128xf32, #tpu.memory_space<vmem>>, vector<64x128xf32>
      %621 = vector.broadcast %1 : vector<1x128xf32> to vector<64x128xf32>
      %622 = arith.mulf %620, %621 : vector<64x128xf32>
      %623 = arith.addf %619, %622 : vector<64x128xf32>
      %c770_277 = arith.constant 770 : index
      %c0_278 = arith.constant 0 : index
      %624 = vector.load %arg7[%c770_277, %c0_278] : memref<968x128xf32, #tpu.memory_space<vmem>>, vector<64x128xf32>
      %625 = vector.broadcast %2 : vector<1x128xf32> to vector<64x128xf32>
      %626 = arith.mulf %624, %625 : vector<64x128xf32>
      %627 = arith.addf %623, %626 : vector<64x128xf32>
      %c800 = arith.constant 800 : index
      %c0_279 = arith.constant 0 : index
      %628 = vector.load %arg7[%c800, %c0_279] : memref<968x128xf32, #tpu.memory_space<vmem>>, vector<64x128xf32>
      %629 = vector.broadcast %3 : vector<1x128xf32> to vector<64x128xf32>
      %630 = arith.mulf %628, %629 : vector<64x128xf32>
      %631 = arith.addf %627, %630 : vector<64x128xf32>
      %c801 = arith.constant 801 : index
      %c0_280 = arith.constant 0 : index
      %632 = vector.load %arg7[%c801, %c0_280] : memref<968x128xf32, #tpu.memory_space<vmem>>, vector<64x128xf32>
      %633 = vector.broadcast %4 : vector<1x128xf32> to vector<64x128xf32>
      %634 = arith.mulf %632, %633 : vector<64x128xf32>
      %635 = arith.addf %631, %634 : vector<64x128xf32>
      %c802 = arith.constant 802 : index
      %c0_281 = arith.constant 0 : index
      %636 = vector.load %arg7[%c802, %c0_281] : memref<968x128xf32, #tpu.memory_space<vmem>>, vector<64x128xf32>
      %637 = vector.broadcast %5 : vector<1x128xf32> to vector<64x128xf32>
      %638 = arith.mulf %636, %637 : vector<64x128xf32>
      %639 = arith.addf %635, %638 : vector<64x128xf32>
      %c832 = arith.constant 832 : index
      %c0_282 = arith.constant 0 : index
      %640 = vector.load %arg7[%c832, %c0_282] : memref<968x128xf32, #tpu.memory_space<vmem>>, vector<64x128xf32>
      %641 = vector.broadcast %6 : vector<1x128xf32> to vector<64x128xf32>
      %642 = arith.mulf %640, %641 : vector<64x128xf32>
      %643 = arith.addf %639, %642 : vector<64x128xf32>
      %c833 = arith.constant 833 : index
      %c0_283 = arith.constant 0 : index
      %644 = vector.load %arg7[%c833, %c0_283] : memref<968x128xf32, #tpu.memory_space<vmem>>, vector<64x128xf32>
      %645 = vector.broadcast %7 : vector<1x128xf32> to vector<64x128xf32>
      %646 = arith.mulf %644, %645 : vector<64x128xf32>
      %647 = arith.addf %643, %646 : vector<64x128xf32>
      %c834 = arith.constant 834 : index
      %c0_284 = arith.constant 0 : index
      %648 = vector.load %arg7[%c834, %c0_284] : memref<968x128xf32, #tpu.memory_space<vmem>>, vector<64x128xf32>
      %649 = vector.broadcast %8 : vector<1x128xf32> to vector<64x128xf32>
      %650 = arith.mulf %648, %649 : vector<64x128xf32>
      %651 = arith.addf %647, %650 : vector<64x128xf32>
      %652 = vector.broadcast %9 : vector<1x128xf32> to vector<64x128xf32>
      %653 = arith.addf %651, %652 : vector<64x128xf32>
      %cst_285 = arith.constant 0.000000e+00 : f32
      %654 = vector.broadcast %cst_285 : f32 to vector<64x128xf32>
      %655 = arith.maximumf %653, %654 : vector<64x128xf32>
      %656 = vector.extract_strided_slice %655 {offsets = [0, 0], sizes = [32, 128], strides = [1, 1]} : vector<64x128xf32> to vector<32x128xf32>
      %657 = vector.extract_strided_slice %655 {offsets = [32, 0], sizes = [32, 128], strides = [1, 1]} : vector<64x128xf32> to vector<32x128xf32>
      %658 = arith.maximumf %656, %657 : vector<32x128xf32>
      %c0_286 = arith.constant 0 : index
      %c0_287 = arith.constant 0 : index
      %659 = vector.load %arg9[%c0_286, %c0_287] : memref<32x128xf32, #tpu.memory_space<vmem>>, vector<32x128xf32>
      tpu.vector_store %arg9[%c0_286, %c0_287], %658 {strides = array<i32>} : memref<32x128xf32, #tpu.memory_space<vmem>>, vector<32x128xf32>,
      %c0_288 = arith.constant 0 : index
      %c0_289 = arith.constant 0 : index
      %660 = tpu.strided_load %arg9[%c0_288, %c0_289] {strides = array<i32: 2, 1>} : memref<32x128xf32, #tpu.memory_space<vmem>>, vector<14x128xf32>
      %c1_290 = arith.constant 1 : index
      %c0_291 = arith.constant 0 : index
      %661 = tpu.strided_load %arg9[%c1_290, %c0_291] {strides = array<i32: 2, 1>} : memref<32x128xf32, #tpu.memory_space<vmem>>, vector<14x128xf32>
      %662 = arith.maximumf %660, %661 : vector<14x128xf32>
      %663 = arith.truncf %662 : vector<14x128xf32> to vector<14x128xbf16>
      %c209 = arith.constant 209 : index
      %c0_292 = arith.constant 0 : index
      %664 = vector.load %arg8[%c209, %c0_292] : memref<264x128xbf16, #tpu.memory_space<vmem>>, vector<14x128xbf16>
      tpu.vector_store %arg8[%c209, %c0_292], %663 {strides = array<i32>} : memref<264x128xbf16, #tpu.memory_space<vmem>>, vector<14x128xbf16>,
      %c832_293 = arith.constant 832 : index
      %c0_294 = arith.constant 0 : index
      %665 = vector.load %arg7[%c832_293, %c0_294] : memref<968x128xf32, #tpu.memory_space<vmem>>, vector<64x128xf32>
      %666 = vector.broadcast %0 : vector<1x128xf32> to vector<64x128xf32>
      %667 = arith.mulf %665, %666 : vector<64x128xf32>
      %c833_295 = arith.constant 833 : index
      %c0_296 = arith.constant 0 : index
      %668 = vector.load %arg7[%c833_295, %c0_296] : memref<968x128xf32, #tpu.memory_space<vmem>>, vector<64x128xf32>
      %669 = vector.broadcast %1 : vector<1x128xf32> to vector<64x128xf32>
      %670 = arith.mulf %668, %669 : vector<64x128xf32>
      %671 = arith.addf %667, %670 : vector<64x128xf32>
      %c834_297 = arith.constant 834 : index
      %c0_298 = arith.constant 0 : index
      %672 = vector.load %arg7[%c834_297, %c0_298] : memref<968x128xf32, #tpu.memory_space<vmem>>, vector<64x128xf32>
      %673 = vector.broadcast %2 : vector<1x128xf32> to vector<64x128xf32>
      %674 = arith.mulf %672, %673 : vector<64x128xf32>
      %675 = arith.addf %671, %674 : vector<64x128xf32>
      %c864 = arith.constant 864 : index
      %c0_299 = arith.constant 0 : index
      %676 = vector.load %arg7[%c864, %c0_299] : memref<968x128xf32, #tpu.memory_space<vmem>>, vector<64x128xf32>
      %677 = vector.broadcast %3 : vector<1x128xf32> to vector<64x128xf32>
      %678 = arith.mulf %676, %677 : vector<64x128xf32>
      %679 = arith.addf %675, %678 : vector<64x128xf32>
      %c865 = arith.constant 865 : index
      %c0_300 = arith.constant 0 : index
      %680 = vector.load %arg7[%c865, %c0_300] : memref<968x128xf32, #tpu.memory_space<vmem>>, vector<64x128xf32>
      %681 = vector.broadcast %4 : vector<1x128xf32> to vector<64x128xf32>
      %682 = arith.mulf %680, %681 : vector<64x128xf32>
      %683 = arith.addf %679, %682 : vector<64x128xf32>
      %c866 = arith.constant 866 : index
      %c0_301 = arith.constant 0 : index
      %684 = vector.load %arg7[%c866, %c0_301] : memref<968x128xf32, #tpu.memory_space<vmem>>, vector<64x128xf32>
      %685 = vector.broadcast %5 : vector<1x128xf32> to vector<64x128xf32>
      %686 = arith.mulf %684, %685 : vector<64x128xf32>
      %687 = arith.addf %683, %686 : vector<64x128xf32>
      %c896 = arith.constant 896 : index
      %c0_302 = arith.constant 0 : index
      %688 = vector.load %arg7[%c896, %c0_302] : memref<968x128xf32, #tpu.memory_space<vmem>>, vector<64x128xf32>
      %689 = vector.broadcast %6 : vector<1x128xf32> to vector<64x128xf32>
      %690 = arith.mulf %688, %689 : vector<64x128xf32>
      %691 = arith.addf %687, %690 : vector<64x128xf32>
      %c897 = arith.constant 897 : index
      %c0_303 = arith.constant 0 : index
      %692 = vector.load %arg7[%c897, %c0_303] : memref<968x128xf32, #tpu.memory_space<vmem>>, vector<64x128xf32>
      %693 = vector.broadcast %7 : vector<1x128xf32> to vector<64x128xf32>
      %694 = arith.mulf %692, %693 : vector<64x128xf32>
      %695 = arith.addf %691, %694 : vector<64x128xf32>
      %c898 = arith.constant 898 : index
      %c0_304 = arith.constant 0 : index
      %696 = vector.load %arg7[%c898, %c0_304] : memref<968x128xf32, #tpu.memory_space<vmem>>, vector<64x128xf32>
      %697 = vector.broadcast %8 : vector<1x128xf32> to vector<64x128xf32>
      %698 = arith.mulf %696, %697 : vector<64x128xf32>
      %699 = arith.addf %695, %698 : vector<64x128xf32>
      %700 = vector.broadcast %9 : vector<1x128xf32> to vector<64x128xf32>
      %701 = arith.addf %699, %700 : vector<64x128xf32>
      %cst_305 = arith.constant 0.000000e+00 : f32
      %702 = vector.broadcast %cst_305 : f32 to vector<64x128xf32>
      %703 = arith.maximumf %701, %702 : vector<64x128xf32>
      %704 = vector.extract_strided_slice %703 {offsets = [0, 0], sizes = [32, 128], strides = [1, 1]} : vector<64x128xf32> to vector<32x128xf32>
      %705 = vector.extract_strided_slice %703 {offsets = [32, 0], sizes = [32, 128], strides = [1, 1]} : vector<64x128xf32> to vector<32x128xf32>
      %706 = arith.maximumf %704, %705 : vector<32x128xf32>
      %c0_306 = arith.constant 0 : index
      %c0_307 = arith.constant 0 : index
      %707 = vector.load %arg9[%c0_306, %c0_307] : memref<32x128xf32, #tpu.memory_space<vmem>>, vector<32x128xf32>
      tpu.vector_store %arg9[%c0_306, %c0_307], %706 {strides = array<i32>} : memref<32x128xf32, #tpu.memory_space<vmem>>, vector<32x128xf32>,
      %c0_308 = arith.constant 0 : index
      %c0_309 = arith.constant 0 : index
      %708 = tpu.strided_load %arg9[%c0_308, %c0_309] {strides = array<i32: 2, 1>} : memref<32x128xf32, #tpu.memory_space<vmem>>, vector<14x128xf32>
      %c1_310 = arith.constant 1 : index
      %c0_311 = arith.constant 0 : index
      %709 = tpu.strided_load %arg9[%c1_310, %c0_311] {strides = array<i32: 2, 1>} : memref<32x128xf32, #tpu.memory_space<vmem>>, vector<14x128xf32>
      %710 = arith.maximumf %708, %709 : vector<14x128xf32>
      %711 = arith.truncf %710 : vector<14x128xf32> to vector<14x128xbf16>
      %c225_312 = arith.constant 225 : index
      %c0_313 = arith.constant 0 : index
      %712 = vector.load %arg8[%c225_312, %c0_313] : memref<264x128xbf16, #tpu.memory_space<vmem>>, vector<14x128xbf16>
      tpu.vector_store %arg8[%c225_312, %c0_313], %711 {strides = array<i32>} : memref<264x128xbf16, #tpu.memory_space<vmem>>, vector<14x128xbf16>,
      %cst_314 = arith.constant 0.000000e+00 : f32
      %713 = vector.broadcast %cst_314 : f32 to vector<224x128xf32>
      %c0_315 = arith.constant 0 : index
      %c0_316 = arith.constant 0 : index
      %714 = vector.load %arg8[%c0_315, %c0_316] : memref<264x128xbf16, #tpu.memory_space<vmem>>, vector<224x128xbf16>
      %c1_317 = arith.constant 1 : index
      %c0_318 = arith.constant 0 : index
      %715 = vector.load %arg8[%c1_317, %c0_318] : memref<264x128xbf16, #tpu.memory_space<vmem>>, vector<224x128xbf16>
      %c2_319 = arith.constant 2 : index
      %c0_320 = arith.constant 0 : index
      %716 = vector.load %arg8[%c2_319, %c0_320] : memref<264x128xbf16, #tpu.memory_space<vmem>>, vector<224x128xbf16>
      %717 = tpu.concatenate %714, %715, %716 in 1 : vector<224x128xbf16>, vector<224x128xbf16>, vector<224x128xbf16> -> vector<224x384xbf16>
      %c0_321 = arith.constant 0 : index
      %c0_322 = arith.constant 0 : index
      %c0_323 = arith.constant 0 : index
      %718 = vector.load %arg4[%c0_321, %c0_322, %c0_323] : memref<3x384x128xbf16, #tpu.memory_space<vmem>>, vector<1x384x128xbf16>
      %719 = vector.shape_cast %718 : vector<1x384x128xbf16> to vector<384x128xbf16>
      %cst_324 = arith.constant dense<0.000000e+00> : vector<224x128xf32>
      %720 = tpu.matmul %717, %719, %cst_324 {dimension_numbers = #tpu.dot_dimension_numbers<[1], [0], [0], [1], [0, 0, 1, 1], [], []>} : vector<224x384xbf16>, vector<384x128xbf16>, vector<224x128xf32> -> vector<224x128xf32>
      %721 = arith.addf %713, %720 : vector<224x128xf32>
      %c16 = arith.constant 16 : index
      %c0_325 = arith.constant 0 : index
      %722 = vector.load %arg8[%c16, %c0_325] : memref<264x128xbf16, #tpu.memory_space<vmem>>, vector<224x128xbf16>
      %c17_326 = arith.constant 17 : index
      %c0_327 = arith.constant 0 : index
      %723 = vector.load %arg8[%c17_326, %c0_327] : memref<264x128xbf16, #tpu.memory_space<vmem>>, vector<224x128xbf16>
      %c18 = arith.constant 18 : index
      %c0_328 = arith.constant 0 : index
      %724 = vector.load %arg8[%c18, %c0_328] : memref<264x128xbf16, #tpu.memory_space<vmem>>, vector<224x128xbf16>
      %725 = tpu.concatenate %722, %723, %724 in 1 : vector<224x128xbf16>, vector<224x128xbf16>, vector<224x128xbf16> -> vector<224x384xbf16>
      %c1_329 = arith.constant 1 : index
      %c0_330 = arith.constant 0 : index
      %c0_331 = arith.constant 0 : index
      %726 = vector.load %arg4[%c1_329, %c0_330, %c0_331] : memref<3x384x128xbf16, #tpu.memory_space<vmem>>, vector<1x384x128xbf16>
      %727 = vector.shape_cast %726 : vector<1x384x128xbf16> to vector<384x128xbf16>
      %cst_332 = arith.constant dense<0.000000e+00> : vector<224x128xf32>
      %728 = tpu.matmul %725, %727, %cst_332 {dimension_numbers = #tpu.dot_dimension_numbers<[1], [0], [0], [1], [0, 0, 1, 1], [], []>} : vector<224x384xbf16>, vector<384x128xbf16>, vector<224x128xf32> -> vector<224x128xf32>
      %729 = arith.addf %721, %728 : vector<224x128xf32>
      %c32_333 = arith.constant 32 : index
      %c0_334 = arith.constant 0 : index
      %730 = vector.load %arg8[%c32_333, %c0_334] : memref<264x128xbf16, #tpu.memory_space<vmem>>, vector<224x128xbf16>
      %c33_335 = arith.constant 33 : index
      %c0_336 = arith.constant 0 : index
      %731 = vector.load %arg8[%c33_335, %c0_336] : memref<264x128xbf16, #tpu.memory_space<vmem>>, vector<224x128xbf16>
      %c34_337 = arith.constant 34 : index
      %c0_338 = arith.constant 0 : index
      %732 = vector.load %arg8[%c34_337, %c0_338] : memref<264x128xbf16, #tpu.memory_space<vmem>>, vector<224x128xbf16>
      %733 = tpu.concatenate %730, %731, %732 in 1 : vector<224x128xbf16>, vector<224x128xbf16>, vector<224x128xbf16> -> vector<224x384xbf16>
      %c2_339 = arith.constant 2 : index
      %c0_340 = arith.constant 0 : index
      %c0_341 = arith.constant 0 : index
      %734 = vector.load %arg4[%c2_339, %c0_340, %c0_341] : memref<3x384x128xbf16, #tpu.memory_space<vmem>>, vector<1x384x128xbf16>
      %735 = vector.shape_cast %734 : vector<1x384x128xbf16> to vector<384x128xbf16>
      %cst_342 = arith.constant dense<0.000000e+00> : vector<224x128xf32>
      %736 = tpu.matmul %733, %735, %cst_342 {dimension_numbers = #tpu.dot_dimension_numbers<[1], [0], [0], [1], [0, 0, 1, 1], [], []>} : vector<224x384xbf16>, vector<384x128xbf16>, vector<224x128xf32> -> vector<224x128xf32>
      %737 = arith.addf %729, %736 : vector<224x128xf32>
      %738 = vector.broadcast %10 : vector<1x128xf32> to vector<224x128xf32>
      %739 = arith.addf %737, %738 : vector<224x128xf32>
      %cst_343 = arith.constant 0.000000e+00 : f32
      %740 = vector.broadcast %cst_343 : f32 to vector<224x128xf32>
      %741 = arith.maximumf %739, %740 : vector<224x128xf32>
      %742 = vector.shape_cast %741 : vector<224x128xf32> to vector<7x32x128xf32>
      %743 = vector.extract_strided_slice %742 {offsets = [0, 0, 0], sizes = [7, 16, 128], strides = [1, 1, 1]} : vector<7x32x128xf32> to vector<7x16x128xf32>
      %744 = vector.extract_strided_slice %742 {offsets = [0, 16, 0], sizes = [7, 16, 128], strides = [1, 1, 1]} : vector<7x32x128xf32> to vector<7x16x128xf32>
      %745 = arith.maximumf %743, %744 : vector<7x16x128xf32>
      %746 = vector.shape_cast %745 : vector<7x16x128xf32> to vector<112x128xf32>
      %c0_344 = arith.constant 0 : index
      %c0_345 = arith.constant 0 : index
      %747 = vector.load %arg10[%c0_344, %c0_345] : memref<112x128xf32, #tpu.memory_space<vmem>>, vector<112x128xf32>
      tpu.vector_store %arg10[%c0_344, %c0_345], %746 {strides = array<i32>} : memref<112x128xf32, #tpu.memory_space<vmem>>, vector<112x128xf32>,
      %c0_346 = arith.constant 0 : index
      %c0_347 = arith.constant 0 : index
      %748 = tpu.strided_load %arg10[%c0_346, %c0_347] {strides = array<i32: 2, 1>} : memref<112x128xf32, #tpu.memory_space<vmem>>, vector<56x128xf32>
      %c1_348 = arith.constant 1 : index
      %c0_349 = arith.constant 0 : index
      %749 = tpu.strided_load %arg10[%c1_348, %c0_349] {strides = array<i32: 2, 1>} : memref<112x128xf32, #tpu.memory_space<vmem>>, vector<56x128xf32>
      %750 = arith.maximumf %748, %749 : vector<56x128xf32>
      %cst_350 = arith.constant 0.000000e+00 : f32
      %751 = vector.broadcast %cst_350 : f32 to vector<56x128xf32>
      %752 = arith.select %29, %750, %751 : vector<56x128xi1>, vector<56x128xf32>
      %753 = arith.truncf %752 : vector<56x128xf32> to vector<56x128xbf16>
      %754 = arith.index_cast %32 : i32 to index
      %c0_351 = arith.constant 0 : index
      %c0_352 = arith.constant 0 : index
      %755 = vector.load %arg6[%754, %c0_351, %c0_352] : memref<2x56x128xbf16, #tpu.memory_space<vmem>>, vector<1x56x128xbf16>
      %756 = vector.shape_cast %755 : vector<1x56x128xbf16> to vector<56x128xbf16>
      %757 = vector.shape_cast %753 : vector<56x128xbf16> to vector<1x56x128xbf16>
      tpu.vector_store %arg6[%754, %c0_351, %c0_352], %757 {strides = array<i32>} : memref<2x56x128xbf16, #tpu.memory_space<vmem>>, vector<1x56x128xbf16>,
    }
    %c2_i32_18 = arith.constant 2 : i32
    return
  }
  func.func @transform_0(%arg0: i32) -> (i32, i32, i32) {
    %c0_i32 = arith.constant 0 : i32
    %c0_i32_0 = arith.constant 0 : i32
    %c0_i32_1 = arith.constant 0 : i32
    return %arg0, %c0_i32, %c0_i32_0 : i32, i32, i32
  }
  func.func @transform_1(%arg0: i32) -> (i32, i32) {
    %c0_i32 = arith.constant 0 : i32
    %c0_i32_0 = arith.constant 0 : i32
    %c0_i32_1 = arith.constant 0 : i32
    return %c0_i32, %c0_i32_0 : i32, i32
  }
  func.func @transform_2(%arg0: i32) -> (i32, i32) {
    %c0_i32 = arith.constant 0 : i32
    %c0_i32_0 = arith.constant 0 : i32
    %c0_i32_1 = arith.constant 0 : i32
    return %c0_i32, %c0_i32_0 : i32, i32
  }
  func.func @transform_3(%arg0: i32) -> (i32, i32, i32) {
    %c0_i32 = arith.constant 0 : i32
    %c0_i32_0 = arith.constant 0 : i32
    %c0_i32_1 = arith.constant 0 : i32
    %c0_i32_2 = arith.constant 0 : i32
    return %c0_i32, %c0_i32_0, %c0_i32_1 : i32, i32, i32
  }
  func.func @transform_4(%arg0: i32) -> (i32, i32) {
    %c0_i32 = arith.constant 0 : i32
    %c0_i32_0 = arith.constant 0 : i32
    %c0_i32_1 = arith.constant 0 : i32
    return %c0_i32, %c0_i32_0 : i32, i32
  }
  func.func @transform_5(%arg0: i32) -> (i32, i32, i32) {
    %c0_i32 = arith.constant 0 : i32
    %c0_i32_0 = arith.constant 0 : i32
    %c0_i32_1 = arith.constant 0 : i32
    return %arg0, %c0_i32, %c0_i32_0 : i32, i32, i32
  }
}

</mosaic_0001>

<bundles_post_ra>
// kernel: simple_cnn_forward.3
= control target key start
LH: loop header
LB: loop body
LE: loop exit
PB: predicated region body
PF: predicated region fallthrough
CT: control target
= control target key end

     0   :  { %v937_v28 = vlaneseq  ;;  %v6701_v36 = vmov 1966171168   ;;  %s8200_s0 = inlined_call_operand.vmem [shape: bf16[2,7168], index: 0, kind: input, shape index: {}]   ;;  %s8201_s1 = inlined_call_operand.vmem [shape: bf16[7168,128], index: 1, kind: input, shape index: {}]   ;;  %s8202_s2 = inlined_call_operand.vmem [shape: f32[1,128], index: 2, kind: input, shape index: {}]   ;;  %s8203_s3 = inlined_call_operand.hbm [shape: f32[2,128], index: 3, kind: output, shape index: {}]  }
   0x1   :  { %v6222_v0 = vld [vmem:[%s8201_s1 + $0x40] sm:$0xff]   ;;  %v6226_v4 = vld [vmem:[%s8201_s1 + $0x48] sm:$0xff]   ;;  %v6230_v8 = vld [vmem:[%s8201_s1 + $0x50] sm:$0xff]   ;;  %v935_v37 = vunpack.c.l.s4 %v6701_v36 }
   0x2   :  { %v6223_v1 = vld [vmem:[%s8201_s1 + $0xc0] sm:$0xff]   ;;  %5604 = vmatprep.subr.bf16.mxu0 %v6222_v0  ;;  %v6227_v5 = vld [vmem:[%s8201_s1 + $0xc8] sm:$0xff]   ;;  %v6231_v9 = vld [vmem:[%s8201_s1 + $0xd0] sm:$0xff]   ;;  %v938_v33 = vshrl.u32 %v937_v28, 7 }
   0x3   :  { %v6224_v2 = vld [vmem:[%s8201_s1] sm:$0xff]   ;;  %5626 = vmatprep.subr.bf16.mxu1 %v6223_v1  ;;  %v6228_v6 = vld [vmem:[%s8201_s1 + $0x8] sm:$0xff]   ;;  %v6232_v10 = vld [vmem:[%s8201_s1 + $0x10] sm:$0xff]   ;;  %v936_v40 = vunpack.c.0.s8 %v935_v37 }
   0x4   :  { %v6225_v3 = vld [vmem:[%s8201_s1 + $0x80] sm:$0xff]   ;;  %5605 = vmatpush3.bf16.msra.mxu0 %v6224_v2  ;;  %v6229_v7 = vld [vmem:[%s8201_s1 + $0x88] sm:$0xff]   ;;  %v6233_v11 = vld [vmem:[%s8201_s1 + $0x90] sm:$0xff]  }
   0x5   :  { %5627 = vmatpush3.bf16.msra.mxu1 %v6225_v3  ;;  %5606 = vmatprep.subr.bf16.mxu0 %v6226_v4  ;;  %v6234_v12 = vld [vmem:[%s8201_s1 + $0x58] sm:$0xff]   ;;  %v6238_v16 = vld [vmem:[%s8201_s1 + $0x60] sm:$0xff]   ;;  %v6242_v20 = vld [vmem:[%s8201_s1 + $0x68] sm:$0xff]   ;;  %v6828_v41 = vsub.s32 %v936_v40, %v938_v33 }
   0x6   :  { %5628 = vmatprep.subr.bf16.mxu1 %v6227_v5  ;;  %v6235_v13 = vld [vmem:[%s8201_s1 + $0xd8] sm:$0xff]   ;;  %v6239_v17 = vld [vmem:[%s8201_s1 + $0xe0] sm:$0xff]   ;;  %v6243_v21 = vld [vmem:[%s8201_s1 + $0xe8] sm:$0xff]  }
   0x7   :  { %v6236_v14 = vld [vmem:[%s8201_s1 + $0x18] sm:$0xff]   ;;  %v6240_v18 = vld [vmem:[%s8201_s1 + $0x20] sm:$0xff]   ;;  %v6244_v22 = vld [vmem:[%s8201_s1 + $0x28] sm:$0xff]  }
   0x8   :  { %5607 = vmatpush3.bf16.msra.mxu0 %v6228_v6  ;;  %v6237_v15 = vld [vmem:[%s8201_s1 + $0x98] sm:$0xff]   ;;  %v6241_v19 = vld [vmem:[%s8201_s1 + $0xa0] sm:$0xff]   ;;  %v6245_v23 = vld [vmem:[%s8201_s1 + $0xa8] sm:$0xff]  }
   0x9   :  { %5629 = vmatpush3.bf16.msra.mxu1 %v6229_v7  ;;  %5608 = vmatprep.subr.bf16.mxu0 %v6230_v8  ;;  %v6246_v24 = vld [vmem:[%s8201_s1 + $0x70] sm:$0xff]   ;;  %v6250_v29 = vld [vmem:[%s8201_s1 + $0x78] sm:$0xff]   ;;  %v16_v34 = vld [vmem:[%s8200_s0] sm:$0xff] }
   0xa   :  { %5630 = vmatprep.subr.bf16.mxu1 %v6231_v9  ;;  %v6247_v25 = vld [vmem:[%s8201_s1 + $0xf0] sm:$0xff]   ;;  %v6251_v30 = vld [vmem:[%s8201_s1 + $0xf8] sm:$0xff]   ;;  %v6255_v35 = vld [vmem:[%s8201_s1 + $0x140] sm:$0xff]   ;;  %v933_v39 = vcombine.high %v16_v34, %v16_v34  ;;  %v940_v42 = vrot.slane %v16_v34, %v6828_v41 }
   0xb   :  { %v6248_v26 = vld [vmem:[%s8201_s1 + $0x30] sm:$0xff]   ;;  %v6252_v31 = vld [vmem:[%s8201_s1 + $0x38] sm:$0xff]   ;;  %v6256_v38 = vld [vmem:[%s8201_s1 + $0x1c0] sm:$0xff]  }
   0xc   :  { %5609 = vmatpush3.bf16.msra.mxu0 %v6232_v10  ;;  %v6249_v27 = vld [vmem:[%s8201_s1 + $0xb0] sm:$0xff]   ;;  %v6253_v32 = vld [vmem:[%s8201_s1 + $0xb8] sm:$0xff]   ;;  %v6832_v43 = vrot.slane %v933_v39, %v6828_v41  ;;  %v948_v44 = vcombine.high %v940_v42, %v940_v42  ;;  %v956_v45 = vrot.slane %v940_v42, %v6828_v41  ;;  %v6257_v47 = vld [vmem:[%s8201_s1 + $0x100] sm:$0xff]  }
   0xd   :  { %5631 = vmatpush3.bf16.msra.mxu1 %v6233_v11  ;;  %5610 = vmatprep.subr.bf16.mxu0 %v6234_v12  ;;  %v6258_v49 = vld [vmem:[%s8201_s1 + $0x180] sm:$0xff]   ;;  %v6259_v52 = vld [vmem:[%s8201_s1 + $0x148] sm:$0xff]   ;;  %v6263_v58 = vld [vmem:[%s8201_s1 + $0x150] sm:$0xff]  }
   0xe   :  { %5632 = vmatprep.subr.bf16.mxu1 %v6235_v13  ;;  %v949_v46 = vcombine.high %v6832_v43, %v6832_v43  ;;  %v970_v48 = vrot.slane %v948_v44, %v6828_v41  ;;  %v978_v51 = vcombine.high %v956_v45, %v956_v45  ;;  %v6260_v54 = vld [vmem:[%s8201_s1 + $0x1c8] sm:$0xff]   ;;  %v6264_v59 = vld [vmem:[%s8201_s1 + $0x1d0] sm:$0xff]   ;;  %v6267_v62 = vld [vmem:[%s8201_s1 + $0x158] sm:$0xff]  }
   0xf   :  { %v6261_v55 = vld [vmem:[%s8201_s1 + $0x108] sm:$0xff]   ;;  %v6265_v60 = vld [vmem:[%s8201_s1 + $0x110] sm:$0xff]   ;;  %v6268_v63 = vld [vmem:[%s8201_s1 + $0x1d8] sm:$0xff]  }
  0x10   :  { %5611 = vmatpush3.bf16.msra.mxu0 %v6236_v14  ;;  %v977_v50 = vrot.slane %v949_v46, %v6828_v41  ;;  %4052 = vmatprep.mubr.bf16.mxu0 %v970_v48  ;;  %v980_v53 = vcombine.high %v970_v48, %v970_v48  ;;  %v6262_v57 = vld [vmem:[%s8201_s1 + $0x188] sm:$0xff]   ;;  %v6266_v61 = vld [vmem:[%s8201_s1 + $0x190] sm:$0xff]   ;;  %v6269_v0 = vld [vmem:[%s8201_s1 + $0x118] sm:$0xff]  }
  0x11   :  { %5633 = vmatpush3.bf16.msra.mxu1 %v6237_v15  ;;  %5612 = vmatprep.subr.bf16.mxu0 %v6238_v16  ;;  %v6270_v1 = vld [vmem:[%s8201_s1 + $0x198] sm:$0xff]   ;;  %v6271_v2 = vld [vmem:[%s8201_s1 + $0x160] sm:$0xff]   ;;  %v6275_v6 = vld [vmem:[%s8201_s1 + $0x168] sm:$0xff]  }
  0x12   :  { %5634 = vmatprep.subr.bf16.mxu1 %v6239_v17  ;;  %v981_v56 = vcombine.high %v977_v50, %v977_v50  ;;  %4092 = vmatprep.mubr.bf16.mxu1 %v980_v53  ;;  %v6272_v3 = vld [vmem:[%s8201_s1 + $0x1e0] sm:$0xff]   ;;  %v6276_v7 = vld [vmem:[%s8201_s1 + $0x1e8] sm:$0xff]   ;;  %v6279_v10 = vld [vmem:[%s8201_s1 + $0x170] sm:$0xff]  }
  0x13   :  { %v6273_v4 = vld [vmem:[%s8201_s1 + $0x120] sm:$0xff]   ;;  %v6277_v8 = vld [vmem:[%s8201_s1 + $0x128] sm:$0xff]   ;;  %v6280_v11 = vld [vmem:[%s8201_s1 + $0x1f0] sm:$0xff]  }
  0x14   :  { %5613 = vmatpush3.bf16.msra.mxu0 %v6240_v18  ;;  %v6274_v5 = vld [vmem:[%s8201_s1 + $0x1a0] sm:$0xff]   ;;  %v6278_v9 = vld [vmem:[%s8201_s1 + $0x1a8] sm:$0xff]   ;;  %v6281_v12 = vld [vmem:[%s8201_s1 + $0x130] sm:$0xff]   ;;  %v963_v18 = vrot.slane %v6832_v43, %v6828_v41 }
  0x15   :  { %5635 = vmatpush3.bf16.msra.mxu1 %v6241_v19  ;;  %5614 = vmatprep.subr.bf16.mxu0 %v6242_v20  ;;  %v6282_v13 = vld [vmem:[%s8201_s1 + $0x1b0] sm:$0xff]   ;;  %v6283_v14 = vld [vmem:[%s8201_s1 + $0x178] sm:$0xff]   ;;  %v6287_v19 = vld [vmem:[%s8201_s1 + $0x240] sm:$0xff]  }
  0x16   :  { %5636 = vmatprep.subr.bf16.mxu1 %v6243_v21  ;;  %v6284_v15 = vld [vmem:[%s8201_s1 + $0x1f8] sm:$0xff]   ;;  %v6288_v20 = vld [vmem:[%s8201_s1 + $0x2c0] sm:$0xff]   ;;  %v6295_v28 = vld [vmem:[%s8201_s1 + $0x250] sm:$0xff]  }
  0x17   :  { %v6285_v16 = vld [vmem:[%s8201_s1 + $0x138] sm:$0xff]   ;;  %v6289_v21 = vld [vmem:[%s8201_s1 + $0x200] sm:$0xff]   ;;  %v6307_v40 = vld [vmem:[%s8201_s1 + $0x268] sm:$0xff]  }
  0x18   :  { %5615 = vmatpush3.bf16.msra.mxu0 %v6244_v22  ;;  %v6286_v17 = vld [vmem:[%s8201_s1 + $0x1b8] sm:$0xff]   ;;  %v6290_v22 = vld [vmem:[%s8201_s1 + $0x280] sm:$0xff]   ;;  %v6308_v42 = vld [vmem:[%s8201_s1 + $0x2e8] sm:$0xff]  }
  0x19   :  { %5637 = vmatpush3.bf16.msra.mxu1 %v6245_v23  ;;  %5616 = vmatprep.subr.bf16.mxu0 %v6246_v24  ;;  %v979_v23 = vcombine.high %v963_v18, %v963_v18  ;;  %v6291_v24 = vld [vmem:[%s8201_s1 + $0x248] sm:$0xff]   ;;  %v6300_v33 = vld [vmem:[%s8201_s1 + $0x2d8] sm:$0xff]   ;;  %v6303_v36 = vld [vmem:[%s8201_s1 + $0x260] sm:$0xff]  }
  0x1a   :  { %5638 = vmatprep.subr.bf16.mxu1 %v6247_v25  ;;  %v6292_v25 = vld [vmem:[%s8201_s1 + $0x2c8] sm:$0xff]   ;;  %v6301_v34 = vld [vmem:[%s8201_s1 + $0x218] sm:$0xff]   ;;  %v6304_v37 = vld [vmem:[%s8201_s1 + $0x2e0] sm:$0xff]  }
  0x1b   :  { %v6306_v39 = vld [vmem:[%s8201_s1 + $0x2a0] sm:$0xff]   ;;  %v6309_v43 = vld [vmem:[%s8201_s1 + $0x228] sm:$0xff]  }
  0x1c   :  { %5617 = vmatpush3.bf16.msra.mxu0 %v6248_v26  ;;  %v6293_v26 = vld [vmem:[%s8201_s1 + $0x208] sm:$0xff]  }
  0x1d   :  { %5639 = vmatpush3.bf16.msra.mxu1 %v6249_v27  ;;  %5618 = vmatprep.subr.bf16.mxu0 %v6250_v29  ;;  %v6294_v27 = vld [vmem:[%s8201_s1 + $0x288] sm:$0xff]   ;;  %v6296_v29 = vld [vmem:[%s8201_s1 + $0x2d0] sm:$0xff]  }
  0x1e   :  { %5640 = vmatprep.subr.bf16.mxu1 %v6251_v30  ;;  %v6297_v30 = vld [vmem:[%s8201_s1 + $0x210] sm:$0xff]   ;;  %v6310_v44 = vld [vmem:[%s8201_s1 + $0x2a8] sm:$0xff]  }
  0x1f   :  { %v17_v46 = vld [vmem:[%s8200_s0 + $0x8] sm:$0xff] }
  0x20   :  { %5619 = vmatpush3.bf16.msra.mxu0 %v6252_v31  ;;  %v6298_v31 = vld [vmem:[%s8201_s1 + $0x290] sm:$0xff]   ;;  %v989_v48 = vrot.slane %v17_v46, %v6828_v41 }
  0x21   :  { %5641 = vmatpush3.bf16.msra.mxu1 %v6253_v32  ;;  %5648 = vmatprep.subr.bf16.mxu0 %v6255_v35  ;;  %v6299_v32 = vld [vmem:[%s8201_s1 + $0x258] sm:$0xff]  }
  0x22   :  { %5670 = vmatprep.subr.bf16.mxu1 %v6256_v38  ;;  %v6302_v35 = vld [vmem:[%s8201_s1 + $0x298] sm:$0xff]   ;;  %v6305_v38 = vld [vmem:[%s8201_s1 + $0x220] sm:$0xff]  }
  0x23   :  { %4053 = vmatmul.mubr.bf16.vlgmr.msra.gmra.mrb[0].mxu0 %v956_v45  ;;  %v6311_v45 = vld [vmem:[%s8201_s1 + $0x270] sm:$0xff]  }
  0x24   :  { %5649 = vmatpush3.bf16.msra.mxu0 %v6257_v47  ;;  %4093 = vmatmul.mubr.bf16.vlgmr.msra.gmra.mrb[0].mxu1 %v978_v51  ;;  %v6312_v47 = vld [vmem:[%s8201_s1 + $0x2f0] sm:$0xff]  }
  0x25   :  { %5650 = vmatprep.subr.bf16.mxu0 %v6259_v52  ;;  %5671 = vmatpush3.bf16.msra.mxu1 %v6258_v49  ;;  %v982_v49 = vcombine.high %v17_v46, %v17_v46  ;;  %v6314_v51 = vld [vmem:[%s8201_s1 + $0x2b0] sm:$0xff]   ;;  %v997_v52 = vcombine.high %v989_v48, %v989_v48 }
  0x26   :  { %4132 = vmatprep.mubr.bf16.mxu0 %v977_v50  ;;  %5672 = vmatprep.subr.bf16.mxu1 %v6260_v54  ;;  %v6313_v50 = vld [vmem:[%s8201_s1 + $0x230] sm:$0xff]   ;;  %v6315_v54 = vld [vmem:[%s8201_s1 + $0x278] sm:$0xff]  }
  0x27   :  { %4172 = vmatprep.mubr.bf16.mxu1 %v981_v56  ;;  %v7020_v53 = vrot.slane %v982_v49, %v6828_v41  ;;  %v1019_v56 = vrot.slane %v997_v52, %v6828_v41  ;;  %v6362_v46 = vld [vmem:[%s8201_s1 + $0x410] sm:$0xff]   ;;  %v6365_v49 = vld [vmem:[%s8201_s1 + $0x4d8] sm:$0xff]   ;;  %v6368_v52 = vld [vmem:[%s8201_s1 + $0x460] sm:$0xff]  }
  0x28   :  { %5651 = vmatpush3.bf16.msra.mxu0 %v6261_v55  ;;  %v6316_v55 = vld [vmem:[%s8201_s1 + $0x2f8] sm:$0xff]  }
  0x29   :  { %5652 = vmatprep.subr.bf16.mxu0 %v6263_v58  ;;  %5673 = vmatpush3.bf16.msra.mxu1 %v6262_v57  ;;  %v998_v57 = vcombine.high %v7020_v53, %v7020_v53  ;;  %v6317_v58 = vld [vmem:[%s8201_s1 + $0x238] sm:$0xff]  }
  0x2a   :  { %5674 = vmatprep.subr.bf16.mxu1 %v6264_v59  ;;  %v6318_v59 = vld [vmem:[%s8201_s1 + $0x2b8] sm:$0xff]  }
  0x2c   :  { %5653 = vmatpush3.bf16.msra.mxu0 %v6265_v60  ;;  %v1029_v60 = vcombine.high %v1019_v56, %v1019_v56 }
  0x2d   :  { %5654 = vmatprep.subr.bf16.mxu0 %v6267_v62  ;;  %5675 = vmatpush3.bf16.msra.mxu1 %v6266_v61  ;;  %v1005_v61 = vrot.slane %v989_v48, %v6828_v41  ;;  %v6319_v62 = vld [vmem:[%s8201_s1 + $0x340] sm:$0xff]   ;;  %v6364_v48 = vld [vmem:[%s8201_s1 + $0x458] sm:$0xff]  }
  0x2e   :  { %5676 = vmatprep.subr.bf16.mxu1 %v6268_v63  ;;  %v6320_v63 = vld [vmem:[%s8201_s1 + $0x3c0] sm:$0xff]  }
  0x30   :  { %5655 = vmatpush3.bf16.msra.mxu0 %v6269_v0  ;;  %v1026_v0 = vrot.slane %v998_v57, %v6828_v41  ;;  %v6373_v57 = vld [vmem:[%s8201_s1 + $0x4e8] sm:$0xff]  }
  0x31   :  { %5656 = vmatprep.subr.bf16.mxu0 %v6271_v2  ;;  %5677 = vmatpush3.bf16.msra.mxu1 %v6270_v1  ;;  %v6321_v1 = vld [vmem:[%s8201_s1 + $0x300] sm:$0xff]  }
  0x32   :  { %5678 = vmatprep.subr.bf16.mxu1 %v6272_v3  ;;  %v6322_v2 = vld [vmem:[%s8201_s1 + $0x380] sm:$0xff]   ;;  %v1027_v3 = vcombine.high %v1005_v61, %v1005_v61 }
  0x34   :  { %5657 = vmatpush3.bf16.msra.mxu0 %v6273_v4  ;;  %v6323_v4 = vld [vmem:[%s8201_s1 + $0x348] sm:$0xff]  }
  0x35   :  { %5658 = vmatprep.subr.bf16.mxu0 %v6275_v6  ;;  %5679 = vmatpush3.bf16.msra.mxu1 %v6274_v5  ;;  %v6324_v5 = vld [vmem:[%s8201_s1 + $0x3c8] sm:$0xff]   ;;  %v1030_v6 = vcombine.high %v1026_v0, %v1026_v0 }
  0x36   :  { %5680 = vmatprep.subr.bf16.mxu1 %v6276_v7  ;;  %v6325_v7 = vld [vmem:[%s8201_s1 + $0x308] sm:$0xff]  }
  0x38   :  { %5659 = vmatpush3.bf16.msra.mxu0 %v6277_v8  ;;  %v6326_v8 = vld [vmem:[%s8201_s1 + $0x388] sm:$0xff]  }
  0x39   :  { %5660 = vmatprep.subr.bf16.mxu0 %v6279_v10  ;;  %5681 = vmatpush3.bf16.msra.mxu1 %v6278_v9  ;;  %v6327_v9 = vld [vmem:[%s8201_s1 + $0x350] sm:$0xff]  }
  0x3a   :  { %5682 = vmatprep.subr.bf16.mxu1 %v6280_v11  ;;  %v6328_v10 = vld [vmem:[%s8201_s1 + $0x3d0] sm:$0xff]  }
  0x3b   :  { %v6329_v11 = vld [vmem:[%s8201_s1 + $0x310] sm:$0xff]  }
  0x3c   :  { %5661 = vmatpush3.bf16.msra.mxu0 %v6281_v12  ;;  %v6330_v12 = vld [vmem:[%s8201_s1 + $0x390] sm:$0xff]  }
  0x3d   :  { %5662 = vmatprep.subr.bf16.mxu0 %v6283_v14  ;;  %5683 = vmatpush3.bf16.msra.mxu1 %v6282_v13  ;;  %v6331_v13 = vld [vmem:[%s8201_s1 + $0x358] sm:$0xff]  }
  0x3e   :  { %5684 = vmatprep.subr.bf16.mxu1 %v6284_v15  ;;  %v6332_v14 = vld [vmem:[%s8201_s1 + $0x3d8] sm:$0xff]  }
  0x3f   :  { %v6333_v15 = vld [vmem:[%s8201_s1 + $0x318] sm:$0xff]  }
  0x40   :  { %5663 = vmatpush3.bf16.msra.mxu0 %v6285_v16  ;;  %v6334_v16 = vld [vmem:[%s8201_s1 + $0x398] sm:$0xff]  }
  0x41   :  { %5692 = vmatprep.subr.bf16.mxu0 %v6287_v19  ;;  %5685 = vmatpush3.bf16.msra.mxu1 %v6286_v17  ;;  %v6335_v17 = vld [vmem:[%s8201_s1 + $0x360] sm:$0xff]  }
  0x42   :  { %5714 = vmatprep.subr.bf16.mxu1 %v6288_v20  ;;  %v6337_v19 = vld [vmem:[%s8201_s1 + $0x320] sm:$0xff]  }
  0x43   :  { %4133 = vmatmul.mubr.bf16.vlgmr.msra.gmra.mrb[4].mxu0 %v963_v18  ;;  %v6336_v18 = vld [vmem:[%s8201_s1 + $0x3e0] sm:$0xff]  }
  0x44   :  { %5693 = vmatpush3.bf16.msra.mxu0 %v6289_v21  ;;  %4173 = vmatmul.mubr.bf16.vlgmr.msra.gmra.mrb[4].mxu1 %v979_v23  ;;  %v6338_v20 = vld [vmem:[%s8201_s1 + $0x3a0] sm:$0xff]   ;;  %v6339_v21 = vld [vmem:[%s8201_s1 + $0x368] sm:$0xff]  }
  0x45   :  { %5694 = vmatprep.subr.bf16.mxu0 %v6291_v24  ;;  %5715 = vmatpush3.bf16.msra.mxu1 %v6290_v22  ;;  %v6340_v22 = vld [vmem:[%s8201_s1 + $0x3e8] sm:$0xff]  }
  0x46   :  { %5716 = vmatprep.subr.bf16.mxu1 %v6292_v25  ;;  %4212 = vmatprep.mubr.bf16.mxu0 %v1019_v56  ;;  %v6341_v23 = vld [vmem:[%s8201_s1 + $0x328] sm:$0xff]   ;;  %v6343_v25 = vld [vmem:[%s8201_s1 + $0x370] sm:$0xff]  }
  0x47   :  { %4252 = vmatprep.mubr.bf16.mxu1 %v1029_v60  ;;  %v6342_v24 = vld [vmem:[%s8201_s1 + $0x3a8] sm:$0xff]   ;;  %v6376_v60 = vld [vmem:[%s8201_s1 + $0x470] sm:$0xff]  }
  0x48   :  { %5695 = vmatpush3.bf16.msra.mxu0 %v6293_v26  ;;  %v6344_v26 = vld [vmem:[%s8201_s1 + $0x3f0] sm:$0xff]   ;;  %v6372_v56 = vld [vmem:[%s8201_s1 + $0x468] sm:$0xff]  }
  0x49   :  { %5696 = vmatprep.subr.bf16.mxu0 %v6295_v28  ;;  %5717 = vmatpush3.bf16.msra.mxu1 %v6294_v27  ;;  %v6345_v27 = vld [vmem:[%s8201_s1 + $0x330] sm:$0xff]  }
  0x4a   :  { %5718 = vmatprep.subr.bf16.mxu1 %v6296_v29  ;;  %v6346_v28 = vld [vmem:[%s8201_s1 + $0x3b0] sm:$0xff]   ;;  %v6347_v29 = vld [vmem:[%s8201_s1 + $0x378] sm:$0xff]  }
  0x4c   :  { %5697 = vmatpush3.bf16.msra.mxu0 %v6297_v30  ;;  %v6348_v30 = vld [vmem:[%s8201_s1 + $0x3f8] sm:$0xff]  }
  0x4d   :  { %5698 = vmatprep.subr.bf16.mxu0 %v6299_v32  ;;  %5719 = vmatpush3.bf16.msra.mxu1 %v6298_v31  ;;  %v6349_v31 = vld [vmem:[%s8201_s1 + $0x338] sm:$0xff]  }
  0x4e   :  { %5720 = vmatprep.subr.bf16.mxu1 %v6300_v33  ;;  %v6350_v32 = vld [vmem:[%s8201_s1 + $0x3b8] sm:$0xff]   ;;  %v1012_v33 = vrot.slane %v7020_v53, %v6828_v41  ;;  %v6369_v53 = vld [vmem:[%s8201_s1 + $0x4e0] sm:$0xff]  }
  0x50   :  { %5699 = vmatpush3.bf16.msra.mxu0 %v6301_v34  ;;  %v6352_v34 = vld [vmem:[%s8201_s1 + $0x440] sm:$0xff]  }
  0x51   :  { %5700 = vmatprep.subr.bf16.mxu0 %v6303_v36  ;;  %5721 = vmatpush3.bf16.msra.mxu1 %v6302_v35  ;;  %v6353_v35 = vld [vmem:[%s8201_s1 + $0x4c0] sm:$0xff]  }
  0x52   :  { %5722 = vmatprep.subr.bf16.mxu1 %v6304_v37  ;;  %v6354_v36 = vld [vmem:[%s8201_s1 + $0x400] sm:$0xff]  }
  0x53   :  { %v6355_v37 = vld [vmem:[%s8201_s1 + $0x480] sm:$0xff]  }
  0x54   :  { %5701 = vmatpush3.bf16.msra.mxu0 %v6305_v38  ;;  %v1028_v38 = vcombine.high %v1012_v33, %v1012_v33 }
  0x55   :  { %5702 = vmatprep.subr.bf16.mxu0 %v6307_v40  ;;  %5723 = vmatpush3.bf16.msra.mxu1 %v6306_v39  ;;  %v6356_v39 = vld [vmem:[%s8201_s1 + $0x448] sm:$0xff]  }
  0x56   :  { %5724 = vmatprep.subr.bf16.mxu1 %v6308_v42  ;;  %v6357_v40 = vld [vmem:[%s8201_s1 + $0x4c8] sm:$0xff]  }
  0x57   :  { %v6358_v42 = vld [vmem:[%s8201_s1 + $0x408] sm:$0xff]  }
  0x58   :  { %5703 = vmatpush3.bf16.msra.mxu0 %v6309_v43  ;;  %v6359_v43 = vld [vmem:[%s8201_s1 + $0x488] sm:$0xff]  }
  0x59   :  { %5704 = vmatprep.subr.bf16.mxu0 %v6311_v45  ;;  %5725 = vmatpush3.bf16.msra.mxu1 %v6310_v44  ;;  %v6360_v44 = vld [vmem:[%s8201_s1 + $0x450] sm:$0xff]  }
  0x5a   :  { %5726 = vmatprep.subr.bf16.mxu1 %v6312_v47  ;;  %v6361_v45 = vld [vmem:[%s8201_s1 + $0x4d0] sm:$0xff]  }
  0x5b   :  { %v6363_v47 = vld [vmem:[%s8201_s1 + $0x490] sm:$0xff]  }
  0x5c   :  { %5705 = vmatpush3.bf16.msra.mxu0 %v6313_v50  ;;  %v6366_v50 = vld [vmem:[%s8201_s1 + $0x418] sm:$0xff]  }
  0x5d   :  { %5706 = vmatprep.subr.bf16.mxu0 %v6315_v54  ;;  %5727 = vmatpush3.bf16.msra.mxu1 %v6314_v51  ;;  %v6367_v51 = vld [vmem:[%s8201_s1 + $0x498] sm:$0xff]   ;;  %v6370_v54 = vld [vmem:[%s8201_s1 + $0x420] sm:$0xff]  }
  0x5e   :  { %5728 = vmatprep.subr.bf16.mxu1 %v6316_v55  ;;  %v6371_v55 = vld [vmem:[%s8201_s1 + $0x4a0] sm:$0xff]  }
  0x60   :  { %5707 = vmatpush3.bf16.msra.mxu0 %v6317_v58  ;;  %v6374_v58 = vld [vmem:[%s8201_s1 + $0x428] sm:$0xff]  }
  0x61   :  { %5736 = vmatprep.subr.bf16.mxu0 %v6319_v62  ;;  %5729 = vmatpush3.bf16.msra.mxu1 %v6318_v59  ;;  %v6375_v59 = vld [vmem:[%s8201_s1 + $0x4a8] sm:$0xff]   ;;  %v6377_v62 = vld [vmem:[%s8201_s1 + $0x4f0] sm:$0xff]  }
  0x62   :  { %5758 = vmatprep.subr.bf16.mxu1 %v6320_v63 }
  0x63   :  { %4213 = vmatmul.mubr.bf16.vlgmr.msra.gmra.mrb[8].mxu0 %v1005_v61  ;;  %v18_v61 = vld [vmem:[%s8200_s0 + $0x10] sm:$0xff] }
  0x64   :  { %5737 = vmatpush3.bf16.msra.mxu0 %v6321_v1  ;;  %4292 = vmatprep.mubr.bf16.mxu0 %v1026_v0  ;;  %v1038_v63 = vrot.slane %v18_v61, %v6828_v41  ;;  %v1031_v0 = vcombine.high %v18_v61, %v18_v61  ;;  %v6378_v1 = vld [vmem:[%s8201_s1 + $0x430] sm:$0xff]  }
  0x65   :  { %4253 = vmatmul.mubr.bf16.vlgmr.msra.gmra.mrb[8].mxu1 %v1027_v3  ;;  %5738 = vmatprep.subr.bf16.mxu0 %v6323_v4  ;;  %v6427_v61 = vld [vmem:[%s8201_s1 + $0x610] sm:$0xff]  }
  0x66   :  { %5759 = vmatpush3.bf16.msra.mxu1 %v6322_v2  ;;  %4332 = vmatprep.mubr.bf16.mxu1 %v1030_v6  ;;  %v6379_v2 = vld [vmem:[%s8201_s1 + $0x4b0] sm:$0xff]   ;;  %v1046_v3 = vcombine.high %v1038_v63, %v1038_v63  ;;  %v7226_v4 = vrot.slane %v1031_v0, %v6828_v41  ;;  %v6381_v6 = vld [vmem:[%s8201_s1 + $0x4f8] sm:$0xff]  }
  0x67   :  { %5760 = vmatprep.subr.bf16.mxu1 %v6324_v5  ;;  %v6380_v5 = vld [vmem:[%s8201_s1 + $0x478] sm:$0xff]  }
  0x68   :  { %5739 = vmatpush3.bf16.msra.mxu0 %v6325_v7  ;;  %v1068_v7 = vrot.slane %v1046_v3, %v6828_v41  ;;  %v6430_v0 = vld [vmem:[%s8201_s1 + $0x6d8] sm:$0xff]   ;;  %v6433_v3 = vld [vmem:[%s8201_s1 + $0x660] sm:$0xff]  }
  0x69   :  { %5740 = vmatprep.subr.bf16.mxu0 %v6327_v9  ;;  %v6382_v9 = vld [vmem:[%s8201_s1 + $0x438] sm:$0xff]  }
  0x6a   :  { %5761 = vmatpush3.bf16.msra.mxu1 %v6326_v8  ;;  %v1047_v8 = vcombine.high %v7226_v4, %v7226_v4 }
  0x6b   :  { %5762 = vmatprep.subr.bf16.mxu1 %v6328_v10  ;;  %v6383_v10 = vld [vmem:[%s8201_s1 + $0x4b8] sm:$0xff]  }
  0x6c   :  { %5741 = vmatpush3.bf16.msra.mxu0 %v6329_v11  ;;  %v1078_v11 = vcombine.high %v1068_v7, %v1068_v7 }
  0x6d   :  { %5742 = vmatprep.subr.bf16.mxu0 %v6331_v13  ;;  %v6384_v13 = vld [vmem:[%s8201_s1 + $0x540] sm:$0xff]  }
  0x6e   :  { %5763 = vmatpush3.bf16.msra.mxu1 %v6330_v12  ;;  %v1054_v12 = vrot.slane %v1038_v63, %v6828_v41  ;;  %v6429_v63 = vld [vmem:[%s8201_s1 + $0x658] sm:$0xff]  }
  0x6f   :  { %5764 = vmatprep.subr.bf16.mxu1 %v6332_v14  ;;  %v6385_v14 = vld [vmem:[%s8201_s1 + $0x5c0] sm:$0xff]  }
  0x70   :  { %5743 = vmatpush3.bf16.msra.mxu0 %v6333_v15  ;;  %v1075_v15 = vrot.slane %v1047_v8, %v6828_v41  ;;  %v6438_v8 = vld [vmem:[%s8201_s1 + $0x6e8] sm:$0xff]  }
  0x71   :  { %5744 = vmatprep.subr.bf16.mxu0 %v6335_v17  ;;  %v6387_v17 = vld [vmem:[%s8201_s1 + $0x580] sm:$0xff]  }
  0x72   :  { %5765 = vmatpush3.bf16.msra.mxu1 %v6334_v16  ;;  %v6386_v16 = vld [vmem:[%s8201_s1 + $0x500] sm:$0xff]  }
  0x73   :  { %5766 = vmatprep.subr.bf16.mxu1 %v6336_v18  ;;  %v1076_v18 = vcombine.high %v1054_v12, %v1054_v12 }
  0x74   :  { %5745 = vmatpush3.bf16.msra.mxu0 %v6337_v19  ;;  %v6388_v19 = vld [vmem:[%s8201_s1 + $0x548] sm:$0xff]  }
  0x75   :  { %5746 = vmatprep.subr.bf16.mxu0 %v6339_v21  ;;  %v1079_v21 = vcombine.high %v1075_v15, %v1075_v15 }
  0x76   :  { %5767 = vmatpush3.bf16.msra.mxu1 %v6338_v20  ;;  %v6389_v20 = vld [vmem:[%s8201_s1 + $0x5c8] sm:$0xff]  }
  0x77   :  { %5768 = vmatprep.subr.bf16.mxu1 %v6340_v22  ;;  %v6390_v22 = vld [vmem:[%s8201_s1 + $0x508] sm:$0xff]  }
  0x78   :  { %5747 = vmatpush3.bf16.msra.mxu0 %v6341_v23  ;;  %v6391_v23 = vld [vmem:[%s8201_s1 + $0x588] sm:$0xff]  }
  0x79   :  { %5748 = vmatprep.subr.bf16.mxu0 %v6343_v25  ;;  %v6393_v25 = vld [vmem:[%s8201_s1 + $0x5d0] sm:$0xff]  }
  0x7a   :  { %5769 = vmatpush3.bf16.msra.mxu1 %v6342_v24  ;;  %v6392_v24 = vld [vmem:[%s8201_s1 + $0x550] sm:$0xff]  }
  0x7b   :  { %5770 = vmatprep.subr.bf16.mxu1 %v6344_v26  ;;  %v6394_v26 = vld [vmem:[%s8201_s1 + $0x510] sm:$0xff]  }
  0x7c   :  { %5749 = vmatpush3.bf16.msra.mxu0 %v6345_v27  ;;  %v6395_v27 = vld [vmem:[%s8201_s1 + $0x590] sm:$0xff]  }
  0x7d   :  { %5750 = vmatprep.subr.bf16.mxu0 %v6347_v29  ;;  %v6397_v29 = vld [vmem:[%s8201_s1 + $0x5d8] sm:$0xff]  }
  0x7e   :  { %5771 = vmatpush3.bf16.msra.mxu1 %v6346_v28  ;;  %v6396_v28 = vld [vmem:[%s8201_s1 + $0x558] sm:$0xff]  }
  0x7f   :  { %5772 = vmatprep.subr.bf16.mxu1 %v6348_v30  ;;  %v6398_v30 = vld [vmem:[%s8201_s1 + $0x518] sm:$0xff]  }
  0x80   :  { %5751 = vmatpush3.bf16.msra.mxu0 %v6349_v31  ;;  %v6399_v31 = vld [vmem:[%s8201_s1 + $0x598] sm:$0xff]  }
  0x81   :  { %5780 = vmatprep.subr.bf16.mxu0 %v6352_v34  ;;  %v6402_v34 = vld [vmem:[%s8201_s1 + $0x520] sm:$0xff]  }
  0x82   :  { %5773 = vmatpush3.bf16.msra.mxu1 %v6350_v32  ;;  %v6400_v32 = vld [vmem:[%s8201_s1 + $0x560] sm:$0xff]  }
  0x83   :  { %4293 = vmatmul.mubr.bf16.vlgmr.msra.gmra.mrb[12].mxu0 %v1012_v33  ;;  %5802 = vmatprep.subr.bf16.mxu1 %v6353_v35  ;;  %v6401_v33 = vld [vmem:[%s8201_s1 + $0x5e0] sm:$0xff]  }
  0x84   :  { %5781 = vmatpush3.bf16.msra.mxu0 %v6354_v36  ;;  %4372 = vmatprep.mubr.bf16.mxu0 %v1068_v7  ;;  %v6403_v35 = vld [vmem:[%s8201_s1 + $0x5a0] sm:$0xff]   ;;  %v6404_v36 = vld [vmem:[%s8201_s1 + $0x568] sm:$0xff]  }
  0x85   :  { %4333 = vmatmul.mubr.bf16.vlgmr.msra.gmra.mrb[12].mxu1 %v1028_v38  ;;  %5782 = vmatprep.subr.bf16.mxu0 %v6356_v39  ;;  %v6406_v38 = vld [vmem:[%s8201_s1 + $0x528] sm:$0xff]  }
  0x86   :  { %5803 = vmatpush3.bf16.msra.mxu1 %v6355_v37  ;;  %4412 = vmatprep.mubr.bf16.mxu1 %v1078_v11  ;;  %v6405_v37 = vld [vmem:[%s8201_s1 + $0x5e8] sm:$0xff]   ;;  %v6441_v11 = vld [vmem:[%s8201_s1 + $0x670] sm:$0xff]  }
  0x87   :  { %5804 = vmatprep.subr.bf16.mxu1 %v6357_v40  ;;  %v6407_v39 = vld [vmem:[%s8201_s1 + $0x5a8] sm:$0xff]   ;;  %v6408_v40 = vld [vmem:[%s8201_s1 + $0x570] sm:$0xff]  }
  0x88   :  { %5783 = vmatpush3.bf16.msra.mxu0 %v6358_v42  ;;  %v6409_v42 = vld [vmem:[%s8201_s1 + $0x5f0] sm:$0xff]   ;;  %v6437_v7 = vld [vmem:[%s8201_s1 + $0x668] sm:$0xff]  }
  0x89   :  { %5784 = vmatprep.subr.bf16.mxu0 %v6360_v44  ;;  %v6411_v44 = vld [vmem:[%s8201_s1 + $0x5b0] sm:$0xff]  }
  0x8a   :  { %5805 = vmatpush3.bf16.msra.mxu1 %v6359_v43  ;;  %v6410_v43 = vld [vmem:[%s8201_s1 + $0x530] sm:$0xff]  }
  0x8b   :  { %5806 = vmatprep.subr.bf16.mxu1 %v6361_v45  ;;  %v6412_v45 = vld [vmem:[%s8201_s1 + $0x578] sm:$0xff]  }
  0x8c   :  { %5785 = vmatpush3.bf16.msra.mxu0 %v6362_v46  ;;  %v6413_v46 = vld [vmem:[%s8201_s1 + $0x5f8] sm:$0xff]  }
  0x8d   :  { %5786 = vmatprep.subr.bf16.mxu0 %v6364_v48  ;;  %v6415_v48 = vld [vmem:[%s8201_s1 + $0x5b8] sm:$0xff]  }
  0x8e   :  { %5807 = vmatpush3.bf16.msra.mxu1 %v6363_v47  ;;  %v6414_v47 = vld [vmem:[%s8201_s1 + $0x538] sm:$0xff]  }
  0x8f   :  { %5808 = vmatprep.subr.bf16.mxu1 %v6365_v49  ;;  %v1061_v49 = vrot.slane %v7226_v4, %v6828_v41  ;;  %v6434_v4 = vld [vmem:[%s8201_s1 + $0x6e0] sm:$0xff]  }
  0x90   :  { %5787 = vmatpush3.bf16.msra.mxu0 %v6366_v50  ;;  %v6417_v50 = vld [vmem:[%s8201_s1 + $0x640] sm:$0xff]  }
  0x91   :  { %5788 = vmatprep.subr.bf16.mxu0 %v6368_v52  ;;  %v6419_v52 = vld [vmem:[%s8201_s1 + $0x600] sm:$0xff]  }
  0x92   :  { %5809 = vmatpush3.bf16.msra.mxu1 %v6367_v51  ;;  %v6418_v51 = vld [vmem:[%s8201_s1 + $0x6c0] sm:$0xff]  }
  0x93   :  { %5810 = vmatprep.subr.bf16.mxu1 %v6369_v53  ;;  %v6420_v53 = vld [vmem:[%s8201_s1 + $0x680] sm:$0xff]  }
  0x94   :  { %5789 = vmatpush3.bf16.msra.mxu0 %v6370_v54  ;;  %v1077_v54 = vcombine.high %v1061_v49, %v1061_v49 }
  0x95   :  { %5790 = vmatprep.subr.bf16.mxu0 %v6372_v56  ;;  %v6422_v56 = vld [vmem:[%s8201_s1 + $0x6c8] sm:$0xff]  }
  0x96   :  { %5811 = vmatpush3.bf16.msra.mxu1 %v6371_v55  ;;  %v6421_v55 = vld [vmem:[%s8201_s1 + $0x648] sm:$0xff]  }
  0x97   :  { %5812 = vmatprep.subr.bf16.mxu1 %v6373_v57  ;;  %v6423_v57 = vld [vmem:[%s8201_s1 + $0x608] sm:$0xff]  }
  0x98   :  { %5791 = vmatpush3.bf16.msra.mxu0 %v6374_v58  ;;  %v6424_v58 = vld [vmem:[%s8201_s1 + $0x688] sm:$0xff]  }
  0x99   :  { %5792 = vmatprep.subr.bf16.mxu0 %v6376_v60  ;;  %v6426_v60 = vld [vmem:[%s8201_s1 + $0x6d0] sm:$0xff]  }
  0x9a   :  { %5813 = vmatpush3.bf16.msra.mxu1 %v6375_v59  ;;  %v6425_v59 = vld [vmem:[%s8201_s1 + $0x650] sm:$0xff]  }
  0x9b   :  { %5814 = vmatprep.subr.bf16.mxu1 %v6377_v62  ;;  %v6428_v62 = vld [vmem:[%s8201_s1 + $0x690] sm:$0xff]  }
  0x9c   :  { %5793 = vmatpush3.bf16.msra.mxu0 %v6378_v1  ;;  %v6431_v1 = vld [vmem:[%s8201_s1 + $0x618] sm:$0xff]  }
  0x9d   :  { %5794 = vmatprep.subr.bf16.mxu0 %v6380_v5  ;;  %v6435_v5 = vld [vmem:[%s8201_s1 + $0x620] sm:$0xff]  }
  0x9e   :  { %5815 = vmatpush3.bf16.msra.mxu1 %v6379_v2  ;;  %v6432_v2 = vld [vmem:[%s8201_s1 + $0x698] sm:$0xff]  }
  0x9f   :  { %5816 = vmatprep.subr.bf16.mxu1 %v6381_v6  ;;  %v6436_v6 = vld [vmem:[%s8201_s1 + $0x6a0] sm:$0xff]  }
  0xa0   :  { %5795 = vmatpush3.bf16.msra.mxu0 %v6382_v9  ;;  %v6439_v9 = vld [vmem:[%s8201_s1 + $0x628] sm:$0xff]  }
  0xa1   :  { %5824 = vmatprep.subr.bf16.mxu0 %v6384_v13  ;;  %v6442_v13 = vld [vmem:[%s8201_s1 + $0x6f0] sm:$0xff]  }
  0xa2   :  { %5817 = vmatpush3.bf16.msra.mxu1 %v6383_v10  ;;  %v6440_v10 = vld [vmem:[%s8201_s1 + $0x6a8] sm:$0xff]  }
  0xa3   :  { %4373 = vmatmul.mubr.bf16.vlgmr.msra.gmra.mrb[16].mxu0 %v1054_v12  ;;  %5846 = vmatprep.subr.bf16.mxu1 %v6385_v14  ;;  %v19_v12 = vld [vmem:[%s8200_s0 + $0x18] sm:$0xff] }
  0xa4   :  { %5825 = vmatpush3.bf16.msra.mxu0 %v6386_v16  ;;  %4452 = vmatprep.mubr.bf16.mxu0 %v1075_v15  ;;  %v1087_v14 = vrot.slane %v19_v12, %v6828_v41  ;;  %v1080_v15 = vcombine.high %v19_v12, %v19_v12  ;;  %v6443_v16 = vld [vmem:[%s8201_s1 + $0x630] sm:$0xff]   ;;  %v6480_v12 = vld [vmem:[%s8201_s1 + $0x7b8] sm:$0xff]  }
  0xa5   :  { %4413 = vmatmul.mubr.bf16.vlgmr.msra.gmra.mrb[16].mxu1 %v1076_v18  ;;  %5826 = vmatprep.subr.bf16.mxu0 %v6388_v19 }
  0xa6   :  { %5847 = vmatpush3.bf16.msra.mxu1 %v6387_v17  ;;  %4492 = vmatprep.mubr.bf16.mxu1 %v1079_v21  ;;  %v6445_v17 = vld [vmem:[%s8201_s1 + $0x678] sm:$0xff]   ;;  %v1095_v18 = vcombine.high %v1087_v14, %v1087_v14  ;;  %v7432_v19 = vrot.slane %v1080_v15, %v6828_v41  ;;  %v6483_v15 = vld [vmem:[%s8201_s1 + $0x8c0] sm:$0xff]  }
  0xa7   :  { %5848 = vmatprep.subr.bf16.mxu1 %v6389_v20  ;;  %v6444_v20 = vld [vmem:[%s8201_s1 + $0x6b0] sm:$0xff]   ;;  %v6446_v21 = vld [vmem:[%s8201_s1 + $0x6f8] sm:$0xff]  }
  0xa8   :  { %5827 = vmatpush3.bf16.msra.mxu0 %v6390_v22  ;;  %v1117_v22 = vrot.slane %v1095_v18, %v6828_v41 }
  0xa9   :  { %5828 = vmatprep.subr.bf16.mxu0 %v6392_v24  ;;  %v6447_v24 = vld [vmem:[%s8201_s1 + $0x638] sm:$0xff]  }
  0xaa   :  { %5849 = vmatpush3.bf16.msra.mxu1 %v6391_v23  ;;  %v1096_v23 = vcombine.high %v7432_v19, %v7432_v19 }
  0xab   :  { %5850 = vmatprep.subr.bf16.mxu1 %v6393_v25  ;;  %v1127_v25 = vcombine.high %v1117_v22, %v1117_v22 }
  0xac   :  { %5829 = vmatpush3.bf16.msra.mxu0 %v6394_v26  ;;  %v1103_v26 = vrot.slane %v1087_v14, %v6828_v41  ;;  %v6482_v14 = vld [vmem:[%s8201_s1 + $0x840] sm:$0xff]  }
  0xad   :  { %5830 = vmatprep.subr.bf16.mxu0 %v6396_v28  ;;  %v6448_v28 = vld [vmem:[%s8201_s1 + $0x6b8] sm:$0xff]  }
  0xae   :  { %5851 = vmatpush3.bf16.msra.mxu1 %v6395_v27  ;;  %v6449_v27 = vld [vmem:[%s8201_s1 + $0x740] sm:$0xff]  }
  0xaf   :  { %5852 = vmatprep.subr.bf16.mxu1 %v6397_v29  ;;  %v1124_v29 = vrot.slane %v1096_v23, %v6828_v41  ;;  %v6490_v23 = vld [vmem:[%s8201_s1 + $0x850] sm:$0xff]  }
  0xb0   :  { %5831 = vmatpush3.bf16.msra.mxu0 %v6398_v30  ;;  %v6450_v30 = vld [vmem:[%s8201_s1 + $0x7c0] sm:$0xff]  }
  0xb1   :  { %5832 = vmatprep.subr.bf16.mxu0 %v6400_v32  ;;  %v1125_v32 = vcombine.high %v1103_v26, %v1103_v26 }
  0xb2   :  { %5853 = vmatpush3.bf16.msra.mxu1 %v6399_v31  ;;  %v6451_v31 = vld [vmem:[%s8201_s1 + $0x700] sm:$0xff]  }
  0xb3   :  { %5854 = vmatprep.subr.bf16.mxu1 %v6401_v33  ;;  %v6453_v33 = vld [vmem:[%s8201_s1 + $0x748] sm:$0xff]  }
  0xb4   :  { %5833 = vmatpush3.bf16.msra.mxu0 %v6402_v34  ;;  %v6452_v34 = vld [vmem:[%s8201_s1 + $0x780] sm:$0xff]  }
  0xb5   :  { %5834 = vmatprep.subr.bf16.mxu0 %v6404_v36  ;;  %v6454_v36 = vld [vmem:[%s8201_s1 + $0x7c8] sm:$0xff]  }
  0xb6   :  { %5855 = vmatpush3.bf16.msra.mxu1 %v6403_v35  ;;  %v1128_v35 = vcombine.high %v1124_v29, %v1124_v29 }
  0xb7   :  { %5856 = vmatprep.subr.bf16.mxu1 %v6405_v37  ;;  %v6455_v37 = vld [vmem:[%s8201_s1 + $0x708] sm:$0xff]  }
  0xb8   :  { %5835 = vmatpush3.bf16.msra.mxu0 %v6406_v38  ;;  %v6457_v38 = vld [vmem:[%s8201_s1 + $0x750] sm:$0xff]  }
  0xb9   :  { %5836 = vmatprep.subr.bf16.mxu0 %v6408_v40  ;;  %v6458_v40 = vld [vmem:[%s8201_s1 + $0x7d0] sm:$0xff]  }
  0xba   :  { %5857 = vmatpush3.bf16.msra.mxu1 %v6407_v39  ;;  %v6456_v39 = vld [vmem:[%s8201_s1 + $0x788] sm:$0xff]  }
  0xbb   :  { %5858 = vmatprep.subr.bf16.mxu1 %v6409_v42  ;;  %v6459_v42 = vld [vmem:[%s8201_s1 + $0x710] sm:$0xff]  }
  0xbc   :  { %5837 = vmatpush3.bf16.msra.mxu0 %v6410_v43  ;;  %v6461_v43 = vld [vmem:[%s8201_s1 + $0x758] sm:$0xff]  }
  0xbd   :  { %5838 = vmatprep.subr.bf16.mxu0 %v6412_v45  ;;  %v6462_v45 = vld [vmem:[%s8201_s1 + $0x7d8] sm:$0xff]  }
  0xbe   :  { %5859 = vmatpush3.bf16.msra.mxu1 %v6411_v44  ;;  %v6460_v44 = vld [vmem:[%s8201_s1 + $0x790] sm:$0xff]  }
  0xbf   :  { %5860 = vmatprep.subr.bf16.mxu1 %v6413_v46  ;;  %v6463_v46 = vld [vmem:[%s8201_s1 + $0x718] sm:$0xff]  }
  0xc0   :  { %5839 = vmatpush3.bf16.msra.mxu0 %v6414_v47  ;;  %v6464_v47 = vld [vmem:[%s8201_s1 + $0x798] sm:$0xff]  }
  0xc1   :  { %5868 = vmatprep.subr.bf16.mxu0 %v6417_v50  ;;  %v6467_v50 = vld [vmem:[%s8201_s1 + $0x720] sm:$0xff]  }
  0xc2   :  { %5861 = vmatpush3.bf16.msra.mxu1 %v6415_v48  ;;  %v6465_v48 = vld [vmem:[%s8201_s1 + $0x760] sm:$0xff]  }
  0xc3   :  { %4453 = vmatmul.mubr.bf16.vlgmr.msra.gmra.mrb[20].mxu0 %v1061_v49  ;;  %5890 = vmatprep.subr.bf16.mxu1 %v6418_v51  ;;  %v6466_v49 = vld [vmem:[%s8201_s1 + $0x7e0] sm:$0xff]  }
  0xc4   :  { %5869 = vmatpush3.bf16.msra.mxu0 %v6419_v52  ;;  %4532 = vmatprep.mubr.bf16.mxu0 %v1117_v22  ;;  %v6468_v51 = vld [vmem:[%s8201_s1 + $0x7a0] sm:$0xff]   ;;  %v6469_v52 = vld [vmem:[%s8201_s1 + $0x768] sm:$0xff]  }
  0xc5   :  { %4493 = vmatmul.mubr.bf16.vlgmr.msra.gmra.mrb[20].mxu1 %v1077_v54  ;;  %5870 = vmatprep.subr.bf16.mxu0 %v6421_v55  ;;  %v6471_v54 = vld [vmem:[%s8201_s1 + $0x728] sm:$0xff]  }
  0xc6   :  { %5891 = vmatpush3.bf16.msra.mxu1 %v6420_v53  ;;  %4572 = vmatprep.mubr.bf16.mxu1 %v1127_v25  ;;  %v6470_v53 = vld [vmem:[%s8201_s1 + $0x7e8] sm:$0xff]   ;;  %v6492_v25 = vld [vmem:[%s8201_s1 + $0x810] sm:$0xff]  }
  0xc7   :  { %5892 = vmatprep.subr.bf16.mxu1 %v6422_v56  ;;  %v6472_v55 = vld [vmem:[%s8201_s1 + $0x7a8] sm:$0xff]   ;;  %v5155_v56 = vld [vmem:[%s8202_s2] ss:$0 sm:$0xff] }
  0xc8   :  { %5871 = vmatpush3.bf16.msra.mxu0 %v6423_v57  ;;  %v6473_v57 = vld [vmem:[%s8201_s1 + $0x770] sm:$0xff]   ;;  %v6489_v22 = vld [vmem:[%s8201_s1 + $0x888] sm:$0xff]  }
  0xc9   :  { %5872 = vmatprep.subr.bf16.mxu0 %v6425_v59  ;;  %v6474_v59 = vld [vmem:[%s8201_s1 + $0x7f0] sm:$0xff]  }
  0xca   :  { %5893 = vmatpush3.bf16.msra.mxu1 %v6424_v58 }
  0xcb   :  { %5894 = vmatprep.subr.bf16.mxu1 %v6426_v60 }
  0xcc   :  { %5873 = vmatpush3.bf16.msra.mxu0 %v6427_v61  ;;  %v6475_v61 = vld [vmem:[%s8201_s1 + $0x730] sm:$0xff]  }
  0xcd   :  { %5874 = vmatprep.subr.bf16.mxu0 %v6429_v63 }
  0xce   :  { %5895 = vmatpush3.bf16.msra.mxu1 %v6428_v62 }
  0xcf   :  { %5896 = vmatprep.subr.bf16.mxu1 %v6430_v0 }
  0xd0   :  { %5875 = vmatpush3.bf16.msra.mxu0 %v6431_v1  ;;  %v6476_v1 = vld [vmem:[%s8201_s1 + $0x7b0] sm:$0xff]  }
  0xd1   :  { %5876 = vmatprep.subr.bf16.mxu0 %v6433_v3 }
  0xd2   :  { %5897 = vmatpush3.bf16.msra.mxu1 %v6432_v2  ;;  %v6477_v2 = vld [vmem:[%s8201_s1 + $0x778] sm:$0xff]  }
  0xd3   :  { %5898 = vmatprep.subr.bf16.mxu1 %v6434_v4 }
  0xd4   :  { %5877 = vmatpush3.bf16.msra.mxu0 %v6435_v5 }
  0xd5   :  { %5878 = vmatprep.subr.bf16.mxu0 %v6437_v7 }
  0xd6   :  { %5899 = vmatpush3.bf16.msra.mxu1 %v6436_v6 }
  0xd7   :  { %5900 = vmatprep.subr.bf16.mxu1 %v6438_v8  ;;  %v6478_v8 = vld [vmem:[%s8201_s1 + $0x7f8] sm:$0xff]  }
  0xd8   :  { %5879 = vmatpush3.bf16.msra.mxu0 %v6439_v9 }
  0xd9   :  { %5880 = vmatprep.subr.bf16.mxu0 %v6441_v11 }
  0xda   :  { %5901 = vmatpush3.bf16.msra.mxu1 %v6440_v10  ;;  %v6479_v10 = vld [vmem:[%s8201_s1 + $0x738] sm:$0xff]  }
  0xdb   :  { %5902 = vmatprep.subr.bf16.mxu1 %v6442_v13  ;;  %v1110_v13 = vrot.slane %v7432_v19, %v6828_v41  ;;  %v6486_v19 = vld [vmem:[%s8201_s1 + $0x848] sm:$0xff]  }
  0xdc   :  { %5881 = vmatpush3.bf16.msra.mxu0 %v6443_v16  ;;  %v6484_v16 = vld [vmem:[%s8201_s1 + $0x800] sm:$0xff]  }
  0xdd   :  { %5882 = vmatprep.subr.bf16.mxu0 %v6445_v17  ;;  %v6485_v17 = vld [vmem:[%s8201_s1 + $0x880] sm:$0xff]   ;;  %v1126_v18 = vcombine.high %v1110_v13, %v1110_v13 }
  0xde   :  { %5903 = vmatpush3.bf16.msra.mxu1 %v6444_v20  ;;  %v6487_v20 = vld [vmem:[%s8201_s1 + $0x8c8] sm:$0xff]  }
  0xdf   :  { %5904 = vmatprep.subr.bf16.mxu1 %v6446_v21  ;;  %v6488_v21 = vld [vmem:[%s8201_s1 + $0x808] sm:$0xff]  }
  0xe0   :  { %5883 = vmatpush3.bf16.msra.mxu0 %v6447_v24  ;;  %v6491_v24 = vld [vmem:[%s8201_s1 + $0x8d0] sm:$0xff]  }
  0xe1   :  { %5912 = vmatprep.subr.bf16.mxu0 %v6449_v27  ;;  %v6494_v27 = vld [vmem:[%s8201_s1 + $0x858] sm:$0xff]  }
  0xe2   :  { %5905 = vmatpush3.bf16.msra.mxu1 %v6448_v28  ;;  %v6495_v28 = vld [vmem:[%s8201_s1 + $0x8d8] sm:$0xff]  }
  0xe3   :  { %4533 = vmatmul.mubr.bf16.vlgmr.msra.gmra.mrb[24].mxu0 %v1103_v26  ;;  %5934 = vmatprep.subr.bf16.mxu1 %v6450_v30  ;;  %v6493_v26 = vld [vmem:[%s8201_s1 + $0x890] sm:$0xff]   ;;  %v6497_v30 = vld [vmem:[%s8201_s1 + $0x898] sm:$0xff]  }
  0xe4   :  { %5913 = vmatpush3.bf16.msra.mxu0 %v6451_v31  ;;  %4612 = vmatprep.mubr.bf16.mxu0 %v1124_v29  ;;  %v6496_v29 = vld [vmem:[%s8201_s1 + $0x818] sm:$0xff]   ;;  %v6498_v31 = vld [vmem:[%s8201_s1 + $0x860] sm:$0xff]  }
  0xe5   :  { %4573 = vmatmul.mubr.bf16.vlgmr.msra.gmra.mrb[24].mxu1 %v1125_v32  ;;  %5914 = vmatprep.subr.bf16.mxu0 %v6453_v33  ;;  %v6499_v32 = vld [vmem:[%s8201_s1 + $0x8e0] sm:$0xff]  }
  0xe6   :  { %5935 = vmatpush3.bf16.msra.mxu1 %v6452_v34  ;;  %4652 = vmatprep.mubr.bf16.mxu1 %v1128_v35  ;;  %v6500_v33 = vld [vmem:[%s8201_s1 + $0x820] sm:$0xff]   ;;  %v6502_v35 = vld [vmem:[%s8201_s1 + $0x868] sm:$0xff]  }
  0xe7   :  { %5936 = vmatprep.subr.bf16.mxu1 %v6454_v36  ;;  %v6501_v34 = vld [vmem:[%s8201_s1 + $0x8a0] sm:$0xff]   ;;  %v6503_v36 = vld [vmem:[%s8201_s1 + $0x8e8] sm:$0xff]  }
  0xe8   :  { %5915 = vmatpush3.bf16.msra.mxu0 %v6455_v37  ;;  %v6504_v37 = vld [vmem:[%s8201_s1 + $0x828] sm:$0xff]  }
  0xe9   :  { %5916 = vmatprep.subr.bf16.mxu0 %v6457_v38  ;;  %v6505_v38 = vld [vmem:[%s8201_s1 + $0x8a8] sm:$0xff]  }
  0xea   :  { %5937 = vmatpush3.bf16.msra.mxu1 %v6456_v39  ;;  %v6506_v39 = vld [vmem:[%s8201_s1 + $0x870] sm:$0xff]  }
  0xeb   :  { %5938 = vmatprep.subr.bf16.mxu1 %v6458_v40  ;;  %v6507_v40 = vld [vmem:[%s8201_s1 + $0x8f0] sm:$0xff]  }
  0xec   :  { %5917 = vmatpush3.bf16.msra.mxu0 %v6459_v42 }
  0xed   :  { %5918 = vmatprep.subr.bf16.mxu0 %v6461_v43  ;;  %v6508_v43 = vld [vmem:[%s8201_s1 + $0x830] sm:$0xff]  }
  0xee   :  { %5939 = vmatpush3.bf16.msra.mxu1 %v6460_v44 }
  0xef   :  { %5940 = vmatprep.subr.bf16.mxu1 %v6462_v45  ;;  %v20_v45 = vld [vmem:[%s8200_s0 + $0x20] sm:$0xff] }
  0xf0   :  { %5919 = vmatpush3.bf16.msra.mxu0 %v6463_v46 }
  0xf1   :  { %5920 = vmatprep.subr.bf16.mxu0 %v6465_v48 }
  0xf2   :  { %5941 = vmatpush3.bf16.msra.mxu1 %v6464_v47 }
  0xf3   :  { %5942 = vmatprep.subr.bf16.mxu1 %v6466_v49  ;;  %v6509_v49 = vld [vmem:[%s8201_s1 + $0x8b0] sm:$0xff]  }
  0xf4   :  { %5921 = vmatpush3.bf16.msra.mxu0 %v6467_v50  ;;  %v6510_v50 = vld [vmem:[%s8201_s1 + $0x878] sm:$0xff]  }
  0xf5   :  { %5922 = vmatprep.subr.bf16.mxu0 %v6469_v52  ;;  %v1129_v52 = vcombine.high %v20_v45, %v20_v45 }
  0xf6   :  { %5943 = vmatpush3.bf16.msra.mxu1 %v6468_v51  ;;  %v5620_v58 = vpop.f32.mrb[0].mxu0  ;;  %v1136_v51 = vrot.slane %v20_v45, %v6828_v41 }
  0xf7   :  { %v5621_v60 = vpop.f32.mrb[1].mxu0  ;;  %5944 = vmatprep.subr.bf16.mxu1 %v6470_v53  ;;  %v5642_v62 = vpop.f32.mrb[0].mxu1 }
  0xf8   :  { %v5622_v63 = vadd.f32 %v5621_v60, %v5620_v58  ;;  %v5623_v0 = vpop.f32.mrb[2].mxu0  ;;  %5923 = vmatpush3.bf16.msra.mxu0 %v6471_v54  ;;  %v5643_v3 = vpop.f32.mrb[1].mxu1  ;;  %v6511_v58 = vld [vmem:[%s8201_s1 + $0x8f8] sm:$0xff]  }
  0xf9   :  { %v5624_v4 = vpop.f32.mrb[3].mxu0  ;;  %5924 = vmatprep.subr.bf16.mxu0 %v6473_v57  ;;  %v5644_v6 = vadd.f32 %v5643_v3, %v5642_v62  ;;  %v5645_v7 = vpop.f32.mrb[2].mxu1  ;;  %v7653_v62 = vrot.slane %v1129_v52, %v6828_v41  ;;  %v6513_v0 = vld [vmem:[%s8201_s1 + $0x8b8] sm:$0xff]   ;;  %v6514_v3 = vld [vmem:[%s8201_s1 + $0x940] sm:$0xff]  }
  0xfa   :  { %v4055_v5 = vadd.f32 %v5622_v63, %v5155_v56  ;;  %5945 = vmatpush3.bf16.msra.mxu1 %v6472_v55  ;;  %v5646_v9 = vpop.f32.mrb[3].mxu1  ;;  %v6516_v7 = vld [vmem:[%s8201_s1 + $0x900] sm:$0xff]   ;;  %v6545_v52 = vld [vmem:[%s8201_s1 + $0x9b8] sm:$0xff]  }
  0xfb   :  { %5946 = vmatprep.subr.bf16.mxu1 %v6474_v59  ;;  %v1144_v59 = vcombine.high %v1136_v51, %v1136_v51  ;;  %v1145_v4 = vcombine.high %v7653_v62, %v7653_v62  ;;  %v6517_v9 = vld [vmem:[%s8201_s1 + $0x980] sm:$0xff]  }
  0xfc   :  { %v7547_v11 = vadd.f32 %v5644_v6, %v4055_v5  ;;  %5925 = vmatpush3.bf16.msra.mxu0 %v6475_v61  ;;  %v6512_v61 = vld [vmem:[%s8201_s1 + $0x838] sm:$0xff]   ;;  %v6515_v6 = vld [vmem:[%s8201_s1 + $0x9c0] sm:$0xff]  }
  0xfd   :  { %5926 = vmatprep.subr.bf16.mxu0 %v6477_v2  ;;  %v1152_v2 = vrot.slane %v1136_v51, %v6828_v41 }
  0xfe   :  { %5947 = vmatpush3.bf16.msra.mxu1 %v6476_v1  ;;  %v1166_v1 = vrot.slane %v1144_v59, %v6828_v41  ;;  %v6551_v59 = vld [vmem:[%s8201_s1 + $0xa48] sm:$0xff]  }
  0xff   :  { %5948 = vmatprep.subr.bf16.mxu1 %v6478_v8  ;;  %v1173_v8 = vrot.slane %v1145_v4, %v6828_v41  ;;  %v6560_v4 = vld [vmem:[%s8201_s1 + $0xad8] sm:$0xff]  }
 0x100   :  { %5927 = vmatpush3.bf16.msra.mxu0 %v6479_v10  ;;  %v1176_v5 = vcombine.high %v1166_v1, %v1166_v1  ;;  %v1174_v10 = vcombine.high %v1152_v2, %v1152_v2 }
 0x101   :  { %5956 = vmatprep.subr.bf16.mxu0 %v6482_v14  ;;  %v6520_v14 = vld [vmem:[%s8201_s1 + $0x908] sm:$0xff]  }
 0x102   :  { %5949 = vmatpush3.bf16.msra.mxu1 %v6480_v12  ;;  %v6519_v12 = vld [vmem:[%s8201_s1 + $0x9c8] sm:$0xff]  }
 0x103   :  { %4613 = vmatmul.mubr.bf16.vlgmr.msra.gmra.mrb[28].mxu0 %v1110_v13  ;;  %5978 = vmatprep.subr.bf16.mxu1 %v6483_v15  ;;  %v1177_v13 = vcombine.high %v1173_v8, %v1173_v8  ;;  %v6521_v15 = vld [vmem:[%s8201_s1 + $0x988] sm:$0xff]  }
 0x104   :  { %5957 = vmatpush3.bf16.msra.mxu0 %v6484_v16  ;;  %4692 = vmatprep.mubr.bf16.mxu0 %v1166_v1  ;;  %v6522_v16 = vld [vmem:[%s8201_s1 + $0x950] sm:$0xff]  }
 0x105   :  { %4653 = vmatmul.mubr.bf16.vlgmr.msra.gmra.mrb[28].mxu1 %v1126_v18  ;;  %5958 = vmatprep.subr.bf16.mxu0 %v6486_v19  ;;  %v6524_v18 = vld [vmem:[%s8201_s1 + $0x910] sm:$0xff]  }
 0x106   :  { %5979 = vmatpush3.bf16.msra.mxu1 %v6485_v17  ;;  %4732 = vmatprep.mubr.bf16.mxu1 %v1176_v5  ;;  %v6523_v17 = vld [vmem:[%s8201_s1 + $0x9d0] sm:$0xff]   ;;  %v6561_v5 = vld [vmem:[%s8201_s1 + $0xa18] sm:$0xff]  }
 0x107   :  { %5980 = vmatprep.subr.bf16.mxu1 %v6487_v20  ;;  %v6525_v19 = vld [vmem:[%s8201_s1 + $0x990] sm:$0xff]   ;;  %v6526_v20 = vld [vmem:[%s8201_s1 + $0x958] sm:$0xff]  }
 0x108   :  { %5959 = vmatpush3.bf16.msra.mxu0 %v6488_v21  ;;  %v6527_v21 = vld [vmem:[%s8201_s1 + $0x9d8] sm:$0xff]   ;;  %v6557_v1 = vld [vmem:[%s8201_s1 + $0xa10] sm:$0xff]  }
 0x109   :  { %5960 = vmatprep.subr.bf16.mxu0 %v6490_v23  ;;  %v6529_v23 = vld [vmem:[%s8201_s1 + $0x998] sm:$0xff]  }
 0x10a   :  { %5981 = vmatpush3.bf16.msra.mxu1 %v6489_v22  ;;  %v6528_v22 = vld [vmem:[%s8201_s1 + $0x918] sm:$0xff]  }
 0x10b   :  { %5982 = vmatprep.subr.bf16.mxu1 %v6491_v24  ;;  %v6530_v24 = vld [vmem:[%s8201_s1 + $0x960] sm:$0xff]  }
 0x10c   :  { %5961 = vmatpush3.bf16.msra.mxu0 %v6492_v25  ;;  %v6531_v25 = vld [vmem:[%s8201_s1 + $0x9e0] sm:$0xff]  }
 0x10d   :  { %5962 = vmatprep.subr.bf16.mxu0 %v6494_v27  ;;  %v6533_v27 = vld [vmem:[%s8201_s1 + $0x9a0] sm:$0xff]  }
 0x10e   :  { %5983 = vmatpush3.bf16.msra.mxu1 %v6493_v26  ;;  %v6532_v26 = vld [vmem:[%s8201_s1 + $0x920] sm:$0xff]  }
 0x10f   :  { %5984 = vmatprep.subr.bf16.mxu1 %v6495_v28  ;;  %v6534_v28 = vld [vmem:[%s8201_s1 + $0x968] sm:$0xff]  }
 0x110   :  { %5963 = vmatpush3.bf16.msra.mxu0 %v6496_v29  ;;  %v6535_v29 = vld [vmem:[%s8201_s1 + $0x9e8] sm:$0xff]  }
 0x111   :  { %5964 = vmatprep.subr.bf16.mxu0 %v6498_v31  ;;  %v6537_v31 = vld [vmem:[%s8201_s1 + $0x9a8] sm:$0xff]  }
 0x112   :  { %5985 = vmatpush3.bf16.msra.mxu1 %v6497_v30  ;;  %v6536_v30 = vld [vmem:[%s8201_s1 + $0x928] sm:$0xff]  }
 0x113   :  { %5986 = vmatprep.subr.bf16.mxu1 %v6499_v32  ;;  %v6538_v32 = vld [vmem:[%s8201_s1 + $0x970] sm:$0xff]  }
 0x114   :  { %5965 = vmatpush3.bf16.msra.mxu0 %v6500_v33 }
 0x115   :  { %5966 = vmatprep.subr.bf16.mxu0 %v6502_v35 }
 0x116   :  { %5987 = vmatpush3.bf16.msra.mxu1 %v6501_v34  ;;  %v5664_v42 = vpop.f32.mrb[4].mxu0  ;;  %v6539_v34 = vld [vmem:[%s8201_s1 + $0x9f0] sm:$0xff]  }
 0x117   :  { %v5665_v44 = vpop.f32.mrb[5].mxu0  ;;  %5988 = vmatprep.subr.bf16.mxu1 %v6503_v36  ;;  %v5686_v46 = vpop.f32.mrb[4].mxu1  ;;  %v6540_v36 = vld [vmem:[%s8201_s1 + $0x930] sm:$0xff]  }
 0x118   :  { %v5666_v47 = vadd.f32 %v5665_v44, %v5664_v42  ;;  %v5667_v48 = vpop.f32.mrb[6].mxu0  ;;  %5967 = vmatpush3.bf16.msra.mxu0 %v6504_v37  ;;  %v5687_v53 = vpop.f32.mrb[5].mxu1  ;;  %v6542_v42 = vld [vmem:[%s8201_s1 + $0x978] sm:$0xff]  }
 0x119   :  { %v5668_v54 = vpop.f32.mrb[7].mxu0  ;;  %5968 = vmatprep.subr.bf16.mxu0 %v6506_v39  ;;  %v5688_v56 = vadd.f32 %v5687_v53, %v5686_v46  ;;  %v5689_v57 = vpop.f32.mrb[6].mxu1  ;;  %v6543_v48 = vld [vmem:[%s8201_s1 + $0x9f8] sm:$0xff]   ;;  %v1159_v53 = vrot.slane %v7653_v62, %v6828_v41  ;;  %v6554_v62 = vld [vmem:[%s8201_s1 + $0xa88] sm:$0xff]  }
 0x11a   :  { %v4135_v55 = vadd.f32 %v5666_v47, %v7547_v11  ;;  %5989 = vmatpush3.bf16.msra.mxu1 %v6505_v38  ;;  %v5690_v60 = vpop.f32.mrb[7].mxu1  ;;  %v6518_v11 = vld [vmem:[%s8201_s1 + $0x948] sm:$0xff]   ;;  %v6547_v54 = vld [vmem:[%s8201_s1 + $0xa40] sm:$0xff]  }
 0x11b   :  { %5990 = vmatprep.subr.bf16.mxu1 %v6507_v40  ;;  %v6541_v40 = vld [vmem:[%s8201_s1 + $0x9b0] sm:$0xff]   ;;  %v6550_v57 = vld [vmem:[%s8201_s1 + $0xa80] sm:$0xff]   ;;  %v6552_v60 = vld [vmem:[%s8201_s1 + $0xac8] sm:$0xff]  }
 0x11c   :  { %v7655_v63 = vadd.f32 %v5688_v56, %v4135_v55  ;;  %5969 = vmatpush3.bf16.msra.mxu0 %v6508_v43  ;;  %v6548_v55 = vld [vmem:[%s8201_s1 + $0xac0] sm:$0xff]  }
 0x11d   :  { %5970 = vmatprep.subr.bf16.mxu0 %v6510_v50  ;;  %v6544_v50 = vld [vmem:[%s8201_s1 + $0x938] sm:$0xff]   ;;  %v6549_v56 = vld [vmem:[%s8201_s1 + $0xa00] sm:$0xff]  }
 0x11e   :  { %5991 = vmatpush3.bf16.msra.mxu1 %v6509_v49 }
 0x11f   :  { %5992 = vmatprep.subr.bf16.mxu1 %v6511_v58  ;;  %v1175_v58 = vcombine.high %v1159_v53, %v1159_v53 }
 0x120   :  { %5971 = vmatpush3.bf16.msra.mxu0 %v6512_v61  ;;  %v6553_v61 = vld [vmem:[%s8201_s1 + $0xa08] sm:$0xff]  }
 0x121   :  { %6000 = vmatprep.subr.bf16.mxu0 %v6514_v3  ;;  %v6559_v3 = vld [vmem:[%s8201_s1 + $0xa58] sm:$0xff]  }
 0x122   :  { %5993 = vmatpush3.bf16.msra.mxu1 %v6513_v0  ;;  %v6556_v0 = vld [vmem:[%s8201_s1 + $0xad0] sm:$0xff]  }
 0x123   :  { %4693 = vmatmul.mubr.bf16.vlgmr.msra.gmra.mrb[32].mxu0 %v1152_v2  ;;  %6022 = vmatprep.subr.bf16.mxu1 %v6515_v6  ;;  %v6558_v2 = vld [vmem:[%s8201_s1 + $0xa90] sm:$0xff]   ;;  %v6562_v6 = vld [vmem:[%s8201_s1 + $0xa98] sm:$0xff]  }
 0x124   :  { %6001 = vmatpush3.bf16.msra.mxu0 %v6516_v7  ;;  %4772 = vmatprep.mubr.bf16.mxu0 %v1173_v8  ;;  %v6563_v7 = vld [vmem:[%s8201_s1 + $0xa60] sm:$0xff]  }
 0x125   :  { %4733 = vmatmul.mubr.bf16.vlgmr.msra.gmra.mrb[32].mxu1 %v1174_v10  ;;  %6002 = vmatprep.subr.bf16.mxu0 %v6518_v11  ;;  %v6564_v8 = vld [vmem:[%s8201_s1 + $0xae0] sm:$0xff]   ;;  %v6567_v11 = vld [vmem:[%s8201_s1 + $0xa68] sm:$0xff]  }
 0x126   :  { %6023 = vmatpush3.bf16.msra.mxu1 %v6517_v9  ;;  %4812 = vmatprep.mubr.bf16.mxu1 %v1177_v13  ;;  %v6565_v9 = vld [vmem:[%s8201_s1 + $0xa20] sm:$0xff]   ;;  %v6569_v13 = vld [vmem:[%s8201_s1 + $0xa28] sm:$0xff]  }
 0x127   :  { %6024 = vmatprep.subr.bf16.mxu1 %v6519_v12  ;;  %v6566_v10 = vld [vmem:[%s8201_s1 + $0xaa0] sm:$0xff]   ;;  %v6568_v12 = vld [vmem:[%s8201_s1 + $0xae8] sm:$0xff]  }
 0x128   :  { %6003 = vmatpush3.bf16.msra.mxu0 %v6520_v14  ;;  %v6570_v14 = vld [vmem:[%s8201_s1 + $0xaa8] sm:$0xff]  }
 0x129   :  { %6004 = vmatprep.subr.bf16.mxu0 %v6522_v16 }
 0x12a   :  { %6025 = vmatpush3.bf16.msra.mxu1 %v6521_v15  ;;  %v6571_v15 = vld [vmem:[%s8201_s1 + $0xa70] sm:$0xff]  }
 0x12b   :  { %6026 = vmatprep.subr.bf16.mxu1 %v6523_v17  ;;  %v6572_v17 = vld [vmem:[%s8201_s1 + $0xaf0] sm:$0xff]  }
 0x12c   :  { %6005 = vmatpush3.bf16.msra.mxu0 %v6524_v18 }
 0x12d   :  { %6006 = vmatprep.subr.bf16.mxu0 %v6526_v20 }
 0x12e   :  { %6027 = vmatpush3.bf16.msra.mxu1 %v6525_v19  ;;  %v6573_v19 = vld [vmem:[%s8201_s1 + $0xa30] sm:$0xff]  }
 0x12f   :  { %6028 = vmatprep.subr.bf16.mxu1 %v6527_v21 }
 0x130   :  { %6007 = vmatpush3.bf16.msra.mxu0 %v6528_v22 }
 0x131   :  { %6008 = vmatprep.subr.bf16.mxu0 %v6530_v24  ;;  %v6575_v24 = vld [vmem:[%s8201_s1 + $0xa78] sm:$0xff]  }
 0x132   :  { %6029 = vmatpush3.bf16.msra.mxu1 %v6529_v23  ;;  %v6574_v23 = vld [vmem:[%s8201_s1 + $0xab0] sm:$0xff]  }
 0x133   :  { %6030 = vmatprep.subr.bf16.mxu1 %v6531_v25  ;;  %v21_v25 = vld [vmem:[%s8200_s0 + $0x28] sm:$0xff] }
 0x134   :  { %6009 = vmatpush3.bf16.msra.mxu0 %v6532_v26 }
 0x135   :  { %6010 = vmatprep.subr.bf16.mxu0 %v6534_v28  ;;  %v1185_v28 = vrot.slane %v21_v25, %v6828_v41 }
 0x136   :  { %6031 = vmatpush3.bf16.msra.mxu1 %v6533_v27  ;;  %v5708_v33 = vpop.f32.mrb[8].mxu0 }
 0x137   :  { %v5709_v35 = vpop.f32.mrb[9].mxu0  ;;  %6032 = vmatprep.subr.bf16.mxu1 %v6535_v29  ;;  %v1178_v29 = vcombine.high %v21_v25, %v21_v25  ;;  %v6609_v25 = vld [vmem:[%s8201_s1 + $0xb38] sm:$0xff]  }
 0x138   :  { %v5730_v37 = vpop.f32.mrb[8].mxu1  ;;  %v5710_v38 = vadd.f32 %v5709_v35, %v5708_v33  ;;  %v5711_v39 = vpop.f32.mrb[10].mxu0  ;;  %6011 = vmatpush3.bf16.msra.mxu0 %v6536_v30  ;;  %v6576_v33 = vld [vmem:[%s8201_s1 + $0xaf8] sm:$0xff]  }
 0x139   :  { %v5731_v43 = vpop.f32.mrb[9].mxu1  ;;  %v5712_v44 = vpop.f32.mrb[11].mxu0  ;;  %6012 = vmatprep.subr.bf16.mxu0 %v6538_v32  ;;  %v6577_v35 = vld [vmem:[%s8201_s1 + $0xa38] sm:$0xff]  }
 0x13a   :  { %v4215_v45 = vadd.f32 %v5710_v38, %v7655_v63  ;;  %v5732_v46 = vadd.f32 %v5731_v43, %v5730_v37  ;;  %v5733_v47 = vpop.f32.mrb[10].mxu1  ;;  %6033 = vmatpush3.bf16.msra.mxu1 %v6537_v31  ;;  %v6555_v63 = vld [vmem:[%s8201_s1 + $0xa50] sm:$0xff]   ;;  %v7865_v37 = vrot.slane %v1178_v29, %v6828_v41  ;;  %v6578_v39 = vld [vmem:[%s8201_s1 + $0xab8] sm:$0xff]   ;;  %v6579_v43 = vld [vmem:[%s8201_s1 + $0xb40] sm:$0xff]  }
 0x13b   :  { %v5734_v49 = vpop.f32.mrb[11].mxu1  ;;  %6034 = vmatprep.subr.bf16.mxu1 %v6539_v34  ;;  %v6581_v47 = vld [vmem:[%s8201_s1 + $0xb00] sm:$0xff]  }
 0x13c   :  { %v7759_v51 = vadd.f32 %v5732_v46, %v4215_v45  ;;  %6013 = vmatpush3.bf16.msra.mxu0 %v6540_v36  ;;  %v1193_v36 = vcombine.high %v1185_v28, %v1185_v28  ;;  %v1194_v44 = vcombine.high %v7865_v37, %v7865_v37  ;;  %v6580_v45 = vld [vmem:[%s8201_s1 + $0xbc0] sm:$0xff]  }
 0x13d   :  { %6014 = vmatprep.subr.bf16.mxu0 %v6542_v42  ;;  %v1201_v42 = vrot.slane %v1185_v28, %v6828_v41  ;;  %v6582_v49 = vld [vmem:[%s8201_s1 + $0xb80] sm:$0xff]   ;;  %v1208_v28 = vrot.slane %v7865_v37, %v6828_v41  ;;  %v6619_v37 = vld [vmem:[%s8201_s1 + $0xc88] sm:$0xff]  }
 0x13e   :  { %6035 = vmatpush3.bf16.msra.mxu1 %v6541_v40  ;;  %v1215_v40 = vrot.slane %v1193_v36, %v6828_v41  ;;  %v6612_v29 = vld [vmem:[%s8201_s1 + $0xc40] sm:$0xff]   ;;  %v6618_v36 = vld [vmem:[%s8201_s1 + $0xc08] sm:$0xff]  }
 0x13f   :  { %6036 = vmatprep.subr.bf16.mxu1 %v6543_v48  ;;  %v1222_v48 = vrot.slane %v1194_v44, %v6828_v41  ;;  %v6625_v44 = vld [vmem:[%s8201_s1 + $0xcd8] sm:$0xff]  }
 0x140   :  { %6015 = vmatpush3.bf16.msra.mxu0 %v6544_v50  ;;  %v1225_v46 = vcombine.high %v1215_v40, %v1215_v40  ;;  %v1223_v50 = vcombine.high %v1201_v42, %v1201_v42 }
 0x141   :  { %6044 = vmatprep.subr.bf16.mxu0 %v6547_v54  ;;  %v6585_v54 = vld [vmem:[%s8201_s1 + $0xb08] sm:$0xff]  }
 0x142   :  { %6037 = vmatpush3.bf16.msra.mxu1 %v6545_v52  ;;  %v6584_v52 = vld [vmem:[%s8201_s1 + $0xbc8] sm:$0xff]  }
 0x143   :  { %4773 = vmatmul.mubr.bf16.vlgmr.msra.gmra.mrb[36].mxu0 %v1159_v53  ;;  %6066 = vmatprep.subr.bf16.mxu1 %v6548_v55  ;;  %v1226_v53 = vcombine.high %v1222_v48, %v1222_v48  ;;  %v6586_v55 = vld [vmem:[%s8201_s1 + $0xb88] sm:$0xff]  }
 0x144   :  { %6045 = vmatpush3.bf16.msra.mxu0 %v6549_v56  ;;  %4852 = vmatprep.mubr.bf16.mxu0 %v1215_v40  ;;  %v6587_v56 = vld [vmem:[%s8201_s1 + $0xb50] sm:$0xff]  }
 0x145   :  { %4813 = vmatmul.mubr.bf16.vlgmr.msra.gmra.mrb[36].mxu1 %v1175_v58  ;;  %6046 = vmatprep.subr.bf16.mxu0 %v6551_v59  ;;  %v6589_v58 = vld [vmem:[%s8201_s1 + $0xb10] sm:$0xff]  }
 0x146   :  { %6067 = vmatpush3.bf16.msra.mxu1 %v6550_v57  ;;  %4892 = vmatprep.mubr.bf16.mxu1 %v1225_v46  ;;  %v6588_v57 = vld [vmem:[%s8201_s1 + $0xbd0] sm:$0xff]   ;;  %v6627_v46 = vld [vmem:[%s8201_s1 + $0xc98] sm:$0xff]  }
 0x147   :  { %6068 = vmatprep.subr.bf16.mxu1 %v6552_v60  ;;  %v6590_v59 = vld [vmem:[%s8201_s1 + $0xb90] sm:$0xff]   ;;  %v6591_v60 = vld [vmem:[%s8201_s1 + $0xb58] sm:$0xff]  }
 0x148   :  { %6047 = vmatpush3.bf16.msra.mxu0 %v6553_v61  ;;  %v6592_v61 = vld [vmem:[%s8201_s1 + $0xbd8] sm:$0xff]   ;;  %v6622_v40 = vld [vmem:[%s8201_s1 + $0xc10] sm:$0xff]  }
 0x149   :  { %6048 = vmatprep.subr.bf16.mxu0 %v6555_v63  ;;  %v6594_v63 = vld [vmem:[%s8201_s1 + $0xb98] sm:$0xff]  }
 0x14a   :  { %6069 = vmatpush3.bf16.msra.mxu1 %v6554_v62  ;;  %v6593_v62 = vld [vmem:[%s8201_s1 + $0xb18] sm:$0xff]  }
 0x14b   :  { %6070 = vmatprep.subr.bf16.mxu1 %v6556_v0  ;;  %v6595_v0 = vld [vmem:[%s8201_s1 + $0xb60] sm:$0xff]  }
 0x14c   :  { %6049 = vmatpush3.bf16.msra.mxu0 %v6557_v1  ;;  %v6596_v1 = vld [vmem:[%s8201_s1 + $0xbe0] sm:$0xff]  }
 0x14d   :  { %6050 = vmatprep.subr.bf16.mxu0 %v6559_v3  ;;  %v6598_v3 = vld [vmem:[%s8201_s1 + $0xba0] sm:$0xff]  }
 0x14e   :  { %6071 = vmatpush3.bf16.msra.mxu1 %v6558_v2  ;;  %v6597_v2 = vld [vmem:[%s8201_s1 + $0xb20] sm:$0xff]  }
 0x14f   :  { %6072 = vmatprep.subr.bf16.mxu1 %v6560_v4  ;;  %v6599_v4 = vld [vmem:[%s8201_s1 + $0xb68] sm:$0xff]  }
 0x150   :  { %6051 = vmatpush3.bf16.msra.mxu0 %v6561_v5  ;;  %v6600_v5 = vld [vmem:[%s8201_s1 + $0xbe8] sm:$0xff]  }
 0x151   :  { %6052 = vmatprep.subr.bf16.mxu0 %v6563_v7  ;;  %v6602_v7 = vld [vmem:[%s8201_s1 + $0xba8] sm:$0xff]  }
 0x152   :  { %6073 = vmatpush3.bf16.msra.mxu1 %v6562_v6  ;;  %v6601_v6 = vld [vmem:[%s8201_s1 + $0xb28] sm:$0xff]  }
 0x153   :  { %6074 = vmatprep.subr.bf16.mxu1 %v6564_v8  ;;  %v6603_v8 = vld [vmem:[%s8201_s1 + $0xb70] sm:$0xff]  }
 0x154   :  { %6053 = vmatpush3.bf16.msra.mxu0 %v6565_v9 }
 0x155   :  { %6054 = vmatprep.subr.bf16.mxu0 %v6567_v11 }
 0x156   :  { %6075 = vmatpush3.bf16.msra.mxu1 %v6566_v10  ;;  %v5752_v16 = vpop.f32.mrb[12].mxu0  ;;  %v6604_v10 = vld [vmem:[%s8201_s1 + $0xbf0] sm:$0xff]  }
 0x157   :  { %v5753_v18 = vpop.f32.mrb[13].mxu0  ;;  %6076 = vmatprep.subr.bf16.mxu1 %v6568_v12  ;;  %v6605_v12 = vld [vmem:[%s8201_s1 + $0xb30] sm:$0xff]  }
 0x158   :  { %v5774_v20 = vpop.f32.mrb[12].mxu1  ;;  %v5754_v21 = vadd.f32 %v5753_v18, %v5752_v16  ;;  %v5755_v22 = vpop.f32.mrb[14].mxu0  ;;  %6055 = vmatpush3.bf16.msra.mxu0 %v6569_v13  ;;  %v6606_v16 = vld [vmem:[%s8201_s1 + $0xbb0] sm:$0xff]  }
 0x159   :  { %v5775_v26 = vpop.f32.mrb[13].mxu1  ;;  %v5756_v27 = vpop.f32.mrb[15].mxu0  ;;  %6056 = vmatprep.subr.bf16.mxu0 %v6571_v15 }
 0x15a   :  { %v4295_v30 = vadd.f32 %v5754_v21, %v7759_v51  ;;  %v5776_v31 = vadd.f32 %v5775_v26, %v5774_v20  ;;  %v5777_v32 = vpop.f32.mrb[14].mxu1  ;;  %6077 = vmatpush3.bf16.msra.mxu1 %v6570_v14  ;;  %v6583_v51 = vld [vmem:[%s8201_s1 + $0xb48] sm:$0xff]   ;;  %v6610_v27 = vld [vmem:[%s8201_s1 + $0xbb8] sm:$0xff]  }
 0x15b   :  { %v5778_v34 = vpop.f32.mrb[15].mxu1  ;;  %6078 = vmatprep.subr.bf16.mxu1 %v6572_v17  ;;  %v6607_v17 = vld [vmem:[%s8201_s1 + $0xb78] sm:$0xff]   ;;  %v6615_v32 = vld [vmem:[%s8201_s1 + $0xc80] sm:$0xff]  }
 0x15c   :  { %v7867_v38 = vadd.f32 %v5776_v31, %v4295_v30  ;;  %6057 = vmatpush3.bf16.msra.mxu0 %v6573_v19  ;;  %v6613_v30 = vld [vmem:[%s8201_s1 + $0xcc0] sm:$0xff]   ;;  %v6616_v34 = vld [vmem:[%s8201_s1 + $0xc48] sm:$0xff]  }
 0x15d   :  { %6058 = vmatprep.subr.bf16.mxu0 %v6575_v24  ;;  %v6614_v31 = vld [vmem:[%s8201_s1 + $0xc00] sm:$0xff]  }
 0x15e   :  { %6079 = vmatpush3.bf16.msra.mxu1 %v6574_v23  ;;  %v6608_v23 = vld [vmem:[%s8201_s1 + $0xbf8] sm:$0xff]  }
 0x15f   :  { %6080 = vmatprep.subr.bf16.mxu1 %v6576_v33  ;;  %v1224_v33 = vcombine.high %v1208_v28, %v1208_v28 }
 0x160   :  { %6059 = vmatpush3.bf16.msra.mxu0 %v6577_v35  ;;  %v6617_v35 = vld [vmem:[%s8201_s1 + $0xcc8] sm:$0xff]  }
 0x161   :  { %6088 = vmatprep.subr.bf16.mxu0 %v6579_v43  ;;  %v6624_v43 = vld [vmem:[%s8201_s1 + $0xc58] sm:$0xff]  }
 0x162   :  { %6081 = vmatpush3.bf16.msra.mxu1 %v6578_v39  ;;  %v6621_v39 = vld [vmem:[%s8201_s1 + $0xcd0] sm:$0xff]  }
 0x163   :  { %4853 = vmatmul.mubr.bf16.vlgmr.msra.gmra.mrb[40].mxu0 %v1201_v42  ;;  %6110 = vmatprep.subr.bf16.mxu1 %v6580_v45  ;;  %v6623_v42 = vld [vmem:[%s8201_s1 + $0xc90] sm:$0xff]   ;;  %v6626_v45 = vld [vmem:[%s8201_s1 + $0xc18] sm:$0xff]  }
 0x164   :  { %6089 = vmatpush3.bf16.msra.mxu0 %v6581_v47  ;;  %4932 = vmatprep.mubr.bf16.mxu0 %v1222_v48  ;;  %v6628_v47 = vld [vmem:[%s8201_s1 + $0xc60] sm:$0xff]  }
 0x165   :  { %4893 = vmatmul.mubr.bf16.vlgmr.msra.gmra.mrb[40].mxu1 %v1223_v50  ;;  %6090 = vmatprep.subr.bf16.mxu0 %v6583_v51  ;;  %v6629_v48 = vld [vmem:[%s8201_s1 + $0xce0] sm:$0xff]   ;;  %v6632_v51 = vld [vmem:[%s8201_s1 + $0xc68] sm:$0xff]  }
 0x166   :  { %6111 = vmatpush3.bf16.msra.mxu1 %v6582_v49  ;;  %4972 = vmatprep.mubr.bf16.mxu1 %v1226_v53  ;;  %v6630_v49 = vld [vmem:[%s8201_s1 + $0xc20] sm:$0xff]   ;;  %v6634_v53 = vld [vmem:[%s8201_s1 + $0xc28] sm:$0xff]  }
 0x167   :  { %6112 = vmatprep.subr.bf16.mxu1 %v6584_v52  ;;  %v6631_v50 = vld [vmem:[%s8201_s1 + $0xca0] sm:$0xff]   ;;  %v6633_v52 = vld [vmem:[%s8201_s1 + $0xce8] sm:$0xff]  }
 0x168   :  { %6091 = vmatpush3.bf16.msra.mxu0 %v6585_v54  ;;  %v6635_v54 = vld [vmem:[%s8201_s1 + $0xca8] sm:$0xff]  }
 0x169   :  { %6092 = vmatprep.subr.bf16.mxu0 %v6587_v56 }
 0x16a   :  { %6113 = vmatpush3.bf16.msra.mxu1 %v6586_v55  ;;  %v6636_v55 = vld [vmem:[%s8201_s1 + $0xc70] sm:$0xff]  }
 0x16b   :  { %6114 = vmatprep.subr.bf16.mxu1 %v6588_v57  ;;  %v6637_v57 = vld [vmem:[%s8201_s1 + $0xcf0] sm:$0xff]  }
 0x16c   :  { %6093 = vmatpush3.bf16.msra.mxu0 %v6589_v58 }
 0x16d   :  { %6094 = vmatprep.subr.bf16.mxu0 %v6591_v60 }
 0x16e   :  { %6115 = vmatpush3.bf16.msra.mxu1 %v6590_v59  ;;  %v6638_v59 = vld [vmem:[%s8201_s1 + $0xc30] sm:$0xff]  }
 0x16f   :  { %6116 = vmatprep.subr.bf16.mxu1 %v6592_v61 }
 0x170   :  { %6095 = vmatpush3.bf16.msra.mxu0 %v6593_v62 }
 0x171   :  { %6096 = vmatprep.subr.bf16.mxu0 %v6595_v0 }
 0x172   :  { %6117 = vmatpush3.bf16.msra.mxu1 %v6594_v63 }
 0x173   :  { %6118 = vmatprep.subr.bf16.mxu1 %v6596_v1  ;;  %v6640_v1 = vld [vmem:[%s8201_s1 + $0xc78] sm:$0xff]  }
 0x174   :  { %6097 = vmatpush3.bf16.msra.mxu0 %v6597_v2  ;;  %v22_v2 = vld [vmem:[%s8200_s0 + $0x30] sm:$0xff] }
 0x175   :  { %6098 = vmatprep.subr.bf16.mxu0 %v6599_v4 }
 0x176   :  { %6119 = vmatpush3.bf16.msra.mxu1 %v6598_v3  ;;  %v5796_v9 = vpop.f32.mrb[16].mxu0 }
 0x177   :  { %v5797_v11 = vpop.f32.mrb[17].mxu0  ;;  %6120 = vmatprep.subr.bf16.mxu1 %v6600_v5 }
 0x178   :  { %v5818_v13 = vpop.f32.mrb[16].mxu1  ;;  %v5798_v14 = vadd.f32 %v5797_v11, %v5796_v9  ;;  %v5799_v15 = vpop.f32.mrb[18].mxu0  ;;  %6099 = vmatpush3.bf16.msra.mxu0 %v6601_v6  ;;  %v6639_v6 = vld [vmem:[%s8201_s1 + $0xcb0] sm:$0xff]  }
 0x179   :  { %v5819_v18 = vpop.f32.mrb[17].mxu1  ;;  %v5800_v19 = vpop.f32.mrb[19].mxu0  ;;  %6100 = vmatprep.subr.bf16.mxu0 %v6603_v8  ;;  %v1227_v8 = vcombine.high %v22_v2, %v22_v2 }
 0x17a   :  { %v4375_v20 = vadd.f32 %v5798_v14, %v7867_v38  ;;  %v5820_v21 = vadd.f32 %v5819_v18, %v5818_v13  ;;  %v5821_v22 = vpop.f32.mrb[18].mxu1  ;;  %6121 = vmatpush3.bf16.msra.mxu1 %v6602_v7  ;;  %v6620_v38 = vld [vmem:[%s8201_s1 + $0xc50] sm:$0xff]   ;;  %v1234_v7 = vrot.slane %v22_v2, %v6828_v41 }
 0x17b   :  { %v5822_v24 = vpop.f32.mrb[19].mxu1  ;;  %6122 = vmatprep.subr.bf16.mxu1 %v6604_v10  ;;  %v6641_v10 = vld [vmem:[%s8201_s1 + $0xcf8] sm:$0xff]   ;;  %v8079_v14 = vrot.slane %v1227_v8, %v6828_v41  ;;  %v6646_v22 = vld [vmem:[%s8201_s1 + $0xd00] sm:$0xff]  }
 0x17c   :  { %v7971_v26 = vadd.f32 %v5820_v21, %v4375_v20  ;;  %6101 = vmatpush3.bf16.msra.mxu0 %v6605_v12  ;;  %v6642_v12 = vld [vmem:[%s8201_s1 + $0xc38] sm:$0xff]   ;;  %v1242_v13 = vcombine.high %v1234_v7, %v1234_v7  ;;  %v1250_v15 = vrot.slane %v1234_v7, %v6828_v41  ;;  %v6645_v20 = vld [vmem:[%s8201_s1 + $0xdc0] sm:$0xff]  }
 0x17d   :  { %6102 = vmatprep.subr.bf16.mxu0 %v6607_v17  ;;  %v6643_v17 = vld [vmem:[%s8201_s1 + $0xcb8] sm:$0xff]   ;;  %v1243_v19 = vcombine.high %v8079_v14, %v8079_v14 }
 0x17e   :  { %6123 = vmatpush3.bf16.msra.mxu1 %v6606_v16  ;;  %v6644_v16 = vld [vmem:[%s8201_s1 + $0xd40] sm:$0xff]   ;;  %v1264_v18 = vrot.slane %v1242_v13, %v6828_v41  ;;  %v1272_v24 = vcombine.high %v1250_v15, %v1250_v15 }
 0x17f   :  { %6124 = vmatprep.subr.bf16.mxu1 %v6608_v23  ;;  %v1271_v23 = vrot.slane %v1243_v19, %v6828_v41 }
 0x180   :  { %6103 = vmatpush3.bf16.msra.mxu0 %v6609_v25  ;;  %v1274_v21 = vcombine.high %v1264_v18, %v1264_v18  ;;  %v6648_v25 = vld [vmem:[%s8201_s1 + $0xd48] sm:$0xff]  }
 0x181   :  { %6132 = vmatprep.subr.bf16.mxu0 %v6612_v29  ;;  %v6650_v29 = vld [vmem:[%s8201_s1 + $0xd08] sm:$0xff]  }
 0x182   :  { %6125 = vmatpush3.bf16.msra.mxu1 %v6610_v27  ;;  %v1275_v27 = vcombine.high %v1271_v23, %v1271_v23 }
 0x183   :  { %4933 = vmatmul.mubr.bf16.vlgmr.msra.gmra.mrb[44].mxu0 %v1208_v28  ;;  %6154 = vmatprep.subr.bf16.mxu1 %v6613_v30  ;;  %v6649_v28 = vld [vmem:[%s8201_s1 + $0xdc8] sm:$0xff]   ;;  %v6652_v30 = vld [vmem:[%s8201_s1 + $0xd50] sm:$0xff]  }
 0x184   :  { %6133 = vmatpush3.bf16.msra.mxu0 %v6614_v31  ;;  %5012 = vmatprep.mubr.bf16.mxu0 %v1264_v18  ;;  %v6651_v31 = vld [vmem:[%s8201_s1 + $0xd88] sm:$0xff]  }
 0x185   :  { %4973 = vmatmul.mubr.bf16.vlgmr.msra.gmra.mrb[44].mxu1 %v1224_v33  ;;  %6134 = vmatprep.subr.bf16.mxu0 %v6616_v34  ;;  %v6654_v33 = vld [vmem:[%s8201_s1 + $0xd10] sm:$0xff]   ;;  %v6656_v34 = vld [vmem:[%s8201_s1 + $0xd58] sm:$0xff]  }
 0x186   :  { %6155 = vmatpush3.bf16.msra.mxu1 %v6615_v32  ;;  %5052 = vmatprep.mubr.bf16.mxu1 %v1274_v21  ;;  %v6653_v32 = vld [vmem:[%s8201_s1 + $0xdd0] sm:$0xff]  }
 0x187   :  { %6156 = vmatprep.subr.bf16.mxu1 %v6617_v35  ;;  %v6655_v35 = vld [vmem:[%s8201_s1 + $0xd90] sm:$0xff]  }
 0x188   :  { %6135 = vmatpush3.bf16.msra.mxu0 %v6618_v36  ;;  %v6657_v36 = vld [vmem:[%s8201_s1 + $0xdd8] sm:$0xff]  }
 0x189   :  { %6136 = vmatprep.subr.bf16.mxu0 %v6620_v38  ;;  %v6660_v38 = vld [vmem:[%s8201_s1 + $0xd60] sm:$0xff]  }
 0x18a   :  { %6157 = vmatpush3.bf16.msra.mxu1 %v6619_v37  ;;  %v6658_v37 = vld [vmem:[%s8201_s1 + $0xd18] sm:$0xff]  }
 0x18b   :  { %6158 = vmatprep.subr.bf16.mxu1 %v6621_v39  ;;  %v6659_v39 = vld [vmem:[%s8201_s1 + $0xd98] sm:$0xff]  }
 0x18c   :  { %6137 = vmatpush3.bf16.msra.mxu0 %v6622_v40  ;;  %v6661_v40 = vld [vmem:[%s8201_s1 + $0xde0] sm:$0xff]  }
 0x18d   :  { %6138 = vmatprep.subr.bf16.mxu0 %v6624_v43  ;;  %v6664_v43 = vld [vmem:[%s8201_s1 + $0xd68] sm:$0xff]  }
 0x18e   :  { %6159 = vmatpush3.bf16.msra.mxu1 %v6623_v42  ;;  %v6662_v42 = vld [vmem:[%s8201_s1 + $0xd20] sm:$0xff]  }
 0x18f   :  { %6160 = vmatprep.subr.bf16.mxu1 %v6625_v44  ;;  %v6663_v44 = vld [vmem:[%s8201_s1 + $0xda0] sm:$0xff]  }
 0x190   :  { %6139 = vmatpush3.bf16.msra.mxu0 %v6626_v45  ;;  %v6665_v45 = vld [vmem:[%s8201_s1 + $0xde8] sm:$0xff]  }
 0x191   :  { %6140 = vmatprep.subr.bf16.mxu0 %v6628_v47  ;;  %v6668_v47 = vld [vmem:[%s8201_s1 + $0xd70] sm:$0xff]  }
 0x192   :  { %6161 = vmatpush3.bf16.msra.mxu1 %v6627_v46  ;;  %v6666_v46 = vld [vmem:[%s8201_s1 + $0xd28] sm:$0xff]  }
 0x193   :  { %6162 = vmatprep.subr.bf16.mxu1 %v6629_v48 }
 0x194   :  { %6141 = vmatpush3.bf16.msra.mxu0 %v6630_v49  ;;  %v6667_v49 = vld [vmem:[%s8201_s1 + $0xda8] sm:$0xff]  }
 0x195   :  { %6142 = vmatprep.subr.bf16.mxu0 %v6632_v51  ;;  %v6669_v51 = vld [vmem:[%s8201_s1 + $0xdf0] sm:$0xff]  }
 0x196   :  { %6163 = vmatpush3.bf16.msra.mxu1 %v6631_v50  ;;  %v5840_v56 = vpop.f32.mrb[20].mxu0 }
 0x197   :  { %v5841_v58 = vpop.f32.mrb[21].mxu0  ;;  %6164 = vmatprep.subr.bf16.mxu1 %v6633_v52 }
 0x198   :  { %v5862_v60 = vpop.f32.mrb[20].mxu1  ;;  %v5842_v61 = vadd.f32 %v5841_v58, %v5840_v56  ;;  %v5843_v62 = vpop.f32.mrb[22].mxu0  ;;  %6143 = vmatpush3.bf16.msra.mxu0 %v6634_v53  ;;  %v6672_v56 = vld [vmem:[%s8201_s1 + $0xd78] sm:$0xff]  }
 0x199   :  { %v5863_v63 = vpop.f32.mrb[21].mxu1  ;;  %v5844_v0 = vpop.f32.mrb[23].mxu0  ;;  %6144 = vmatprep.subr.bf16.mxu0 %v6636_v55  ;;  %v6670_v55 = vld [vmem:[%s8201_s1 + $0xd30] sm:$0xff]  }
 0x19a   :  { %v4455_v3 = vadd.f32 %v5842_v61, %v7971_v26  ;;  %v5864_v4 = vadd.f32 %v5863_v63, %v5862_v60  ;;  %v5865_v5 = vpop.f32.mrb[22].mxu1  ;;  %6165 = vmatpush3.bf16.msra.mxu1 %v6635_v54  ;;  %v6647_v26 = vld [vmem:[%s8201_s1 + $0xd80] sm:$0xff]   ;;  %v6671_v62 = vld [vmem:[%s8201_s1 + $0xdb0] sm:$0xff]  }
 0x19b   :  { %v5866_v9 = vpop.f32.mrb[23].mxu1  ;;  %6166 = vmatprep.subr.bf16.mxu1 %v6637_v57 }
 0x19c   :  { %v8073_v11 = vadd.f32 %v5864_v4, %v4455_v3  ;;  %6145 = vmatpush3.bf16.msra.mxu0 %v6638_v59 }
 0x19d   :  { %6146 = vmatprep.subr.bf16.mxu0 %v6640_v1 }
 0x19e   :  { %6167 = vmatpush3.bf16.msra.mxu1 %v6639_v6 }
 0x19f   :  { %6168 = vmatprep.subr.bf16.mxu1 %v6641_v10 }
 0x1a0   :  { %6147 = vmatpush3.bf16.msra.mxu0 %v6642_v12 }
 0x1a1   :  { %6176 = vmatprep.subr.bf16.mxu0 %v6644_v16 }
 0x1a2   :  { %6169 = vmatpush3.bf16.msra.mxu1 %v6643_v17 }
 0x1a3   :  { %5013 = vmatmul.mubr.bf16.vlgmr.msra.gmra.mrb[48].mxu0 %v1250_v15  ;;  %6198 = vmatprep.subr.bf16.mxu1 %v6645_v20 }
 0x1a4   :  { %6177 = vmatpush3.bf16.msra.mxu0 %v6646_v22  ;;  %5092 = vmatprep.mubr.bf16.mxu0 %v1271_v23 }
 0x1a5   :  { %5053 = vmatmul.mubr.bf16.vlgmr.msra.gmra.mrb[48].mxu1 %v1272_v24  ;;  %6178 = vmatprep.subr.bf16.mxu0 %v6648_v25 }
 0x1a6   :  { %6199 = vmatpush3.bf16.msra.mxu1 %v6647_v26  ;;  %5132 = vmatprep.mubr.bf16.mxu1 %v1275_v27 }
 0x1a7   :  { %6200 = vmatprep.subr.bf16.mxu1 %v6649_v28 }
 0x1a8   :  { %6179 = vmatpush3.bf16.msra.mxu0 %v6650_v29 }
 0x1a9   :  { %6180 = vmatprep.subr.bf16.mxu0 %v6652_v30 }
 0x1aa   :  { %6201 = vmatpush3.bf16.msra.mxu1 %v6651_v31 }
 0x1ab   :  { %6202 = vmatprep.subr.bf16.mxu1 %v6653_v32 }
 0x1ac   :  { %6181 = vmatpush3.bf16.msra.mxu0 %v6654_v33 }
 0x1ad   :  { %6182 = vmatprep.subr.bf16.mxu0 %v6656_v34 }
 0x1ae   :  { %6203 = vmatpush3.bf16.msra.mxu1 %v6655_v35 }
 0x1af   :  { %6204 = vmatprep.subr.bf16.mxu1 %v6657_v36 }
 0x1b0   :  { %6183 = vmatpush3.bf16.msra.mxu0 %v6658_v37 }
 0x1b1   :  { %6184 = vmatprep.subr.bf16.mxu0 %v6660_v38 }
 0x1b2   :  { %6205 = vmatpush3.bf16.msra.mxu1 %v6659_v39 }
 0x1b3   :  { %6206 = vmatprep.subr.bf16.mxu1 %v6661_v40 }
 0x1b4   :  { %6185 = vmatpush3.bf16.msra.mxu0 %v6662_v42 }
 0x1b5   :  { %6186 = vmatprep.subr.bf16.mxu0 %v6664_v43 }
 0x1b6   :  { %6207 = vmatpush3.bf16.msra.mxu1 %v6663_v44  ;;  %v5884_v48 = vpop.f32.mrb[24].mxu0 }
 0x1b7   :  { %v5885_v50 = vpop.f32.mrb[25].mxu0  ;;  %6208 = vmatprep.subr.bf16.mxu1 %v6665_v45 }
 0x1b8   :  { %v5906_v52 = vpop.f32.mrb[24].mxu1  ;;  %v5886_v53 = vadd.f32 %v5885_v50, %v5884_v48  ;;  %v5887_v54 = vpop.f32.mrb[26].mxu0  ;;  %6187 = vmatpush3.bf16.msra.mxu0 %v6666_v46 }
 0x1b9   :  { %v5907_v57 = vpop.f32.mrb[25].mxu1  ;;  %v5888_v58 = vpop.f32.mrb[27].mxu0  ;;  %6188 = vmatprep.subr.bf16.mxu0 %v6668_v47 }
 0x1ba   :  { %v4535_v59 = vadd.f32 %v5886_v53, %v8073_v11  ;;  %v5908_v60 = vadd.f32 %v5907_v57, %v5906_v52  ;;  %v5909_v61 = vpop.f32.mrb[26].mxu1  ;;  %6209 = vmatpush3.bf16.msra.mxu1 %v6667_v49 }
 0x1bb   :  { %8 = vsyncpa [#allocation3], 0  ;;  %v5910_v63 = vpop.f32.mrb[27].mxu1  ;;  %6210 = vmatprep.subr.bf16.mxu1 %v6669_v51  ;;  %v6673_v0 = vld [vmem:[%s8201_s1 + $0xdf8] sm:$0xff]   ;;  %v1257_v3 = vrot.slane %v8079_v14, %v6828_v41 }
 0x1bc   :  { %v4575_v1 = vadd.f32 %v5908_v60, %v4535_v59  ;;  %6189 = vmatpush3.bf16.msra.mxu0 %v6670_v55  ;;  %v6674_v2 = vld [vmem:[%s8201_s1 + $0xd38] sm:$0xff]  }
 0x1bd   :  { %6190 = vmatprep.subr.bf16.mxu0 %v6672_v56  ;;  %v6675_v4 = vld [vmem:[%s8201_s1 + $0xdb8] sm:$0xff]   ;;  %v1273_v5 = vcombine.high %v1257_v3, %v1257_v3  ;;  %s6702_s1 = smov [#allocation2]  }
 0x1be   :  { %6211 = vmatpush3.bf16.msra.mxu1 %v6671_v62  ;;  %s5147_s15 = sshll.u32 %s6702_s1, 4  ;;  %s5148_s15 = int_to_ptr.vmem [resolvable:$true] %s5147_s15 }
 0x1bf   :  { %6212 = vmatprep.subr.bf16.mxu1 %v6673_v0  ;;  %s6677_s16 = scalar_lea.vmem %s5148_s15, 32  ;;  %p6682_p1 = scmp.lt.s32.totalorder %s5148_s15, %s5148_s15 }
 0x1c0   :  { %6191 = vmatpush3.bf16.msra.mxu0 %v6674_v2  ;;  %p6678_p0 = scmp.ne.s32.totalorder %s5148_s15, %s6677_s16  ;;  %p6683_p2 = scmp.lt.s32.totalorder %s6677_s16, %s6677_s16 }
 0x1c2   :  { %6213 = vmatpush3.bf16.msra.mxu1 %v6675_v4  ;;  %p6684_p3 = por %p6683_p2, %p6682_p1 }
 0x1c3   :  { %5093 = vmatmul.mubr.bf16.vlgmr.msra.gmra.mrb[52].mxu0 %v1257_v3 }
 0x1c4   :  { %p6685_p4 = pnand %p6684_p3, %p6678_p0 }
 0x1c5   :  { %5133 = vmatmul.mubr.bf16.vlgmr.msra.gmra.mrb[52].mxu1 %v1273_v5 }
 0x1d6   :  { %v5928_v6 = vpop.f32.mrb[28].mxu0 }
 0x1d7   :  { %v5929_v7 = vpop.f32.mrb[29].mxu0 }
 0x1d8   :  { %v5950_v8 = vpop.f32.mrb[28].mxu1  ;;  %v5930_v9 = vadd.f32 %v5929_v7, %v5928_v6  ;;  %v5931_v10 = vpop.f32.mrb[30].mxu0 }
 0x1d9   :  { %v5951_v11 = vpop.f32.mrb[29].mxu1  ;;  %v5932_v12 = vpop.f32.mrb[31].mxu0 }
 0x1da   :  { %v4615_v13 = vadd.f32 %v5930_v9, %v4575_v1  ;;  %v5952_v41 = vadd.f32 %v5951_v11, %v5950_v8  ;;  %v5953_v14 = vpop.f32.mrb[30].mxu1 }
 0x1db   :  { %v5954_v15 = vpop.f32.mrb[31].mxu1 }
 0x1dc   :  { %v4655_v16 = vadd.f32 %v5952_v41, %v4615_v13 }
 0x1f6   :  { %v5972_v17 = vpop.f32.mrb[32].mxu0 }
 0x1f7   :  { %v5973_v18 = vpop.f32.mrb[33].mxu0 }
 0x1f8   :  { %v5994_v19 = vpop.f32.mrb[32].mxu1  ;;  %v5974_v20 = vadd.f32 %v5973_v18, %v5972_v17  ;;  %v5975_v21 = vpop.f32.mrb[34].mxu0 }
 0x1f9   :  { %v5995_v22 = vpop.f32.mrb[33].mxu1  ;;  %v5976_v23 = vpop.f32.mrb[35].mxu0 }
 0x1fa   :  { %v4695_v24 = vadd.f32 %v5974_v20, %v4655_v16  ;;  %v5996_v25 = vadd.f32 %v5995_v22, %v5994_v19  ;;  %v5997_v26 = vpop.f32.mrb[34].mxu1 }
 0x1fb   :  { %v5998_v27 = vpop.f32.mrb[35].mxu1 }
 0x1fc   :  { %v4735_v28 = vadd.f32 %v5996_v25, %v4695_v24 }
 0x216   :  { %v6016_v29 = vpop.f32.mrb[36].mxu0 }
 0x217   :  { %v6017_v30 = vpop.f32.mrb[37].mxu0 }
 0x218   :  { %v6038_v31 = vpop.f32.mrb[36].mxu1  ;;  %v6018_v32 = vadd.f32 %v6017_v30, %v6016_v29  ;;  %v6019_v33 = vpop.f32.mrb[38].mxu0 }
 0x219   :  { %v6039_v34 = vpop.f32.mrb[37].mxu1  ;;  %v6020_v35 = vpop.f32.mrb[39].mxu0 }
 0x21a   :  { %v4775_v36 = vadd.f32 %v6018_v32, %v4735_v28  ;;  %v6040_v37 = vadd.f32 %v6039_v34, %v6038_v31  ;;  %v6041_v38 = vpop.f32.mrb[38].mxu1 }
 0x21b   :  { %v6042_v39 = vpop.f32.mrb[39].mxu1 }
 0x21c   :  { %v4815_v40 = vadd.f32 %v6040_v37, %v4775_v36 }
 0x236   :  { %v6060_v42 = vpop.f32.mrb[40].mxu0 }
 0x237   :  { %v6061_v43 = vpop.f32.mrb[41].mxu0 }
 0x238   :  { %v6082_v44 = vpop.f32.mrb[40].mxu1  ;;  %v6062_v45 = vadd.f32 %v6061_v43, %v6060_v42  ;;  %v6063_v46 = vpop.f32.mrb[42].mxu0 }
 0x239   :  { %v6083_v47 = vpop.f32.mrb[41].mxu1  ;;  %v6064_v48 = vpop.f32.mrb[43].mxu0 }
 0x23a   :  { %v4855_v49 = vadd.f32 %v6062_v45, %v4815_v40  ;;  %v6084_v50 = vadd.f32 %v6083_v47, %v6082_v44  ;;  %v6085_v51 = vpop.f32.mrb[42].mxu1 }
 0x23b   :  { %v6086_v52 = vpop.f32.mrb[43].mxu1 }
 0x23c   :  { %v4895_v53 = vadd.f32 %v6084_v50, %v4855_v49 }
 0x256   :  { %v6104_v54 = vpop.f32.mrb[44].mxu0 }
 0x257   :  { %v6105_v55 = vpop.f32.mrb[45].mxu0 }
 0x258   :  { %v6126_v56 = vpop.f32.mrb[44].mxu1  ;;  %v6106_v57 = vadd.f32 %v6105_v55, %v6104_v54  ;;  %v6107_v58 = vpop.f32.mrb[46].mxu0 }
 0x259   :  { %v6127_v59 = vpop.f32.mrb[45].mxu1  ;;  %v6108_v60 = vpop.f32.mrb[47].mxu0 }
 0x25a   :  { %v4935_v61 = vadd.f32 %v6106_v57, %v4895_v53  ;;  %v6128_v62 = vadd.f32 %v6127_v59, %v6126_v56  ;;  %v6129_v63 = vpop.f32.mrb[46].mxu1 }
 0x25b   :  { %v6130_v0 = vpop.f32.mrb[47].mxu1 }
 0x25c   :  { %v4975_v1 = vadd.f32 %v6128_v62, %v4935_v61 }
 0x276   :  { %v6148_v2 = vpop.f32.mrb[48].mxu0 }
 0x277   :  { %v6149_v3 = vpop.f32.mrb[49].mxu0 }
 0x278   :  { %v6170_v4 = vpop.f32.mrb[48].mxu1  ;;  %v6150_v5 = vadd.f32 %v6149_v3, %v6148_v2  ;;  %v6151_v6 = vpop.f32.mrb[50].mxu0 }
 0x279   :  { %v6171_v7 = vpop.f32.mrb[49].mxu1  ;;  %v6152_v8 = vpop.f32.mrb[51].mxu0 }
 0x27a   :  { %v5015_v9 = vadd.f32 %v6150_v5, %v4975_v1  ;;  %v6172_v10 = vadd.f32 %v6171_v7, %v6170_v4  ;;  %v6173_v11 = vpop.f32.mrb[50].mxu1 }
 0x27b   :  { %v6174_v12 = vpop.f32.mrb[51].mxu1 }
 0x27c   :  { %v5055_v13 = vadd.f32 %v6172_v10, %v5015_v9 }
 0x296   :  { %v6192_v41 = vpop.f32.mrb[52].mxu0 }
 0x297   :  { %v6193_v14 = vpop.f32.mrb[53].mxu0 }
 0x298   :  { %v6214_v15 = vpop.f32.mrb[52].mxu1  ;;  %v6194_v16 = vadd.f32 %v6193_v14, %v6192_v41  ;;  %v6195_v17 = vpop.f32.mrb[54].mxu0 }
 0x299   :  { %v6215_v18 = vpop.f32.mrb[53].mxu1  ;;  %v6196_v19 = vpop.f32.mrb[55].mxu0 }
 0x29a   :  { %v5095_v20 = vadd.f32 %v6194_v16, %v5055_v13  ;;  %v6216_v21 = vadd.f32 %v6215_v18, %v6214_v15  ;;  %v6217_v22 = vpop.f32.mrb[54].mxu1 }
 0x29b   :  { %v6218_v23 = vpop.f32.mrb[55].mxu1 }
 0x29c   :  { %v5135_v24 = vadd.f32 %v6216_v21, %v5095_v20 }
 0x29e   :  { %5140 = vst [vmem:[#allocation2] sm:$0x3] %v5135_v24 }
 0x29f   :  { %6688 = shalt.err (!%p6685_p4)
}
 0x2a0   :  { %s6689_s19 = scalar_lea.hbm %s8203_s3, 32 }
 0x2a1   :  { %p6690_p5 = scmp.ne.s32.totalorder %s8203_s3, %s6689_s19  ;;  %p6693_p6 = scmp.lt.u32.totalorder %s6689_s19, %s8203_s3 }
 0x2a3   :  { %p6695_p7 = pnand %p6693_p6, %p6690_p5 }
 0x2a5   :  { %6698 = shalt.err (!%p6695_p7)
}
 0x2a6   :  { %5150 = dma.vmem_to_hbm [thread:$0]  %s5148_s15, 32, %s8203_s3, [#allocation3]  }
 0x2a7   :  { %6699 = dma.done.wait [#allocation3], 32  }
 0x2a8   :  { %6700 = vsyncadd [#allocation3], 4294967264 }
 0x2a9   :  { %5154 = vsyncpa [#allocation3], 1 }

// kernel: simple_cnn_forward.2
= control target key start
LH: loop header
LB: loop body
LE: loop exit
PB: predicated region body
PF: predicated region fallthrough
CT: control target
= control target key end

     0   :  { %10 = vsyncpa [#allocation7], 0  ;;  %s11694_s0 = inlined_call_operand.vmem [shape: f32[2,968,1], index: 0, kind: input, shape index: {}]   ;;  %s11695_s1 = inlined_call_operand.hbm [shape: f32[9,128], index: 1, kind: input, shape index: {}]   ;;  %s11696_s2 = inlined_call_operand.hbm [shape: f32[1,128], index: 2, kind: input, shape index: {}]   ;;  %s11697_s3 = inlined_call_operand.hbm [shape: bf16[3,384,128], index: 3, kind: input, shape index: {}]   ;;  %s11698_s4 = inlined_call_operand.hbm [shape: f32[1,128], index: 4, kind: input, shape index: {}]   ;;  %s11699_s5 = inlined_call_operand.vmem [shape: bf16[2,56,128], index: 5, kind: output, shape index: {}]  }
   0x1   :  { %11 = vsyncpa [#allocation9], 0 }
   0x2   :  { %12 = vsyncpa [#allocation12], 0  ;;  %s8136_s18 = smov [#allocation8]   ;;  %s8137_s20 = smov [#allocation6]  }
   0x3   :  { %s33_s19 = sshll.u32 %s8136_s18, 4  ;;  %s20_s21 = sshll.u32 %s8137_s20, 4  ;;  %s34_s19 = int_to_ptr.vmem [resolvable:$true] %s33_s19  ;;  %s8175_s21 = int_to_ptr.vmem [resolvable:$true] %s20_s21 }
   0x4   :  { %s8034_s24 = scalar_lea.hbm %s11696_s2, 16 }
   0x5   :  { %p8035_p0 = scmp.ne.s32.totalorder %s11696_s2, %s8034_s24  ;;  %p8038_p1 = scmp.lt.u32.totalorder %s8034_s24, %s11696_s2 }
   0x7   :  { %p8040_p2 = pnand %p8038_p1, %p8035_p0 }
   0x9   :  { %8043 = shalt.err (!%p8040_p2)
}
   0xa   :  { %s8044_s29 = scalar_lea.vmem %s34_s19, 16  ;;  %s8048_s30 = scalar_lea.vmem %s34_s19, 32 }
   0xb   :  { %p8045_p3 = scmp.ne.s32.totalorder %s34_s19, %s8044_s29  ;;  %p8049_p4 = scmp.lt.s32.totalorder %s34_s19, %s34_s19 }
   0xc   :  { %p8050_p5 = scmp.lt.s32.totalorder %s8048_s30, %s8044_s29 }
   0xe   :  { %p8051_p6 = por %p8050_p5, %p8049_p4 }
  0x10   :  { %p8052_p7 = pnand %p8051_p6, %p8045_p3 }
  0x12   :  { %8055 = shalt.err (!%p8052_p7)
}
  0x13   :  { %36 = dma.hbm_to_vmem [thread:$0]  %s11696_s2, 16, %s34_s19, [#allocation9]  }
  0x14   :  { %s8056_s10 = scalar_lea.hbm %s11695_s1, 256 }
  0x15   :  { %p8057_p8 = scmp.ne.s32.totalorder %s11695_s1, %s8056_s10  ;;  %p8060_p9 = scmp.lt.u32.totalorder %s8056_s10, %s11695_s1 }
  0x17   :  { %p8062_p10 = pnand %p8060_p9, %p8057_p8 }
  0x19   :  { %8065 = shalt.err (!%p8062_p10)
}
  0x1a   :  { %s8066_s15 = scalar_lea.vmem %s8175_s21, 256  ;;  %p8071_p12 = scmp.lt.s32.totalorder %s8175_s21, %s8175_s21 }
  0x1b   :  { %p8067_p11 = scmp.ne.s32.totalorder %s8175_s21, %s8066_s15  ;;  %p8072_p13 = scmp.lt.s32.totalorder %s8066_s15, %s8066_s15 }
  0x1d   :  { %p8073_p0 = por %p8072_p13, %p8071_p12 }
  0x1f   :  { %p8074_p1 = pnand %p8073_p0, %p8067_p11 }
  0x21   :  { %8077 = shalt.err (!%p8074_p1)
}
  0x22   :  { %s8138_s2 = smov 128   ;;  %s8139_s16 = smov 8  }
  0x23   :  { %26 = dma.hbm_to_vmem [thread:$0]  %s11695_s1, 256, %s8175_s21, [#allocation7], %s8138_s2, %s8138_s2, %s8139_s16  }
  0x24   :  { %s8140_s19 = smov [#allocation10]   ;;  %s8078_s24 = scalar_lea.hbm %s11697_s3, 9216 }
  0x25   :  { %s42_s20 = sshll.u32 %s8140_s19, 4  ;;  %p8079_p2 = scmp.ne.s32.totalorder %s11697_s3, %s8078_s24  ;;  %s43_s20 = int_to_ptr.vmem [resolvable:$true] %s42_s20 }
  0x26   :  { %p8082_p3 = scmp.lt.u32.totalorder %s8078_s24, %s11697_s3 }
  0x28   :  { %p8084_p4 = pnand %p8082_p3, %p8079_p2 }
  0x2a   :  { %8087 = shalt.err (!%p8084_p4)
}
  0x2b   :  { %s8088_s29 = scalar_lea.vmem %s43_s20, 9216  ;;  %p8093_p6 = scmp.lt.s32.totalorder %s43_s20, %s43_s20 }
  0x2c   :  { %p8089_p5 = scmp.ne.s32.totalorder %s43_s20, %s8088_s29  ;;  %p8094_p7 = scmp.lt.s32.totalorder %s8088_s29, %s8088_s29 }
  0x2e   :  { %p8095_p8 = por %p8094_p7, %p8093_p6 }
  0x30   :  { %p8096_p9 = pnand %p8095_p8, %p8089_p5 }
  0x32   :  { %8099 = shalt.err (!%p8096_p9)
}
  0x33   :  { %s8141_s1 = smov 64   ;;  %s8142_s21 = smov 4  }
  0x34   :  { %48 = dma.hbm_to_vmem [thread:$0]  %s11697_s3, 9216, %s43_s20, [#allocation9], %s8141_s1, %s8141_s1, %s8142_s21  }
  0x35   :  { %s8143_s7 = smov [#allocation11]   ;;  %s8100_s11 = scalar_lea.hbm %s11698_s4, 16 }
  0x36   :  { %s55_s8 = sshll.u32 %s8143_s7, 4  ;;  %p8101_p10 = scmp.ne.s32.totalorder %s11698_s4, %s8100_s11  ;;  %s56_s8 = int_to_ptr.vmem [resolvable:$true] %s55_s8 }
  0x37   :  { %p8104_p11 = scmp.lt.u32.totalorder %s8100_s11, %s11698_s4 }
  0x39   :  { %p8106_p12 = pnand %p8104_p11, %p8101_p10 }
  0x3b   :  { %8109 = shalt.err (!%p8106_p12)
}
  0x3c   :  { %s8110_s2 = scalar_lea.vmem %s56_s8, 16  ;;  %s8114_s3 = scalar_lea.vmem %s56_s8, 32 }
  0x3d   :  { %p8111_p13 = scmp.ne.s32.totalorder %s56_s8, %s8110_s2  ;;  %p8115_p0 = scmp.lt.s32.totalorder %s56_s8, %s56_s8 }
  0x3e   :  { %p8116_p1 = scmp.lt.s32.totalorder %s8114_s3, %s8110_s2 }
  0x40   :  { %p8117_p2 = por %p8116_p1, %p8115_p0 }
  0x42   :  { %p8118_p3 = pnand %p8117_p2, %p8111_p13 }
  0x44   :  { %8121 = shalt.err (!%p8118_p3)
}
  0x45   :  { %58 = dma.hbm_to_vmem [thread:$0]  %s11698_s4, 16, %s56_s8, [#allocation12]  }
  0x46   :  { %8126 = dma.done.wait [#allocation7], 256  }
  0x47   :  { %8127 = vsyncadd [#allocation7], 4294967040 }
  0x48   :  { %8128 = dma.done.wait [#allocation9], 9232  }
  0x49   :  { %8129 = vsyncadd [#allocation9], 4294958064 }
  0x4a   :  { %8130 = dma.done.wait [#allocation12], 16  }
  0x4b   :  { %8131 = vsyncadd [#allocation12], 4294967280  ;;  %v83_v0 = vlaneseq  ;;  %v8230_v13 = vld [vmem:[#allocation6] ss:$0 sm:$0xff]  ;;  %v8232_v14 = vld [vmem:[#allocation6 + $0x1] ss:$0 sm:$0xff] }
  0x4c   :  { %11735 = vst [vmem:[#allocation16_spill] sm:$0xff] %v8230_v13  ;;  %11736 = vst [vmem:[#allocation17_spill] sm:$0xff] %v8232_v14  ;;  %v8234_v15 = vld [vmem:[#allocation6 + $0x2] ss:$0 sm:$0xff]  ;;  %v8236_v16 = vld [vmem:[#allocation6 + $0x3] ss:$0 sm:$0xff] }
  0x4d   :  { %v84_v1 = vshrl.u32 %v83_v0, 7  ;;  %11737 = vst [vmem:[#allocation18_spill] sm:$0xff] %v8234_v15  ;;  %11738 = vst [vmem:[#allocation19_spill] sm:$0xff] %v8236_v16  ;;  %v8238_v17 = vld [vmem:[#allocation6 + $0x4] ss:$0 sm:$0xff]  ;;  %v11746_v26 = vmov 0 }
  0x4e   :  { %11739 = vst [vmem:[#allocation20_spill] sm:$0xff] %v8238_v17  ;;  %v8240_v18 = vld [vmem:[#allocation6 + $0x5] ss:$0 sm:$0xff]  ;;  %v8242_v19 = vld [vmem:[#allocation6 + $0x6] ss:$0 sm:$0xff]  ;;  %v11749_v27 = vmov 0 }
  0x4f   :  { %v85_v2 = vadd.s32 8, %v84_v1  ;;  %v86_v3 = vadd.s32 16, %v84_v1  ;;  %v87_v4 = vadd.s32 24, %v84_v1  ;;  %v88_v5 = vadd.s32 32, %v84_v1  ;;  %11740 = vst [vmem:[#allocation21_spill] sm:$0xff] %v8240_v18  ;;  %11741 = vst [vmem:[#allocation22_spill] sm:$0xff] %v8242_v19 }
  0x50   :  { %v89_v6 = vadd.s32 40, %v84_v1  ;;  %v90_v7 = vadd.s32 48, %v84_v1  ;;  %v95_v8 = vand.u32 7, %v84_v1  ;;  %v8244_v20 = vld [vmem:[#allocation6 + $0x7] ss:$0 sm:$0xff]  ;;  %v11752_v28 = vmov 0 }
  0x51   :  { %v102_v9 = vand.u32 7, %v85_v2  ;;  %v109_v10 = vand.u32 7, %v86_v3  ;;  %v116_v11 = vand.u32 7, %v87_v4  ;;  %v123_v12 = vand.u32 7, %v88_v5  ;;  %11742 = vst [vmem:[#allocation23_spill] sm:$0xff] %v8244_v20  ;;  %s8280_s4 = smov 0  }
  0x52   :  { %v8246_v21 = vld [vmem:[#allocation6 + $0x8] ss:$0 sm:$0xff]  ;;  %v8248_v22 = vld [vmem:[#allocation8] ss:$0 sm:$0xff]  ;;  %v8250_v23 = vld [vmem:[#allocation11] ss:$0 sm:$0xff] }
  0x53   :  { %11743 = vst [vmem:[#allocation24_spill] sm:$0xff] %v8246_v21  ;;  %11744 = vst [vmem:[#allocation25_spill] sm:$0xff] %v8248_v22  ;;  %v130_v24 = vand.u32 7, %v89_v6  ;;  %v137_v25 = vand.u32 7, %v90_v7  ;;  %vm8252_vm0 = vcmp.lt.s32.totalorder %v95_v8, 7  ;;  %vm8256_vm1 = vcmp.lt.s32.totalorder %v102_v9, 7 }
  0x54   :  { %11745 = vst [vmem:[#allocation26_spill] sm:$0xff] %v8250_v23  ;;  %v11747_v26 = vsel %vm8252_vm0, 4294967295, %v11746_v26  ;;  %v11750_v27 = vsel %vm8256_vm1, 4294967295, %v11749_v27  ;;  %vm8260_vm2 = vcmp.lt.s32.totalorder %v109_v10, 7  ;;  %vm8264_vm3 = vcmp.lt.s32.totalorder %v116_v11, 7 }
  0x55   :  { %11748 = vst [vmem:[#allocation27_spill] sm:$0xff] %v11747_v26  ;;  %11751 = vst [vmem:[#allocation28_spill] sm:$0xff] %v11750_v27  ;;  %v11753_v28 = vsel %vm8260_vm2, 4294967295, %v11752_v28  ;;  %v11755_v29 = vmov 0  ;;  %vm8268_vm4 = vcmp.lt.s32.totalorder %v123_v12, 7  ;;  %v11758_v30 = vmov 0 }
  0x56   :  { %11754 = vst [vmem:[#allocation29_spill] sm:$0xff] %v11753_v28  ;;  %v11756_v29 = vsel %vm8264_vm3, 4294967295, %v11755_v29  ;;  %v11759_v30 = vsel %vm8268_vm4, 4294967295, %v11758_v30  ;;  %vm8272_vm5 = vcmp.lt.s32.totalorder %v130_v24, 7  ;;  %v11761_v31 = vmov 0 }
  0x57   :  { %11757 = vst [vmem:[#allocation30_spill] sm:$0xff] %v11756_v29  ;;  %11760 = vst [vmem:[#allocation31_spill] sm:$0xff] %v11759_v30  ;;  %v11762_v31 = vsel %vm8272_vm5, 4294967295, %v11761_v31  ;;  %vm8276_vm6 = vcmp.lt.s32.totalorder %v137_v25, 7  ;;  %v11764_v32 = vmov 0 }
  0x58   :  { %11763 = vst [vmem:[#allocation32_spill] sm:$0xff] %v11762_v31  ;;  %v11765_v32 = vsel %vm8276_vm6, 4294967295, %v11764_v32 }
  0x59   :  { %11766 = vst [vmem:[#allocation33_spill] sm:$0xff] %v11765_v32 }
  0x5a LB: > { %v11767_v22 = vld [vmem:[#allocation25_spill] sm:$0xff]  ;;  %v11768_v21 = vld [vmem:[#allocation24_spill] sm:$0xff]  ;;  %v11769_v20 = vld [vmem:[#allocation23_spill] sm:$0xff]  ;;  %v8144_v33 = vmov 0   ;;  %s188_s18 = smul.u32 968, %s8134_s4  ;;  %vm1356_vm8 = vcmask 1043456   ;;  %s8134_s4 = sphi %s8280_s4, %s187_s4  }
  0x5b   : > { %v11770_v19 = vld [vmem:[#allocation22_spill] sm:$0xff]  ;;  %v11771_v18 = vld [vmem:[#allocation21_spill] sm:$0xff]  ;;  %v11772_v17 = vld [vmem:[#allocation20_spill] sm:$0xff]  ;;  %7820 = vset.pattern.permute.xlu1 %v8144_v33  ;;  %1037 = vst [vmem:[#allocation3] sm:$0xf] %v8144_v33  ;;  %7819 = vset.pattern.permute.xlu0 %v8144_v33  ;;  %s7130_s23 = smul.u32 28, %s8134_s4 }
  0x5c   : > { %v11773_v16 = vld [vmem:[#allocation19_spill] sm:$0xff]  ;;  %v11774_v15 = vld [vmem:[#allocation18_spill] sm:$0xff]  ;;  %v11775_v14 = vld [vmem:[#allocation17_spill] sm:$0xff]  ;;  %1038 = vst [vmem:[#allocation3 + $0x4] sm:$0xf] %v8144_v33  ;;  %s8289_s22 = scalar_lea.vmem %s11694_s0, %s188_s18  ;;  %s187_s4 = sadd.s32 1, %s8134_s4  }
  0x5d   : > { %v11776_v13 = vld [vmem:[#allocation16_spill] sm:$0xff]  ;;  %1039 = vst [vmem:[#allocation3 + $0x8] sm:$0xf] %v8144_v33  ;;  %1040 = vst [vmem:[#allocation3 + $0xc] sm:$0xf] %v8144_v33  ;;  %v190_v35 = vld [vmem:[%s8289_s22] sm:$0xff]  ;;  %s11650_s26 = scalar_lea.vmem %s11699_s5, %s7130_s23 }
  0x5e   : > { %1041 = vst [vmem:[#allocation3 + $0x10] sm:$0xf] %v8144_v33  ;;  %1042 = vst [vmem:[#allocation3 + $0x14] sm:$0xf] %v8144_v33  ;;  %v192_v34 = vld [vmem:[%s8289_s22 + $0x10] sm:$0xff]  ;;  %313 = vperm.xlu0 %7819, %v190_v35   ;;  %v193_v36 = vld [vmem:[%s8289_s22 + $0x18] sm:$0xff] }
  0x5f   : > { %1043 = vst [vmem:[#allocation3 + $0x18] sm:$0xf] %v8144_v33  ;;  %1044 = vst [vmem:[#allocation3 + $0x1c] sm:$0xf] %v8144_v33  ;;  %323 = vperm.xlu1 %7820, %v192_v34   ;;  %v191_v37 = vld [vmem:[%s8289_s22 + $0x8] sm:$0xff]  ;;  %v194_v39 = vld [vmem:[%s8289_s22 + $0x20] sm:$0xff] }
  0x60   : > { %1045 = vst [vmem:[#allocation3 + $0x20] sm:$0xf] %v8144_v33  ;;  %1046 = vst [vmem:[#allocation3 + $0x24] sm:$0xf] %v8144_v33  ;;  %v195_v38 = vld [vmem:[%s8289_s22 + $0x28] sm:$0xff]  ;;  %v197_v40 = vld [vmem:[%s8289_s22 + $0x38] sm:$0xff] }
  0x61   : > { %1047 = vst [vmem:[#allocation3 + $0x28] sm:$0xf] %v8144_v33  ;;  %1048 = vst [vmem:[#allocation3 + $0x2c] sm:$0xf] %v8144_v33  ;;  %v196_v41 = vld [vmem:[%s8289_s22 + $0x30] sm:$0xff]  ;;  %v199_v42 = vld [vmem:[%s8289_s22 + $0x48] sm:$0xff] }
  0x62   : > { %1049 = vst [vmem:[#allocation3 + $0x30] sm:$0xf] %v8144_v33  ;;  %1050 = vst [vmem:[#allocation3 + $0x34] sm:$0xf] %v8144_v33  ;;  %318 = vperm.xlu0 %7819, %v191_v37   ;;  %v198_v43 = vld [vmem:[%s8289_s22 + $0x40] sm:$0xff]  ;;  %v201_v44 = vld [vmem:[%s8289_s22 + $0x58] sm:$0xff] }
  0x63   : > { %1051 = vst [vmem:[#allocation3 + $0x38] sm:$0xf] %v8144_v33  ;;  %1052 = vst [vmem:[#allocation3 + $0x3c] sm:$0xf] %v8144_v33  ;;  %328 = vperm.xlu1 %7820, %v193_v36   ;;  %v200_v45 = vld [vmem:[%s8289_s22 + $0x50] sm:$0xff]  ;;  %v203_v46 = vld [vmem:[%s8289_s22 + $0x68] sm:$0xff] }
  0x64   : > { %1053 = vst [vmem:[#allocation3 + $0x40] sm:$0xf] %v8144_v33  ;;  %1054 = vst [vmem:[#allocation3 + $0x44] sm:$0xf] %v8144_v33  ;;  %v202_v47 = vld [vmem:[%s8289_s22 + $0x60] sm:$0xff]  ;;  %v205_v48 = vld [vmem:[%s8289_s22 + $0x78] sm:$0xff] }
  0x65   : > { %1055 = vst [vmem:[#allocation3 + $0x48] sm:$0xf] %v8144_v33  ;;  %1056 = vst [vmem:[#allocation3 + $0x4c] sm:$0xf] %v8144_v33  ;;  %v204_v49 = vld [vmem:[%s8289_s22 + $0x70] sm:$0xff]  ;;  %v207_v50 = vld [vmem:[%s8289_s22 + $0x88] sm:$0xff] }
  0x66   : > { %1057 = vst [vmem:[#allocation3 + $0x50] sm:$0xf] %v8144_v33  ;;  %1058 = vst [vmem:[#allocation3 + $0x54] sm:$0xf] %v8144_v33  ;;  %333 = vperm.xlu0 %7819, %v194_v39   ;;  %v206_v51 = vld [vmem:[%s8289_s22 + $0x80] sm:$0xff]  ;;  %v209_v52 = vld [vmem:[%s8289_s22 + $0x98] sm:$0xff] }
  0x67   : > { %1059 = vst [vmem:[#allocation3 + $0x58] sm:$0xf] %v8144_v33  ;;  %1060 = vst [vmem:[#allocation3 + $0x5c] sm:$0xf] %v8144_v33  ;;  %338 = vperm.xlu1 %7820, %v195_v38   ;;  %v208_v53 = vld [vmem:[%s8289_s22 + $0x90] sm:$0xff]  ;;  %v211_v54 = vld [vmem:[%s8289_s22 + $0xa8] sm:$0xff] }
  0x68   : > { %1061 = vst [vmem:[#allocation3 + $0x60] sm:$0xf] %v8144_v33  ;;  %1062 = vst [vmem:[#allocation3 + $0x64] sm:$0xf] %v8144_v33  ;;  %v210_v55 = vld [vmem:[%s8289_s22 + $0xa0] sm:$0xff]  ;;  %v213_v56 = vld [vmem:[%s8289_s22 + $0xb8] sm:$0xff] }
  0x69   : > { %1063 = vst [vmem:[#allocation3 + $0x68] sm:$0xf] %v8144_v33  ;;  %1064 = vst [vmem:[#allocation3 + $0x6c] sm:$0xf] %v8144_v33  ;;  %v212_v57 = vld [vmem:[%s8289_s22 + $0xb0] sm:$0xff]  ;;  %v215_v58 = vld [vmem:[%s8289_s22 + $0xc8] sm:$0xff] }
  0x6a   : > { %1065 = vst [vmem:[#allocation3 + $0x70] sm:$0xf] %v8144_v33  ;;  %1066 = vst [vmem:[#allocation3 + $0x74] sm:$0xf] %v8144_v33  ;;  %343 = vperm.xlu0 %7819, %v196_v41   ;;  %v214_v59 = vld [vmem:[%s8289_s22 + $0xc0] sm:$0xff]  ;;  %v217_v60 = vld [vmem:[%s8289_s22 + $0xd8] sm:$0xff] }
  0x6b   : > { %1067 = vst [vmem:[#allocation3 + $0x78] sm:$0xf] %v8144_v33  ;;  %1068 = vst [vmem:[#allocation3 + $0x7c] sm:$0xf] %v8144_v33  ;;  %348 = vperm.xlu1 %7820, %v197_v40   ;;  %v216_v61 = vld [vmem:[%s8289_s22 + $0xd0] sm:$0xff]  ;;  %v219_v62 = vld [vmem:[%s8289_s22 + $0xe8] sm:$0xff] }
  0x6c   : > { %1069 = vst [vmem:[#allocation3 + $0x80] sm:$0xf] %v8144_v33  ;;  %v218_v63 = vld [vmem:[%s8289_s22 + $0xe0] sm:$0xff]  ;;  %v221_v0 = vld [vmem:[%s8289_s22 + $0xf8] sm:$0xff]  ;;  %v220_v1 = vld [vmem:[%s8289_s22 + $0xf0] sm:$0xff]  ;;  %p184_p4 = scmp.ge.s32.totalorder %s187_s4, 2  }
  0x6d   : > { %v223_v2 = vld [vmem:[%s8289_s22 + $0x108] sm:$0xff]  ;;  %v222_v3 = vld [vmem:[%s8289_s22 + $0x100] sm:$0xff]  ;;  %v225_v4 = vld [vmem:[%s8289_s22 + $0x118] sm:$0xff]  ;;  %vm1335_vm7 = vsmask.f32 256 }
  0x6e   : > { %353 = vperm.xlu0 %7819, %v198_v43   ;;  %v224_v5 = vld [vmem:[%s8289_s22 + $0x110] sm:$0xff]  ;;  %v227_v6 = vld [vmem:[%s8289_s22 + $0x128] sm:$0xff]  ;;  %v226_v7 = vld [vmem:[%s8289_s22 + $0x120] sm:$0xff]  ;;  %vm1357_vm9 = vsmask.f32 7938 }
  0x6f   : > { %358 = vperm.xlu1 %7820, %v199_v42   ;;  %v229_v8 = vld [vmem:[%s8289_s22 + $0x138] sm:$0xff]  ;;  %v228_v9 = vld [vmem:[%s8289_s22 + $0x130] sm:$0xff]  ;;  %v231_v10 = vld [vmem:[%s8289_s22 + $0x148] sm:$0xff]  ;;  %vm1336_vm10 = vsmask.f32 4368 }
  0x70   : > { %v230_v11 = vld [vmem:[%s8289_s22 + $0x140] sm:$0xff]  ;;  %v233_v12 = vld [vmem:[%s8289_s22 + $0x158] sm:$0xff]  ;;  %v232_v24 = vld [vmem:[%s8289_s22 + $0x150] sm:$0xff]  ;;  %vm1362_vm11 = vsmask.f32 3328 }
  0x71   : > { %v235_v25 = vld [vmem:[%s8289_s22 + $0x168] sm:$0xff]  ;;  %v234_v33 = vld [vmem:[%s8289_s22 + $0x160] sm:$0xff]  ;;  %v237_v34 = vld [vmem:[%s8289_s22 + $0x178] sm:$0xff]  ;;  %vm4656_vm15 = vsmask.f32 7424 }
  0x72   : > { %363 = vperm.xlu0 %7819, %v200_v45   ;;  %v236_v35 = vld [vmem:[%s8289_s22 + $0x170] sm:$0xff]  ;;  %v239_v36 = vld [vmem:[%s8289_s22 + $0x188] sm:$0xff]  ;;  %v238_v37 = vld [vmem:[%s8289_s22 + $0x180] sm:$0xff] }
  0x73   : > { %368 = vperm.xlu1 %7820, %v201_v44   ;;  %v241_v38 = vld [vmem:[%s8289_s22 + $0x198] sm:$0xff]  ;;  %v240_v39 = vld [vmem:[%s8289_s22 + $0x190] sm:$0xff]  ;;  %v243_v40 = vld [vmem:[%s8289_s22 + $0x1a8] sm:$0xff] }
  0x74   : > { %v242_v41 = vld [vmem:[%s8289_s22 + $0x1a0] sm:$0xff]  ;;  %v245_v42 = vld [vmem:[%s8289_s22 + $0x1b8] sm:$0xff]  ;;  %v244_v43 = vld [vmem:[%s8289_s22 + $0x1b0] sm:$0xff] }
  0x75   : > { %v247_v44 = vld [vmem:[%s8289_s22 + $0x1c8] sm:$0xff]  ;;  %v246_v45 = vld [vmem:[%s8289_s22 + $0x1c0] sm:$0xff]  ;;  %vm9469_vm12 = vmand %vm1356_vm8, %vm1357_vm9 }
  0x76   : > { %373 = vperm.xlu0 %7819, %v202_v47   ;;  %v248_v47 = vld [vmem:[%s8289_s22 + $0x1d0] sm:$0xff]  ;;  %v7825_v30 = vld [vmem:[#allocation10 + $0x110] sm:$0xff]   ;;  %vm9476_vm13 = vmor %vm1335_vm7, %vm1336_vm10  ;;  %vm4790_vm7 = vcmask 1046528  }
  0x77   : > { %378 = vperm.xlu1 %7820, %v203_v46   ;;  %v249_v46 = vld [vmem:[%s8289_s22 + $0x1d8] sm:$0xff]  ;;  %vm9483_vm14 = vmand %vm1356_vm8, %vm1362_vm11 }
  0x7a   : > { %383 = vperm.xlu0 %7819, %v204_v49   ;;  %v250_v49 = vld [vmem:[%s8289_s22 + $0x1e0] sm:$0xff] }
  0x7b   : > { %388 = vperm.xlu1 %7820, %v205_v48   ;;  %v251_v48 = vld [vmem:[%s8289_s22 + $0x1e8] sm:$0xff] }
  0x7e   : > { %393 = vperm.xlu0 %7819, %v206_v51   ;;  %v252_v51 = vld [vmem:[%s8289_s22 + $0x1f0] sm:$0xff] }
  0x7f   : > { %398 = vperm.xlu1 %7820, %v207_v50   ;;  %v253_v50 = vld [vmem:[%s8289_s22 + $0x1f8] sm:$0xff] }
  0x82   : > { %403 = vperm.xlu0 %7819, %v208_v53   ;;  %v254_v53 = vld [vmem:[%s8289_s22 + $0x200] sm:$0xff] }
  0x83   : > { %408 = vperm.xlu1 %7820, %v209_v52   ;;  %v255_v52 = vld [vmem:[%s8289_s22 + $0x208] sm:$0xff] }
  0x86   : > { %413 = vperm.xlu0 %7819, %v210_v55  }
  0x87   : > { %418 = vperm.xlu1 %7820, %v211_v54  }
  0x8a   : > { %423 = vperm.xlu0 %7819, %v212_v57   ;;  %v256_v57 = vld [vmem:[%s8289_s22 + $0x210] sm:$0xff] }
  0x8b   : > { %428 = vperm.xlu1 %7820, %v213_v56   ;;  %v257_v56 = vld [vmem:[%s8289_s22 + $0x218] sm:$0xff] }
  0x8e   : > { %433 = vperm.xlu0 %7819, %v214_v59  }
  0x8f   : > { %438 = vperm.xlu1 %7820, %v215_v58  }
  0x92   : > { %443 = vperm.xlu0 %7819, %v216_v61   ;;  %v258_v61 = vld [vmem:[%s8289_s22 + $0x220] sm:$0xff] }
  0x93   : > { %448 = vperm.xlu1 %7820, %v217_v60   ;;  %v259_v60 = vld [vmem:[%s8289_s22 + $0x228] sm:$0xff] }
  0x96   : > { %453 = vperm.xlu0 %7819, %v218_v63  }
  0x97   : > { %458 = vperm.xlu1 %7820, %v219_v62  }
  0x9a   : > { %463 = vperm.xlu0 %7819, %v220_v1   ;;  %v260_v1 = vld [vmem:[%s8289_s22 + $0x230] sm:$0xff] }
  0x9b   : > { %468 = vperm.xlu1 %7820, %v221_v0   ;;  %v261_v0 = vld [vmem:[%s8289_s22 + $0x238] sm:$0xff] }
  0x9e   : > { %473 = vperm.xlu0 %7819, %v222_v3  }
  0x9f   : > { %478 = vperm.xlu1 %7820, %v223_v2  }
  0xa2   : > { %483 = vperm.xlu0 %7819, %v224_v5  }
  0xa3   : > { %488 = vperm.xlu1 %7820, %v225_v4  }
  0xa6   : > { %493 = vperm.xlu0 %7819, %v226_v7  }
  0xa7   : > { %498 = vperm.xlu1 %7820, %v227_v6  }
  0xaa   : > { %503 = vperm.xlu0 %7819, %v228_v9  }
  0xab   : > { %508 = vperm.xlu1 %7820, %v229_v8  }
  0xae   : > { %513 = vperm.xlu0 %7819, %v230_v11  }
  0xaf   : > { %518 = vperm.xlu1 %7820, %v231_v10  }
  0xb2   : > { %523 = vperm.xlu0 %7819, %v232_v24  }
  0xb3   : > { %528 = vperm.xlu1 %7820, %v233_v12  }
  0xb6   : > { %533 = vperm.xlu0 %7819, %v234_v33  }
  0xb7   : > { %538 = vperm.xlu1 %7820, %v235_v25  }
  0xba   : > { %543 = vperm.xlu0 %7819, %v236_v35  }
  0xbb   : > { %548 = vperm.xlu1 %7820, %v237_v34  }
  0xbe   : > { %553 = vperm.xlu0 %7819, %v238_v37  }
  0xbf   : > { %558 = vperm.xlu1 %7820, %v239_v36  }
  0xc2   : > { %563 = vperm.xlu0 %7819, %v240_v39   ;;  %v263_v39 = vld [vmem:[%s8289_s22 + $0x248] sm:$0xff] }
  0xc3   : > { %568 = vperm.xlu1 %7820, %v241_v38  }
  0xc6   : > { %573 = vperm.xlu0 %7819, %v242_v41  }
  0xc7   : > { %578 = vperm.xlu1 %7820, %v243_v40  }
  0xca   : > { %583 = vperm.xlu0 %7819, %v244_v43  }
  0xcb   : > { %588 = vperm.xlu1 %7820, %v245_v42  }
  0xce   : > { %593 = vperm.xlu0 %7819, %v246_v45  }
  0xcf   : > { %598 = vperm.xlu1 %7820, %v247_v44   ;;  %v262_v44 = vld [vmem:[%s8289_s22 + $0x240] sm:$0xff] }
  0xd2   : > { %603 = vperm.xlu0 %7819, %v248_v47  }
  0xd3   : > { %608 = vperm.xlu1 %7820, %v249_v46  }
  0xd6   : > { %613 = vperm.xlu0 %7819, %v250_v49  }
  0xd7   : > { %618 = vperm.xlu1 %7820, %v251_v48  }
  0xda   : > { %623 = vperm.xlu0 %7819, %v252_v51  }
  0xdb   : > { %628 = vperm.xlu1 %7820, %v253_v50  }
  0xdd   : > { %v314_v55 = vpop.permute.xlu0 %313 }
  0xde   : > { %v324_v54 = vpop.permute.xlu1 %323  ;;  %916 = vst [vmem:[#allocation2] sm:$0xff] %v314_v55  ;;  %633 = vperm.xlu0 %7819, %v254_v53   ;;  %v1082_v3 = vmul.f32 %v11776_v13, %v314_v55 }
  0xdf   : > { %918 = vst [vmem:[#allocation2 + $0x10] sm:$0xff] %v324_v54  ;;  %638 = vperm.xlu1 %7820, %v255_v52   ;;  %v1084_v2 = vmul.f32 %v11776_v13, %v324_v54 }
  0xe1   : > { %v319_v59 = vpop.permute.xlu0 %318 }
  0xe2   : > { %v329_v58 = vpop.permute.xlu1 %328  ;;  %917 = vst [vmem:[#allocation2 + $0x8] sm:$0xff] %v319_v59  ;;  %643 = vperm.xlu0 %7819, %v256_v57   ;;  %v1083_v11 = vmul.f32 %v11776_v13, %v319_v59 }
  0xe3   : > { %919 = vst [vmem:[#allocation2 + $0x18] sm:$0xff] %v329_v58  ;;  %648 = vperm.xlu1 %7820, %v257_v56   ;;  %v1085_v4 = vmul.f32 %v11776_v13, %v329_v58 }
  0xe5   : > { %v334_v63 = vpop.permute.xlu0 %333 }
  0xe6   : > { %v339_v62 = vpop.permute.xlu1 %338  ;;  %920 = vst [vmem:[#allocation2 + $0x20] sm:$0xff] %v334_v63  ;;  %653 = vperm.xlu0 %7819, %v258_v61   ;;  %v1086_v37 = vmul.f32 %v11776_v13, %v334_v63  ;;  %v1154_v38 = vmul.f32 %v11773_v16, %v334_v63  ;;  %v265_v63 = vld [vmem:[%s8289_s22 + $0x258] sm:$0xff] }
  0xe7   : > { %921 = vst [vmem:[#allocation2 + $0x28] sm:$0xff] %v339_v62  ;;  %658 = vperm.xlu1 %7820, %v259_v60   ;;  %v8370_v34 = vmul.f32 %v11776_v13, %v339_v62  ;;  %v1155_v36 = vmul.f32 %v11773_v16, %v339_v62 }
  0xe9   : > { %v1090_v7 = vld [vmem:[#allocation2 + $0x1] sm:$0xff]  ;;  %v344_v9 = vpop.permute.xlu0 %343  ;;  %v1091_v12 = vld [vmem:[#allocation2 + $0x9] sm:$0xff] }
  0xea   : > { %v1092_v5 = vld [vmem:[#allocation2 + $0x11] sm:$0xff]  ;;  %v349_v8 = vpop.permute.xlu1 %348  ;;  %v1102_v24 = vmul.f32 %v11775_v14, %v1090_v7  ;;  %v1118_v25 = vld [vmem:[#allocation2 + $0x2] sm:$0xff]  ;;  %922 = vst [vmem:[#allocation2 + $0x30] sm:$0xff] %v344_v9  ;;  %v1103_v35 = vmul.f32 %v11775_v14, %v1091_v12  ;;  %663 = vperm.xlu0 %7819, %v260_v1   ;;  %v1088_v61 = vmul.f32 %v11776_v13, %v344_v9 }
  0xeb   : > { %v1120_v6 = vld [vmem:[#allocation2 + $0x12] sm:$0xff]  ;;  %v1104_v10 = vmul.f32 %v11775_v14, %v1092_v5  ;;  %v1119_v33 = vld [vmem:[#allocation2 + $0xa] sm:$0xff]  ;;  %923 = vst [vmem:[#allocation2 + $0x38] sm:$0xff] %v349_v8  ;;  %668 = vperm.xlu1 %7820, %v261_v0   ;;  %v1130_v43 = vmul.f32 %v11774_v15, %v1118_v25  ;;  %v8382_v50 = vmul.f32 %v11776_v13, %v349_v8 }
  0xec   : > { %v1132_v41 = vmul.f32 %v11774_v15, %v1120_v6  ;;  %v1110_v42 = vadd.f32 %v1102_v24, %v1082_v3  ;;  %v1111_v45 = vadd.f32 %v1103_v35, %v1083_v11  ;;  %v1131_v46 = vmul.f32 %v11774_v15, %v1119_v33  ;;  %v264_v5 = vld [vmem:[%s8289_s22 + $0x250] sm:$0xff] }
  0xed   : > { %v1112_v40 = vadd.f32 %v1104_v10, %v1084_v2  ;;  %v1093_v47 = vld [vmem:[#allocation2 + $0x19] sm:$0xff]  ;;  %v1157_v51 = vmul.f32 %v11773_v16, %v349_v8  ;;  %v8387_v53 = vpop.permute.xlu0 %353  ;;  %v1156_v62 = vmul.f32 %v11773_v16, %v344_v9 }
  0xee   : > { %v1094_v48 = vld [vmem:[#allocation2 + $0x21] sm:$0xff]  ;;  %v8385_v52 = vpop.permute.xlu1 %358  ;;  %v1138_v55 = vadd.f32 %v1130_v43, %v1110_v42  ;;  %v1105_v56 = vmul.f32 %v11775_v14, %v1093_v47  ;;  %924 = vst [vmem:[#allocation2 + $0x40] sm:$0xff] %v8387_v53  ;;  %v1139_v59 = vadd.f32 %v1131_v46, %v1111_v45  ;;  %673 = vperm.xlu0 %7819, %v262_v44  }
  0xef   : > { %v1121_v49 = vld [vmem:[#allocation2 + $0x1a] sm:$0xff]  ;;  %v1140_v54 = vadd.f32 %v1132_v41, %v1112_v40  ;;  %v1106_v57 = vmul.f32 %v11775_v14, %v1094_v48  ;;  %v1122_v58 = vld [vmem:[#allocation2 + $0x22] sm:$0xff]  ;;  %925 = vst [vmem:[#allocation2 + $0x48] sm:$0xff] %v8385_v52  ;;  %678 = vperm.xlu1 %7820, %v263_v39   ;;  %v1178_v3 = vmul.f32 %v11772_v17, %v1094_v48 }
  0xf0   : > { %v1133_v60 = vmul.f32 %v11774_v15, %v1121_v49  ;;  %v1113_v0 = vadd.f32 %v1105_v56, %v1085_v4  ;;  %v1162_v2 = vadd.f32 %v1154_v38, %v1138_v55  ;;  %v1163_v6 = vadd.f32 %v1155_v36, %v1139_v59  ;;  %v267_v42 = vld [vmem:[%s8289_s22 + $0x268] sm:$0xff]  ;;  %v266_v47 = vld [vmem:[%s8289_s22 + $0x260] sm:$0xff] }
  0xf1   : > { %v1114_v1 = vadd.f32 %v1106_v57, %v1086_v37  ;;  %v1134_v7 = vmul.f32 %v11774_v15, %v1122_v58  ;;  %v1202_v8 = vmul.f32 %v11771_v18, %v1122_v58  ;;  %v1095_v10 = vld [vmem:[#allocation2 + $0x29] sm:$0xff]  ;;  %v1164_v24 = vadd.f32 %v1156_v62, %v1140_v54  ;;  %v8403_v9 = vpop.permute.xlu0 %363 }
  0xf2   : > { %v1096_v11 = vld [vmem:[#allocation2 + $0x31] sm:$0xff]  ;;  %v8401_v25 = vpop.permute.xlu1 %368  ;;  %v1141_v4 = vadd.f32 %v1133_v60, %v1113_v0  ;;  %v1186_v33 = vadd.f32 %v1178_v3, %v1162_v2  ;;  %v1107_v35 = vmul.f32 %v11775_v14, %v1095_v10  ;;  %v1159_v36 = vmul.f32 %v11773_v16, %v8385_v52  ;;  %926 = vst [vmem:[#allocation2 + $0x50] sm:$0xff] %v8403_v9 }
  0xf3   : > { %v1123_v12 = vld [vmem:[#allocation2 + $0x2a] sm:$0xff]  ;;  %v1124_v37 = vld [vmem:[#allocation2 + $0x32] sm:$0xff]  ;;  %927 = vst [vmem:[#allocation2 + $0x58] sm:$0xff] %v8401_v25  ;;  %688 = vperm.xlu1 %7820, %v265_v63   ;;  %v1142_v38 = vadd.f32 %v1134_v7, %v1114_v1  ;;  %v1108_v39 = vmul.f32 %v11775_v14, %v1096_v11  ;;  %v1179_v40 = vmul.f32 %v11772_v17, %v1095_v10 }
  0xf4   : > { %v1227_v41 = vmul.f32 %v11770_v19, %v8385_v52  ;;  %683 = vperm.xlu0 %7819, %v264_v5   ;;  %v1115_v43 = vadd.f32 %v1107_v35, %v8370_v34  ;;  %v1135_v44 = vmul.f32 %v11774_v15, %v1123_v12  ;;  %v1136_v45 = vmul.f32 %v11774_v15, %v1124_v37  ;;  %v269_v3 = vld [vmem:[%s8289_s22 + $0x278] sm:$0xff] }
  0xf5   : > { %v1180_v46 = vmul.f32 %v11772_v17, %v1096_v11  ;;  %v1210_v48 = vadd.f32 %v1202_v8, %v1186_v33  ;;  %v1116_v49 = vadd.f32 %v1108_v39, %v1088_v61  ;;  %v1187_v54 = vadd.f32 %v1179_v40, %v1163_v6  ;;  %v1097_v56 = vld [vmem:[#allocation2 + $0x39] sm:$0xff]  ;;  %v8423_v59 = vpop.permute.xlu0 %373  ;;  %v268_v11 = vld [vmem:[%s8289_s22 + $0x270] sm:$0xff] }
  0xf6   : > { %v1203_v55 = vmul.f32 %v11771_v18, %v1123_v12  ;;  %v1125_v57 = vld [vmem:[#allocation2 + $0x3a] sm:$0xff]  ;;  %v8421_v58 = vpop.permute.xlu1 %378  ;;  %v1165_v34 = vadd.f32 %v1157_v51, %v1141_v4  ;;  %v1143_v60 = vadd.f32 %v1135_v44, %v1115_v43  ;;  %v1109_v63 = vmul.f32 %v11775_v14, %v1097_v56  ;;  %928 = vst [vmem:[#allocation2 + $0x60] sm:$0xff] %v8423_v59  ;;  %v1194_v10 = vld [vmem:[#allocation2 + $0x42] sm:$0xff] }
  0xf7   : > { %v1188_v62 = vadd.f32 %v1180_v46, %v1164_v24  ;;  %v1170_v0 = vld [vmem:[#allocation2 + $0x41] sm:$0xff]  ;;  %929 = vst [vmem:[#allocation2 + $0x68] sm:$0xff] %v8421_v58  ;;  %698 = vperm.xlu1 %7820, %v267_v42   ;;  %v1204_v61 = vmul.f32 %v11771_v18, %v1124_v37  ;;  %v8431_v2 = vmul.f32 %v11776_v13, %v8385_v52 }
  0xf8   : > { %v1211_v1 = vadd.f32 %v1203_v55, %v1187_v54  ;;  %v1158_v51 = vmul.f32 %v11773_v16, %v8387_v53  ;;  %693 = vperm.xlu0 %7819, %v266_v47   ;;  %v1144_v5 = vadd.f32 %v1136_v45, %v1116_v49  ;;  %v1117_v6 = vadd.f32 %v1109_v63, %v8382_v50  ;;  %v271_v44 = vld [vmem:[%s8289_s22 + $0x288] sm:$0xff]  ;;  %v270_v55 = vld [vmem:[%s8289_s22 + $0x280] sm:$0xff] }
  0xf9   : > { %v1137_v7 = vmul.f32 %v11774_v15, %v1125_v57  ;;  %v1181_v8 = vmul.f32 %v11772_v17, %v1097_v56  ;;  %v8440_v12 = vadd.f32 %v1204_v61, %v1188_v62  ;;  %v1167_v24 = vadd.f32 %v1159_v36, %v1143_v60  ;;  %v8445_v35 = vpop.permute.xlu0 %383 }
  0xfa   : > { %v1166_v4 = vadd.f32 %v1158_v51, %v1142_v38  ;;  %v1182_v52 = vmul.f32 %v11772_v17, %v1170_v0  ;;  %v8443_v33 = vpop.permute.xlu1 %388  ;;  %v8447_v37 = vadd.f32 %v1227_v41, %v1211_v1  ;;  %v1205_v39 = vmul.f32 %v11771_v18, %v1125_v57  ;;  %930 = vst [vmem:[#allocation2 + $0x70] sm:$0xff] %v8445_v35  ;;  %v1171_v41 = vld [vmem:[#allocation2 + $0x49] sm:$0xff]  ;;  %v1172_v54 = vld [vmem:[#allocation2 + $0x51] sm:$0xff] }
  0xfb   : > { %v1189_v50 = vadd.f32 %v1181_v8, %v1165_v34  ;;  %v1226_v40 = vmul.f32 %v11770_v19, %v8387_v53  ;;  %931 = vst [vmem:[#allocation2 + $0x78] sm:$0xff] %v8443_v33  ;;  %708 = vperm.xlu1 %7820, %v269_v3   ;;  %v1145_v36 = vadd.f32 %v1137_v7, %v1117_v6  ;;  %v1195_v1 = vld [vmem:[#allocation2 + $0x4a] sm:$0xff]  ;;  %v1196_v8 = vld [vmem:[#allocation2 + $0x52] sm:$0xff] }
  0xfc   : > { %v1190_v38 = vadd.f32 %v1182_v52, %v1166_v4  ;;  %v1206_v42 = vmul.f32 %v11771_v18, %v1194_v10  ;;  %v1250_v43 = vmul.f32 %v11769_v20, %v1170_v0  ;;  %703 = vperm.xlu0 %7819, %v268_v11   ;;  %v1375_v47 = vmul.f32 %v11776_v13, %v8387_v53  ;;  %v7821_v11 = vld [vmem:[#allocation10 + $0x100] sm:$0xff]  }
  0xfd   : > { %v1213_v45 = vadd.f32 %v1205_v39, %v1189_v50  ;;  %v1234_v46 = vadd.f32 %v1226_v40, %v1210_v48  ;;  %v1391_v49 = vmul.f32 %v11775_v14, %v1170_v0  ;;  %v1274_v56 = vmul.f32 %v11768_v21, %v1194_v10  ;;  %v8469_v48 = vpop.permute.xlu0 %393  ;;  %v272_v40 = vld [vmem:[%s8289_s22 + $0x290] sm:$0xff]  ;;  %7148 = vmatprep.subr.bf16.mxu0 %v7821_v11 }
  0xfe   : > { %v1415_v57 = vmul.f32 %v11774_v15, %v1194_v10  ;;  %v1161_v34 = vmul.f32 %v11773_v16, %v8401_v25  ;;  %v1229_v60 = vmul.f32 %v11770_v19, %v8401_v25  ;;  %v8467_v62 = vpop.permute.xlu1 %398  ;;  %v1160_v0 = vmul.f32 %v11773_v16, %v8403_v9  ;;  %932 = vst [vmem:[#allocation2 + $0x80] sm:$0xff] %v8469_v48  ;;  %v273_v10 = vld [vmem:[%s8289_s22 + $0x298] sm:$0xff] }
  0xff   : > { %v1258_v53 = vadd.f32 %v1250_v43, %v1234_v46  ;;  %v1399_v63 = vadd.f32 %v1391_v49, %v1375_v47  ;;  %v1183_v61 = vmul.f32 %v11772_v17, %v1171_v41  ;;  %933 = vst [vmem:[#allocation2 + $0x88] sm:$0xff] %v8467_v62  ;;  %718 = vperm.xlu1 %7820, %v271_v44  }
 0x100   : > { %v8476_v51 = vadd.f32 %v1206_v42, %v1190_v38  ;;  %v8478_v3 = vadd.f32 %v1161_v34, %v1145_v36  ;;  %v8482_v6 = vmul.f32 %v11776_v13, %v8401_v25  ;;  %v1184_v7 = vmul.f32 %v11772_v17, %v1172_v54  ;;  %713 = vperm.xlu0 %7819, %v270_v55   ;;  %v7822_v38 = vld [vmem:[#allocation10 + $0xc0] sm:$0xff]  }
 0x101   : > { %v1282_v4 = vadd.f32 %v1274_v56, %v1258_v53  ;;  %v8486_v52 = vadd.f32 %v1229_v60, %v1213_v45  ;;  %v1168_v50 = vadd.f32 %v1160_v0, %v1144_v5  ;;  %v1191_v39 = vadd.f32 %v1183_v61, %v1167_v24  ;;  %v8496_v46 = vpop.permute.xlu0 %403  ;;  %v275_v60 = vld [vmem:[%s8289_s22 + $0x2a8] sm:$0xff]  ;;  %v1173_v61 = vld [vmem:[#allocation2 + $0x59] sm:$0xff]  ;;  %7149 = vmatpush3.bf16.msra.mxu0 %v7822_v38 }
 0x102   : > { %v1207_v36 = vmul.f32 %v11771_v18, %v1195_v1  ;;  %v1228_v42 = vmul.f32 %v11770_v19, %v8403_v9  ;;  %v1251_v25 = vmul.f32 %v11769_v20, %v1171_v41  ;;  %v1252_v43 = vmul.f32 %v11769_v20, %v1172_v54  ;;  %v8494_v44 = vpop.permute.xlu1 %408  ;;  %934 = vst [vmem:[#allocation2 + $0x90] sm:$0xff] %v8496_v46 }
 0x103   : > { %v8499_v5 = vadd.f32 %v11767_v22, %v1282_v4  ;;  %v8501_v24 = vadd.f32 %v1415_v57, %v1399_v63  ;;  %v1192_v45 = vadd.f32 %v1184_v7, %v1168_v50  ;;  %v1208_v47 = vmul.f32 %v11771_v18, %v1196_v8  ;;  %935 = vst [vmem:[#allocation2 + $0x98] sm:$0xff] %v8494_v44  ;;  %v274_v7 = vld [vmem:[%s8289_s22 + $0x2a0] sm:$0xff] }
 0x104   : > { %728 = vperm.xlu1 %7820, %v273_v10   ;;  %v1215_v49 = vadd.f32 %v1207_v36, %v1191_v39  ;;  %v1236_v55 = vadd.f32 %v1228_v42, %v8440_v12  ;;  %v1259_v56 = vadd.f32 %v1251_v25, %v8447_v37  ;;  %v1275_v34 = vmul.f32 %v11768_v21, %v1195_v1  ;;  %v1242_v25 = vld [vmem:[#allocation2 + $0x61] sm:$0xff] }
 0x105   : > { %723 = vperm.xlu0 %7819, %v272_v40   ;;  %v1276_v57 = vmul.f32 %v11768_v21, %v1196_v8  ;;  %v1377_v53 = vmul.f32 %v11776_v13, %v8403_v9  ;;  %v1392_v63 = vmul.f32 %v11775_v14, %v1171_v41  ;;  %v1393_v0 = vmul.f32 %v11775_v14, %v1172_v54  ;;  %v8521_v50 = vpop.permute.xlu0 %413  ;;  %v1197_v40 = vld [vmem:[#allocation2 + $0x5a] sm:$0xff] }
 0x106   : > { %v8517_v10 = vadd.f32 %v1208_v47, %v1192_v45  ;;  %v1260_v37 = vadd.f32 %v1252_v43, %v1236_v55  ;;  %v1283_v11 = vadd.f32 %v1275_v34, %v1259_v56  ;;  %v8519_v4 = vpop.permute.xlu1 %418  ;;  %v1416_v41 = vmul.f32 %v11774_v15, %v1195_v1  ;;  %936 = vst [vmem:[#allocation2 + $0xa0] sm:$0xff] %v8521_v50  ;;  %v277_v1 = vld [vmem:[%s8289_s22 + $0x2b8] sm:$0xff]  ;;  %v276_v55 = vld [vmem:[%s8289_s22 + $0x2b0] sm:$0xff] }
 0x107   : > { %v1400_v9 = vadd.f32 %v1392_v63, %v8431_v2  ;;  %v1401_v39 = vadd.f32 %v1393_v0, %v1377_v53  ;;  %v1417_v54 = vmul.f32 %v11774_v15, %v1196_v8  ;;  %937 = vst [vmem:[#allocation2 + $0xa8] sm:$0xff] %v8519_v4  ;;  %v1231_v42 = vmul.f32 %v11770_v19, %v8421_v58  ;;  %v7823_v56 = vld [vmem:[#allocation10 + $0x108] sm:$0xff]  }
 0x108   : > { %738 = vperm.xlu1 %7820, %v275_v60   ;;  %v1284_v38 = vadd.f32 %v1276_v57, %v1260_v37  ;;  %v8529_v36 = vadd.f32 %v11767_v22, %v1283_v11  ;;  %v1185_v2 = vmul.f32 %v11772_v17, %v1173_v61  ;;  %v8539_v45 = vmul.f32 %v11776_v13, %v8421_v58 }
 0x109   : > { %733 = vperm.xlu0 %7819, %v274_v7   ;;  %v1424_v8 = vadd.f32 %v1416_v41, %v1400_v9  ;;  %v8535_v43 = vadd.f32 %v1417_v54, %v1401_v39  ;;  %v1436_v47 = vmul.f32 %v11773_v16, %v8421_v58  ;;  %v8544_v34 = vadd.f32 %v1231_v42, %v1215_v49  ;;  %v8552_v0 = vpop.permute.xlu0 %423  ;;  %v279_v54 = vld [vmem:[%s8289_s22 + $0x2c8] sm:$0xff] }
 0x10a   : > { %v1193_v60 = vadd.f32 %v1185_v2, %v8478_v3  ;;  %v1209_v57 = vmul.f32 %v11771_v18, %v1197_v40  ;;  %v1230_v53 = vmul.f32 %v11770_v19, %v8423_v59  ;;  %v8550_v63 = vpop.permute.xlu1 %428  ;;  %v8555_v7 = vadd.f32 %v11767_v22, %v1284_v38  ;;  %v1266_v3 = vld [vmem:[#allocation2 + $0x62] sm:$0xff]  ;;  %938 = vst [vmem:[#allocation2 + $0xb0] sm:$0xff] %v8552_v0  ;;  %v7824_v38 = vld [vmem:[#allocation10 + $0xc8] sm:$0xff]  }
 0x10b   : > { %v8557_v58 = vadd.f32 %v1436_v47, %v1424_v8  ;;  %v1253_v49 = vmul.f32 %v11769_v20, %v1173_v61  ;;  %v1254_v37 = vmul.f32 %v11769_v20, %v1242_v25  ;;  %939 = vst [vmem:[#allocation2 + $0xb8] sm:$0xff] %v8550_v63  ;;  %v1277_v41 = vmul.f32 %v11768_v21, %v1197_v40  ;;  %v278_v47 = vld [vmem:[%s8289_s22 + $0x2c0] sm:$0xff] }
 0x10c   : > { %748 = vperm.xlu1 %7820, %v277_v1   ;;  %v1217_v9 = vadd.f32 %v1209_v57, %v1193_v60  ;;  %v1238_v39 = vadd.f32 %v1230_v53, %v8476_v51  ;;  %7150 = vmatprep.subr.bf16.mxu0 %v7823_v56  ;;  %v1379_v2 = vmul.f32 %v11776_v13, %v8423_v59 }
 0x10d   : > { %743 = vperm.xlu0 %7819, %v276_v55   ;;  %v1261_v42 = vadd.f32 %v1253_v49, %v8486_v52  ;;  %v1394_v8 = vmul.f32 %v11775_v14, %v1173_v61  ;;  %v1395_v1 = vmul.f32 %v11775_v14, %v1242_v25  ;;  %v1278_v60 = vmul.f32 %v11768_v21, %v1266_v3  ;;  %v8579_v57 = vpop.permute.xlu0 %433 }
 0x10e   : > { %v1262_v11 = vadd.f32 %v1254_v37, %v1238_v39  ;;  %v1418_v51 = vmul.f32 %v11774_v15, %v1197_v40  ;;  %v1435_v55 = vmul.f32 %v11773_v16, %v8423_v59  ;;  %v8577_v56 = vpop.permute.xlu1 %438  ;;  %7151 = vmatpush3.bf16.msra.mxu0 %v7824_v38  ;;  %v1455_v49 = vmul.f32 %v11772_v17, %v1242_v25  ;;  %v1243_v38 = vld [vmem:[#allocation2 + $0x69] sm:$0xff] }
 0x10f   : > { %v1285_v52 = vadd.f32 %v1277_v41, %v1261_v42  ;;  %v1402_v61 = vadd.f32 %v1394_v8, %v8482_v6  ;;  %v1403_v53 = vadd.f32 %v1395_v1, %v1379_v2  ;;  %941 = vst [vmem:[#allocation2 + $0xc8] sm:$0xff] %v8577_v56  ;;  %940 = vst [vmem:[#allocation2 + $0xc0] sm:$0xff] %v8579_v57  ;;  %v1244_v41 = vld [vmem:[#allocation2 + $0x71] sm:$0xff]  ;;  %7152 = vmatprep.subr.bf16.mxu0 %v7825_v30  ;;  %v1269_v30 = vld [vmem:[#allocation2 + $0x7a] sm:$0xff] }
 0x110   : > { %758 = vperm.xlu1 %7820, %v279_v54   ;;  %v1286_v40 = vadd.f32 %v1278_v60, %v1262_v11  ;;  %v1419_v37 = vmul.f32 %v11774_v15, %v1266_v3  ;;  %v1443_v39 = vadd.f32 %v1435_v55, %v8501_v24  ;;  %v281_v6 = vld [vmem:[%s8289_s22 + $0x2d8] sm:$0xff]  ;;  %v1475_v2 = vmul.f32 %v11771_v18, %v1266_v3  ;;  %v280_v8 = vld [vmem:[%s8289_s22 + $0x2d0] sm:$0xff] }
 0x111   : > { %753 = vperm.xlu0 %7819, %v278_v47   ;;  %v8590_v42 = vadd.f32 %v11767_v22, %v1285_v52  ;;  %v1426_v25 = vadd.f32 %v1418_v51, %v1402_v61  ;;  %v1233_v54 = vmul.f32 %v11770_v19, %v8443_v33  ;;  %v8601_v24 = vmul.f32 %v11776_v13, %v8443_v33  ;;  %v1267_v47 = vld [vmem:[#allocation2 + $0x6a] sm:$0xff]  ;;  %v8603_v55 = vld [vmem:[#allocation2 + $0x72] sm:$0xff]  ;;  %v8607_v3 = vpop.permute.xlu0 %443 }
 0x112   : > { %v1300_v11 = vadd.f32 %v11767_v22, %v1286_v40  ;;  %v8597_v1 = vadd.f32 %v1419_v37, %v1403_v53  ;;  %v1463_v60 = vadd.f32 %v1455_v49, %v1443_v39  ;;  %v8605_v51 = vpop.permute.xlu1 %448  ;;  %v1232_v61 = vmul.f32 %v11770_v19, %v8445_v35  ;;  %942 = vst [vmem:[#allocation2 + $0xd0] sm:$0xff] %v8607_v3 }
 0x113   : > { %v8609_v52 = vadd.f32 %v1233_v54, %v1217_v9  ;;  %v1255_v53 = vmul.f32 %v11769_v20, %v1243_v38  ;;  %v1256_v49 = vmul.f32 %v11769_v20, %v1244_v41  ;;  %943 = vst [vmem:[#allocation2 + $0xd8] sm:$0xff] %v8605_v51  ;;  %v1438_v9 = vmul.f32 %v11773_v16, %v8443_v33  ;;  %v283_v54 = vld [vmem:[%s8289_s22 + $0x2e8] sm:$0xff] }
 0x114   : > { %768 = vperm.xlu1 %7820, %v281_v6   ;;  %v1308_v37 = vmax.f32 %v1300_v11, 0.0  ;;  %v8618_v39 = vadd.f32 %v1475_v2, %v1463_v60  ;;  %v1240_v59 = vadd.f32 %v1232_v61, %v8517_v10  ;;  %v1279_v32 = vmul.f32 %v11768_v21, %v1267_v47  ;;  %v282_v6 = vld [vmem:[%s8289_s22 + $0x2e0] sm:$0xff] }
 0x115   : > { %763 = vperm.xlu0 %7819, %v280_v8   ;;  %v1263_v12 = vadd.f32 %v1255_v53, %v8544_v34  ;;  %v1280_v31 = vmul.f32 %v11768_v21, %v8603_v55  ;;  %v11777_v11 = vmax.f32 %v8499_v5, 0.0  ;;  %v1381_v60 = vmul.f32 %v11776_v13, %v8445_v35  ;;  %v8637_v34 = vpop.permute.xlu0 %453 }
 0x116   : > { %v1396_v33 = vmul.f32 %v11775_v14, %v1243_v38  ;;  %v1397_v8 = vmul.f32 %v11775_v14, %v1244_v41  ;;  %v8635_v10 = vpop.permute.xlu1 %458  ;;  %v1264_v61 = vadd.f32 %v1256_v49, %v1240_v59  ;;  %v1420_v40 = vmul.f32 %v11774_v15, %v1267_v47  ;;  %944 = vst [vmem:[#allocation2 + $0xe0] sm:$0xff] %v8637_v34 }
 0x117   : > { %v1312_v2 = vmax.f32 %v11777_v11, %v1308_v37  ;;  %v1287_v53 = vadd.f32 %v1279_v32, %v1263_v12  ;;  %v1437_v5 = vmul.f32 %v11773_v16, %v8445_v35  ;;  %945 = vst [vmem:[#allocation2 + $0xe8] sm:$0xff] %v8635_v10  ;;  %v1456_v29 = vmul.f32 %v11772_v17, %v1243_v38  ;;  %v285_v32 = vld [vmem:[%s8289_s22 + $0x2f8] sm:$0xff] }
 0x118   : > { %778 = vperm.xlu1 %7820, %v283_v54   ;;  %v1404_v37 = vadd.f32 %v1396_v33, %v8539_v45  ;;  %v1405_v11 = vadd.f32 %v1397_v8, %v1381_v60  ;;  %v1457_v59 = vmul.f32 %v11772_v17, %v1244_v41  ;;  %v7826_v12 = vld [vmem:[#allocation10 + $0xd0] sm:$0xff]   ;;  %v1288_v49 = vadd.f32 %v1280_v31, %v1264_v61 }
 0x119   : > { %1316 = vst [vmem:[#allocation4] sm:$0xff] %v1312_v2  ;;  %773 = vperm.xlu0 %7819, %v282_v6   ;;  %v1301_v35 = vadd.f32 %v11767_v22, %v1287_v53  ;;  %v1421_v28 = vmul.f32 %v11774_v15, %v8603_v55  ;;  %v1445_v27 = vadd.f32 %v1437_v5, %v8535_v43  ;;  %v1245_v54 = vld [vmem:[#allocation2 + $0x79] sm:$0xff]  ;;  %v284_v2 = vld [vmem:[%s8289_s22 + $0x2f0] sm:$0xff]  ;;  %v8657_v31 = vpop.permute.xlu0 %463 }
 0x11a   : > { %v1446_v45 = vadd.f32 %v1438_v9, %v1426_v25  ;;  %v1428_v60 = vadd.f32 %v1420_v40, %v1404_v37  ;;  %v1464_v38 = vadd.f32 %v1456_v29, %v8557_v58  ;;  %v1476_v41 = vmul.f32 %v11771_v18, %v1267_v47  ;;  %v8655_v6 = vpop.permute.xlu1 %468  ;;  %7153 = vmatpush3.bf16.msra.mxu0 %v7826_v12  ;;  %v286_v37 = vld [vmem:[%s8289_s22 + $0x300] sm:$0xff] }
 0x11b   : > { %v1302_v33 = vadd.f32 %v11767_v22, %v1288_v49  ;;  %v1309_v8 = vmax.f32 %v1301_v35, 0.0  ;;  %v8660_v61 = vadd.f32 %v1421_v28, %v1405_v11  ;;  %v1465_v43 = vadd.f32 %v1457_v59, %v1445_v27  ;;  %947 = vst [vmem:[#allocation2 + $0xf8] sm:$0xff] %v8655_v6  ;;  %946 = vst [vmem:[#allocation2 + $0xf0] sm:$0xff] %v8657_v31  ;;  %v287_v28 = vld [vmem:[%s8289_s22 + $0x308] sm:$0xff] }
 0x11c   : > { %788 = vperm.xlu1 %7820, %v285_v32   ;;  %v1477_v29 = vmul.f32 %v11771_v18, %v8603_v55  ;;  %v1484_v58 = vadd.f32 %v1476_v41, %v1464_v38  ;;  %v1440_v25 = vmul.f32 %v11773_v16, %v8467_v62  ;;  %v1257_v47 = vmul.f32 %v11769_v20, %v1245_v54  ;;  %v1451_v55 = vld [vmem:[#allocation2 + $0x81] sm:$0xff] }
 0x11d   : > { %783 = vperm.xlu0 %7819, %v284_v2   ;;  %v1310_v40 = vmax.f32 %v1302_v33, 0.0  ;;  %v11778_v27 = vmax.f32 %v8529_v36, 0.0  ;;  %v1496_v53 = vmul.f32 %v11770_v19, %v8467_v62  ;;  %v8676_v5 = vmul.f32 %v11776_v13, %v8467_v62  ;;  %v8686_v36 = vpop.permute.xlu0 %473  ;;  %v1471_v41 = vld [vmem:[#allocation2 + $0x82] sm:$0xff] }
 0x11e   : > { %v8679_v11 = vadd.f32 %v1477_v29, %v1465_v43  ;;  %v1265_v59 = vadd.f32 %v1257_v47, %v8609_v52  ;;  %v1281_v32 = vmul.f32 %v11768_v21, %v1269_v30  ;;  %v1398_v12 = vmul.f32 %v11775_v14, %v1245_v54  ;;  %v8684_v49 = vpop.permute.xlu1 %478  ;;  %948 = vst [vmem:[#allocation2 + $0x100] sm:$0xff] %v8686_v36  ;;  %v7827_v33 = vld [vmem:[#allocation10 + $0x118] sm:$0xff]  }
 0x11f   : > { %v1313_v9 = vmax.f32 %v11778_v27, %v1309_v8  ;;  %v11779_v35 = vmax.f32 %v8555_v7, 0.0  ;;  %v8690_v62 = vadd.f32 %v1440_v25, %v1428_v60  ;;  %v1439_v38 = vmul.f32 %v11773_v16, %v8469_v48  ;;  %949 = vst [vmem:[#allocation2 + $0x108] sm:$0xff] %v8684_v49  ;;  %v7828_v8 = vld [vmem:[#allocation10 + $0xd8] sm:$0xff]   ;;  %v289_v25 = vld [vmem:[%s8289_s22 + $0x318] sm:$0xff]  ;;  %v288_v27 = vld [vmem:[%s8289_s22 + $0x310] sm:$0xff]  ;;  %7154 = vmatprep.subr.bf16.mxu0 %v7827_v33 }
 0x120   : > { %v1458_v52 = vmul.f32 %v11772_v17, %v1245_v54  ;;  %798 = vperm.xlu1 %7820, %v287_v28   ;;  %v8697_v7 = vadd.f32 %v1496_v53, %v1484_v58  ;;  %v1289_v43 = vadd.f32 %v1281_v32, %v1265_v59  ;;  %v1406_v60 = vadd.f32 %v1398_v12, %v8601_v24  ;;  %v1453_v33 = vld [vmem:[#allocation2 + $0x91] sm:$0xff] }
 0x121   : > { %v1314_v2 = vmax.f32 %v11779_v35, %v1310_v40  ;;  %1317 = vst [vmem:[#allocation4 + $0x8] sm:$0xff] %v1313_v9  ;;  %v1459_v29 = vmul.f32 %v11772_v17, %v1451_v55  ;;  %793 = vperm.xlu0 %7819, %v286_v37   ;;  %v1422_v54 = vmul.f32 %v11774_v15, %v1269_v30  ;;  %v8713_v59 = vpop.permute.xlu0 %483 }
 0x122   : > { %v1447_v47 = vadd.f32 %v1439_v38, %v8597_v1  ;;  %v1466_v40 = vadd.f32 %v1458_v52, %v1446_v45  ;;  %v1495_v28 = vmul.f32 %v11770_v19, %v8469_v48  ;;  %v1303_v58 = vadd.f32 %v11767_v22, %v1289_v43  ;;  %v8711_v37 = vpop.permute.xlu1 %488  ;;  %7155 = vmatpush3.bf16.msra.mxu0 %v7828_v8  ;;  %v1452_v52 = vld [vmem:[#allocation2 + $0x89] sm:$0xff] }
 0x123   : > { %1318 = vst [vmem:[#allocation4 + $0x10] sm:$0xff] %v1314_v2  ;;  %v1478_v9 = vmul.f32 %v11771_v18, %v1269_v30  ;;  %v1479_v24 = vmul.f32 %v11771_v18, %v1471_v41  ;;  %v1515_v53 = vmul.f32 %v11769_v20, %v1451_v55  ;;  %v1430_v1 = vadd.f32 %v1422_v54, %v1406_v60  ;;  %v291_v8 = vld [vmem:[%s8289_s22 + $0x328] sm:$0xff] }
 0x124   : > { %v1467_v45 = vadd.f32 %v1459_v29, %v1447_v47  ;;  %v1503_v32 = vadd.f32 %v1495_v28, %v8618_v39  ;;  %v1535_v12 = vmul.f32 %v11768_v21, %v1471_v41  ;;  %951 = vst [vmem:[#allocation2 + $0x118] sm:$0xff] %v8711_v37  ;;  %950 = vst [vmem:[#allocation2 + $0x110] sm:$0xff] %v8713_v59  ;;  %808 = vperm.xlu1 %7820, %v289_v25   ;;  %v290_v25 = vld [vmem:[%s8289_s22 + $0x320] sm:$0xff] }
 0x125   : > { %v1311_v30 = vmax.f32 %v1303_v58, 0.0  ;;  %v1486_v35 = vadd.f32 %v1478_v9, %v1466_v40  ;;  %v1619_v2 = vmul.f32 %v11776_v13, %v8469_v48  ;;  %v1635_v38 = vmul.f32 %v11775_v14, %v1451_v55  ;;  %803 = vperm.xlu0 %7819, %v288_v27   ;;  %v8737_v27 = vpop.permute.xlu0 %493 }
 0x126   : > { %v8723_v39 = vadd.f32 %v1479_v24, %v1467_v45  ;;  %v1523_v43 = vadd.f32 %v1515_v53, %v1503_v32  ;;  %v1659_v60 = vmul.f32 %v11774_v15, %v1471_v41  ;;  %v1442_v29 = vmul.f32 %v11773_v16, %v8494_v44  ;;  %v8735_v28 = vpop.permute.xlu1 %498  ;;  %11781 = vst [vmem:[#allocation34_spill] sm:$0xff] %v8737_v27  ;;  %v1472_v24 = vld [vmem:[#allocation2 + $0x8a] sm:$0xff]  ;;  %v1473_v53 = vld [vmem:[#allocation2 + $0x92] sm:$0xff] }
 0x127   : > { %v11780_v54 = vmax.f32 %v8590_v42, 0.0  ;;  %v1643_v40 = vadd.f32 %v1635_v38, %v1619_v2  ;;  %v1498_v48 = vmul.f32 %v11770_v19, %v8494_v44  ;;  %v1441_v55 = vmul.f32 %v11773_v16, %v8496_v46  ;;  %953 = vst [vmem:[#allocation2 + $0x128] sm:$0xff] %v8735_v28  ;;  %952 = vst [vmem:[#allocation2 + $0x120] sm:$0xff] %v8737_v27  ;;  %v7829_v2 = vld [vmem:[#allocation10 + $0x120] sm:$0xff]  }
 0x128   : > { %v1543_v41 = vadd.f32 %v1535_v12, %v1523_v43  ;;  %v8741_v58 = vmul.f32 %v11776_v13, %v8494_v44  ;;  %v1460_v42 = vmul.f32 %v11772_v17, %v1452_v52  ;;  %v1461_v9 = vmul.f32 %v11772_v17, %v1453_v33  ;;  %818 = vperm.xlu1 %7820, %v291_v8   ;;  %v7830_v38 = vld [vmem:[#allocation10 + $0xe0] sm:$0xff]  }
 0x129   : > { %v1315_v47 = vmax.f32 %v11780_v54, %v1311_v30  ;;  %v8747_v45 = vadd.f32 %v1659_v60, %v1643_v40  ;;  %v8749_v32 = vadd.f32 %v1442_v29, %v1430_v1  ;;  %v8751_v12 = vadd.f32 %v1498_v48, %v1486_v35  ;;  %813 = vperm.xlu0 %7819, %v290_v25   ;;  %v293_v30 = vld [vmem:[%s8289_s22 + $0x338] sm:$0xff]  ;;  %v292_v1 = vld [vmem:[%s8289_s22 + $0x330] sm:$0xff]  ;;  %v504_v40 = vpop.permute.xlu0 %503 }
 0x12a   : > { %v1449_v44 = vadd.f32 %v1441_v55, %v8660_v61  ;;  %v8756_v43 = vadd.f32 %v11767_v22, %v1543_v41  ;;  %v1468_v54 = vadd.f32 %v1460_v42, %v8690_v62  ;;  %v1497_v8 = vmul.f32 %v11770_v19, %v8496_v46  ;;  %7156 = vmatprep.subr.bf16.mxu0 %v7829_v2 }
 0x12b   : > { %1319 = vst [vmem:[#allocation4 + $0x18] sm:$0xff] %v1315_v47  ;;  %v1516_v60 = vmul.f32 %v11769_v20, %v1452_v52  ;;  %v1480_v35 = vmul.f32 %v11771_v18, %v1472_v24  ;;  %v1481_v61 = vmul.f32 %v11771_v18, %v1473_v53  ;;  %v1517_v25 = vmul.f32 %v11769_v20, %v1453_v33  ;;  %v8766_v47 = vpop.permute.xlu1 %508 }
 0x12c   : > { %v1469_v29 = vadd.f32 %v1461_v9, %v1449_v44  ;;  %11782 = vst [vmem:[#allocation35_spill] sm:$0xff] %v8766_v47  ;;  %v1505_v62 = vadd.f32 %v1497_v8, %v8679_v11  ;;  %v1536_v55 = vmul.f32 %v11768_v21, %v1472_v24  ;;  %955 = vst [vmem:[#allocation2 + $0x138] sm:$0xff] %v8766_v47  ;;  %828 = vperm.xlu1 %7820, %v293_v30   ;;  %v1454_v11 = vld [vmem:[#allocation2 + $0x99] sm:$0xff] }
 0x12d   : > { %v1524_v48 = vadd.f32 %v1516_v60, %v8697_v7  ;;  %954 = vst [vmem:[#allocation2 + $0x130] sm:$0xff] %v504_v40  ;;  %7157 = vmatpush3.bf16.msra.mxu0 %v7830_v38  ;;  %v1537_v41 = vmul.f32 %v11768_v21, %v1473_v53  ;;  %v1621_v42 = vmul.f32 %v11776_v13, %v8496_v46  ;;  %v295_v7 = vld [vmem:[%s8289_s22 + $0x348] sm:$0xff]  ;;  %v1559_v2 = vmax.f32 %v8756_v43, 0.0  ;;  %v294_v40 = vld [vmem:[%s8289_s22 + $0x340] sm:$0xff] }
 0x12e   : > { %v1636_v9 = vmul.f32 %v11775_v14, %v1452_v52  ;;  %v1637_v44 = vmul.f32 %v11775_v14, %v1453_v33  ;;  %823 = vperm.xlu0 %7819, %v292_v1   ;;  %v1488_v8 = vadd.f32 %v1480_v35, %v1468_v54  ;;  %v1525_v60 = vadd.f32 %v1517_v25, %v1505_v62  ;;  %v1474_v47 = vld [vmem:[#allocation2 + $0x9a] sm:$0xff]  ;;  %v514_v33 = vpop.permute.xlu0 %513 }
 0x12f   : > { %v1544_v26 = vadd.f32 %v1536_v55, %v1524_v48  ;;  %v1660_v23 = vmul.f32 %v11774_v15, %v1472_v24  ;;  %v1661_v46 = vmul.f32 %v11774_v15, %v1473_v53  ;;  %v519_v52 = vpop.permute.xlu1 %518  ;;  %v1500_v54 = vmul.f32 %v11770_v19, %v8519_v4  ;;  %956 = vst [vmem:[#allocation2 + $0x140] sm:$0xff] %v514_v33  ;;  %v297_v62 = vld [vmem:[%s8289_s22 + $0x358] sm:$0xff] }
 0x130   : > { %v1644_v30 = vadd.f32 %v1636_v9, %v8676_v5  ;;  %v1645_v38 = vadd.f32 %v1637_v44, %v1621_v42  ;;  %v1545_v27 = vadd.f32 %v1537_v41, %v1525_v60  ;;  %v1462_v35 = vmul.f32 %v11772_v17, %v1454_v11  ;;  %v1511_v5 = vld [vmem:[#allocation2 + $0xa1] sm:$0xff]  ;;  %957 = vst [vmem:[#allocation2 + $0x148] sm:$0xff] %v519_v52  ;;  %v7831_v48 = vld [vmem:[#allocation10 + $0x128] sm:$0xff]  }
 0x131   : > { %v8784_v1 = vadd.f32 %v11767_v22, %v1544_v26  ;;  %838 = vperm.xlu1 %7820, %v295_v7   ;;  %v8789_v24 = vadd.f32 %v1481_v61, %v1469_v29  ;;  %v8793_v25 = vmul.f32 %v11776_v13, %v8519_v4  ;;  %v1680_v26 = vmul.f32 %v11773_v16, %v8519_v4  ;;  %v7832_v61 = vld [vmem:[#allocation10 + $0xe8] sm:$0xff]   ;;  %v1531_v60 = vld [vmem:[#allocation2 + $0xa2] sm:$0xff] }
 0x132   : > { %v1668_v53 = vadd.f32 %v1660_v23, %v1644_v30  ;;  %833 = vperm.xlu0 %7819, %v294_v40   ;;  %v8798_v55 = vadd.f32 %v1661_v46, %v1645_v38  ;;  %v8800_v41 = vadd.f32 %v1500_v54, %v1488_v8  ;;  %v1482_v42 = vmul.f32 %v11771_v18, %v1474_v47  ;;  %v296_v23 = vld [vmem:[%s8289_s22 + $0x350] sm:$0xff]  ;;  %v524_v8 = vpop.permute.xlu0 %523 }
 0x133   : > { %v1499_v29 = vmul.f32 %v11770_v19, %v8521_v50  ;;  %v8807_v9 = vadd.f32 %v11767_v22, %v1545_v27  ;;  %v1470_v44 = vadd.f32 %v1462_v35, %v8749_v32  ;;  %v1518_v4 = vmul.f32 %v11769_v20, %v1454_v11  ;;  %v529_v40 = vpop.permute.xlu1 %528  ;;  %7158 = vmatprep.subr.bf16.mxu0 %v7831_v48  ;;  %v299_v35 = vld [vmem:[%s8289_s22 + $0x368] sm:$0xff]  ;;  %v298_v48 = vld [vmem:[%s8289_s22 + $0x360] sm:$0xff] }
 0x134   : > { %v1519_v7 = vmul.f32 %v11769_v20, %v1511_v5  ;;  %v8813_v38 = vadd.f32 %v1680_v26, %v1668_v53  ;;  %v1538_v27 = vmul.f32 %v11768_v21, %v1474_v47  ;;  %959 = vst [vmem:[#allocation2 + $0x158] sm:$0xff] %v529_v40  ;;  %958 = vst [vmem:[#allocation2 + $0x150] sm:$0xff] %v524_v8  ;;  %7159 = vmatpush3.bf16.msra.mxu0 %v7832_v61  ;;  %v1512_v30 = vld [vmem:[#allocation2 + $0xa9] sm:$0xff] }
 0x135   : > { %v1507_v46 = vadd.f32 %v1499_v29, %v8723_v39  ;;  %848 = vperm.xlu1 %7820, %v297_v62   ;;  %v1526_v32 = vadd.f32 %v1518_v4, %v8751_v12  ;;  %v1623_v52 = vmul.f32 %v11776_v13, %v8521_v50  ;;  %v1638_v33 = vmul.f32 %v11775_v14, %v1454_v11 }
 0x136   : > { %v1639_v54 = vmul.f32 %v11775_v14, %v1511_v5  ;;  %843 = vperm.xlu0 %7819, %v296_v23   ;;  %v1539_v39 = vmul.f32 %v11768_v21, %v1531_v60  ;;  %v1679_v26 = vmul.f32 %v11773_v16, %v8521_v50  ;;  %v1699_v62 = vmul.f32 %v11772_v17, %v1511_v5  ;;  %v534_v40 = vpop.permute.xlu0 %533  ;;  %v1513_v50 = vld [vmem:[#allocation2 + $0xb1] sm:$0xff] }
 0x137   : > { %v1527_v53 = vadd.f32 %v1519_v7, %v1507_v46  ;;  %v1546_v29 = vadd.f32 %v1538_v27, %v1526_v32  ;;  %v1646_v12 = vadd.f32 %v1638_v33, %v8741_v58  ;;  %v1662_v4 = vmul.f32 %v11774_v15, %v1474_v47  ;;  %v539_v11 = vpop.permute.xlu1 %538  ;;  %960 = vst [vmem:[#allocation2 + $0x160] sm:$0xff] %v534_v40  ;;  %v301_v32 = vld [vmem:[%s8289_s22 + $0x378] sm:$0xff]  ;;  %v1532_v33 = vld [vmem:[#allocation2 + $0xaa] sm:$0xff] }
 0x138   : > { %v1647_v61 = vadd.f32 %v1639_v54, %v1623_v52  ;;  %v1663_v7 = vmul.f32 %v11774_v15, %v1531_v60  ;;  %v1687_v8 = vadd.f32 %v1679_v26, %v8747_v45  ;;  %v1490_v46 = vadd.f32 %v1482_v42, %v1470_v44  ;;  %961 = vst [vmem:[#allocation2 + $0x168] sm:$0xff] %v539_v11  ;;  %v300_v54 = vld [vmem:[%s8289_s22 + $0x370] sm:$0xff] }
 0x139   : > { %v1547_v23 = vadd.f32 %v1539_v39, %v1527_v53  ;;  %858 = vperm.xlu1 %7820, %v299_v35   ;;  %v1561_v58 = vmax.f32 %v8807_v9, 0.0  ;;  %v8834_v5 = vadd.f32 %v11767_v22, %v1546_v29  ;;  %v1719_v47 = vmul.f32 %v11771_v18, %v1531_v60  ;;  %v305_v9 = vld [vmem:[%s8289_s22 + $0x398] sm:$0xff] }
 0x13a   : > { %v1502_v27 = vmul.f32 %v11770_v19, %v8550_v63  ;;  %853 = vperm.xlu0 %7819, %v298_v48   ;;  %v1670_v42 = vadd.f32 %v1662_v4, %v1646_v12  ;;  %v8841_v44 = vadd.f32 %v1663_v7, %v1647_v61  ;;  %v1707_v52 = vadd.f32 %v1699_v62, %v1687_v8  ;;  %v544_v48 = vpop.permute.xlu0 %543  ;;  %v1533_v4 = vld [vmem:[#allocation2 + $0xb2] sm:$0xff]  ;;  %v7833_v8 = vld [vmem:[#allocation10 + $0x130] sm:$0xff]  }
 0x13b   : > { %v1555_v45 = vadd.f32 %v11767_v22, %v1547_v23  ;;  %v8846_v35 = vmul.f32 %v11776_v13, %v8550_v63  ;;  %v1501_v60 = vmul.f32 %v11770_v19, %v8552_v0  ;;  %v1520_v53 = vmul.f32 %v11769_v20, %v1512_v30  ;;  %v549_v26 = vpop.permute.xlu1 %548  ;;  %962 = vst [vmem:[#allocation2 + $0x170] sm:$0xff] %v544_v48 }
 0x13c   : > { %v1521_v39 = vmul.f32 %v11769_v20, %v1513_v50  ;;  %v1562_v29 = vmax.f32 %v8834_v5, 0.0  ;;  %v8853_v61 = vadd.f32 %v1502_v27, %v1490_v46  ;;  %v1682_v62 = vmul.f32 %v11773_v16, %v8550_v63  ;;  %963 = vst [vmem:[#allocation2 + $0x178] sm:$0xff] %v549_v26  ;;  %7160 = vmatprep.subr.bf16.mxu0 %v7833_v8 }
 0x13d   : > { %v1563_v12 = vmax.f32 %v1555_v45, 0.0  ;;  %868 = vperm.xlu1 %7820, %v301_v32   ;;  %v8857_v11 = vadd.f32 %v1719_v47, %v1707_v52  ;;  %v1509_v40 = vadd.f32 %v1501_v60, %v8789_v24  ;;  %v1528_v23 = vadd.f32 %v1520_v53, %v8800_v41  ;;  %v7834_v47 = vld [vmem:[#allocation10 + $0xf0] sm:$0xff]   ;;  %v8868_v45 = vld [vmem:[#allocation4] ss:$2 sm:$0xff]  ;;  %v8870_v24 = vld [vmem:[#allocation4 + $0x1] ss:$2 sm:$0xff] }
 0x13e   : > { %v1540_v7 = vmul.f32 %v11768_v21, %v1532_v33  ;;  %863 = vperm.xlu0 %7819, %v300_v54   ;;  %v1625_v63 = vmul.f32 %v11776_v13, %v8552_v0  ;;  %v1640_v27 = vmul.f32 %v11775_v14, %v1512_v30  ;;  %v1641_v32 = vmul.f32 %v11775_v14, %v1513_v50  ;;  %v554_v60 = vpop.permute.xlu0 %553 }
 0x13f   : > { %v1567_v46 = vmax.f32 %v1559_v2, %v1563_v12  ;;  %v1529_v41 = vadd.f32 %v1521_v39, %v1509_v40  ;;  %v1541_v52 = vmul.f32 %v11768_v21, %v1533_v4  ;;  %v1681_v43 = vmul.f32 %v11773_v16, %v8552_v0  ;;  %v559_v2 = vpop.permute.xlu1 %558  ;;  %964 = vst [vmem:[#allocation2 + $0x180] sm:$0xff] %v554_v60  ;;  %v303_v39 = vld [vmem:[%s8289_s22 + $0x388] sm:$0xff]  ;;  %v302_v40 = vld [vmem:[%s8289_s22 + $0x380] sm:$0xff] }
 0x140   : > { %v1548_v54 = vadd.f32 %v1540_v7, %v1528_v23  ;;  %v1648_v53 = vadd.f32 %v1640_v27, %v8793_v25  ;;  %v1649_v26 = vadd.f32 %v1641_v32, %v1625_v63  ;;  %v1700_v48 = vmul.f32 %v11772_v17, %v1512_v30  ;;  %965 = vst [vmem:[#allocation2 + $0x188] sm:$0xff] %v559_v2 }
 0x141   : > { %1571 = vst [vmem:[#allocation4] sm:$0xff] %v1567_v46  ;;  %v1701_v12 = vmul.f32 %v11772_v17, %v1513_v50  ;;  %7161 = vmatpush3.bf16.msra.mxu0 %v7834_v47  ;;  %v1549_v23 = vadd.f32 %v1541_v52, %v1529_v41  ;;  %v1664_v0 = vmul.f32 %v11774_v15, %v1532_v33  ;;  %v1514_v46 = vld [vmem:[#allocation2 + $0xb9] sm:$0xff] }
 0x142   : > { %v1556_v7 = vadd.f32 %v11767_v22, %v1548_v54  ;;  %v1689_v8 = vadd.f32 %v1681_v43, %v8798_v55  ;;  %878 = vperm.xlu1 %7820, %v303_v39   ;;  %v1690_v25 = vadd.f32 %v1682_v62, %v1670_v42  ;;  %v1665_v63 = vmul.f32 %v11774_v15, %v1533_v4  ;;  %v1534_v52 = vld [vmem:[#allocation2 + $0xba] sm:$0xff]  ;;  %v564_v2 = vpop.permute.xlu0 %563 }
 0x143   : > { %v1708_v30 = vadd.f32 %v1700_v48, %v8813_v38  ;;  %v1720_v50 = vmul.f32 %v11771_v18, %v1532_v33  ;;  %873 = vperm.xlu0 %7819, %v302_v40   ;;  %v1557_v27 = vadd.f32 %v11767_v22, %v1549_v23  ;;  %v1672_v47 = vadd.f32 %v1664_v0, %v1648_v53  ;;  %v569_v54 = vpop.permute.xlu1 %568  ;;  %v7835_v23 = vld [vmem:[#allocation10 + $0x138] sm:$0xff]  }
 0x144   : > { %v1564_v32 = vmax.f32 %v1556_v7, 0.0  ;;  %v1709_v41 = vadd.f32 %v1701_v12, %v1689_v8  ;;  %v8887_v60 = vadd.f32 %v1665_v63, %v1649_v26  ;;  %v1721_v55 = vmul.f32 %v11771_v18, %v1533_v4  ;;  %967 = vst [vmem:[#allocation2 + $0x198] sm:$0xff] %v569_v54  ;;  %966 = vst [vmem:[#allocation2 + $0x190] sm:$0xff] %v564_v2  ;;  %v1695_v12 = vld [vmem:[#allocation2 + $0xc1] sm:$0xff] }
 0x145   : > { %v1684_v42 = vmul.f32 %v11773_v16, %v8577_v56  ;;  %v1522_v38 = vmul.f32 %v11769_v20, %v1514_v46  ;;  %v1565_v33 = vmax.f32 %v1557_v27, 0.0  ;;  %v11783_v62 = vmax.f32 %v8784_v1, 0.0  ;;  %v8904_v1 = vld [vmem:[#allocation4 + $0x10] ss:$2 sm:$0x3f]  ;;  %7162 = vmatprep.subr.bf16.mxu0 %v7835_v23  ;;  %v1697_v23 = vld [vmem:[#allocation2 + $0xd1] sm:$0xff] }
 0x146   : > { %v1728_v53 = vadd.f32 %v1720_v50, %v1708_v30  ;;  %v1740_v48 = vmul.f32 %v11770_v19, %v8577_v56  ;;  %v8899_v26 = vmul.f32 %v11776_v13, %v8577_v56  ;;  %v1542_v39 = vmul.f32 %v11768_v21, %v1534_v52  ;;  %v8913_v8 = vld [vmem:[#allocation4 + $0x11] ss:$2 sm:$0x3f]  ;;  %888 = vperm.xlu1 %7820, %v305_v9  }
 0x147   : > { %v1568_v43 = vmax.f32 %v11783_v62, %v1564_v32  ;;  %v1530_v4 = vadd.f32 %v1522_v38, %v8853_v61  ;;  %v1642_v40 = vmul.f32 %v11775_v14, %v1514_v46  ;;  %v1569_v7 = vmax.f32 %v1561_v58, %v1565_v33  ;;  %v304_v58 = vld [vmem:[%s8289_s22 + $0x390] sm:$0xff]  ;;  %v7836_v2 = vld [vmem:[#allocation10 + $0xf8] sm:$0xff]  }
 0x148   : > { %v8908_v0 = vadd.f32 %v1721_v55, %v1709_v41  ;;  %v1683_v56 = vmul.f32 %v11773_v16, %v8579_v57  ;;  %v1702_v61 = vmul.f32 %v11772_v17, %v1514_v46  ;;  %v1666_v50 = vmul.f32 %v11774_v15, %v1534_v52  ;;  %v1715_v33 = vld [vmem:[#allocation2 + $0xc2] sm:$0xff]  ;;  %883 = vperm.xlu0 %7819, %v304_v58   ;;  %v1716_v58 = vld [vmem:[#allocation2 + $0xca] sm:$0xff] }
 0x149   : > { %1572 = vst [vmem:[#allocation4 + $0x8] sm:$0xff] %v1568_v43  ;;  %v1550_v63 = vadd.f32 %v1542_v39, %v1530_v4  ;;  %v1650_v30 = vadd.f32 %v1642_v40, %v8846_v35  ;;  %v1703_v27 = vmul.f32 %v11772_v17, %v1695_v12  ;;  %1573 = vst [vmem:[#allocation4 + $0x10] sm:$0xff] %v1569_v7  ;;  %7163 = vmatpush3.bf16.msra.mxu0 %v7836_v2  ;;  %v579_v7 = vpop.permute.xlu1 %578 }
 0x14a   : > { %v1691_v32 = vadd.f32 %v1683_v56, %v8841_v44  ;;  %v1710_v41 = vadd.f32 %v1702_v61, %v1690_v25  ;;  %v1722_v54 = vmul.f32 %v11771_v18, %v1534_v52  ;;  %v1739_v46 = vmul.f32 %v11770_v19, %v8579_v57  ;;  %969 = vst [vmem:[#allocation2 + $0x1a8] sm:$0xff] %v579_v7  ;;  %v1698_v7 = vld [vmem:[#allocation2 + $0xd9] sm:$0xff] }
 0x14b   : > { %v1692_v55 = vadd.f32 %v1684_v42, %v1672_v47  ;;  %v1558_v35 = vadd.f32 %v11767_v22, %v1550_v63  ;;  %v1674_v38 = vadd.f32 %v1666_v50, %v1650_v30  ;;  %v1759_v62 = vmul.f32 %v11769_v20, %v1695_v12  ;;  %v1696_v42 = vld [vmem:[#allocation2 + $0xc9] sm:$0xff] }
 0x14c   : > { %v1748_v43 = vadd.f32 %v1740_v48, %v1728_v53  ;;  %v1711_v4 = vadd.f32 %v1703_v27, %v1691_v32  ;;  %v1730_v39 = vadd.f32 %v1722_v54, %v1710_v41  ;;  %v1747_v44 = vadd.f32 %v1739_v46, %v8857_v11  ;;  %v1717_v32 = vld [vmem:[#allocation2 + $0xd2] sm:$0xff] }
 0x14d   : > { %v1566_v25 = vmax.f32 %v1558_v35, 0.0  ;;  %v1863_v52 = vmul.f32 %v11776_v13, %v8579_v57  ;;  %v1879_v40 = vmul.f32 %v11775_v14, %v1695_v12  ;;  %v1686_v47 = vmul.f32 %v11773_v16, %v8605_v51 }
 0x14e   : > { %v1723_v56 = vmul.f32 %v11771_v18, %v1715_v33  ;;  %v1767_v53 = vadd.f32 %v1759_v62, %v1747_v44  ;;  %v1779_v48 = vmul.f32 %v11768_v21, %v1715_v33  ;;  %v1742_v11 = vmul.f32 %v11770_v19, %v8605_v51 }
 0x14f   : > { %v1570_v57 = vmax.f32 %v1562_v29, %v1566_v25  ;;  %v1887_v61 = vadd.f32 %v1879_v40, %v1863_v52  ;;  %v1694_v12 = vadd.f32 %v1686_v47, %v1674_v38  ;;  %v1685_v63 = vmul.f32 %v11773_v16, %v8607_v3 }
 0x150   : > { %v1787_v30 = vadd.f32 %v1779_v48, %v1767_v53  ;;  %v1750_v50 = vadd.f32 %v1742_v11, %v1730_v39  ;;  %v1704_v27 = vmul.f32 %v11772_v17, %v1696_v42  ;;  %v1705_v9 = vmul.f32 %v11772_v17, %v1697_v23 }
 0x151   : > { %1574 = vst [vmem:[#allocation4 + $0x18] sm:$0xff] %v1570_v57  ;;  %v1731_v41 = vadd.f32 %v1723_v56, %v1711_v4  ;;  %v1903_v54 = vmul.f32 %v11774_v15, %v1715_v33  ;;  %v1866_v5 = vmul.f32 %v11776_v13, %v8605_v51  ;;  %v1693_v29 = vadd.f32 %v1685_v63, %v8887_v60 }
 0x152   : > { %v8947_v46 = vadd.f32 %v11767_v22, %v1787_v30  ;;  %v1712_v2 = vadd.f32 %v1704_v27, %v1692_v55  ;;  %v1741_v35 = vmul.f32 %v11770_v19, %v8607_v3  ;;  %v1760_v38 = vmul.f32 %v11769_v20, %v1696_v42  ;;  %v1718_v30 = vld [vmem:[#allocation2 + $0xda] sm:$0xff] }
 0x153   : > { %v1911_v62 = vadd.f32 %v1903_v54, %v1887_v61  ;;  %v1724_v39 = vmul.f32 %v11771_v18, %v1716_v58  ;;  %v1725_v4 = vmul.f32 %v11771_v18, %v1717_v32  ;;  %v1761_v33 = vmul.f32 %v11769_v20, %v1697_v23  ;;  %v1755_v27 = vld [vmem:[#allocation2 + $0xe1] sm:$0xff] }
 0x154   : > { %v1713_v44 = vadd.f32 %v1705_v9, %v1693_v29  ;;  %v1749_v51 = vadd.f32 %v1741_v35, %v8908_v0  ;;  %v1768_v60 = vadd.f32 %v1760_v38, %v1748_v43  ;;  %v1780_v25 = vmul.f32 %v11768_v21, %v1716_v58 }
 0x155   : > { %v1732_v52 = vadd.f32 %v1724_v39, %v1712_v2  ;;  %v1865_v55 = vmul.f32 %v11776_v13, %v8607_v3  ;;  %v1880_v40 = vmul.f32 %v11775_v14, %v1696_v42  ;;  %v1881_v47 = vmul.f32 %v11775_v14, %v1697_v23 }
 0x156   : > { %v1803_v56 = vmax.f32 %v8947_v46, 0.0  ;;  %v1769_v53 = vadd.f32 %v1761_v33, %v1749_v51  ;;  %v1781_v48 = vmul.f32 %v11768_v21, %v1717_v32  ;;  %v1788_v11 = vadd.f32 %v1780_v25, %v1768_v60 }
 0x157   : > { %v1888_v0 = vadd.f32 %v1880_v40, %v8899_v26  ;;  %v1889_v43 = vadd.f32 %v1881_v47, %v1865_v55  ;;  %v1904_v57 = vmul.f32 %v11774_v15, %v1716_v58  ;;  %v1744_v61 = vmul.f32 %v11770_v19, %v8635_v10 }
 0x158   : > { %v1789_v3 = vadd.f32 %v1781_v48, %v1769_v53  ;;  %v8968_v42 = vadd.f32 %v11767_v22, %v1788_v11  ;;  %v1905_v23 = vmul.f32 %v11774_v15, %v1717_v32  ;;  %v1706_v63 = vmul.f32 %v11772_v17, %v1698_v7 }
 0x159   : > { %v1733_v9 = vadd.f32 %v1725_v4, %v1713_v44  ;;  %v1912_v54 = vadd.f32 %v1904_v57, %v1888_v0  ;;  %v1752_v29 = vadd.f32 %v1744_v61, %v1732_v52  ;;  %v1924_v26 = vmul.f32 %v11773_v16, %v8635_v10  ;;  %v1775_v44 = vld [vmem:[#allocation2 + $0xe2] sm:$0xff] }
 0x15a   : > { %v8974_v58 = vadd.f32 %v1905_v23, %v1889_v43  ;;  %v8978_v2 = vmul.f32 %v11776_v13, %v8635_v10  ;;  %v1714_v35 = vadd.f32 %v1706_v63, %v1694_v12  ;;  %v1743_v32 = vmul.f32 %v11770_v19, %v8637_v34  ;;  %v1756_v23 = vld [vmem:[#allocation2 + $0xe9] sm:$0xff]  ;;  %v1757_v63 = vld [vmem:[#allocation2 + $0xf1] sm:$0xff] }
 0x15b   : > { %v8982_v38 = vadd.f32 %v1924_v26, %v1912_v54  ;;  %v1726_v39 = vmul.f32 %v11771_v18, %v1718_v30  ;;  %v1762_v4 = vmul.f32 %v11769_v20, %v1698_v7  ;;  %v1763_v33 = vmul.f32 %v11769_v20, %v1755_v27 }
 0x15c   : > { %v8988_v51 = vadd.f32 %v11767_v22, %v1789_v3  ;;  %v1804_v60 = vmax.f32 %v8968_v42, 0.0  ;;  %v1751_v10 = vadd.f32 %v1743_v32, %v1731_v41  ;;  %v1782_v12 = vmul.f32 %v11768_v21, %v1718_v30  ;;  %v589_v42 = vpop.permute.xlu1 %588 }
 0x15d   : > { %v1770_v25 = vadd.f32 %v1762_v4, %v1750_v50  ;;  %v1867_v52 = vmul.f32 %v11776_v13, %v8637_v34  ;;  %v1882_v55 = vmul.f32 %v11775_v14, %v1698_v7  ;;  %v1883_v40 = vmul.f32 %v11775_v14, %v1755_v27  ;;  %971 = vst [vmem:[#allocation2 + $0x1b8] sm:$0xff] %v589_v42  ;;  %v1960_v42 = vld [vmem:[#allocation2 + $0x10a] sm:$0xff] }
 0x15e   : > { %v1734_v47 = vadd.f32 %v1726_v39, %v1714_v35  ;;  %v1771_v53 = vadd.f32 %v1763_v33, %v1751_v10  ;;  %v1783_v48 = vmul.f32 %v11768_v21, %v1775_v44  ;;  %v1923_v11 = vmul.f32 %v11773_v16, %v8637_v34  ;;  %v1776_v39 = vld [vmem:[#allocation2 + $0xea] sm:$0xff] }
 0x15f   : > { %v1790_v0 = vadd.f32 %v1782_v12, %v1770_v25  ;;  %v1890_v43 = vadd.f32 %v1882_v55, %v1866_v5  ;;  %v1891_v41 = vadd.f32 %v1883_v40, %v1867_v52  ;;  %v1943_v57 = vmul.f32 %v11772_v17, %v1755_v27  ;;  %v1777_v55 = vld [vmem:[#allocation2 + $0xf2] sm:$0xff] }
 0x160   : > { %v1791_v50 = vadd.f32 %v1783_v48, %v1771_v53  ;;  %v1906_v61 = vmul.f32 %v11774_v15, %v1718_v30  ;;  %v1907_v3 = vmul.f32 %v11774_v15, %v1775_v44  ;;  %v1931_v7 = vadd.f32 %v1923_v11, %v1911_v62 }
 0x161   : > { %v1805_v54 = vmax.f32 %v8988_v51, 0.0  ;;  %v9004_v26 = vadd.f32 %v11767_v22, %v1790_v0  ;;  %v1963_v34 = vmul.f32 %v11771_v18, %v1775_v44  ;;  %v1746_v5 = vmul.f32 %v11770_v19, %v8655_v6 }
 0x162   : > { %v1799_v27 = vadd.f32 %v11767_v22, %v1791_v50  ;;  %v1914_v35 = vadd.f32 %v1906_v61, %v1890_v43  ;;  %v9010_v32 = vadd.f32 %v1907_v3, %v1891_v41  ;;  %v1951_v30 = vadd.f32 %v1943_v57, %v1931_v7  ;;  %v9032_v57 = vld [vmem:[#allocation4] ss:$2 sm:$0xff] }
 0x163   : > { %v9014_v62 = vmul.f32 %v11776_v13, %v8655_v6  ;;  %v1745_v4 = vmul.f32 %v11770_v19, %v8657_v31  ;;  %v1764_v33 = vmul.f32 %v11769_v20, %v1756_v23  ;;  %v1765_v44 = vmul.f32 %v11769_v20, %v1757_v63 }
 0x164   : > { %v1806_v10 = vmax.f32 %v9004_v26, 0.0  ;;  %v1807_v12 = vmax.f32 %v1799_v27, 0.0  ;;  %v1754_v25 = vadd.f32 %v1746_v5, %v1734_v47  ;;  %v1926_v52 = vmul.f32 %v11773_v16, %v8655_v6  ;;  %v9034_v6 = vld [vmem:[#allocation4 + $0x1] ss:$2 sm:$0xff] }
 0x165   : > { %v9023_v40 = vadd.f32 %v1963_v34, %v1951_v30  ;;  %v1753_v53 = vadd.f32 %v1745_v4, %v1733_v9  ;;  %v1772_v48 = vadd.f32 %v1764_v33, %v1752_v29  ;;  %v1784_v11 = vmul.f32 %v11768_v21, %v1776_v39  ;;  %v1758_v4 = vld [vmem:[#allocation2 + $0xf9] sm:$0xff] }
 0x166   : > { %v1811_v0 = vmax.f32 %v1803_v56, %v1807_v12  ;;  %v1869_v43 = vmul.f32 %v11776_v13, %v8657_v31  ;;  %v1884_v41 = vmul.f32 %v11775_v14, %v1756_v23  ;;  %v1885_v47 = vmul.f32 %v11775_v14, %v1757_v63  ;;  %v309_v26 = vld [vmem:[%s8289_s22 + $0x3b8] sm:$0xff] }
 0x167   : > { %v1773_v50 = vadd.f32 %v1765_v44, %v1753_v53  ;;  %v1785_v9 = vmul.f32 %v11768_v21, %v1777_v55  ;;  %v1792_v29 = vadd.f32 %v1784_v11, %v1772_v48  ;;  %v1925_v61 = vmul.f32 %v11773_v16, %v8657_v31  ;;  %v1778_v48 = vld [vmem:[#allocation2 + $0xfa] sm:$0xff] }
 0x168   : > { %1815 = vst [vmem:[#allocation4] sm:$0xff] %v1811_v0  ;;  %v1892_v46 = vadd.f32 %v1884_v41, %v8978_v2  ;;  %v1893_v56 = vadd.f32 %v1885_v47, %v1869_v43  ;;  %v1944_v3 = vmul.f32 %v11772_v17, %v1756_v23  ;;  %v1945_v7 = vmul.f32 %v11772_v17, %v1757_v63  ;;  %v1939_v41 = vld [vmem:[#allocation2 + $0x101] sm:$0xff]  ;;  %v574_v47 = vpop.permute.xlu0 %573 }
 0x169   : > { %v1793_v34 = vadd.f32 %v1785_v9, %v1773_v50  ;;  %v1800_v5 = vadd.f32 %v11767_v22, %v1792_v29  ;;  %v1908_v27 = vmul.f32 %v11774_v15, %v1776_v39  ;;  %v1933_v30 = vadd.f32 %v1925_v61, %v8974_v58  ;;  %v307_v50 = vld [vmem:[%s8289_s22 + $0x3a8] sm:$0xff]  ;;  %v306_v9 = vld [vmem:[%s8289_s22 + $0x3a0] sm:$0xff]  ;;  %968 = vst [vmem:[#allocation2 + $0x1a0] sm:$0xff] %v574_v47 }
 0x16a   : > { %v1934_v33 = vadd.f32 %v1926_v52, %v1914_v35  ;;  %v1909_v44 = vmul.f32 %v11774_v15, %v1777_v55  ;;  %v1952_v31 = vadd.f32 %v1944_v3, %v8982_v38  ;;  %v1964_v2 = vmul.f32 %v11771_v18, %v1776_v39  ;;  %898 = vperm.xlu1 %7820, %v307_v50  }
 0x16b   : > { %v1801_v23 = vadd.f32 %v11767_v22, %v1793_v34  ;;  %v1808_v63 = vmax.f32 %v1800_v5, 0.0  ;;  %v1916_v12 = vadd.f32 %v1908_v27, %v1892_v46  ;;  %v1953_v53 = vadd.f32 %v1945_v7, %v1933_v30  ;;  %v1959_v7 = vld [vmem:[#allocation2 + $0x102] sm:$0xff]  ;;  %893 = vperm.xlu0 %7819, %v306_v9  }
 0x16c   : > { %v9049_v11 = vadd.f32 %v1909_v44, %v1893_v56  ;;  %v1965_v58 = vmul.f32 %v11771_v18, %v1777_v55  ;;  %v1928_v35 = vmul.f32 %v11773_v16, %v8684_v49  ;;  %v1766_v52 = vmul.f32 %v11769_v20, %v1758_v4  ;;  %v9076_v34 = vld [vmem:[#allocation4 + $0x11] ss:$2 sm:$0x3f] }
 0x16d   : > { %v1809_v38 = vmax.f32 %v1801_v23, 0.0  ;;  %v1812_v39 = vmax.f32 %v1804_v60, %v1808_v63  ;;  %v1972_v0 = vadd.f32 %v1964_v2, %v1952_v31  ;;  %v1984_v43 = vmul.f32 %v11770_v19, %v8684_v49  ;;  %v584_v2 = vpop.permute.xlu0 %583 }
 0x16e   : > { %v9063_v55 = vmul.f32 %v11776_v13, %v8684_v49  ;;  %v1774_v29 = vadd.f32 %v1766_v52, %v1754_v25  ;;  %v1786_v61 = vmul.f32 %v11768_v21, %v1778_v48  ;;  %v1886_v46 = vmul.f32 %v11775_v14, %v1758_v4  ;;  %v9074_v25 = vld [vmem:[#allocation4 + $0x10] ss:$2 sm:$0x3f]  ;;  %970 = vst [vmem:[#allocation2 + $0x1b0] sm:$0xff] %v584_v2 }
 0x16f   : > { %v1813_v60 = vmax.f32 %v1805_v54, %v1809_v38  ;;  %1816 = vst [vmem:[#allocation4 + $0x8] sm:$0xff] %v1812_v39  ;;  %v9069_v56 = vadd.f32 %v1965_v58, %v1953_v53  ;;  %v1927_v3 = vmul.f32 %v11773_v16, %v8686_v36  ;;  %v1946_v49 = vmul.f32 %v11772_v17, %v1758_v4 }
 0x170   : > { %v1936_v5 = vadd.f32 %v1928_v35, %v1916_v12  ;;  %v1794_v27 = vadd.f32 %v1786_v61, %v1774_v29  ;;  %v1894_v51 = vadd.f32 %v1886_v46, %v9014_v62  ;;  %v1947_v54 = vmul.f32 %v11772_v17, %v1939_v41  ;;  %908 = vperm.xlu1 %7820, %v309_v26   ;;  %v11784_v26 = vld [vmem:[#allocation34_spill] sm:$0xff] }
 0x171   : > { %1817 = vst [vmem:[#allocation4 + $0x10] sm:$0xff] %v1813_v60  ;;  %v1910_v30 = vmul.f32 %v11774_v15, %v1778_v48  ;;  %v1935_v44 = vadd.f32 %v1927_v3, %v9010_v32  ;;  %v1954_v31 = vadd.f32 %v1946_v49, %v1934_v33  ;;  %v1983_v4 = vmul.f32 %v11770_v19, %v8686_v36  ;;  %v594_v29 = vpop.permute.xlu0 %593 }
 0x172   : > { %v1992_v23 = vadd.f32 %v1984_v43, %v1972_v0  ;;  %v1802_v63 = vadd.f32 %v11767_v22, %v1794_v27  ;;  %v1966_v12 = vmul.f32 %v11771_v18, %v1778_v48  ;;  %v2003_v53 = vmul.f32 %v11769_v20, %v1939_v41  ;;  %v1940_v0 = vld [vmem:[#allocation2 + $0x109] sm:$0xff]  ;;  %v1941_v43 = vld [vmem:[#allocation2 + $0x111] sm:$0xff]  ;;  %972 = vst [vmem:[#allocation2 + $0x1c0] sm:$0xff] %v594_v29 }
 0x173   : > { %v1918_v62 = vadd.f32 %v1910_v30, %v1894_v51  ;;  %v1955_v58 = vadd.f32 %v1947_v54, %v1935_v44  ;;  %v1967_v35 = vmul.f32 %v11771_v18, %v1959_v7  ;;  %v1991_v52 = vadd.f32 %v1983_v4, %v9023_v40  ;;  %v599_v40 = vpop.permute.xlu1 %598  ;;  %v1961_v27 = vld [vmem:[#allocation2 + $0x112] sm:$0xff] }
 0x174   : > { %v1810_v32 = vmax.f32 %v1802_v63, 0.0  ;;  %v1974_v33 = vadd.f32 %v1966_v12, %v1954_v31  ;;  %v2107_v38 = vmul.f32 %v11776_v13, %v8686_v36  ;;  %v2123_v39 = vmul.f32 %v11775_v14, %v1939_v41  ;;  %973 = vst [vmem:[#allocation2 + $0x1c8] sm:$0xff] %v599_v40 }
 0x175   : > { %v2011_v47 = vadd.f32 %v2003_v53, %v1991_v52  ;;  %v2023_v48 = vmul.f32 %v11768_v21, %v1959_v7  ;;  %v2147_v50 = vmul.f32 %v11774_v15, %v1959_v7  ;;  %v1930_v9 = vmul.f32 %v11773_v16, %v8711_v37 }
 0x176   : > { %v1814_v61 = vmax.f32 %v1806_v10, %v1810_v32  ;;  %v2131_v36 = vadd.f32 %v2123_v39, %v2107_v38  ;;  %v1986_v41 = vmul.f32 %v11770_v19, %v8711_v37  ;;  %v1929_v46 = vmul.f32 %v11773_v16, %v8713_v59  ;;  %v308_v10 = vld [vmem:[%s8289_s22 + $0x3b0] sm:$0xff]  ;;  %v1942_v39 = vld [vmem:[#allocation2 + $0x119] sm:$0xff] }
 0x177   : > { %v9102_v60 = vadd.f32 %v1967_v35, %v1955_v58  ;;  %v2031_v3 = vadd.f32 %v2023_v48, %v2011_v47  ;;  %v1948_v49 = vmul.f32 %v11772_v17, %v1940_v0  ;;  %v1949_v7 = vmul.f32 %v11772_v17, %v1941_v43  ;;  %903 = vperm.xlu0 %7819, %v308_v10  }
 0x178   : > { %1818 = vst [vmem:[#allocation4 + $0x18] sm:$0xff] %v1814_v61  ;;  %v1938_v51 = vadd.f32 %v1930_v9, %v1918_v62  ;;  %v1994_v54 = vadd.f32 %v1986_v41, %v1974_v33  ;;  %v9110_v30 = vmul.f32 %v11776_v13, %v8711_v37  ;;  %v1937_v44 = vadd.f32 %v1929_v46, %v9049_v11  ;;  %v1999_v41 = vld [vmem:[#allocation2 + $0x121] sm:$0xff] }
 0x179   : > { %v9114_v31 = vadd.f32 %v11767_v22, %v2031_v3  ;;  %v1956_v4 = vadd.f32 %v1948_v49, %v1936_v5  ;;  %v1985_v2 = vmul.f32 %v11770_v19, %v8713_v59  ;;  %v2004_v63 = vmul.f32 %v11769_v20, %v1940_v0 }
 0x17a   : > { %v9119_v12 = vadd.f32 %v2147_v50, %v2131_v36  ;;  %v1968_v53 = vmul.f32 %v11771_v18, %v1960_v42  ;;  %v1969_v37 = vmul.f32 %v11771_v18, %v1961_v27  ;;  %v2005_v62 = vmul.f32 %v11769_v20, %v1941_v43  ;;  %v1962_v36 = vld [vmem:[#allocation2 + $0x11a] sm:$0xff] }
 0x17b   : > { %v1957_v11 = vadd.f32 %v1949_v7, %v1937_v44  ;;  %v1993_v58 = vadd.f32 %v1985_v2, %v9069_v56  ;;  %v2012_v35 = vadd.f32 %v2004_v63, %v1992_v23  ;;  %v2024_v5 = vmul.f32 %v11768_v21, %v1960_v42  ;;  %v310_v44 = vld [vmem:[%s8289_s22 + $0x3c0] sm:$0xff]  ;;  %v604_v2 = vpop.permute.xlu0 %603 }
 0x17c   : > { %v2025_v52 = vmul.f32 %v11768_v21, %v1961_v27  ;;  %v2109_v32 = vmul.f32 %v11776_v13, %v8713_v59  ;;  %v2124_v33 = vmul.f32 %v11775_v14, %v1940_v0  ;;  %v2125_v38 = vmul.f32 %v11775_v14, %v1941_v43  ;;  %913 = vperm.xlu0 %7819, %v310_v44  }
 0x17d   : > { %v2047_v47 = vmax.f32 %v9114_v31, 0.0  ;;  %v1976_v48 = vadd.f32 %v1968_v53, %v1956_v4  ;;  %v2013_v50 = vadd.f32 %v2005_v62, %v1993_v58  ;;  %v2032_v9 = vadd.f32 %v2024_v5, %v2012_v35  ;;  %v609_v4 = vpop.permute.xlu1 %608  ;;  %974 = vst [vmem:[#allocation2 + $0x1d0] sm:$0xff] %v604_v2 }
 0x17e   : > { %v2132_v56 = vadd.f32 %v2124_v33, %v9063_v55  ;;  %v2133_v23 = vadd.f32 %v2125_v38, %v2109_v32  ;;  %v2148_v40 = vmul.f32 %v11774_v15, %v1960_v42  ;;  %v2149_v29 = vmul.f32 %v11774_v15, %v1961_v27  ;;  %975 = vst [vmem:[#allocation2 + $0x1d8] sm:$0xff] %v609_v4 }
 0x17f   : > { %v2033_v61 = vadd.f32 %v2025_v52, %v2013_v50  ;;  %v9136_v59 = vadd.f32 %v11767_v22, %v2032_v9  ;;  %v1988_v0 = vmul.f32 %v11770_v19, %v8735_v28  ;;  %v1950_v43 = vmul.f32 %v11772_v17, %v1942_v39  ;;  %v7942_v52 = vld [vmem:[#allocation2 + $0x120] sm:$0xff] }
 0x180   : > { %v9141_v46 = vadd.f32 %v1969_v37, %v1957_v11  ;;  %v2156_v55 = vadd.f32 %v2148_v40, %v2132_v56  ;;  %v9145_v42 = vmul.f32 %v11776_v13, %v8735_v28  ;;  %v2168_v3 = vmul.f32 %v11773_v16, %v8735_v28  ;;  %v2019_v28 = vld [vmem:[#allocation2 + $0x122] sm:$0xff] }
 0x181   : > { %v9149_v49 = vadd.f32 %v2149_v29, %v2133_v23  ;;  %v1996_v7 = vadd.f32 %v1988_v0, %v1976_v48  ;;  %v1958_v27 = vadd.f32 %v1950_v43, %v1938_v51  ;;  %v1987_v10 = vmul.f32 %v11770_v19, %v11784_v26  ;;  %v619_v23 = vpop.permute.xlu1 %618 }
 0x182   : > { %v9155_v63 = vadd.f32 %v11767_v22, %v2033_v61  ;;  %v1970_v53 = vmul.f32 %v11771_v18, %v1962_v36  ;;  %v2006_v37 = vmul.f32 %v11769_v20, %v1942_v39  ;;  %v2007_v62 = vmul.f32 %v11769_v20, %v1999_v41  ;;  %977 = vst [vmem:[#allocation2 + $0x1e8] sm:$0xff] %v619_v23 }
 0x183   : > { %v2048_v51 = vmax.f32 %v9136_v59, 0.0  ;;  %v9161_v11 = vadd.f32 %v2168_v3, %v2156_v55  ;;  %v1995_v58 = vadd.f32 %v1987_v10, %v9102_v60  ;;  %v2026_v35 = vmul.f32 %v11768_v21, %v1962_v36  ;;  %v2000_v55 = vld [vmem:[#allocation2 + $0x129] sm:$0xff]  ;;  %v2001_v3 = vld [vmem:[#allocation2 + $0x131] sm:$0xff]  ;;  %v7946_v59 = vld [vmem:[#allocation2 + $0x140] sm:$0xff] }
 0x184   : > { %v2014_v5 = vadd.f32 %v2006_v37, %v1994_v54  ;;  %v2111_v32 = vmul.f32 %v7942_v52, %v11776_v13  ;;  %v2126_v33 = vmul.f32 %v11775_v14, %v1942_v39  ;;  %v2127_v38 = vmul.f32 %v11775_v14, %v1999_v41  ;;  %v11785_v10 = vld [vmem:[#allocation35_spill] sm:$0xff] }
 0x185   : > { %v1978_v48 = vadd.f32 %v1970_v53, %v1958_v27  ;;  %v2015_v50 = vadd.f32 %v2007_v62, %v1995_v58  ;;  %v2027_v9 = vmul.f32 %v11768_v21, %v2019_v28  ;;  %v2167_v56 = vmul.f32 %v7942_v52, %v11773_v16  ;;  %v2020_v53 = vld [vmem:[#allocation2 + $0x12a] sm:$0xff] }
 0x186   : > { %v2034_v40 = vadd.f32 %v2026_v35, %v2014_v5  ;;  %v2134_v60 = vadd.f32 %v2126_v33, %v9110_v30  ;;  %v2135_v29 = vadd.f32 %v2127_v38, %v2111_v32  ;;  %v2187_v54 = vmul.f32 %v11772_v17, %v1999_v41  ;;  %v7944_v62 = vld [vmem:[#allocation2 + $0x130] sm:$0xff] }
 0x187   : > { %v2035_v61 = vadd.f32 %v2027_v9, %v2015_v50  ;;  %v2150_v0 = vmul.f32 %v11774_v15, %v1962_v36  ;;  %v2151_v39 = vmul.f32 %v11774_v15, %v2019_v28  ;;  %v2175_v43 = vadd.f32 %v2167_v56, %v9119_v12  ;;  %v7943_v12 = vld [vmem:[#allocation2 + $0x138] sm:$0xff] }
 0x188   : > { %v2049_v27 = vmax.f32 %v9155_v63, 0.0  ;;  %v9177_v26 = vadd.f32 %v11767_v22, %v2034_v40  ;;  %v2207_v30 = vmul.f32 %v11771_v18, %v2019_v28  ;;  %v1990_v41 = vmul.f32 %v11770_v19, %v11785_v10  ;;  %v2021_v38 = vld [vmem:[#allocation2 + $0x132] sm:$0xff] }
 0x189   : > { %v2043_v44 = vadd.f32 %v11767_v22, %v2035_v61  ;;  %v2158_v4 = vadd.f32 %v2150_v0, %v2134_v60  ;;  %v9183_v36 = vadd.f32 %v2151_v39, %v2135_v29  ;;  %v2195_v2 = vadd.f32 %v2187_v54, %v2175_v43  ;;  %v9204_v61 = vld [vmem:[#allocation4 + $0x1] ss:$2 sm:$0xff] }
 0x18a   : > { %v9186_v37 = vmul.f32 %v7943_v12, %v11776_v13  ;;  %v1989_v58 = vmul.f32 %v7944_v62, %v11770_v19  ;;  %v2008_v35 = vmul.f32 %v11769_v20, %v2000_v55  ;;  %v2009_v28 = vmul.f32 %v11769_v20, %v2001_v3 }
 0x18b   : > { %v2050_v5 = vmax.f32 %v9177_v26, 0.0  ;;  %v2051_v52 = vmax.f32 %v2043_v44, 0.0  ;;  %v1998_v32 = vadd.f32 %v1990_v41, %v1978_v48  ;;  %v2170_v33 = vmul.f32 %v7943_v12, %v11773_v16  ;;  %v9202_v48 = vld [vmem:[#allocation4] ss:$2 sm:$0xff] }
 0x18c   : > { %v9193_v50 = vadd.f32 %v2207_v30, %v2195_v2  ;;  %v1997_v9 = vadd.f32 %v1989_v58, %v9141_v46  ;;  %v2016_v56 = vadd.f32 %v2008_v35, %v1996_v7  ;;  %v2028_v23 = vmul.f32 %v11768_v21, %v2020_v53  ;;  %v2002_v12 = vld [vmem:[#allocation2 + $0x139] sm:$0xff] }
 0x18d   : > { %v2055_v40 = vmax.f32 %v2047_v47, %v2051_v52  ;;  %v2113_v60 = vmul.f32 %v7944_v62, %v11776_v13  ;;  %v2128_v29 = vmul.f32 %v11775_v14, %v2000_v55  ;;  %v2129_v54 = vmul.f32 %v11775_v14, %v2001_v3 }
 0x18e   : > { %v2017_v0 = vadd.f32 %v2009_v28, %v1997_v9  ;;  %v2029_v39 = vmul.f32 %v11768_v21, %v2021_v38  ;;  %v2036_v46 = vadd.f32 %v2028_v23, %v2016_v56  ;;  %v2169_v7 = vmul.f32 %v7944_v62, %v11773_v16  ;;  %v2022_v9 = vld [vmem:[#allocation2 + $0x13a] sm:$0xff] }
 0x18f   : > { %2059 = vst [vmem:[#allocation4] sm:$0xff] %v2055_v40  ;;  %v2136_v31 = vadd.f32 %v2128_v29, %v9145_v42  ;;  %v2137_v47 = vadd.f32 %v2129_v54, %v2113_v60  ;;  %v2188_v43 = vmul.f32 %v11772_v17, %v2000_v55  ;;  %v2189_v30 = vmul.f32 %v11772_v17, %v2001_v3  ;;  %v7945_v40 = vld [vmem:[#allocation2 + $0x148] sm:$0xff] }
 0x190   : > { %v2037_v10 = vadd.f32 %v2029_v39, %v2017_v0  ;;  %v2044_v41 = vadd.f32 %v11767_v22, %v2036_v46  ;;  %v2152_v44 = vmul.f32 %v11774_v15, %v2020_v53  ;;  %v2177_v2 = vadd.f32 %v2169_v7, %v9149_v49  ;;  %v2183_v29 = vld [vmem:[#allocation2 + $0x141] sm:$0xff] }
 0x191   : > { %v2178_v58 = vadd.f32 %v2170_v33, %v2158_v4  ;;  %v2153_v35 = vmul.f32 %v11774_v15, %v2021_v38  ;;  %v2196_v62 = vadd.f32 %v2188_v43, %v9161_v11  ;;  %v2208_v42 = vmul.f32 %v11771_v18, %v2020_v53  ;;  %v9237_v43 = vld [vmem:[#allocation4 + $0x10] ss:$2 sm:$0x3f] }
 0x192   : > { %v2045_v28 = vadd.f32 %v11767_v22, %v2037_v10  ;;  %v2052_v55 = vmax.f32 %v2044_v41, 0.0  ;;  %v2160_v52 = vadd.f32 %v2152_v44, %v2136_v31  ;;  %v2197_v3 = vadd.f32 %v2189_v30, %v2177_v2  ;;  %v9239_v30 = vld [vmem:[#allocation4 + $0x11] ss:$2 sm:$0x3f] }
 0x193   : > { %v9218_v56 = vadd.f32 %v2153_v35, %v2137_v47  ;;  %v2209_v23 = vmul.f32 %v11771_v18, %v2021_v38  ;;  %v2172_v49 = vmul.f32 %v7945_v40, %v11773_v16  ;;  %v2010_v4 = vmul.f32 %v11769_v20, %v2002_v12  ;;  %v2203_v47 = vld [vmem:[#allocation2 + $0x142] sm:$0xff] }
 0x194   : > { %v2053_v33 = vmax.f32 %v2045_v28, 0.0  ;;  %v2056_v11 = vmax.f32 %v2048_v51, %v2052_v55  ;;  %v2216_v53 = vadd.f32 %v2208_v42, %v2196_v62  ;;  %v2228_v60 = vmul.f32 %v7945_v40, %v11770_v19 }
 0x195   : > { %v9227_v54 = vmul.f32 %v7945_v40, %v11776_v13  ;;  %v2018_v0 = vadd.f32 %v2010_v4, %v1998_v32  ;;  %v2030_v39 = vmul.f32 %v11768_v21, %v2022_v9  ;;  %v2130_v38 = vmul.f32 %v11775_v14, %v2002_v12  ;;  %v2184_v4 = vld [vmem:[#allocation2 + $0x149] sm:$0xff] }
 0x196   : > { %v2057_v46 = vmax.f32 %v2049_v27, %v2053_v33  ;;  %2060 = vst [vmem:[#allocation4 + $0x8] sm:$0xff] %v2056_v11  ;;  %v9233_v7 = vadd.f32 %v2209_v23, %v2197_v3  ;;  %v2171_v51 = vmul.f32 %v7946_v59, %v11773_v16  ;;  %v2190_v31 = vmul.f32 %v11772_v17, %v2002_v12  ;;  %v614_v23 = vpop.permute.xlu0 %613  ;;  %v2185_v33 = vld [vmem:[#allocation2 + $0x151] sm:$0xff]  ;;  %v629_v11 = vpop.permute.xlu1 %628 }
 0x197   : > { %v2180_v32 = vadd.f32 %v2172_v49, %v2160_v52  ;;  %v2038_v10 = vadd.f32 %v2030_v39, %v2018_v0  ;;  %v2138_v41 = vadd.f32 %v2130_v38, %v9186_v37  ;;  %v2191_v63 = vmul.f32 %v11772_v17, %v2183_v29  ;;  %976 = vst [vmem:[#allocation2 + $0x1e0] sm:$0xff] %v614_v23  ;;  %v7947_v0 = vld [vmem:[#allocation2 + $0x158] sm:$0xff] }
 0x198   : > { %2061 = vst [vmem:[#allocation4 + $0x10] sm:$0xff] %v2057_v46  ;;  %v2154_v27 = vmul.f32 %v11774_v15, %v2022_v9  ;;  %v2179_v44 = vadd.f32 %v2171_v51, %v9183_v36  ;;  %v2198_v2 = vadd.f32 %v2190_v31, %v2178_v58  ;;  %v2227_v35 = vmul.f32 %v7946_v59, %v11770_v19 }
 0x199   : > { %v2236_v12 = vadd.f32 %v2228_v60, %v2216_v53  ;;  %v2046_v62 = vadd.f32 %v11767_v22, %v2038_v10  ;;  %v2210_v42 = vmul.f32 %v11771_v18, %v2022_v9  ;;  %v2247_v28 = vmul.f32 %v11769_v20, %v2183_v29  ;;  %979 = vst [vmem:[#allocation2 + $0x1f8] sm:$0xff] %v629_v11 }
 0x19a   : > { %v2162_v55 = vadd.f32 %v2154_v27, %v2138_v41  ;;  %v2199_v52 = vadd.f32 %v2191_v63, %v2179_v44  ;;  %v2211_v37 = vmul.f32 %v11771_v18, %v2203_v47  ;;  %v2235_v3 = vadd.f32 %v2227_v35, %v9193_v50  ;;  %v2204_v41 = vld [vmem:[#allocation2 + $0x14a] sm:$0xff]  ;;  %v2205_v63 = vld [vmem:[#allocation2 + $0x152] sm:$0xff]  ;;  %v624_v27 = vpop.permute.xlu0 %623  ;;  %v639_v35 = vpop.permute.xlu1 %638 }
 0x19b   : > { %v2054_v40 = vmax.f32 %v2046_v62, 0.0  ;;  %v2218_v49 = vadd.f32 %v2210_v42, %v2198_v2  ;;  %v2351_v36 = vmul.f32 %v7946_v59, %v11776_v13  ;;  %v2367_v58 = vmul.f32 %v11775_v14, %v2183_v29  ;;  %v7948_v29 = vld [vmem:[#allocation2 + $0x150] sm:$0xff]  ;;  %978 = vst [vmem:[#allocation2 + $0x1f0] sm:$0xff] %v624_v27  ;;  %981 = vst [vmem:[#allocation2 + $0x208] sm:$0xff] %v639_v35  ;;  %v2243_v27 = vld [vmem:[#allocation2 + $0x161] sm:$0xff] }
 0x19c   : > { %v2255_v9 = vadd.f32 %v2247_v28, %v2235_v3  ;;  %v2267_v53 = vmul.f32 %v11768_v21, %v2203_v47  ;;  %v2391_v60 = vmul.f32 %v11774_v15, %v2203_v47  ;;  %v2174_v39 = vmul.f32 %v7947_v0, %v11773_v16 }
 0x19d   : > { %v2058_v50 = vmax.f32 %v2050_v5, %v2054_v40  ;;  %v2375_v38 = vadd.f32 %v2367_v58, %v2351_v36  ;;  %v2230_v46 = vmul.f32 %v7947_v0, %v11770_v19  ;;  %v2173_v59 = vmul.f32 %v7948_v29, %v11773_v16 }
 0x19e   : > { %v9260_v51 = vadd.f32 %v2211_v37, %v2199_v52  ;;  %v2275_v31 = vadd.f32 %v2267_v53, %v2255_v9  ;;  %v2192_v10 = vmul.f32 %v11772_v17, %v2184_v4  ;;  %v2193_v47 = vmul.f32 %v11772_v17, %v2185_v33 }
 0x19f   : > { %2062 = vst [vmem:[#allocation4 + $0x18] sm:$0xff] %v2058_v50  ;;  %v2182_v44 = vadd.f32 %v2174_v39, %v2162_v55  ;;  %v2238_v26 = vadd.f32 %v2230_v46, %v2218_v49  ;;  %v9265_v5 = vmul.f32 %v7947_v0, %v11776_v13  ;;  %v2181_v2 = vadd.f32 %v2173_v59, %v9218_v56 }
 0x1a0   : > { %v9269_v62 = vadd.f32 %v11767_v22, %v2275_v31  ;;  %v2200_v42 = vadd.f32 %v2192_v10, %v2180_v32  ;;  %v2229_v28 = vmul.f32 %v7948_v29, %v11770_v19  ;;  %v2248_v52 = vmul.f32 %v11769_v20, %v2184_v4  ;;  %v634_v32 = vpop.permute.xlu0 %633 }
 0x1a1   : > { %v9273_v37 = vadd.f32 %v2391_v60, %v2375_v38  ;;  %v2212_v55 = vmul.f32 %v11771_v18, %v2204_v41  ;;  %v2213_v3 = vmul.f32 %v11771_v18, %v2205_v63  ;;  %v2249_v23 = vmul.f32 %v11769_v20, %v2185_v33  ;;  %v2186_v60 = vld [vmem:[#allocation2 + $0x159] sm:$0xff]  ;;  %980 = vst [vmem:[#allocation2 + $0x200] sm:$0xff] %v634_v32  ;;  %v2263_v32 = vld [vmem:[#allocation2 + $0x162] sm:$0xff] }
 0x1a2   : > { %v2201_v56 = vadd.f32 %v2193_v47, %v2181_v2  ;;  %v2237_v40 = vadd.f32 %v2229_v28, %v9233_v7  ;;  %v2256_v49 = vadd.f32 %v2248_v52, %v2236_v12  ;;  %v2268_v36 = vmul.f32 %v11768_v21, %v2204_v41  ;;  %v2206_v47 = vld [vmem:[#allocation2 + $0x15a] sm:$0xff] }
 0x1a3   : > { %v2269_v58 = vmul.f32 %v11768_v21, %v2205_v63  ;;  %v2353_v11 = vmul.f32 %v7948_v29, %v11776_v13  ;;  %v2368_v9 = vmul.f32 %v11775_v14, %v2184_v4  ;;  %v2369_v53 = vmul.f32 %v11775_v14, %v2185_v33  ;;  %v7949_v4 = vld [vmem:[#allocation2 + $0x168] sm:$0xff] }
 0x1a4   : > { %v2291_v0 = vmax.f32 %v9269_v62, 0.0  ;;  %v2220_v39 = vadd.f32 %v2212_v55, %v2200_v42  ;;  %v2257_v50 = vadd.f32 %v2249_v23, %v2237_v40  ;;  %v2276_v38 = vadd.f32 %v2268_v36, %v2256_v49  ;;  %v644_v42 = vpop.permute.xlu0 %643  ;;  %v7950_v23 = vld [vmem:[#allocation2 + $0x160] sm:$0xff] }
 0x1a5   : > { %v2376_v7 = vadd.f32 %v2368_v9, %v9227_v54  ;;  %v2377_v12 = vadd.f32 %v2369_v53, %v2353_v11  ;;  %v2392_v46 = vmul.f32 %v11774_v15, %v2204_v41  ;;  %v2393_v59 = vmul.f32 %v11774_v15, %v2205_v63  ;;  %v649_v63 = vpop.permute.xlu1 %648  ;;  %982 = vst [vmem:[#allocation2 + $0x210] sm:$0xff] %v644_v42 }
 0x1a6   : > { %v2277_v31 = vadd.f32 %v2269_v58, %v2257_v50  ;;  %v9289_v29 = vadd.f32 %v11767_v22, %v2276_v38  ;;  %v2232_v33 = vmul.f32 %v7949_v4, %v11770_v19  ;;  %v2194_v10 = vmul.f32 %v11772_v17, %v2186_v60  ;;  %983 = vst [vmem:[#allocation2 + $0x218] sm:$0xff] %v649_v63  ;;  %v2245_v63 = vld [vmem:[#allocation2 + $0x171] sm:$0xff] }
 0x1a7   : > { %v9293_v2 = vadd.f32 %v2213_v3, %v2201_v56  ;;  %v2400_v35 = vadd.f32 %v2392_v46, %v2376_v7  ;;  %v9296_v54 = vmul.f32 %v7949_v4, %v11776_v13  ;;  %v2412_v41 = vmul.f32 %v7949_v4, %v11773_v16 }
 0x1a8   : > { %v9299_v28 = vadd.f32 %v2393_v59, %v2377_v12  ;;  %v2240_v52 = vadd.f32 %v2232_v33, %v2220_v39  ;;  %v2202_v55 = vadd.f32 %v2194_v10, %v2182_v44  ;;  %v2231_v40 = vmul.f32 %v7950_v23, %v11770_v19 }
 0x1a9   : > { %v9303_v3 = vadd.f32 %v11767_v22, %v2277_v31  ;;  %v2214_v56 = vmul.f32 %v11771_v18, %v2206_v47  ;;  %v2250_v49 = vmul.f32 %v11769_v20, %v2186_v60  ;;  %v2251_v36 = vmul.f32 %v11769_v20, %v2243_v27  ;;  %v659_v42 = vpop.permute.xlu1 %658 }
 0x1aa   : > { %v2292_v58 = vmax.f32 %v9289_v29, 0.0  ;;  %v9309_v11 = vadd.f32 %v2412_v41, %v2400_v35  ;;  %v2239_v44 = vadd.f32 %v2231_v40, %v9260_v51  ;;  %v2270_v9 = vmul.f32 %v11768_v21, %v2206_v47  ;;  %v2244_v41 = vld [vmem:[#allocation2 + $0x169] sm:$0xff]  ;;  %v7951_v40 = vld [vmem:[#allocation2 + $0x178] sm:$0xff]  ;;  %985 = vst [vmem:[#allocation2 + $0x228] sm:$0xff] %v659_v42  ;;  %v7954_v29 = vld [vmem:[#allocation2 + $0x180] sm:$0xff] }
 0x1ab   : > { %v2258_v53 = vadd.f32 %v2250_v49, %v2238_v26  ;;  %v2355_v39 = vmul.f32 %v7950_v23, %v11776_v13  ;;  %v2370_v50 = vmul.f32 %v11775_v14, %v2186_v60  ;;  %v2371_v38 = vmul.f32 %v11775_v14, %v2243_v27  ;;  %v9351_v42 = vld [vmem:[#allocation4 + $0x1] ss:$2 sm:$0xff] }
 0x1ac   : > { %v2222_v7 = vadd.f32 %v2214_v56, %v2202_v55  ;;  %v2259_v12 = vadd.f32 %v2251_v36, %v2239_v44  ;;  %v2271_v46 = vmul.f32 %v11768_v21, %v2263_v32  ;;  %v2411_v59 = vmul.f32 %v7950_v23, %v11773_v16  ;;  %v2264_v36 = vld [vmem:[#allocation2 + $0x16a] sm:$0xff] }
 0x1ad   : > { %v2278_v31 = vadd.f32 %v2270_v9, %v2258_v53  ;;  %v2378_v4 = vadd.f32 %v2370_v50, %v9265_v5  ;;  %v2379_v33 = vadd.f32 %v2371_v38, %v2355_v39  ;;  %v2431_v51 = vmul.f32 %v11772_v17, %v2243_v27  ;;  %v7952_v9 = vld [vmem:[#allocation2 + $0x170] sm:$0xff] }
 0x1ae   : > { %v2279_v10 = vadd.f32 %v2271_v46, %v2259_v12  ;;  %v2394_v26 = vmul.f32 %v11774_v15, %v2206_v47  ;;  %v2395_v35 = vmul.f32 %v11774_v15, %v2263_v32  ;;  %v2419_v60 = vadd.f32 %v2411_v59, %v9273_v37  ;;  %v2265_v59 = vld [vmem:[#allocation2 + $0x172] sm:$0xff] }
 0x1af   : > { %v2293_v55 = vmax.f32 %v9303_v3, 0.0  ;;  %v9325_v23 = vadd.f32 %v11767_v22, %v2278_v31  ;;  %v2451_v5 = vmul.f32 %v11771_v18, %v2263_v32  ;;  %v2234_v27 = vmul.f32 %v7951_v40, %v11770_v19 }
 0x1b0   : > { %v2287_v47 = vadd.f32 %v11767_v22, %v2279_v10  ;;  %v2402_v56 = vadd.f32 %v2394_v26, %v2378_v4  ;;  %v9330_v49 = vadd.f32 %v2395_v35, %v2379_v33  ;;  %v2439_v37 = vadd.f32 %v2431_v51, %v2419_v60 }
 0x1b1   : > { %v9333_v44 = vmul.f32 %v7951_v40, %v11776_v13  ;;  %v2233_v53 = vmul.f32 %v7952_v9, %v11770_v19  ;;  %v2252_v39 = vmul.f32 %v11769_v20, %v2244_v41  ;;  %v2253_v32 = vmul.f32 %v11769_v20, %v2245_v63 }
 0x1b2   : > { %v2294_v50 = vmax.f32 %v9325_v23, 0.0  ;;  %v2295_v38 = vmax.f32 %v2287_v47, 0.0  ;;  %v2242_v12 = vadd.f32 %v2234_v27, %v2222_v7  ;;  %v2414_v46 = vmul.f32 %v7951_v40, %v11773_v16  ;;  %v9349_v7 = vld [vmem:[#allocation4] ss:$2 sm:$0xff] }
 0x1b3   : > { %v9340_v31 = vadd.f32 %v2451_v5, %v2439_v37  ;;  %v2241_v4 = vadd.f32 %v2233_v53, %v9293_v2  ;;  %v2260_v33 = vadd.f32 %v2252_v39, %v2240_v52  ;;  %v2272_v51 = vmul.f32 %v11768_v21, %v2264_v36 }
 0x1b4   : > { %v2299_v10 = vmax.f32 %v2291_v0, %v2295_v38  ;;  %v2357_v26 = vmul.f32 %v7952_v9, %v11776_v13  ;;  %v2372_v35 = vmul.f32 %v11775_v14, %v2244_v41  ;;  %v2373_v60 = vmul.f32 %v11775_v14, %v2245_v63  ;;  %v2246_v38 = vld [vmem:[#allocation2 + $0x179] sm:$0xff] }
 0x1b5   : > { %v2261_v5 = vadd.f32 %v2253_v32, %v2241_v4  ;;  %v2273_v40 = vmul.f32 %v11768_v21, %v2265_v59  ;;  %v2280_v2 = vadd.f32 %v2272_v51, %v2260_v33  ;;  %v2413_v52 = vmul.f32 %v7952_v9, %v11773_v16 }
 0x1b6   : > { %2303 = vst [vmem:[#allocation4] sm:$0xff] %v2299_v10  ;;  %v2380_v62 = vadd.f32 %v2372_v35, %v9296_v54  ;;  %v2381_v0 = vadd.f32 %v2373_v60, %v2357_v26  ;;  %v2432_v27 = vmul.f32 %v11772_v17, %v2244_v41  ;;  %v2433_v47 = vmul.f32 %v11772_v17, %v2245_v63  ;;  %v2266_v26 = vld [vmem:[#allocation2 + $0x17a] sm:$0xff] }
 0x1b7   : > { %v2281_v37 = vadd.f32 %v2273_v40, %v2261_v5  ;;  %v2288_v53 = vadd.f32 %v11767_v22, %v2280_v2  ;;  %v2396_v39 = vmul.f32 %v11774_v15, %v2264_v36  ;;  %v2421_v32 = vadd.f32 %v2413_v52, %v9299_v28  ;;  %v7953_v5 = vld [vmem:[#allocation2 + $0x188] sm:$0xff] }
 0x1b8   : > { %v2422_v4 = vadd.f32 %v2414_v46, %v2402_v56  ;;  %v2397_v33 = vmul.f32 %v11774_v15, %v2265_v59  ;;  %v2440_v9 = vadd.f32 %v2432_v27, %v9309_v11  ;;  %v2452_v54 = vmul.f32 %v11771_v18, %v2264_v36  ;;  %v2427_v2 = vld [vmem:[#allocation2 + $0x181] sm:$0xff] }
 0x1b9   : > { %v2289_v51 = vadd.f32 %v11767_v22, %v2281_v37  ;;  %v2296_v41 = vmax.f32 %v2288_v53, 0.0  ;;  %v2404_v10 = vadd.f32 %v2396_v39, %v2380_v62  ;;  %v2441_v63 = vadd.f32 %v2433_v47, %v2421_v32  ;;  %v2447_v53 = vld [vmem:[#allocation2 + $0x182] sm:$0xff] }
 0x1ba   : > { %v9365_v35 = vadd.f32 %v2397_v33, %v2381_v0  ;;  %v2453_v60 = vmul.f32 %v11771_v18, %v2265_v59  ;;  %v2416_v28 = vmul.f32 %v7953_v5, %v11773_v16  ;;  %v2254_v56 = vmul.f32 %v11769_v20, %v2246_v38  ;;  %v9384_v39 = vld [vmem:[#allocation4 + $0x10] ss:$2 sm:$0x3f]  ;;  %v9386_v32 = vld [vmem:[#allocation4 + $0x11] ss:$2 sm:$0x3f] }
 0x1bb   : > { %v2297_v46 = vmax.f32 %v2289_v51, 0.0  ;;  %v2300_v11 = vmax.f32 %v2292_v58, %v2296_v41  ;;  %v2460_v36 = vadd.f32 %v2452_v54, %v2440_v9  ;;  %v2472_v40 = vmul.f32 %v7953_v5, %v11770_v19 }
 0x1bc   : > { %v9374_v52 = vmul.f32 %v7953_v5, %v11776_v13  ;;  %v2262_v62 = vadd.f32 %v2254_v56, %v2242_v12  ;;  %v2274_v0 = vmul.f32 %v11768_v21, %v2266_v26  ;;  %v2374_v59 = vmul.f32 %v11775_v14, %v2246_v38 }
 0x1bd   : > { %v2301_v27 = vmax.f32 %v2293_v55, %v2297_v46  ;;  %2304 = vst [vmem:[#allocation4 + $0x8] sm:$0xff] %v2300_v11  ;;  %v9380_v47 = vadd.f32 %v2453_v60, %v2441_v63  ;;  %v2415_v58 = vmul.f32 %v7954_v29, %v11773_v16  ;;  %v2434_v37 = vmul.f32 %v11772_v17, %v2246_v38 }
 0x1be   : > { %v2424_v12 = vadd.f32 %v2416_v28, %v2404_v10  ;;  %v2282_v33 = vadd.f32 %v2274_v0, %v2262_v62  ;;  %v2382_v9 = vadd.f32 %v2374_v59, %v9333_v44  ;;  %v2435_v3 = vmul.f32 %v11772_v17, %v2427_v2  ;;  %v2428_v62 = vld [vmem:[#allocation2 + $0x189] sm:$0xff]  ;;  %v7955_v59 = vld [vmem:[#allocation2 + $0x198] sm:$0xff] }
 0x1bf   : > { %2305 = vst [vmem:[#allocation4 + $0x10] sm:$0xff] %v2301_v27  ;;  %v2398_v55 = vmul.f32 %v11774_v15, %v2266_v26  ;;  %v2423_v54 = vadd.f32 %v2415_v58, %v9330_v49  ;;  %v2442_v51 = vadd.f32 %v2434_v37, %v2422_v4  ;;  %v2471_v41 = vmul.f32 %v7954_v29, %v11770_v19 }
 0x1c0   : > { %v2480_v38 = vadd.f32 %v2472_v40, %v2460_v36  ;;  %v2290_v63 = vadd.f32 %v11767_v22, %v2282_v33  ;;  %v2454_v60 = vmul.f32 %v11771_v18, %v2266_v26  ;;  %v2491_v10 = vmul.f32 %v11769_v20, %v2427_v2  ;;  %v2429_v36 = vld [vmem:[#allocation2 + $0x191] sm:$0xff] }
 0x1c1   : > { %v2406_v5 = vadd.f32 %v2398_v55, %v2382_v9  ;;  %v2443_v28 = vadd.f32 %v2435_v3, %v2423_v54  ;;  %v2455_v44 = vmul.f32 %v11771_v18, %v2447_v53  ;;  %v2479_v56 = vadd.f32 %v2471_v41, %v9340_v31  ;;  %v7956_v33 = vld [vmem:[#allocation2 + $0x190] sm:$0xff] }
 0x1c2   : > { %v2298_v46 = vmax.f32 %v2290_v63, 0.0  ;;  %v2462_v11 = vadd.f32 %v2454_v60, %v2442_v51  ;;  %v2595_v49 = vmul.f32 %v7954_v29, %v11776_v13  ;;  %v2611_v4 = vmul.f32 %v11775_v14, %v2427_v2  ;;  %v2449_v54 = vld [vmem:[#allocation2 + $0x192] sm:$0xff] }
 0x1c3   : > { %v2499_v40 = vadd.f32 %v2491_v10, %v2479_v56  ;;  %v2511_v0 = vmul.f32 %v11768_v21, %v2447_v53  ;;  %v2635_v26 = vmul.f32 %v11774_v15, %v2447_v53  ;;  %v2418_v27 = vmul.f32 %v7955_v59, %v11773_v16  ;;  %v2448_v53 = vld [vmem:[#allocation2 + $0x18a] sm:$0xff] }
 0x1c4   : > { %v2302_v58 = vmax.f32 %v2294_v50, %v2298_v46  ;;  %v2619_v31 = vadd.f32 %v2611_v4, %v2595_v49  ;;  %v2474_v37 = vmul.f32 %v7955_v59, %v11770_v19  ;;  %v2417_v29 = vmul.f32 %v7956_v33, %v11773_v16  ;;  %v669_v49 = vpop.permute.xlu1 %668 }
 0x1c5   : > { %v9407_v2 = vadd.f32 %v2455_v44, %v2443_v28  ;;  %v2519_v9 = vadd.f32 %v2511_v0, %v2499_v40  ;;  %v2436_v3 = vmul.f32 %v11772_v17, %v2428_v62  ;;  %v2437_v55 = vmul.f32 %v11772_v17, %v2429_v36  ;;  %v654_v44 = vpop.permute.xlu0 %653  ;;  %987 = vst [vmem:[#allocation2 + $0x238] sm:$0xff] %v669_v49 }
 0x1c6   : > { %2306 = vst [vmem:[#allocation4 + $0x18] sm:$0xff] %v2302_v58  ;;  %v9411_v51 = vadd.f32 %v2418_v27, %v2406_v5  ;;  %v9413_v23 = vadd.f32 %v2474_v37, %v2462_v11  ;;  %v9416_v50 = vmul.f32 %v7955_v59, %v11776_v13  ;;  %v2425_v41 = vadd.f32 %v2417_v29, %v9365_v35 }
 0x1c7   : > { %v9420_v63 = vadd.f32 %v11767_v22, %v2519_v9  ;;  %v2444_v60 = vadd.f32 %v2436_v3, %v2424_v12  ;;  %v2473_v10 = vmul.f32 %v7956_v33, %v11770_v19  ;;  %v2492_v28 = vmul.f32 %v11769_v20, %v2428_v62  ;;  %984 = vst [vmem:[#allocation2 + $0x220] sm:$0xff] %v654_v44 }
 0x1c8   : > { %v9424_v56 = vadd.f32 %v2635_v26, %v2619_v31  ;;  %v2456_v5 = vmul.f32 %v11771_v18, %v2448_v53  ;;  %v2457_v46 = vmul.f32 %v11771_v18, %v2449_v54  ;;  %v2493_v11 = vmul.f32 %v11769_v20, %v2429_v36 }
 0x1c9   : > { %v2445_v35 = vadd.f32 %v2437_v55, %v2425_v41  ;;  %v2481_v4 = vadd.f32 %v2473_v10, %v9380_v47  ;;  %v2500_v40 = vadd.f32 %v2492_v28, %v2480_v38  ;;  %v2512_v12 = vmul.f32 %v11768_v21, %v2448_v53  ;;  %v664_v9 = vpop.permute.xlu0 %663  ;;  %v679_v41 = vpop.permute.xlu1 %678 }
 0x1ca   : > { %v2513_v0 = vmul.f32 %v11768_v21, %v2449_v54  ;;  %v2597_v26 = vmul.f32 %v7956_v33, %v11776_v13  ;;  %v2612_v59 = vmul.f32 %v11775_v14, %v2428_v62  ;;  %v2613_v27 = vmul.f32 %v11775_v14, %v2429_v36  ;;  %986 = vst [vmem:[#allocation2 + $0x230] sm:$0xff] %v664_v9  ;;  %v7957_v36 = vld [vmem:[#allocation2 + $0x1a8] sm:$0xff] }
 0x1cb   : > { %v2535_v58 = vmax.f32 %v9420_v63, 0.0  ;;  %v2464_v31 = vadd.f32 %v2456_v5, %v2444_v60  ;;  %v2501_v37 = vadd.f32 %v2493_v11, %v2481_v4  ;;  %v2520_v29 = vadd.f32 %v2512_v12, %v2500_v40  ;;  %989 = vst [vmem:[#allocation2 + $0x248] sm:$0xff] %v679_v41 }
 0x1cc   : > { %v2620_v47 = vadd.f32 %v2612_v59, %v9374_v52  ;;  %v2621_v38 = vadd.f32 %v2613_v27, %v2597_v26  ;;  %v2636_v3 = vmul.f32 %v11774_v15, %v2448_v53  ;;  %v2637_v55 = vmul.f32 %v11774_v15, %v2449_v54 }
 0x1cd   : > { %v2521_v33 = vadd.f32 %v2513_v0, %v2501_v37  ;;  %v9440_v62 = vadd.f32 %v11767_v22, %v2520_v29  ;;  %v2476_v10 = vmul.f32 %v7957_v36, %v11770_v19  ;;  %v1327_v60 = vmax.f32 %v8868_v45, %v8870_v24  ;;  %v674_v4 = vpop.permute.xlu0 %673 }
 0x1ce   : > { %v9445_v28 = vadd.f32 %v2457_v46, %v2445_v35  ;;  %v2644_v52 = vadd.f32 %v2636_v3, %v2620_v47  ;;  %v9448_v53 = vmul.f32 %v7957_v36, %v11776_v13  ;;  %v1328_v54 = vmax.f32 %v8904_v1, %v8913_v8  ;;  %v2430_v35 = vld [vmem:[#allocation2 + $0x199] sm:$0xff]  ;;  %988 = vst [vmem:[#allocation2 + $0x240] sm:$0xff] %v674_v4  ;;  %v1359_v47 = vld [vmem:[#allocation3 + $0x8] sm:$0xf] }
 0x1cf   : > { %v9452_v44 = vadd.f32 %v2637_v55, %v2621_v38  ;;  %v9454_v5 = vadd.f32 %v2476_v10, %v2464_v31  ;;  %v2656_v11 = vmul.f32 %v7957_v36, %v11773_v16  ;;  %v7095_v49 = vpack.c.bf16 %v1327_v60, %v1327_v60  ;;  %v2450_v8 = vld [vmem:[#allocation2 + $0x19a] sm:$0xff]  ;;  %v689_v55 = vpop.permute.xlu1 %688 }
 0x1d0   : > { %v9458_v45 = vadd.f32 %v11767_v22, %v2521_v33  ;;  %v7096_v46 = vpack.c.bf16 %v1328_v54, %v1328_v54  ;;  %v1579_v26 = vmax.f32 %v9032_v57, %v9034_v6  ;;  %v1580_v27 = vmax.f32 %v9074_v25, %v9076_v34  ;;  %v7958_v33 = vld [vmem:[#allocation2 + $0x1a0] sm:$0xff]  ;;  %991 = vst [vmem:[#allocation2 + $0x258] sm:$0xff] %v689_v55  ;;  %v1364_v54 = vld [vmem:[#allocation3 + $0xc] sm:$0xf] }
 0x1d1   : > { %v9461_v40 = vadd.f32 %v2656_v11, %v2644_v52  ;;  %v1339_v1 = vshrl.u32 %v7095_v49, 16  ;;  %v1342_v12 = vshll.u32 %v7095_v49, 16  ;;  %v2438_v31 = vmul.f32 %v11772_v17, %v2430_v35  ;;  %v684_v57 = vpop.permute.xlu0 %683  ;;  %v2487_v10 = vld [vmem:[#allocation2 + $0x1a1] sm:$0xff] }
 0x1d2   : > { %v1347_v0 = vshrl.u32 %v7096_v46, 16  ;;  %v1350_v29 = vshll.u32 %v7096_v46, 16  ;;  %v7097_v38 = vpack.c.bf16 %v1579_v26, %v1579_v26  ;;  %v2458_v3 = vmul.f32 %v11771_v18, %v2450_v8  ;;  %990 = vst [vmem:[#allocation2 + $0x250] sm:$0xff] %v684_v57  ;;  %v2507_v46 = vld [vmem:[#allocation2 + $0x1a2] sm:$0xff] }
 0x1d3   : > { %v1341_v59 = vrot.slane %v1339_v1, 7  ;;  %v7098_v41 = vpack.c.bf16 %v1580_v27, %v1580_v27  ;;  %v2475_v36 = vmul.f32 %v7958_v33, %v11770_v19  ;;  %v2446_v4 = vadd.f32 %v2438_v31, %v9411_v51 }
 0x1d4   : > { %v1349_v37 = vrot.slane %v1347_v0, 7  ;;  %v1588_v11 = vshrl.u32 %v7097_v38, 16  ;;  %v1591_v49 = vshll.u32 %v7097_v38, 16  ;;  %v1605_v38 = vld [vmem:[#allocation3 + $0x10] sm:$0xf]  ;;  %v2515_v55 = vmul.f32 %v11768_v21, %v2507_v46 }
 0x1d5   : > { %v1344_v25 = vor.u32 %v1342_v12, %v1341_v59  ;;  %v1345_v34 = vrot.slane %v1341_v59, 4  ;;  %v1596_v12 = vshrl.u32 %v7098_v41, 16  ;;  %v1599_v0 = vshll.u32 %v7098_v41, 16 }
 0x1d6   : > { %v1352_v60 = vor.u32 %v1350_v29, %v1349_v37  ;;  %v2483_v26 = vadd.f32 %v2475_v36, %v9407_v2  ;;  %v1590_v27 = vrot.slane %v1588_v11, 7  ;;  %v2494_v37 = vmul.f32 %v11769_v20, %v2430_v35  ;;  %v1608_v36 = vld [vmem:[#allocation3 + $0x14] sm:$0xf] }
 0x1d7   : > { %v1360_v1 = vsel %vm9469_vm12, %v1344_v25, %v1359_v47  ;;  %v2495_v29 = vmul.f32 %v11769_v20, %v2487_v10  ;;  %v1598_v31 = vrot.slane %v1596_v12, 7  ;;  %v2514_v47 = vmul.f32 %v11768_v21, %v2450_v8 }
 0x1d8   : > { %v1353_v59 = vsel %vm9476_vm13, %v1345_v34, %v1352_v60  ;;  %1361 = vst [vmem:[#allocation3 + $0x8] sm:$0xf] %v1360_v1  ;;  %v1593_v2 = vor.u32 %v1591_v49, %v1590_v27  ;;  %v1594_v57 = vrot.slane %v1590_v27, 4  ;;  %v2502_v25 = vadd.f32 %v2494_v37, %v9413_v23  ;;  %v699_v1 = vpop.permute.xlu1 %698 }
 0x1d9   : > { %v1365_v51 = vsel %vm9483_vm14, %v1353_v59, %v1364_v54  ;;  %v2503_v34 = vadd.f32 %v2495_v29, %v2483_v26  ;;  %v1601_v41 = vor.u32 %v1599_v0, %v1598_v31  ;;  %v2599_v60 = vmul.f32 %v7958_v33, %v11776_v13  ;;  %993 = vst [vmem:[#allocation2 + $0x268] sm:$0xff] %v699_v1 }
 0x1da   : > { %1366 = vst [vmem:[#allocation3 + $0xc] sm:$0xf] %v1365_v51  ;;  %v2614_v11 = vmul.f32 %v11775_v14, %v2430_v35  ;;  %v2615_v54 = vmul.f32 %v11775_v14, %v2487_v10  ;;  %v1606_v12 = vsel %vm9469_vm12, %v1593_v2, %v1605_v38  ;;  %v2522_v59 = vadd.f32 %v2514_v47, %v2502_v25  ;;  %v2488_v51 = vld [vmem:[#allocation2 + $0x1a9] sm:$0xff] }
 0x1db   : > { %v2523_v24 = vadd.f32 %v2515_v55, %v2503_v34  ;;  %v2638_v49 = vmul.f32 %v11774_v15, %v2450_v8  ;;  %v1602_v23 = vsel %vm9476_vm13, %v1594_v57, %v1601_v41  ;;  %1607 = vst [vmem:[#allocation3 + $0x10] sm:$0xf] %v1606_v12  ;;  %v2639_v35 = vmul.f32 %v11774_v15, %v2507_v46  ;;  %v2489_v34 = vld [vmem:[#allocation2 + $0x1b1] sm:$0xff] }
 0x1dc   : > { %v2622_v0 = vadd.f32 %v2614_v11, %v9416_v50  ;;  %v2623_v26 = vadd.f32 %v2615_v54, %v2599_v60  ;;  %v1609_v27 = vsel %vm9483_vm14, %v1602_v23, %v1608_v36  ;;  %v9513_v37 = vadd.f32 %v11767_v22, %v2522_v59  ;;  %v7959_v36 = vld [vmem:[#allocation2 + $0x1b8] sm:$0xff]  ;;  %v7960_v11 = vld [vmem:[#allocation2 + $0x1b0] sm:$0xff] }
 0x1dd   : > { %v2531_v29 = vadd.f32 %v11767_v22, %v2523_v24  ;;  %v2655_v8 = vmul.f32 %v7958_v33, %v11773_v16  ;;  %v2537_v31 = vmax.f32 %v9458_v45, 0.0  ;;  %1610 = vst [vmem:[#allocation3 + $0x14] sm:$0xf] %v1609_v27  ;;  %v2466_v38 = vadd.f32 %v2458_v3, %v2446_v4  ;;  %v2508_v4 = vld [vmem:[#allocation2 + $0x1aa] sm:$0xff]  ;;  %v2509_v12 = vld [vmem:[#allocation2 + $0x1b2] sm:$0xff] }
 0x1de   : > { %v2646_v47 = vadd.f32 %v2638_v49, %v2622_v0  ;;  %v2675_v50 = vmul.f32 %v11772_v17, %v2487_v10  ;;  %v9519_v2 = vadd.f32 %v2639_v35, %v2623_v26  ;;  %v2695_v25 = vmul.f32 %v11771_v18, %v2507_v46  ;;  %v9532_v59 = vld [vmem:[#allocation4] ss:$2 sm:$0xff]  ;;  %v9534_v49 = vld [vmem:[#allocation4 + $0x1] ss:$2 sm:$0xff] }
 0x1df   : > { %v2539_v55 = vmax.f32 %v2531_v29, 0.0  ;;  %v2663_v57 = vadd.f32 %v2655_v8, %v9424_v56  ;;  %v4541_v41 = vld [vmem:[#allocation3 + $0x8] sm:$0xf]  ;;  %v2478_v60 = vmul.f32 %v7959_v36, %v11770_v19  ;;  %v2477_v3 = vmul.f32 %v7960_v11, %v11770_v19  ;;  %v2490_v33 = vld [vmem:[#allocation2 + $0x1b9] sm:$0xff] }
 0x1e0   : > { %v2496_v10 = vmul.f32 %v11769_v20, %v2488_v51  ;;  %v2658_v1 = vmul.f32 %v7959_v36, %v11773_v16  ;;  %v9537_v23 = vmul.f32 %v7959_v36, %v11776_v13  ;;  %v2497_v26 = vmul.f32 %v11769_v20, %v2489_v34 }
 0x1e1   : > { %v4542_v24 = vld [vmem:[#allocation3 + $0xc] sm:$0xf]  ;;  %v2543_v56 = vmax.f32 %v2535_v58, %v2539_v55  ;;  %v2683_v46 = vadd.f32 %v2675_v50, %v2663_v57  ;;  %v2485_v0 = vadd.f32 %v2477_v3, %v9445_v28  ;;  %v2486_v58 = vadd.f32 %v2478_v60, %v2466_v38 }
 0x1e2   : > { %v9527_v54 = vcombine.low %v4541_v41, %v4542_v24  ;;  %v2504_v35 = vadd.f32 %v2496_v10, %v9454_v5  ;;  %v9543_v27 = vadd.f32 %v2658_v1, %v2646_v47  ;;  %v2516_v29 = vmul.f32 %v11768_v21, %v2508_v4 }
 0x1e3   : > { %2547 = vst [vmem:[#allocation4] sm:$0xff] %v2543_v56  ;;  %v2505_v50 = vadd.f32 %v2497_v26, %v2485_v0  ;;  %v2517_v55 = vmul.f32 %v11768_v21, %v2509_v12  ;;  %v2616_v57 = vmul.f32 %v11775_v14, %v2488_v51  ;;  %v9553_v5 = vadd.f32 %v2695_v25, %v2683_v46 }
 0x1e4   : > { %11792 = vst [vmem:[#allocation34_spill] sm:$0xff] %v9527_v54  ;;  %v4665_v63 = vshll.u32 %v9527_v54, 16  ;;  %v4669_v8 = vshrl.u32 %v9527_v54, 16  ;;  %v9549_v28 = vld [vmem:[#allocation3 + $0x10] sm:$0xff]   ;;  %v2524_v24 = vadd.f32 %v2516_v29, %v2504_v35  ;;  %v2617_v38 = vmul.f32 %v11775_v14, %v2489_v34 }
 0x1e5   : > { %v2525_v47 = vadd.f32 %v2517_v55, %v2505_v50  ;;  %v2601_v36 = vmul.f32 %v7960_v11, %v11776_v13  ;;  %v2624_v60 = vadd.f32 %v2616_v57, %v9448_v53  ;;  %v2640_v3 = vmul.f32 %v11774_v15, %v2508_v4 }
 0x1e6   : > { %v9551_v41 = vrot.slane %v4665_v63, 1  ;;  %v4673_v10 = vshll.u32 %v9549_v28, 16  ;;  %v2532_v56 = vadd.f32 %v11767_v22, %v2524_v24  ;;  %v2641_v1 = vmul.f32 %v11774_v15, %v2509_v12 }
 0x1e7   : > { %v2657_v0 = vmul.f32 %v7960_v11, %v11773_v16  ;;  %v2533_v46 = vadd.f32 %v11767_v22, %v2525_v47  ;;  %v2625_v26 = vadd.f32 %v2617_v38, %v2601_v36  ;;  %v2676_v35 = vmul.f32 %v11772_v17, %v2488_v51 }
 0x1e8   : > { %11793 = vst [vmem:[#allocation35_spill] sm:$0xff] %v9551_v41  ;;  %v4671_v25 = vor.u32 %v4669_v8, %v9551_v41  ;;  %v9566_v63 = vrot.slane %v4673_v10, 1  ;;  %v2540_v53 = vmax.f32 %v2532_v56, 0.0  ;;  %v2677_v50 = vmul.f32 %v11772_v17, %v2489_v34  ;;  %v2671_v10 = vld [vmem:[#allocation2 + $0x1c1] sm:$0xff] }
 0x1e9   : > { %v2665_v29 = vadd.f32 %v2657_v0, %v9452_v44  ;;  %v2541_v55 = vmax.f32 %v2533_v46, 0.0  ;;  %v2648_v57 = vadd.f32 %v2640_v3, %v2624_v60  ;;  %v2684_v24 = vadd.f32 %v2676_v35, %v9461_v40  ;;  %v2510_v44 = vld [vmem:[#allocation2 + $0x1ba] sm:$0xff]  ;;  %v7961_v60 = vld [vmem:[#allocation2 + $0x1c8] sm:$0xff] }
 0x1ea   : > { %v2696_v11 = vmul.f32 %v11771_v18, %v2508_v4  ;;  %v9574_v8 = vsel %vm4656_vm15, %v4671_v25, %v9566_v63  ;;  %v11795_v51 = vmax.f32 %v9440_v62, 0.0  ;;  %v2697_v36 = vmul.f32 %v11771_v18, %v2509_v12  ;;  %v9585_v56 = vld [vmem:[#allocation4 + $0x10] ss:$2 sm:$0x3f] }
 0x1eb   : > { %11794 = vst [vmem:[#allocation36_spill] sm:$0xff] %v9574_v8  ;;  %v2685_v47 = vadd.f32 %v2677_v50, %v2665_v29  ;;  %5147 = vmatprep.mubr.bf16.mxu0 %v9574_v8  ;;  %v2545_v34 = vmax.f32 %v2537_v31, %v2541_v55  ;;  %v9582_v40 = vadd.f32 %v2641_v1, %v2625_v26  ;;  %v9587_v62 = vld [vmem:[#allocation4 + $0x11] ss:$2 sm:$0x3f] }
 0x1ec   : > { %v2544_v38 = vmax.f32 %v11795_v51, %v2540_v53  ;;  %v2704_v4 = vadd.f32 %v2696_v11, %v2684_v24  ;;  %v2660_v3 = vmul.f32 %v7961_v60, %v11773_v16  ;;  %5148 = vmatmul.mubr.bf16.vlgmr.msra.gmra.mrb[0].mxu0 %v9527_v54  ;;  %v2716_v0 = vmul.f32 %v7961_v60, %v11770_v19  ;;  %v7962_v26 = vld [vmem:[#allocation2 + $0x1c0] sm:$0xff] }
 0x1ed   : > { %v9590_v12 = vadd.f32 %v2697_v36, %v2685_v47  ;;  %v9594_v45 = vmul.f32 %v7961_v60, %v11776_v13  ;;  %v2498_v31 = vmul.f32 %v11769_v20, %v2490_v33  ;;  %2549 = vst [vmem:[#allocation4 + $0x10] sm:$0xff] %v2545_v34  ;;  %v2518_v25 = vmul.f32 %v11768_v21, %v2510_v44  ;;  %v2691_v24 = vld [vmem:[#allocation2 + $0x1c2] sm:$0xff] }
 0x1ee   : > { %2548 = vst [vmem:[#allocation4 + $0x8] sm:$0xff] %v2544_v38  ;;  %v2668_v1 = vadd.f32 %v2660_v3, %v2648_v57  ;;  %v2618_v46 = vmul.f32 %v11775_v14, %v2490_v33  ;;  %v2659_v35 = vmul.f32 %v7962_v26, %v11773_v16  ;;  %v9600_v53 = vadd.f32 %v2716_v0, %v2704_v4  ;;  %v694_v3 = vpop.permute.xlu0 %693 }
 0x1ef   : > { %v2506_v29 = vadd.f32 %v2498_v31, %v2486_v58  ;;  %v2678_v50 = vmul.f32 %v11772_v17, %v2490_v33  ;;  %v2679_v55 = vmul.f32 %v11772_v17, %v2671_v10  ;;  %v2642_v51 = vmul.f32 %v11774_v15, %v2510_v44  ;;  %992 = vst [vmem:[#allocation2 + $0x260] sm:$0xff] %v694_v3 }
 0x1f0   : > { %v2626_v11 = vadd.f32 %v2618_v46, %v9537_v23  ;;  %v2667_v57 = vadd.f32 %v2659_v35, %v9519_v2  ;;  %v2715_v38 = vmul.f32 %v7962_v26, %v11770_v19  ;;  %v2698_v34 = vmul.f32 %v11771_v18, %v2510_v44  ;;  %v709_v44 = vpop.permute.xlu1 %708 }
 0x1f1   : > { %v2526_v47 = vadd.f32 %v2518_v25, %v2506_v29  ;;  %v2686_v36 = vadd.f32 %v2678_v50, %v9543_v27  ;;  %v2735_v58 = vmul.f32 %v11769_v20, %v2671_v10  ;;  %v2699_v33 = vmul.f32 %v11771_v18, %v2691_v24  ;;  %v2672_v27 = vld [vmem:[#allocation2 + $0x1c9] sm:$0xff]  ;;  %995 = vst [vmem:[#allocation2 + $0x278] sm:$0xff] %v709_v44  ;;  %v2693_v44 = vld [vmem:[#allocation2 + $0x1d2] sm:$0xff] }
 0x1f2   : > { %v2687_v4 = vadd.f32 %v2679_v55, %v2667_v57  ;;  %v2723_v60 = vadd.f32 %v2715_v38, %v9553_v5  ;;  %v2755_v23 = vmul.f32 %v11768_v21, %v2691_v24  ;;  %v2650_v2 = vadd.f32 %v2642_v51, %v2626_v11  ;;  %v2673_v5 = vld [vmem:[#allocation2 + $0x1d1] sm:$0xff] }
 0x1f3   : > { %v2534_v0 = vadd.f32 %v11767_v22, %v2526_v47  ;;  %v2839_v31 = vmul.f32 %v7962_v26, %v11776_v13  ;;  %v2855_v25 = vmul.f32 %v11775_v14, %v2671_v10  ;;  %v2706_v46 = vadd.f32 %v2698_v34, %v2686_v36  ;;  %v7963_v57 = vld [vmem:[#allocation2 + $0x1d8] sm:$0xff]  ;;  %v7964_v26 = vld [vmem:[#allocation2 + $0x1d0] sm:$0xff] }
 0x1f4   : > { %v9617_v35 = vadd.f32 %v2699_v33, %v2687_v4  ;;  %v2743_v29 = vadd.f32 %v2735_v58, %v2723_v60  ;;  %v2879_v50 = vmul.f32 %v11774_v15, %v2691_v24  ;;  %v2662_v38 = vmul.f32 %v7963_v57, %v11773_v16  ;;  %v2692_v51 = vld [vmem:[#allocation2 + $0x1ca] sm:$0xff]  ;;  %v704_v24 = vpop.permute.xlu0 %703  ;;  %v719_v54 = vpop.permute.xlu1 %718 }
 0x1f5   : > { %v2542_v55 = vmax.f32 %v2534_v0, 0.0  ;;  %v2718_v11 = vmul.f32 %v7963_v57, %v11770_v19  ;;  %v2661_v10 = vmul.f32 %v7964_v26, %v11773_v16  ;;  %v2863_v3 = vadd.f32 %v2855_v25, %v2839_v31  ;;  %994 = vst [vmem:[#allocation2 + $0x270] sm:$0xff] %v704_v24  ;;  %997 = vst [vmem:[#allocation2 + $0x288] sm:$0xff] %v719_v54 }
 0x1f6   : > { %v2763_v47 = vadd.f32 %v2755_v23, %v2743_v29  ;;  %v9624_v36 = vmul.f32 %v7963_v57, %v11776_v13  ;;  %v2680_v34 = vmul.f32 %v11772_v17, %v2672_v27  ;;  %v11796_v58 = vmax.f32 %v9513_v37, 0.0 }
 0x1f7   : > { %v9629_v33 = vadd.f32 %v2662_v38, %v2650_v2  ;;  %v2669_v60 = vadd.f32 %v2661_v10, %v9582_v40  ;;  %v2681_v0 = vmul.f32 %v11772_v17, %v2673_v5  ;;  %v9636_v31 = vadd.f32 %v2718_v11, %v2706_v46 }
 0x1f8   : > { %v2546_v4 = vmax.f32 %v11796_v58, %v2542_v55  ;;  %v9634_v23 = vadd.f32 %v11767_v22, %v2763_v47  ;;  %v2688_v25 = vadd.f32 %v2680_v34, %v2668_v1  ;;  %v2700_v29 = vmul.f32 %v11771_v18, %v2692_v51  ;;  %v714_v11 = vpop.permute.xlu0 %713 }
 0x1f9   : > { %v2689_v37 = vadd.f32 %v2681_v0, %v2669_v60  ;;  %v2717_v2 = vmul.f32 %v7964_v26, %v11770_v19  ;;  %v2736_v40 = vmul.f32 %v11769_v20, %v2672_v27  ;;  %v2737_v55 = vmul.f32 %v11769_v20, %v2673_v5  ;;  %996 = vst [vmem:[#allocation2 + $0x280] sm:$0xff] %v714_v11 }
 0x1fa   : > { %2550 = vst [vmem:[#allocation4 + $0x18] sm:$0xff] %v2546_v4  ;;  %v9643_v38 = vadd.f32 %v2879_v50, %v2863_v3  ;;  %v2701_v10 = vmul.f32 %v11771_v18, %v2693_v44  ;;  %v2708_v46 = vadd.f32 %v2700_v29, %v2688_v25  ;;  %v2756_v47 = vmul.f32 %v11768_v21, %v2692_v51 }
 0x1fb   : > { %v2725_v1 = vadd.f32 %v2717_v2, %v9590_v12  ;;  %v2744_v54 = vadd.f32 %v2736_v40, %v9600_v53  ;;  %v2757_v34 = vmul.f32 %v11768_v21, %v2693_v44  ;;  %v2841_v58 = vmul.f32 %v7964_v26, %v11776_v13  ;;  %v2674_v53 = vld [vmem:[#allocation2 + $0x1d9] sm:$0xff]  ;;  %v7965_v2 = vld [vmem:[#allocation2 + $0x1e8] sm:$0xff] }
 0x1fc   : > { %v9650_v24 = vadd.f32 %v2701_v10, %v2689_v37  ;;  %v2856_v50 = vmul.f32 %v11775_v14, %v2672_v27  ;;  %v2857_v3 = vmul.f32 %v11775_v14, %v2673_v5  ;;  %v2880_v0 = vmul.f32 %v11774_v15, %v2692_v51 }
 0x1fd   : > { %v2745_v4 = vadd.f32 %v2737_v55, %v2725_v1  ;;  %v2764_v60 = vadd.f32 %v2756_v47, %v2744_v54  ;;  %v2881_v12 = vmul.f32 %v11774_v15, %v2693_v44  ;;  %v2720_v37 = vmul.f32 %v7965_v2, %v11770_v19  ;;  %v729_v44 = vpop.permute.xlu1 %728  ;;  %v724_v55 = vpop.permute.xlu0 %723 }
 0x1fe   : > { %v2864_v25 = vadd.f32 %v2856_v50, %v9594_v45  ;;  %v2865_v29 = vadd.f32 %v2857_v3, %v2841_v58  ;;  %v1823_v26 = vmax.f32 %v9202_v48, %v9204_v61  ;;  %v9665_v5 = vmul.f32 %v7965_v2, %v11776_v13  ;;  %999 = vst [vmem:[#allocation2 + $0x298] sm:$0xff] %v729_v44  ;;  %v2694_v50 = vld [vmem:[#allocation2 + $0x1da] sm:$0xff] }
 0x1ff   : > { %v2765_v40 = vadd.f32 %v2757_v34, %v2745_v4  ;;  %v9662_v27 = vadd.f32 %v11767_v22, %v2764_v60  ;;  %v1824_v51 = vmax.f32 %v9237_v43, %v9239_v30  ;;  %v2900_v10 = vmul.f32 %v7965_v2, %v11773_v16  ;;  %998 = vst [vmem:[#allocation2 + $0x290] sm:$0xff] %v724_v55  ;;  %v2731_v3 = vld [vmem:[#allocation2 + $0x1e1] sm:$0xff] }
 0x200   : > { %v2888_v45 = vadd.f32 %v2880_v0, %v2864_v25  ;;  %v7099_v11 = vpack.c.bf16 %v1823_v26, %v1823_v26  ;;  %v2682_v1 = vmul.f32 %v11772_v17, %v2674_v53  ;;  %v9674_v61 = vadd.f32 %v2881_v12, %v2865_v29  ;;  %v2751_v12 = vld [vmem:[#allocation2 + $0x1e2] sm:$0xff] }
 0x201   : > { %v9672_v48 = vadd.f32 %v11767_v22, %v2765_v40  ;;  %v9676_v54 = vadd.f32 %v2720_v37, %v2708_v46  ;;  %v7100_v47 = vpack.c.bf16 %v1824_v51, %v1824_v51  ;;  %v4677_v58 = vshrl.u32 %v9549_v28, 16  ;;  %v7966_v2 = vld [vmem:[#allocation2 + $0x1e0] sm:$0xff] }
 0x202   : > { %v9679_v30 = vadd.f32 %v2900_v10, %v2888_v45  ;;  %v1832_v34 = vshrl.u32 %v7099_v11, 16  ;;  %v1835_v60 = vshll.u32 %v7099_v11, 16  ;;  %v2690_v25 = vadd.f32 %v2682_v1, %v9629_v33  ;;  %v1849_v51 = vld [vmem:[#allocation3 + $0x18] sm:$0xf]  ;;  %v1852_v43 = vld [vmem:[#allocation3 + $0x1c] sm:$0xf] }
 0x203   : > { %v1840_v0 = vshrl.u32 %v7100_v47, 16  ;;  %v1843_v46 = vshll.u32 %v7100_v47, 16  ;;  %v2719_v37 = vmul.f32 %v7966_v2, %v11770_v19  ;;  %v2738_v26 = vmul.f32 %v11769_v20, %v2674_v53  ;;  %v739_v47 = vpop.permute.xlu1 %738 }
 0x204   : > { %v1834_v29 = vrot.slane %v1832_v34, 7  ;;  %v9687_v44 = vor.u32 %v4677_v58, %v9566_v63  ;;  %v2702_v55 = vmul.f32 %v11771_v18, %v2694_v50  ;;  %v2739_v45 = vmul.f32 %v11769_v20, %v2731_v3  ;;  %1001 = vst [vmem:[#allocation2 + $0x2a8] sm:$0xff] %v739_v47 }
 0x205   : > { %v1842_v40 = vrot.slane %v1840_v0, 7  ;;  %v2727_v33 = vadd.f32 %v2719_v37, %v9617_v35  ;;  %v2758_v11 = vmul.f32 %v11768_v21, %v2694_v50  ;;  %v2759_v1 = vmul.f32 %v11768_v21, %v2751_v12 }
 0x206   : > { %v1837_v10 = vor.u32 %v1835_v60, %v1834_v29  ;;  %v1838_v34 = vrot.slane %v1834_v29, 4  ;;  %v2746_v0 = vadd.f32 %v2738_v26, %v9636_v31  ;;  %v2858_v63 = vmul.f32 %v11775_v14, %v2674_v53 }
 0x207   : > { %v1845_v4 = vor.u32 %v1843_v46, %v1842_v40  ;;  %v2747_v57 = vadd.f32 %v2739_v45, %v2727_v33  ;;  %v2843_v60 = vmul.f32 %v7966_v2, %v11776_v13  ;;  %v2859_v35 = vmul.f32 %v11775_v14, %v2731_v3 }
 0x208   : > { %v1850_v58 = vsel %vm9469_vm12, %v1837_v10, %v1849_v51  ;;  %v2766_v29 = vadd.f32 %v2758_v11, %v2746_v0  ;;  %v2866_v46 = vadd.f32 %v2858_v63, %v9624_v36  ;;  %v2882_v31 = vmul.f32 %v11774_v15, %v2694_v50  ;;  %v2732_v11 = vld [vmem:[#allocation2 + $0x1e9] sm:$0xff]  ;;  %v2753_v63 = vld [vmem:[#allocation2 + $0x1f2] sm:$0xff] }
 0x209   : > { %v1846_v37 = vsel %vm9476_vm13, %v1838_v34, %v1845_v4  ;;  %1851 = vst [vmem:[#allocation3 + $0x18] sm:$0xf] %v1850_v58  ;;  %v2767_v26 = vadd.f32 %v2759_v1, %v2747_v57  ;;  %v2867_v40 = vadd.f32 %v2859_v35, %v2843_v60  ;;  %v2883_v51 = vmul.f32 %v11774_v15, %v2751_v12  ;;  %v7968_v0 = vld [vmem:[#allocation2 + $0x1f0] sm:$0xff] }
 0x20a   : > { %v1853_v53 = vsel %vm9483_vm14, %v1846_v37, %v1852_v43  ;;  %v2710_v45 = vadd.f32 %v2702_v55, %v2690_v25  ;;  %v9708_v10 = vadd.f32 %v11767_v22, %v2766_v29  ;;  %v2899_v4 = vmul.f32 %v7966_v2, %v11773_v16  ;;  %v2733_v43 = vld [vmem:[#allocation2 + $0x1f1] sm:$0xff] }
 0x20b   : > { %1854 = vst [vmem:[#allocation3 + $0x1c] sm:$0xf] %v1853_v53  ;;  %v2919_v33 = vmul.f32 %v11772_v17, %v2731_v3  ;;  %v2775_v36 = vadd.f32 %v11767_v22, %v2767_v26  ;;  %v2890_v50 = vadd.f32 %v2882_v31, %v2866_v46  ;;  %v9713_v47 = vadd.f32 %v2883_v51, %v2867_v40  ;;  %v7967_v55 = vld [vmem:[#allocation2 + $0x1f8] sm:$0xff]  ;;  %v2752_v3 = vld [vmem:[#allocation2 + $0x1ea] sm:$0xff] }
 0x20c   : > { %v2939_v57 = vmul.f32 %v11771_v18, %v2751_v12  ;;  %v2907_v25 = vadd.f32 %v2899_v4, %v9643_v38  ;;  %v2722_v34 = vmul.f32 %v7967_v55, %v11770_v19  ;;  %v2721_v2 = vmul.f32 %v7968_v0, %v11770_v19  ;;  %v9732_v4 = vld [vmem:[#allocation4] ss:$2 sm:$0xff] }
 0x20d   : > { %v2783_v58 = vmax.f32 %v2775_v36, 0.0  ;;  %v9721_v60 = vmul.f32 %v7967_v55, %v11776_v13  ;;  %v2902_v35 = vmul.f32 %v7967_v55, %v11773_v16  ;;  %v2740_v12 = vmul.f32 %v11769_v20, %v2732_v11  ;;  %v9734_v36 = vld [vmem:[#allocation4 + $0x1] ss:$2 sm:$0xff] }
 0x20e   : > { %v2927_v37 = vadd.f32 %v2919_v33, %v2907_v25  ;;  %v2730_v29 = vadd.f32 %v2722_v34, %v2710_v45  ;;  %v2729_v38 = vadd.f32 %v2721_v2, %v9650_v24  ;;  %v2741_v46 = vmul.f32 %v11769_v20, %v2733_v43 }
 0x20f   : > { %v11797_v31 = vmax.f32 %v9634_v23, 0.0  ;;  %v2748_v26 = vadd.f32 %v2740_v12, %v9676_v54  ;;  %v2760_v40 = vmul.f32 %v11768_v21, %v2752_v3  ;;  %v2761_v51 = vmul.f32 %v11768_v21, %v2753_v63 }
 0x210   : > { %v2749_v55 = vadd.f32 %v2741_v46, %v2729_v38  ;;  %v2845_v45 = vmul.f32 %v7968_v0, %v11776_v13  ;;  %v2860_v24 = vmul.f32 %v11775_v14, %v2732_v11  ;;  %v2861_v33 = vmul.f32 %v11775_v14, %v2733_v43 }
 0x211   : > { %v2787_v53 = vmax.f32 %v11797_v31, %v2783_v58  ;;  %v2910_v23 = vadd.f32 %v2902_v35, %v2890_v50  ;;  %v2768_v54 = vadd.f32 %v2760_v40, %v2748_v26  ;;  %v2884_v34 = vmul.f32 %v11774_v15, %v2752_v3 }
 0x212   : > { %v9739_v25 = vld [vmem:[#allocation3 + $0x18] sm:$0xff]   ;;  %v2901_v2 = vmul.f32 %v7968_v0, %v11773_v16  ;;  %v2769_v58 = vadd.f32 %v2761_v51, %v2749_v55  ;;  %v2868_v12 = vadd.f32 %v2860_v24, %v9665_v5  ;;  %v2869_v31 = vadd.f32 %v2861_v33, %v2845_v45 }
 0x213   : > { %2791 = vst [vmem:[#allocation4] sm:$0xff] %v2787_v53  ;;  %v2920_v38 = vmul.f32 %v11772_v17, %v2732_v11  ;;  %v4681_v46 = vshll.u32 %v9739_v25, 16  ;;  %v2776_v1 = vadd.f32 %v11767_v22, %v2768_v54  ;;  %v2921_v53 = vmul.f32 %v11772_v17, %v2733_v43  ;;  %v2734_v55 = vld [vmem:[#allocation2 + $0x1f9] sm:$0xff] }
 0x214   : > { %v2909_v8 = vadd.f32 %v2901_v2, %v9674_v61  ;;  %v2777_v50 = vadd.f32 %v11767_v22, %v2769_v58  ;;  %v2885_v35 = vmul.f32 %v11774_v15, %v2753_v63  ;;  %v2892_v26 = vadd.f32 %v2884_v34, %v2868_v12  ;;  %v2754_v43 = vld [vmem:[#allocation2 + $0x1fa] sm:$0xff] }
 0x215   : > { %v2928_v0 = vadd.f32 %v2920_v38, %v9679_v30  ;;  %v9752_v40 = vrot.slane %v4681_v46, 1  ;;  %v2784_v5 = vmax.f32 %v2776_v1, 0.0  ;;  %v2940_v11 = vmul.f32 %v11771_v18, %v2752_v3  ;;  %v2915_v2 = vld [vmem:[#allocation2 + $0x201] sm:$0xff] }
 0x216   : > { %v2929_v51 = vadd.f32 %v2921_v53, %v2909_v8  ;;  %v2947_v45 = vadd.f32 %v2939_v57, %v2927_v37  ;;  %v2785_v24 = vmax.f32 %v2777_v50, 0.0  ;;  %v9755_v33 = vadd.f32 %v2885_v35, %v2869_v31  ;;  %v7969_v8 = vld [vmem:[#allocation2 + $0x208] sm:$0xff]  ;;  %v9774_v12 = vld [vmem:[#allocation4 + $0x10] ss:$2 sm:$0x3f] }
 0x217   : > { %v2941_v61 = vmul.f32 %v11771_v18, %v2753_v63  ;;  %v9761_v54 = vsel %vm4656_vm15, %v9687_v44, %v9752_v40  ;;  %v11799_v30 = vmax.f32 %v9662_v27, 0.0  ;;  %v2948_v1 = vadd.f32 %v2940_v11, %v2928_v0  ;;  %v9776_v27 = vld [vmem:[#allocation4 + $0x11] ss:$2 sm:$0x3f] }
 0x218   : > { %11798 = vst [vmem:[#allocation37_spill] sm:$0xff] %v9761_v54  ;;  %v2904_v3 = vmul.f32 %v7969_v8, %v11773_v16  ;;  %5155 = vmatprep.mubr.bf16.mxu0 %v9761_v54  ;;  %v11800_v57 = vmax.f32 %v9672_v48, 0.0  ;;  %v2960_v63 = vmul.f32 %v7969_v8, %v11770_v19  ;;  %v9771_v58 = vmul.f32 %v7969_v8, %v11776_v13  ;;  %v7970_v50 = vld [vmem:[#allocation2 + $0x200] sm:$0xff] }
 0x219   : > { %v2788_v34 = vmax.f32 %v11799_v30, %v2784_v5  ;;  %v2742_v44 = vmul.f32 %v11769_v20, %v2734_v55  ;;  %5156 = vmatmul.mubr.bf16.gmra.mrb[4].mxu0 %v9549_v28  ;;  %v9779_v31 = vadd.f32 %v2941_v61, %v2929_v51  ;;  %v2762_v48 = vmul.f32 %v11768_v21, %v2754_v43  ;;  %v2935_v11 = vld [vmem:[#allocation2 + $0x202] sm:$0xff] }
 0x21a   : > { %v2789_v37 = vmax.f32 %v11800_v57, %v2785_v24  ;;  %v2912_v38 = vadd.f32 %v2904_v3, %v2892_v26  ;;  %v2862_v46 = vmul.f32 %v11775_v14, %v2734_v55  ;;  %v2903_v35 = vmul.f32 %v7970_v50, %v11773_v16 }
 0x21b   : > { %2792 = vst [vmem:[#allocation4 + $0x8] sm:$0xff] %v2788_v34  ;;  %v2750_v53 = vadd.f32 %v2742_v44, %v2730_v29  ;;  %v2922_v0 = vmul.f32 %v11772_v17, %v2734_v55  ;;  %v2923_v5 = vmul.f32 %v11772_v17, %v2915_v2  ;;  %v2968_v24 = vadd.f32 %v2960_v63, %v2948_v1 }
 0x21c   : > { %2793 = vst [vmem:[#allocation4 + $0x10] sm:$0xff] %v2789_v37  ;;  %v2870_v28 = vadd.f32 %v2862_v46, %v9721_v60  ;;  %v2886_v51 = vmul.f32 %v11774_v15, %v2754_v43  ;;  %v2959_v26 = vmul.f32 %v7970_v50, %v11770_v19  ;;  %v2911_v30 = vadd.f32 %v2903_v35, %v9713_v47  ;;  %v734_v37 = vpop.permute.xlu0 %733  ;;  %v2917_v35 = vld [vmem:[#allocation2 + $0x211] sm:$0xff] }
 0x21d   : > { %v2770_v61 = vadd.f32 %v2762_v48, %v2750_v53  ;;  %v2930_v34 = vadd.f32 %v2922_v0, %v2910_v23  ;;  %v2979_v29 = vmul.f32 %v11769_v20, %v2915_v2  ;;  %v2942_v3 = vmul.f32 %v11771_v18, %v2754_v43  ;;  %1000 = vst [vmem:[#allocation2 + $0x2a0] sm:$0xff] %v734_v37  ;;  %v749_v48 = vpop.permute.xlu1 %748  ;;  %v2916_v43 = vld [vmem:[#allocation2 + $0x209] sm:$0xff] }
 0x21e   : > { %v2894_v8 = vadd.f32 %v2886_v51, %v2870_v28  ;;  %v2943_v55 = vmul.f32 %v11771_v18, %v2935_v11  ;;  %v2967_v57 = vadd.f32 %v2959_v26, %v2947_v45  ;;  %v2931_v60 = vadd.f32 %v2923_v5, %v2911_v30  ;;  %1003 = vst [vmem:[#allocation2 + $0x2b8] sm:$0xff] %v749_v48  ;;  %v7971_v28 = vld [vmem:[#allocation2 + $0x218] sm:$0xff] }
 0x21f   : > { %v2778_v1 = vadd.f32 %v11767_v22, %v2770_v61  ;;  %v3083_v63 = vmul.f32 %v7970_v50, %v11776_v13  ;;  %v3099_v44 = vmul.f32 %v11775_v14, %v2915_v2  ;;  %v2950_v47 = vadd.f32 %v2942_v3, %v2930_v34  ;;  %v7972_v61 = vld [vmem:[#allocation2 + $0x210] sm:$0xff] }
 0x220   : > { %v2987_v23 = vadd.f32 %v2979_v29, %v2967_v57  ;;  %v2999_v46 = vmul.f32 %v11768_v21, %v2935_v11  ;;  %v3123_v53 = vmul.f32 %v11774_v15, %v2935_v11  ;;  %v2906_v5 = vmul.f32 %v7971_v28, %v11773_v16  ;;  %v744_v11 = vpop.permute.xlu0 %743 }
 0x221   : > { %v2786_v45 = vmax.f32 %v2778_v1, 0.0  ;;  %v3107_v0 = vadd.f32 %v3099_v44, %v3083_v63  ;;  %v2962_v50 = vmul.f32 %v7971_v28, %v11770_v19  ;;  %v9800_v51 = vadd.f32 %v2943_v55, %v2931_v60  ;;  %v2936_v1 = vld [vmem:[#allocation2 + $0x20a] sm:$0xff]  ;;  %v2937_v55 = vld [vmem:[#allocation2 + $0x212] sm:$0xff]  ;;  %1002 = vst [vmem:[#allocation2 + $0x2b0] sm:$0xff] %v744_v11  ;;  %v759_v60 = vpop.permute.xlu1 %758 }
 0x222   : > { %v3007_v2 = vadd.f32 %v2999_v46, %v2987_v23  ;;  %v9803_v26 = vmul.f32 %v7971_v28, %v11776_v13  ;;  %v2905_v30 = vmul.f32 %v7972_v61, %v11773_v16  ;;  %v11801_v34 = vmax.f32 %v9708_v10, 0.0  ;;  %1005 = vst [vmem:[#allocation2 + $0x2c8] sm:$0xff] %v759_v60 }
 0x223   : > { %v9808_v3 = vadd.f32 %v2906_v5, %v2894_v8  ;;  %v2924_v57 = vmul.f32 %v11772_v17, %v2916_v43  ;;  %v2925_v37 = vmul.f32 %v11772_v17, %v2917_v35  ;;  %v9815_v44 = vadd.f32 %v3123_v53, %v3107_v0 }
 0x224   : > { %v2790_v29 = vmax.f32 %v11801_v34, %v2786_v45  ;;  %v9813_v63 = vadd.f32 %v11767_v22, %v3007_v2  ;;  %v9817_v48 = vadd.f32 %v2962_v50, %v2950_v47  ;;  %v2913_v10 = vadd.f32 %v2905_v30, %v9755_v33  ;;  %v754_v47 = vpop.permute.xlu0 %753 }
 0x225   : > { %v2932_v8 = vadd.f32 %v2924_v57, %v2912_v38  ;;  %v2961_v23 = vmul.f32 %v7972_v61, %v11770_v19  ;;  %v2980_v46 = vmul.f32 %v11769_v20, %v2916_v43  ;;  %v2981_v45 = vmul.f32 %v11769_v20, %v2917_v35  ;;  %1004 = vst [vmem:[#allocation2 + $0x2c0] sm:$0xff] %v754_v47 }
 0x226   : > { %2794 = vst [vmem:[#allocation4 + $0x18] sm:$0xff] %v2790_v29  ;;  %v2933_v5 = vadd.f32 %v2925_v37, %v2913_v10  ;;  %v2944_v2 = vmul.f32 %v11771_v18, %v2936_v1  ;;  %v2945_v53 = vmul.f32 %v11771_v18, %v2937_v55  ;;  %v3000_v50 = vmul.f32 %v11768_v21, %v2936_v1 }
 0x227   : > { %v2969_v0 = vadd.f32 %v2961_v23, %v9779_v31  ;;  %v2988_v33 = vadd.f32 %v2980_v46, %v2968_v24  ;;  %v3001_v38 = vmul.f32 %v11768_v21, %v2937_v55  ;;  %v3085_v11 = vmul.f32 %v7972_v61, %v11776_v13  ;;  %v7973_v46 = vld [vmem:[#allocation2 + $0x228] sm:$0xff] }
 0x228   : > { %v2952_v30 = vadd.f32 %v2944_v2, %v2932_v8  ;;  %v3100_v34 = vmul.f32 %v11775_v14, %v2916_v43  ;;  %v3101_v29 = vmul.f32 %v11775_v14, %v2917_v35  ;;  %v9832_v57 = vadd.f32 %v2945_v53, %v2933_v5  ;;  %v2918_v2 = vld [vmem:[#allocation2 + $0x219] sm:$0xff]  ;;  %v764_v5 = vpop.permute.xlu0 %763 }
 0x229   : > { %v2989_v37 = vadd.f32 %v2981_v45, %v2969_v0  ;;  %v3008_v60 = vadd.f32 %v3000_v50, %v2988_v33  ;;  %v3124_v10 = vmul.f32 %v11774_v15, %v2936_v1  ;;  %v3125_v23 = vmul.f32 %v11774_v15, %v2937_v55  ;;  %v769_v1 = vpop.permute.xlu1 %768  ;;  %v2938_v0 = vld [vmem:[#allocation2 + $0x21a] sm:$0xff]  ;;  %1006 = vst [vmem:[#allocation2 + $0x2d0] sm:$0xff] %v764_v5 }
 0x22a   : > { %v3108_v31 = vadd.f32 %v3100_v34, %v9771_v58  ;;  %v3109_v24 = vadd.f32 %v3101_v29, %v3085_v11  ;;  %v2964_v8 = vmul.f32 %v7973_v46, %v11770_v19  ;;  %v9842_v35 = vmul.f32 %v7973_v46, %v11776_v13  ;;  %1007 = vst [vmem:[#allocation2 + $0x2d8] sm:$0xff] %v769_v1 }
 0x22b   : > { %v3009_v61 = vadd.f32 %v3001_v38, %v2989_v37  ;;  %v9839_v43 = vadd.f32 %v11767_v22, %v3008_v60  ;;  %v2067_v45 = vmax.f32 %v9349_v7, %v9351_v42  ;;  %v3144_v55 = vmul.f32 %v7973_v46, %v11773_v16  ;;  %v7843_v42 = vld [vmem:[#allocation10 + $0x140] sm:$0xff]   ;;  %v7974_v46 = vld [vmem:[#allocation2 + $0x220] sm:$0xff] }
 0x22c   : > { %v3132_v58 = vadd.f32 %v3124_v10, %v3108_v31  ;;  %v9846_v53 = vadd.f32 %v2964_v8, %v2952_v30  ;;  %v2068_v47 = vmax.f32 %v9384_v39, %v9386_v32  ;;  %v9851_v33 = vadd.f32 %v3125_v23, %v3109_v24  ;;  %v2975_v39 = vld [vmem:[#allocation2 + $0x221] sm:$0xff]  ;;  %7646 = vmatprep.subr.bf16.mxu1 %v7843_v42 }
 0x22d   : > { %v7101_v50 = vpack.c.bf16 %v2067_v45, %v2067_v45  ;;  %v4685_v38 = vshrl.u32 %v9739_v25, 16  ;;  %v2926_v7 = vmul.f32 %v11772_v17, %v2918_v2  ;;  %v9856_v11 = vadd.f32 %v11767_v22, %v3009_v61  ;;  %v2995_v31 = vld [vmem:[#allocation2 + $0x222] sm:$0xff]  ;;  %7514 = vmatprep.subr.bf16.mxu0 %v7843_v42  ;;  %7654 = vmatpush3.bf16.msra.mxu1 %v7843_v42 }
 0x22e   : > { %v9859_v34 = vadd.f32 %v3144_v55, %v3132_v58  ;;  %v7102_v29 = vpack.c.bf16 %v2068_v47, %v2068_v47  ;;  %v2946_v10 = vmul.f32 %v11771_v18, %v2938_v0  ;;  %v2963_v8 = vmul.f32 %v7974_v46, %v11770_v19  ;;  %7515 = vmatpush3.bf16.msra.mxu0 %v7843_v42  ;;  %v2093_v55 = vld [vmem:[#allocation3 + $0x20] sm:$0xf] }
 0x22f   : > { %v2076_v32 = vshrl.u32 %v7101_v50, 16  ;;  %v2079_v37 = vshll.u32 %v7101_v50, 16  ;;  %v9862_v60 = vor.u32 %v4685_v38, %v9752_v40  ;;  %v2934_v23 = vadd.f32 %v2926_v7, %v9808_v3  ;;  %v779_v38 = vpop.permute.xlu1 %778 }
 0x230   : > { %v2084_v24 = vshrl.u32 %v7102_v29, 16  ;;  %v2982_v61 = vmul.f32 %v11769_v20, %v2918_v2  ;;  %v2087_v1 = vshll.u32 %v7102_v29, 16  ;;  %v2983_v40 = vmul.f32 %v11769_v20, %v2975_v39  ;;  %1009 = vst [vmem:[#allocation2 + $0x2e8] sm:$0xff] %v779_v38  ;;  %v7976_v38 = vld [vmem:[#allocation2 + $0x230] sm:$0xff] }
 0x231   : > { %v2078_v45 = vrot.slane %v2076_v32, 7  ;;  %v3002_v5 = vmul.f32 %v11768_v21, %v2938_v0  ;;  %v2971_v47 = vadd.f32 %v2963_v8, %v9800_v51  ;;  %v3003_v3 = vmul.f32 %v11768_v21, %v2995_v31  ;;  %v2096_v32 = vld [vmem:[#allocation3 + $0x24] sm:$0xf] }
 0x232   : > { %v2086_v58 = vrot.slane %v2084_v24, 7  ;;  %v2990_v50 = vadd.f32 %v2982_v61, %v9817_v48  ;;  %v3087_v28 = vmul.f32 %v7974_v46, %v11776_v13  ;;  %v3102_v42 = vmul.f32 %v11775_v14, %v2918_v2 }
 0x233   : > { %v2081_v7 = vor.u32 %v2079_v37, %v2078_v45  ;;  %v2082_v30 = vrot.slane %v2078_v45, 4  ;;  %v2991_v54 = vadd.f32 %v2983_v40, %v2971_v47  ;;  %v3103_v24 = vmul.f32 %v11775_v14, %v2975_v39 }
 0x234   : > { %v2089_v29 = vor.u32 %v2087_v1, %v2086_v58  ;;  %v3010_v41 = vadd.f32 %v3002_v5, %v2990_v50  ;;  %v2954_v48 = vadd.f32 %v2946_v10, %v2934_v23  ;;  %v3110_v8 = vadd.f32 %v3102_v42, %v9803_v26  ;;  %v2976_v23 = vld [vmem:[#allocation2 + $0x229] sm:$0xff]  ;;  %v7975_v50 = vld [vmem:[#allocation2 + $0x238] sm:$0xff] }
 0x235   : > { %v2094_v51 = vsel %vm9469_vm12, %v2081_v7, %v2093_v55  ;;  %v3126_v37 = vmul.f32 %v11774_v15, %v2938_v0  ;;  %v3011_v2 = vadd.f32 %v3003_v3, %v2991_v54  ;;  %v3111_v1 = vadd.f32 %v3103_v24, %v3087_v28  ;;  %v2977_v0 = vld [vmem:[#allocation2 + $0x231] sm:$0xff] }
 0x236   : > { %v2090_v61 = vsel %vm9476_vm13, %v2082_v30, %v2089_v29  ;;  %2095 = vst [vmem:[#allocation3 + $0x20] sm:$0xf] %v2094_v51  ;;  %v9883_v45 = vadd.f32 %v11767_v22, %v3010_v41  ;;  %v3127_v5 = vmul.f32 %v11774_v15, %v2995_v31  ;;  %v3143_v10 = vmul.f32 %v7974_v46, %v11773_v16 }
 0x237   : > { %v2097_v40 = vsel %vm9483_vm14, %v2090_v61, %v2096_v32  ;;  %v3163_v26 = vmul.f32 %v11772_v17, %v2975_v39  ;;  %v3025_v58 = vmax.f32 %v9856_v11, 0.0  ;;  %v3019_v54 = vadd.f32 %v11767_v22, %v3011_v2  ;;  %v2996_v39 = vld [vmem:[#allocation2 + $0x22a] sm:$0xff]  ;;  %v9966_v11 = vld [vmem:[#allocation4 + $0x10] ss:$2 sm:$0x3f] }
 0x238   : > { %2098 = vst [vmem:[#allocation3 + $0x24] sm:$0xf] %v2097_v40  ;;  %v3026_v41 = vmax.f32 %v9883_v45, 0.0  ;;  %v3134_v30 = vadd.f32 %v3126_v37, %v3110_v8  ;;  %v9893_v28 = vadd.f32 %v3127_v5, %v3111_v1  ;;  %v3151_v55 = vadd.f32 %v3143_v10, %v9815_v44  ;;  %v9910_v40 = vld [vmem:[#allocation4] ss:$2 sm:$0xff]  ;;  %11805 = vst [vmem:[#allocation39_spill] sm:$0xff] %v9966_v11 }
 0x239   : > { %v3183_v47 = vmul.f32 %v11771_v18, %v2995_v31  ;;  %v2966_v46 = vmul.f32 %v7975_v50, %v11770_v19  ;;  %v3027_v3 = vmax.f32 %v3019_v54, 0.0  ;;  %v2965_v7 = vmul.f32 %v7976_v38, %v11770_v19  ;;  %v2997_v31 = vld [vmem:[#allocation2 + $0x232] sm:$0xff] }
 0x23a   : > { %v2984_v42 = vmul.f32 %v11769_v20, %v2976_v23  ;;  %v2985_v29 = vmul.f32 %v11769_v20, %v2977_v0  ;;  %v3171_v32 = vadd.f32 %v3163_v26, %v3151_v55  ;;  %v9902_v51 = vmul.f32 %v7975_v50, %v11776_v13  ;;  %v9912_v5 = vld [vmem:[#allocation4 + $0x1] ss:$2 sm:$0xff] }
 0x23b   : > { %v2974_v24 = vadd.f32 %v2966_v46, %v2954_v48  ;;  %v3146_v44 = vmul.f32 %v7975_v50, %v11773_v16  ;;  %v11802_v8 = vmax.f32 %v9813_v63, 0.0  ;;  %v2973_v61 = vadd.f32 %v2965_v7, %v9832_v57 }
 0x23c   : > { %v2992_v2 = vadd.f32 %v2984_v42, %v9846_v53  ;;  %v3004_v1 = vmul.f32 %v11768_v21, %v2996_v39  ;;  %v3089_v10 = vmul.f32 %v7976_v38, %v11776_v13  ;;  %v3104_v26 = vmul.f32 %v11775_v14, %v2976_v23 }
 0x23d   : > { %v3031_v37 = vmax.f32 %v11802_v8, %v3027_v3  ;;  %v9914_v48 = vadd.f32 %v3146_v44, %v3134_v30  ;;  %v3105_v54 = vmul.f32 %v11775_v14, %v2977_v0  ;;  %v9919_v63 = vadd.f32 %v3183_v47, %v3171_v32 }
 0x23e   : > { %v2993_v55 = vadd.f32 %v2985_v29, %v2973_v61  ;;  %v3005_v57 = vmul.f32 %v11768_v21, %v2997_v31  ;;  %v3012_v53 = vadd.f32 %v3004_v1, %v2992_v2  ;;  %v3112_v46 = vadd.f32 %v3104_v26, %v9842_v35  ;;  %v2978_v1 = vld [vmem:[#allocation2 + $0x239] sm:$0xff] }
 0x23f   : > { %3035 = vst [vmem:[#allocation4] sm:$0xff] %v3031_v37  ;;  %v9922_v50 = vld [vmem:[#allocation3 + $0x20] sm:$0xff]   ;;  %v3113_v3 = vadd.f32 %v3105_v54, %v3089_v10  ;;  %v3145_v30 = vmul.f32 %v7976_v38, %v11773_v16  ;;  %v3164_v7 = vmul.f32 %v11772_v17, %v2976_v23  ;;  %v3128_v47 = vmul.f32 %v11774_v15, %v2996_v39 }
 0x240   : > { %v3013_v42 = vadd.f32 %v3005_v57, %v2993_v55  ;;  %v3020_v44 = vadd.f32 %v11767_v22, %v3012_v53  ;;  %v3165_v29 = vmul.f32 %v11772_v17, %v2977_v0  ;;  %v4689_v32 = vshll.u32 %v9922_v50, 16 }
 0x241   : > { %v3129_v8 = vmul.f32 %v11774_v15, %v2997_v31  ;;  %v3153_v37 = vadd.f32 %v3145_v30, %v9851_v33  ;;  %v3184_v35 = vmul.f32 %v11771_v18, %v2996_v39  ;;  %v3136_v2 = vadd.f32 %v3128_v47, %v3112_v46  ;;  %v7977_v39 = vld [vmem:[#allocation2 + $0x248] sm:$0xff] }
 0x242   : > { %v3021_v61 = vadd.f32 %v11767_v22, %v3013_v42  ;;  %v3028_v38 = vmax.f32 %v3020_v44, 0.0  ;;  %v3172_v23 = vadd.f32 %v3164_v7, %v9859_v34  ;;  %v9936_v10 = vrot.slane %v4689_v32, 1  ;;  %v2998_v42 = vld [vmem:[#allocation2 + $0x23a] sm:$0xff] }
 0x243   : > { %v9938_v26 = vadd.f32 %v3129_v8, %v3113_v3  ;;  %v3173_v0 = vadd.f32 %v3165_v29, %v3153_v37  ;;  %v3185_v54 = vmul.f32 %v11771_v18, %v2997_v31  ;;  %v11803_v57 = vmax.f32 %v9839_v43, 0.0  ;;  %v3159_v7 = vld [vmem:[#allocation2 + $0x241] sm:$0xff] }
 0x244   : > { %v3029_v55 = vmax.f32 %v3021_v61, 0.0  ;;  %v3192_v53 = vadd.f32 %v3184_v35, %v3172_v23  ;;  %v3148_v30 = vmul.f32 %v7977_v39, %v11773_v16  ;;  %v9947_v34 = vsel %vm4656_vm15, %v9862_v60, %v9936_v10  ;;  %v3179_v29 = vld [vmem:[#allocation2 + $0x242] sm:$0xff] }
 0x245   : > { %v3032_v33 = vmax.f32 %v11803_v57, %v3028_v38  ;;  %11804 = vst [vmem:[#allocation38_spill] sm:$0xff] %v9947_v34  ;;  %v3204_v46 = vmul.f32 %v7977_v39, %v11770_v19  ;;  %v9951_v3 = vmul.f32 %v7977_v39, %v11776_v13  ;;  %v2986_v31 = vmul.f32 %v11769_v20, %v2978_v1  ;;  %v7978_v37 = vld [vmem:[#allocation2 + $0x240] sm:$0xff] }
 0x246   : > { %5163 = vmatprep.mubr.bf16.mxu0 %v9947_v34  ;;  %v3033_v43 = vmax.f32 %v3025_v58, %v3029_v55  ;;  %v9957_v44 = vadd.f32 %v3185_v54, %v3173_v0  ;;  %v9959_v47 = vadd.f32 %v3148_v30, %v3136_v2  ;;  %v3106_v60 = vmul.f32 %v11775_v14, %v2978_v1  ;;  %v9968_v58 = vld [vmem:[#allocation4 + $0x11] ss:$2 sm:$0x3f] }
 0x247   : > { %3036 = vst [vmem:[#allocation4 + $0x8] sm:$0xff] %v3032_v33  ;;  %5164 = vmatmul.mubr.bf16.gmra.mrb[8].mxu0 %v9739_v25  ;;  %v2994_v32 = vadd.f32 %v2986_v31, %v2974_v24  ;;  %v3006_v8 = vmul.f32 %v11768_v21, %v2998_v42  ;;  %v3147_v35 = vmul.f32 %v7978_v37, %v11773_v16 }
 0x248   : > { %v3166_v61 = vmul.f32 %v11772_v17, %v2978_v1  ;;  %v9970_v38 = vadd.f32 %v3204_v46, %v3192_v53  ;;  %v3114_v2 = vadd.f32 %v3106_v60, %v9902_v51  ;;  %v3130_v23 = vmul.f32 %v11774_v15, %v2998_v42  ;;  %3037 = vst [vmem:[#allocation4 + $0x10] sm:$0xff] %v3033_v43  ;;  %v774_v51 = vpop.permute.xlu0 %773  ;;  %v7846_v43 = vld [vmem:[#allocation10 + $0x150] sm:$0xff]  }
 0x249   : > { %v3167_v25 = vmul.f32 %v11772_v17, %v3159_v7  ;;  %v3014_v24 = vadd.f32 %v3006_v8, %v2994_v32  ;;  %v3155_v0 = vadd.f32 %v3147_v35, %v9893_v28  ;;  %v3203_v1 = vmul.f32 %v7978_v37, %v11770_v19  ;;  %1008 = vst [vmem:[#allocation2 + $0x2e0] sm:$0xff] %v774_v51  ;;  %v7845_v28 = vld [vmem:[#allocation10 + $0x148] sm:$0xff]   ;;  %v3160_v35 = vld [vmem:[#allocation2 + $0x249] sm:$0xff] }
 0x24a   : > { %v3174_v54 = vadd.f32 %v3166_v61, %v9914_v48  ;;  %v3138_v55 = vadd.f32 %v3130_v23, %v3114_v2  ;;  %v3186_v57 = vmul.f32 %v11771_v18, %v2998_v42  ;;  %v3187_v33 = vmul.f32 %v11771_v18, %v3179_v29  ;;  %v789_v48 = vpop.permute.xlu1 %788  ;;  %v3161_v61 = vld [vmem:[#allocation2 + $0x251] sm:$0xff]  ;;  %7647 = vmatprep.subr.bf16.mxu1 %v7845_v28 }
 0x24b   : > { %v3223_v53 = vmul.f32 %v11769_v20, %v3159_v7  ;;  %v3022_v39 = vadd.f32 %v11767_v22, %v3014_v24  ;;  %v3175_v30 = vadd.f32 %v3167_v25, %v3155_v0  ;;  %v3211_v46 = vadd.f32 %v3203_v1, %v9919_v63  ;;  %1011 = vst [vmem:[#allocation2 + $0x2f8] sm:$0xff] %v789_v48  ;;  %v7979_v25 = vld [vmem:[#allocation2 + $0x258] sm:$0xff] }
 0x24c   : > { %v3243_v31 = vmul.f32 %v11768_v21, %v3179_v29  ;;  %v3194_v60 = vadd.f32 %v3186_v57, %v3174_v54  ;;  %v3327_v32 = vmul.f32 %v7978_v37, %v11776_v13  ;;  %v3343_v42 = vmul.f32 %v11775_v14, %v3159_v7  ;;  %7516 = vmatprep.subr.bf16.mxu0 %v7845_v28  ;;  %v7980_v7 = vld [vmem:[#allocation2 + $0x250] sm:$0xff]  ;;  %v784_v1 = vpop.permute.xlu0 %783 }
 0x24d   : > { %v3367_v8 = vmul.f32 %v11774_v15, %v3179_v29  ;;  %v3030_v2 = vmax.f32 %v3022_v39, 0.0  ;;  %v3231_v23 = vadd.f32 %v3223_v53, %v3211_v46  ;;  %v3150_v63 = vmul.f32 %v7979_v25, %v11773_v16  ;;  %7655 = vmatpush3.bf16.msra.mxu1 %v7845_v28  ;;  %v3180_v46 = vld [vmem:[#allocation2 + $0x24a] sm:$0xff]  ;;  %1010 = vst [vmem:[#allocation2 + $0x2f0] sm:$0xff] %v784_v1 }
 0x24e   : > { %v3206_v24 = vmul.f32 %v7979_v25, %v11770_v19  ;;  %v9989_v0 = vadd.f32 %v3187_v33, %v3175_v30  ;;  %v3351_v54 = vadd.f32 %v3343_v42, %v3327_v32  ;;  %v9992_v37 = vmul.f32 %v7979_v25, %v11776_v13  ;;  %v3181_v33 = vld [vmem:[#allocation2 + $0x252] sm:$0xff]  ;;  %7648 = vmatprep.subr.bf16.mxu1 %v7846_v43  ;;  %v799_v30 = vpop.permute.xlu1 %798 }
 0x24f   : > { %v3149_v29 = vmul.f32 %v7980_v7, %v11773_v16  ;;  %v3034_v57 = vmax.f32 %v3026_v41, %v3030_v2  ;;  %v3251_v53 = vadd.f32 %v3243_v31, %v3231_v23  ;;  %v3168_v51 = vmul.f32 %v11772_v17, %v3160_v35  ;;  %1013 = vst [vmem:[#allocation2 + $0x308] sm:$0xff] %v799_v30 }
 0x250   : > { %v3169_v39 = vmul.f32 %v11772_v17, %v3161_v61  ;;  %v9999_v48 = vadd.f32 %v3367_v8, %v3351_v54  ;;  %v10001_v32 = vadd.f32 %v3150_v63, %v3138_v55  ;;  %v10003_v42 = vadd.f32 %v3206_v24, %v3194_v60  ;;  %7517 = vmatpush3.bf16.msra.mxu0 %v7845_v28  ;;  %v794_v28 = vpop.permute.xlu0 %793 }
 0x251   : > { %v3157_v25 = vadd.f32 %v3149_v29, %v9938_v26  ;;  %v10007_v45 = vadd.f32 %v11767_v22, %v3251_v53  ;;  %v3176_v41 = vadd.f32 %v3168_v51, %v9959_v47  ;;  %v3205_v31 = vmul.f32 %v7980_v7, %v11770_v19  ;;  %3038 = vst [vmem:[#allocation4 + $0x18] sm:$0xff] %v3034_v57 }
 0x252   : > { %v3224_v2 = vmul.f32 %v11769_v20, %v3160_v35  ;;  %7518 = vmatprep.subr.bf16.mxu0 %v7846_v43  ;;  %v3188_v55 = vmul.f32 %v11771_v18, %v3180_v46  ;;  %v3189_v60 = vmul.f32 %v11771_v18, %v3181_v33  ;;  %v3225_v26 = vmul.f32 %v11769_v20, %v3161_v61 }
 0x253   : > { %v3177_v8 = vadd.f32 %v3169_v39, %v3157_v25  ;;  %7656 = vmatpush3.bf16.msra.mxu1 %v7846_v43  ;;  %v3213_v23 = vadd.f32 %v3205_v31, %v9957_v44  ;;  %v3244_v47 = vmul.f32 %v11768_v21, %v3180_v46  ;;  %v3245_v24 = vmul.f32 %v11768_v21, %v3181_v33 }
 0x254   : > { %v3232_v63 = vadd.f32 %v3224_v2, %v9970_v38  ;;  %1012 = vst [vmem:[#allocation2 + $0x300] sm:$0xff] %v794_v28  ;;  %v3329_v29 = vmul.f32 %v7980_v7, %v11776_v13  ;;  %v3344_v1 = vmul.f32 %v11775_v14, %v3160_v35  ;;  %v3345_v57 = vmul.f32 %v11775_v14, %v3161_v61  ;;  %v7847_v38 = vld [vmem:[#allocation10 + $0x158] sm:$0xff]  }
 0x255   : > { %7519 = vmatpush3.bf16.msra.mxu0 %v7846_v43  ;;  %v3196_v53 = vadd.f32 %v3188_v55, %v3176_v41  ;;  %v10023_v51 = vadd.f32 %v3189_v60, %v3177_v8  ;;  %v3233_v44 = vadd.f32 %v3225_v26, %v3213_v23  ;;  %v3368_v31 = vmul.f32 %v11774_v15, %v3180_v46  ;;  %v7981_v35 = vld [vmem:[#allocation2 + $0x268] sm:$0xff]  ;;  %v3162_v41 = vld [vmem:[#allocation2 + $0x259] sm:$0xff]  ;;  %v809_v8 = vpop.permute.xlu1 %808  ;;  %v804_v55 = vpop.permute.xlu0 %803 }
 0x256   : > { %v3252_v39 = vadd.f32 %v3244_v47, %v3232_v63  ;;  %v3352_v30 = vadd.f32 %v3344_v1, %v9951_v3  ;;  %v3353_v25 = vadd.f32 %v3345_v57, %v3329_v29  ;;  %v3369_v2 = vmul.f32 %v11774_v15, %v3181_v33  ;;  %7649 = vmatprep.subr.bf16.mxu1 %v7847_v38  ;;  %v3182_v26 = vld [vmem:[#allocation2 + $0x25a] sm:$0xff]  ;;  %v7848_v47 = vld [vmem:[#allocation10 + $0x160] sm:$0xff]  }
 0x257   : > { %v3253_v28 = vadd.f32 %v3245_v24, %v3233_v44  ;;  %v3208_v43 = vmul.f32 %v7981_v35, %v11770_v19  ;;  %v2311_v61 = vmax.f32 %v9532_v59, %v9534_v49  ;;  %v10035_v60 = vmul.f32 %v7981_v35, %v11776_v13  ;;  %7657 = vmatpush3.bf16.msra.mxu1 %v7847_v38 }
 0x258   : > { %v10029_v7 = vadd.f32 %v11767_v22, %v3252_v39  ;;  %v3376_v3 = vadd.f32 %v3368_v31, %v3352_v30  ;;  %v3388_v46 = vmul.f32 %v7981_v35, %v11773_v16  ;;  %v2312_v33 = vmax.f32 %v9585_v56, %v9587_v62  ;;  %1015 = vst [vmem:[#allocation2 + $0x318] sm:$0xff] %v809_v8  ;;  %v3219_v62 = vld [vmem:[#allocation2 + $0x261] sm:$0xff] }
 0x259   : > { %1014 = vst [vmem:[#allocation2 + $0x310] sm:$0xff] %v804_v55  ;;  %v10041_v23 = vadd.f32 %v11767_v22, %v3253_v28  ;;  %v10043_v59 = vadd.f32 %v3369_v2, %v3353_v25  ;;  %v10045_v49 = vadd.f32 %v3208_v43, %v3196_v53  ;;  %v7103_v63 = vpack.c.bf16 %v2311_v61, %v2311_v61  ;;  %v3239_v30 = vld [vmem:[#allocation2 + $0x262] sm:$0xff] }
 0x25a   : > { %7520 = vmatprep.subr.bf16.mxu0 %v7847_v38  ;;  %v7104_v29 = vpack.c.bf16 %v2312_v33, %v2312_v33  ;;  %v4693_v1 = vshrl.u32 %v9922_v50, 16  ;;  %v3170_v56 = vmul.f32 %v11772_v17, %v3162_v41  ;;  %v10051_v44 = vadd.f32 %v3388_v46, %v3376_v3  ;;  %7650 = vmatprep.subr.bf16.mxu1 %v7848_v47  ;;  %v7982_v28 = vld [vmem:[#allocation2 + $0x260] sm:$0xff]  ;;  %v2337_v3 = vld [vmem:[#allocation3 + $0x28] sm:$0xf] }
 0x25b   : > { %7521 = vmatpush3.bf16.msra.mxu0 %v7847_v38  ;;  %v2320_v39 = vshrl.u32 %v7103_v63, 16  ;;  %v3190_v53 = vmul.f32 %v11771_v18, %v3182_v26  ;;  %v2323_v25 = vshll.u32 %v7103_v63, 16  ;;  %v3207_v35 = vmul.f32 %v7982_v28, %v11770_v19  ;;  %7658 = vmatpush3.bf16.msra.mxu1 %v7848_v47 }
 0x25c   : > { %7522 = vmatprep.subr.bf16.mxu0 %v7848_v47  ;;  %v2328_v31 = vshrl.u32 %v7104_v29, 16  ;;  %v2331_v2 = vshll.u32 %v7104_v29, 16  ;;  %v3178_v38 = vadd.f32 %v3170_v56, %v10001_v32  ;;  %v3226_v61 = vmul.f32 %v11769_v20, %v3162_v41  ;;  %v2340_v56 = vld [vmem:[#allocation3 + $0x2c] sm:$0xf] }
 0x25d   : > { %v2322_v43 = vrot.slane %v2320_v39, 7  ;;  %v3227_v8 = vmul.f32 %v11769_v20, %v3219_v62  ;;  %v3215_v46 = vadd.f32 %v3207_v35, %v9989_v0  ;;  %v3246_v33 = vmul.f32 %v11768_v21, %v3182_v26 }
 0x25e   : > { %v2330_v55 = vrot.slane %v2328_v31, 7  ;;  %v3247_v63 = vmul.f32 %v11768_v21, %v3239_v30  ;;  %v3234_v24 = vadd.f32 %v3226_v61, %v10003_v42  ;;  %v3331_v39 = vmul.f32 %v7982_v28, %v11776_v13 }
 0x25f   : > { %7523 = vmatpush3.bf16.msra.mxu0 %v7848_v47  ;;  %v2325_v29 = vor.u32 %v2323_v25, %v2322_v43  ;;  %v2326_v57 = vrot.slane %v2322_v43, 4  ;;  %v3235_v54 = vadd.f32 %v3227_v8, %v3215_v46  ;;  %v3346_v34 = vmul.f32 %v11775_v14, %v3162_v41  ;;  %v3220_v8 = vld [vmem:[#allocation2 + $0x269] sm:$0xff] }
 0x260   : > { %v2333_v32 = vor.u32 %v2331_v2, %v2330_v55  ;;  %v3347_v31 = vmul.f32 %v11775_v14, %v3219_v62  ;;  %v3254_v35 = vadd.f32 %v3246_v33, %v3234_v24  ;;  %v3370_v11 = vmul.f32 %v11774_v15, %v3182_v26 }
 0x261   : > { %v2338_v0 = vsel %vm9469_vm12, %v2325_v29, %v2337_v3  ;;  %v3371_v47 = vmul.f32 %v11774_v15, %v3239_v30  ;;  %v3255_v25 = vadd.f32 %v3247_v63, %v3235_v54  ;;  %v3354_v2 = vadd.f32 %v3346_v34, %v9992_v37  ;;  %v3221_v37 = vld [vmem:[#allocation2 + $0x271] sm:$0xff] }
 0x262   : > { %v2334_v42 = vsel %vm9476_vm13, %v2326_v57, %v2333_v32  ;;  %2339 = vst [vmem:[#allocation3 + $0x28] sm:$0xf] %v2338_v0  ;;  %v3355_v43 = vadd.f32 %v3347_v31, %v3331_v39  ;;  %v10075_v61 = vadd.f32 %v11767_v22, %v3254_v35  ;;  %v3387_v24 = vmul.f32 %v7982_v28, %v11773_v16  ;;  %v3240_v63 = vld [vmem:[#allocation2 + $0x26a] sm:$0xff]  ;;  %v7983_v29 = vld [vmem:[#allocation2 + $0x278] sm:$0xff] }
 0x263   : > { %v2341_v41 = vsel %vm9483_vm14, %v2334_v42, %v2340_v56  ;;  %v3407_v26 = vmul.f32 %v11772_v17, %v3219_v62  ;;  %v10080_v55 = vor.u32 %v4693_v1, %v9936_v10  ;;  %v3198_v57 = vadd.f32 %v3190_v53, %v3178_v38  ;;  %v7984_v10 = vld [vmem:[#allocation2 + $0x270] sm:$0xff] }
 0x264   : > { %2342 = vst [vmem:[#allocation3 + $0x2c] sm:$0xf] %v2341_v41  ;;  %v3263_v54 = vadd.f32 %v11767_v22, %v3255_v25  ;;  %v3378_v34 = vadd.f32 %v3370_v11, %v3354_v2  ;;  %v3270_v3 = vmax.f32 %v10075_v61, 0.0  ;;  %v10084_v46 = vadd.f32 %v3371_v47, %v3355_v43  ;;  %v3241_v56 = vld [vmem:[#allocation2 + $0x272] sm:$0xff] }
 0x265   : > { %v3395_v33 = vadd.f32 %v3387_v24, %v9999_v48  ;;  %v3427_v28 = vmul.f32 %v11771_v18, %v3239_v30  ;;  %v3210_v39 = vmul.f32 %v7983_v29, %v11770_v19  ;;  %v3209_v1 = vmul.f32 %v7984_v10, %v11770_v19  ;;  %v10101_v42 = vld [vmem:[#allocation4] ss:$2 sm:$0xff]  ;;  %v10103_v25 = vld [vmem:[#allocation4 + $0x1] ss:$2 sm:$0xff] }
 0x266   : > { %v3271_v62 = vmax.f32 %v3263_v54, 0.0  ;;  %v3228_v53 = vmul.f32 %v11769_v20, %v3220_v8  ;;  %v10092_v38 = vmul.f32 %v7983_v29, %v11776_v13  ;;  %v3390_v32 = vmul.f32 %v7983_v29, %v11773_v16 }
 0x267   : > { %v3415_v11 = vadd.f32 %v3407_v26, %v3395_v33  ;;  %v3229_v48 = vmul.f32 %v11769_v20, %v3221_v37  ;;  %v11806_v30 = vmax.f32 %v10007_v45, 0.0  ;;  %v3217_v0 = vadd.f32 %v3209_v1, %v10023_v51 }
 0x268   : > { %v3236_v35 = vadd.f32 %v3228_v53, %v10045_v49  ;;  %v3248_v47 = vmul.f32 %v11768_v21, %v3240_v63  ;;  %v3218_v43 = vadd.f32 %v3210_v39, %v3198_v57  ;;  %v10107_v41 = vadd.f32 %v3390_v32, %v3378_v34 }
 0x269   : > { %v3275_v31 = vmax.f32 %v11806_v30, %v3271_v62  ;;  %v10105_v2 = vadd.f32 %v3427_v28, %v3415_v11  ;;  %v3348_v24 = vmul.f32 %v11775_v14, %v3220_v8  ;;  %v3237_v26 = vadd.f32 %v3229_v48, %v3217_v0 }
 0x26a   : > { %v3249_v45 = vmul.f32 %v11768_v21, %v3241_v56  ;;  %v3256_v54 = vadd.f32 %v3248_v47, %v3236_v35  ;;  %v3349_v51 = vmul.f32 %v11775_v14, %v3221_v37  ;;  %v3333_v33 = vmul.f32 %v7984_v10, %v11776_v13  ;;  %v3222_v47 = vld [vmem:[#allocation2 + $0x279] sm:$0xff] }
 0x26b   : > { %3279 = vst [vmem:[#allocation4] sm:$0xff] %v3275_v31  ;;  %v10112_v49 = vld [vmem:[#allocation3 + $0x28] sm:$0xff]   ;;  %v3356_v62 = vadd.f32 %v3348_v24, %v10035_v60  ;;  %v3389_v28 = vmul.f32 %v7984_v10, %v11773_v16  ;;  %v3408_v57 = vmul.f32 %v11772_v17, %v3220_v8  ;;  %v3372_v39 = vmul.f32 %v11774_v15, %v3240_v63 }
 0x26c   : > { %v3257_v34 = vadd.f32 %v3249_v45, %v3237_v26  ;;  %v3264_v29 = vadd.f32 %v11767_v22, %v3256_v54  ;;  %v3409_v1 = vmul.f32 %v11772_v17, %v3221_v37  ;;  %v4697_v53 = vshll.u32 %v10112_v49, 16 }
 0x26d   : > { %v3357_v11 = vadd.f32 %v3349_v51, %v3333_v33  ;;  %v3397_v32 = vadd.f32 %v3389_v28, %v10043_v59  ;;  %v3416_v48 = vadd.f32 %v3408_v57, %v10051_v44  ;;  %v3380_v10 = vadd.f32 %v3372_v39, %v3356_v62  ;;  %v7985_v44 = vld [vmem:[#allocation2 + $0x288] sm:$0xff]  ;;  %v3242_v62 = vld [vmem:[#allocation2 + $0x27a] sm:$0xff] }
 0x26e   : > { %v3265_v60 = vadd.f32 %v11767_v22, %v3257_v34  ;;  %v3272_v30 = vmax.f32 %v3264_v29, 0.0  ;;  %v3428_v8 = vmul.f32 %v11771_v18, %v3240_v63  ;;  %v10126_v31 = vrot.slane %v4697_v53, 1  ;;  %v3403_v28 = vld [vmem:[#allocation2 + $0x281] sm:$0xff] }
 0x26f   : > { %v3373_v0 = vmul.f32 %v11774_v15, %v3241_v56  ;;  %v3417_v35 = vadd.f32 %v3409_v1, %v3397_v32  ;;  %v3429_v37 = vmul.f32 %v11771_v18, %v3241_v56  ;;  %v11807_v26 = vmax.f32 %v10029_v7, 0.0  ;;  %v3423_v39 = vld [vmem:[#allocation2 + $0x282] sm:$0xff] }
 0x270   : > { %v3273_v24 = vmax.f32 %v3265_v60, 0.0  ;;  %v3436_v45 = vadd.f32 %v3428_v8, %v3416_v48  ;;  %v3392_v54 = vmul.f32 %v7985_v44, %v11773_v16  ;;  %v10136_v63 = vsel %vm4656_vm15, %v10080_v55, %v10126_v31  ;;  %v10158_v48 = vld [vmem:[#allocation4 + $0x10] ss:$2 sm:$0x3f] }
 0x271   : > { %v3276_v59 = vmax.f32 %v11807_v26, %v3272_v30  ;;  %11808 = vst [vmem:[#allocation40_spill] sm:$0xff] %v10136_v63  ;;  %v10138_v51 = vadd.f32 %v3373_v0, %v3357_v11  ;;  %v10140_v33 = vadd.f32 %v3429_v37, %v3417_v35  ;;  %v3448_v56 = vmul.f32 %v7985_v44, %v11770_v19  ;;  %v7986_v11 = vld [vmem:[#allocation2 + $0x280] sm:$0xff]  ;;  %v819_v30 = vpop.permute.xlu1 %818  ;;  %v814_v26 = vpop.permute.xlu0 %813 }
 0x272   : > { %5171 = vmatprep.mubr.bf16.mxu0 %v10136_v63  ;;  %v11809_v7 = vmax.f32 %v10041_v23, 0.0  ;;  %v10146_v34 = vadd.f32 %v3392_v54, %v3380_v10  ;;  %v10149_v29 = vmul.f32 %v7985_v44, %v11776_v13  ;;  %v3230_v55 = vmul.f32 %v11769_v20, %v3222_v47  ;;  %v10160_v60 = vld [vmem:[#allocation4 + $0x11] ss:$2 sm:$0x3f]  ;;  %1017 = vst [vmem:[#allocation2 + $0x328] sm:$0xff] %v819_v30 }
 0x273   : > { %3280 = vst [vmem:[#allocation4 + $0x8] sm:$0xff] %v3276_v59  ;;  %5172 = vmatmul.mubr.bf16.gmra.mrb[12].mxu0 %v9922_v50  ;;  %v10153_v1 = vadd.f32 %v3448_v56, %v3436_v45  ;;  %v3350_v53 = vmul.f32 %v11775_v14, %v3222_v47  ;;  %v3391_v32 = vmul.f32 %v7986_v11, %v11773_v16  ;;  %1016 = vst [vmem:[#allocation2 + $0x320] sm:$0xff] %v814_v26  ;;  %v7850_v54 = vld [vmem:[#allocation10 + $0x168] sm:$0xff]   ;;  %v7851_v30 = vld [vmem:[#allocation10 + $0x170] sm:$0xff]  }
 0x274   : > { %v3277_v57 = vmax.f32 %v11809_v7, %v3273_v24  ;;  %v3410_v23 = vmul.f32 %v11772_v17, %v3222_v47  ;;  %v3238_v10 = vadd.f32 %v3230_v55, %v3218_v43  ;;  %v3250_v8 = vmul.f32 %v11768_v21, %v3242_v62  ;;  %7651 = vmatprep.subr.bf16.mxu1 %v7850_v54 }
 0x275   : > { %v3374_v0 = vmul.f32 %v11774_v15, %v3242_v62  ;;  %v3411_v50 = vmul.f32 %v11772_v17, %v3403_v28  ;;  %v3358_v35 = vadd.f32 %v3350_v53, %v10092_v38  ;;  %v3399_v37 = vadd.f32 %v3391_v32, %v10084_v46  ;;  %v3404_v32 = vld [vmem:[#allocation2 + $0x289] sm:$0xff]  ;;  %7659 = vmatpush3.bf16.msra.mxu1 %v7850_v54 }
 0x276   : > { %3281 = vst [vmem:[#allocation4 + $0x10] sm:$0xff] %v3277_v57  ;;  %v3418_v47 = vadd.f32 %v3410_v23, %v10107_v41  ;;  %v3447_v24 = vmul.f32 %v7986_v11, %v11770_v19  ;;  %v3258_v59 = vadd.f32 %v3250_v8, %v3238_v10  ;;  %v3430_v43 = vmul.f32 %v11771_v18, %v3242_v62  ;;  %v829_v41 = vpop.permute.xlu1 %828  ;;  %v3405_v23 = vld [vmem:[#allocation2 + $0x291] sm:$0xff] }
 0x277   : > { %v3431_v45 = vmul.f32 %v11771_v18, %v3423_v39  ;;  %v3467_v44 = vmul.f32 %v11769_v20, %v3403_v28  ;;  %v3419_v56 = vadd.f32 %v3411_v50, %v3399_v37  ;;  %v3487_v38 = vmul.f32 %v11768_v21, %v3423_v39  ;;  %1019 = vst [vmem:[#allocation2 + $0x338] sm:$0xff] %v829_v41  ;;  %v7987_v50 = vld [vmem:[#allocation2 + $0x298] sm:$0xff]  ;;  %v824_v37 = vpop.permute.xlu0 %823 }
 0x278   : > { %v3455_v7 = vadd.f32 %v3447_v24, %v10105_v2  ;;  %v3571_v46 = vmul.f32 %v7986_v11, %v11776_v13  ;;  %v3266_v57 = vadd.f32 %v11767_v22, %v3258_v59  ;;  %v3382_v55 = vadd.f32 %v3374_v0, %v3358_v35  ;;  %1018 = vst [vmem:[#allocation2 + $0x330] sm:$0xff] %v824_v37 }
 0x279   : > { %v3438_v53 = vadd.f32 %v3430_v43, %v3418_v47  ;;  %v3587_v62 = vmul.f32 %v11775_v14, %v3403_v28  ;;  %v10177_v10 = vadd.f32 %v3431_v45, %v3419_v56  ;;  %v3611_v2 = vmul.f32 %v11774_v15, %v3423_v39  ;;  %v7988_v28 = vld [vmem:[#allocation2 + $0x290] sm:$0xff]  ;;  %7652 = vmatprep.subr.bf16.mxu1 %v7851_v30 }
 0x27a   : > { %v3475_v8 = vadd.f32 %v3467_v44, %v3455_v7  ;;  %v3394_v11 = vmul.f32 %v7987_v50, %v11773_v16  ;;  %v3274_v24 = vmax.f32 %v3266_v57, 0.0  ;;  %v3450_v35 = vmul.f32 %v7987_v50, %v11770_v19  ;;  %7524 = vmatprep.subr.bf16.mxu0 %v7850_v54  ;;  %v3424_v45 = vld [vmem:[#allocation2 + $0x28a] sm:$0xff]  ;;  %v839_v44 = vpop.permute.xlu1 %838  ;;  %7660 = vmatpush3.bf16.msra.mxu1 %v7851_v30 }
 0x27b   : > { %v3595_v0 = vadd.f32 %v3587_v62, %v3571_v46  ;;  %v3393_v47 = vmul.f32 %v7988_v28, %v11773_v16  ;;  %v10184_v59 = vmul.f32 %v7987_v50, %v11776_v13  ;;  %v3412_v39 = vmul.f32 %v11772_v17, %v3404_v32  ;;  %7525 = vmatpush3.bf16.msra.mxu0 %v7850_v54  ;;  %v834_v61 = vpop.permute.xlu0 %833 }
 0x27c   : > { %v3495_v26 = vadd.f32 %v3487_v38, %v3475_v8  ;;  %v3413_v43 = vmul.f32 %v11772_v17, %v3405_v23  ;;  %v3278_v56 = vmax.f32 %v3270_v3, %v3274_v24  ;;  %v10190_v7 = vadd.f32 %v3394_v11, %v3382_v55  ;;  %v3425_v38 = vld [vmem:[#allocation2 + $0x292] sm:$0xff]  ;;  %1021 = vst [vmem:[#allocation2 + $0x348] sm:$0xff] %v839_v44 }
 0x27d   : > { %v10192_v46 = vadd.f32 %v3450_v35, %v3438_v53  ;;  %v3401_v41 = vadd.f32 %v3393_v47, %v10138_v51  ;;  %7526 = vmatprep.subr.bf16.mxu0 %v7851_v30  ;;  %v10198_v62 = vadd.f32 %v3611_v2, %v3595_v0  ;;  %v3420_v8 = vadd.f32 %v3412_v39, %v10146_v34 }
 0x27e   : > { %v10196_v57 = vadd.f32 %v11767_v22, %v3495_v26  ;;  %v3449_v54 = vmul.f32 %v7988_v28, %v11770_v19  ;;  %v3432_v55 = vmul.f32 %v11771_v18, %v3424_v45  ;;  %v3468_v53 = vmul.f32 %v11769_v20, %v3404_v32  ;;  %3282 = vst [vmem:[#allocation4 + $0x18] sm:$0xff] %v3278_v56 }
 0x27f   : > { %v3421_v3 = vadd.f32 %v3413_v43, %v3401_v41  ;;  %v3469_v51 = vmul.f32 %v11769_v20, %v3405_v23  ;;  %1020 = vst [vmem:[#allocation2 + $0x340] sm:$0xff] %v834_v61  ;;  %v3433_v2 = vmul.f32 %v11771_v18, %v3425_v38  ;;  %v3488_v34 = vmul.f32 %v11768_v21, %v3424_v45  ;;  %v3406_v61 = vld [vmem:[#allocation2 + $0x299] sm:$0xff] }
 0x280   : > { %v3511_v50 = vmax.f32 %v10196_v57, 0.0  ;;  %v3457_v11 = vadd.f32 %v3449_v54, %v10140_v33  ;;  %7527 = vmatpush3.bf16.msra.mxu0 %v7851_v30  ;;  %v3440_v37 = vadd.f32 %v3432_v55, %v3420_v8  ;;  %v3476_v24 = vadd.f32 %v3468_v53, %v10153_v1  ;;  %v7989_v8 = vld [vmem:[#allocation2 + $0x2a8] sm:$0xff] }
 0x281   : > { %v3489_v0 = vmul.f32 %v11768_v21, %v3425_v38  ;;  %v3588_v35 = vmul.f32 %v11775_v14, %v3404_v32  ;;  %v10212_v47 = vadd.f32 %v3433_v2, %v3421_v3  ;;  %v3573_v39 = vmul.f32 %v7988_v28, %v11776_v13 }
 0x282   : > { %v3477_v26 = vadd.f32 %v3469_v51, %v3457_v11  ;;  %v3589_v43 = vmul.f32 %v11775_v14, %v3405_v23  ;;  %v3496_v44 = vadd.f32 %v3488_v34, %v3476_v24  ;;  %v3612_v56 = vmul.f32 %v11774_v15, %v3424_v45  ;;  %v3463_v24 = vld [vmem:[#allocation2 + $0x2a1] sm:$0xff] }
 0x283   : > { %v3596_v33 = vadd.f32 %v3588_v35, %v10149_v29  ;;  %v3613_v30 = vmul.f32 %v11774_v15, %v3425_v38  ;;  %v3452_v54 = vmul.f32 %v7989_v8, %v11770_v19  ;;  %v2555_v32 = vmax.f32 %v9732_v4, %v9734_v36  ;;  %v849_v4 = vpop.permute.xlu1 %848  ;;  %v844_v36 = vpop.permute.xlu0 %843 }
 0x284   : > { %v3497_v41 = vadd.f32 %v3489_v0, %v3477_v26  ;;  %v3597_v1 = vadd.f32 %v3589_v43, %v3573_v39  ;;  %v10223_v28 = vadd.f32 %v11767_v22, %v3496_v44  ;;  %v10226_v3 = vmul.f32 %v7989_v8, %v11776_v13  ;;  %v7852_v0 = vld [vmem:[#allocation10 + $0x178] sm:$0xff]   ;;  %1023 = vst [vmem:[#allocation2 + $0x358] sm:$0xff] %v849_v4  ;;  %v3426_v26 = vld [vmem:[#allocation2 + $0x29a] sm:$0xff] }
 0x285   : > { %v3620_v23 = vadd.f32 %v3612_v56, %v3596_v33  ;;  %v2556_v29 = vmax.f32 %v9774_v12, %v9776_v27  ;;  %v10233_v38 = vadd.f32 %v3452_v54, %v3440_v37  ;;  %v3632_v55 = vmul.f32 %v7989_v8, %v11773_v16  ;;  %1022 = vst [vmem:[#allocation2 + $0x350] sm:$0xff] %v844_v36 }
 0x286   : > { %v10231_v45 = vadd.f32 %v11767_v22, %v3497_v41  ;;  %v7105_v53 = vpack.c.bf16 %v2555_v32, %v2555_v32  ;;  %v10236_v51 = vadd.f32 %v3613_v30, %v3597_v1  ;;  %v4701_v11 = vshrl.u32 %v10112_v49, 16  ;;  %7653 = vmatprep.subr.bf16.mxu1 %v7852_v0  ;;  %7528 = vmatprep.subr.bf16.mxu0 %v7852_v0  ;;  %v7990_v30 = vld [vmem:[#allocation2 + $0x2a0] sm:$0xff]  ;;  %v2581_v32 = vld [vmem:[#allocation3 + $0x30] sm:$0xf] }
 0x287   : > { %v7106_v2 = vpack.c.bf16 %v2556_v29, %v2556_v29  ;;  %v3414_v34 = vmul.f32 %v11772_v17, %v3406_v61  ;;  %v10242_v37 = vadd.f32 %v3632_v55, %v3620_v23  ;;  %v3451_v41 = vmul.f32 %v7990_v30, %v11770_v19  ;;  %7661 = vmatpush3.bf16.msra.mxu1 %v7852_v0 }
 0x288   : > { %v2564_v35 = vshrl.u32 %v7105_v53, 16  ;;  %v2567_v39 = vshll.u32 %v7105_v53, 16  ;;  %v10245_v33 = vor.u32 %v4701_v11, %v10126_v31  ;;  %v3470_v1 = vmul.f32 %v11769_v20, %v3406_v61  ;;  %7529 = vmatpush3.bf16.msra.mxu0 %v7852_v0  ;;  %v3483_v31 = vld [vmem:[#allocation2 + $0x2a2] sm:$0xff] }
 0x289   : > { %v2572_v43 = vshrl.u32 %v7106_v2, 16  ;;  %v2575_v44 = vshll.u32 %v7106_v2, 16  ;;  %v3471_v8 = vmul.f32 %v11769_v20, %v3463_v24  ;;  %v3422_v23 = vadd.f32 %v3414_v34, %v10190_v7 }
 0x28a   : > { %v2566_v56 = vrot.slane %v2564_v35, 7  ;;  %v3434_v29 = vmul.f32 %v11771_v18, %v3426_v26  ;;  %v3490_v55 = vmul.f32 %v11768_v21, %v3426_v26  ;;  %v3459_v36 = vadd.f32 %v3451_v41, %v10177_v10  ;;  %v2584_v35 = vld [vmem:[#allocation3 + $0x34] sm:$0xf] }
 0x28b   : > { %v2574_v54 = vrot.slane %v2572_v43, 7  ;;  %v3478_v2 = vadd.f32 %v3470_v1, %v10192_v46  ;;  %v3575_v27 = vmul.f32 %v7990_v30, %v11776_v13  ;;  %v3590_v0 = vmul.f32 %v11775_v14, %v3406_v61 }
 0x28c   : > { %v2569_v53 = vor.u32 %v2567_v39, %v2566_v56  ;;  %v2570_v4 = vrot.slane %v2566_v56, 4  ;;  %v3591_v43 = vmul.f32 %v11775_v14, %v3463_v24  ;;  %v3479_v34 = vadd.f32 %v3471_v8, %v3459_v36 }
 0x28d   : > { %v2577_v11 = vor.u32 %v2575_v44, %v2574_v54  ;;  %v3491_v12 = vmul.f32 %v11768_v21, %v3483_v31  ;;  %v3498_v39 = vadd.f32 %v3490_v55, %v3478_v2  ;;  %v3598_v46 = vadd.f32 %v3590_v0, %v10184_v59  ;;  %v3464_v54 = vld [vmem:[#allocation2 + $0x2a9] sm:$0xff]  ;;  %v3485_v0 = vld [vmem:[#allocation2 + $0x2b2] sm:$0xff] }
 0x28e   : > { %v2582_v7 = vsel %vm9469_vm12, %v2569_v53, %v2581_v32  ;;  %v3599_v44 = vadd.f32 %v3591_v43, %v3575_v27  ;;  %v3614_v56 = vmul.f32 %v11774_v15, %v3426_v26  ;;  %v3615_v8 = vmul.f32 %v11774_v15, %v3483_v31  ;;  %v3465_v27 = vld [vmem:[#allocation2 + $0x2b1] sm:$0xff] }
 0x28f   : > { %v2578_v10 = vsel %vm9476_vm13, %v2570_v4, %v2577_v11  ;;  %2583 = vst [vmem:[#allocation3 + $0x30] sm:$0xf] %v2582_v7  ;;  %v3499_v41 = vadd.f32 %v3491_v12, %v3479_v34  ;;  %v10268_v1 = vadd.f32 %v11767_v22, %v3498_v39  ;;  %v3442_v32 = vadd.f32 %v3434_v29, %v3422_v23  ;;  %v3484_v2 = vld [vmem:[#allocation2 + $0x2aa] sm:$0xff] }
 0x290   : > { %v2585_v61 = vsel %vm9483_vm14, %v2578_v10, %v2584_v35  ;;  %v3622_v55 = vadd.f32 %v3614_v56, %v3598_v46  ;;  %v3631_v53 = vmul.f32 %v7990_v30, %v11773_v16  ;;  %v3651_v59 = vmul.f32 %v11772_v17, %v3463_v24  ;;  %v7991_v35 = vld [vmem:[#allocation2 + $0x2b8] sm:$0xff]  ;;  %v7992_v29 = vld [vmem:[#allocation2 + $0x2b0] sm:$0xff] }
 0x291   : > { %2586 = vst [vmem:[#allocation3 + $0x34] sm:$0xf] %v2585_v61  ;;  %v3507_v26 = vadd.f32 %v11767_v22, %v3499_v41  ;;  %v3514_v4 = vmax.f32 %v10268_v1, 0.0  ;;  %v10275_v36 = vadd.f32 %v3615_v8, %v3599_v44  ;;  %v3671_v12 = vmul.f32 %v11771_v18, %v3483_v31 }
 0x292   : > { %v3639_v11 = vadd.f32 %v3631_v53, %v10198_v62  ;;  %v3454_v23 = vmul.f32 %v7991_v35, %v11770_v19  ;;  %v3453_v30 = vmul.f32 %v7992_v29, %v11770_v19  ;;  %v3472_v24 = vmul.f32 %v11769_v20, %v3464_v54 }
 0x293   : > { %v3515_v43 = vmax.f32 %v3507_v26, 0.0  ;;  %v10283_v7 = vmul.f32 %v7991_v35, %v11776_v13  ;;  %v3634_v34 = vmul.f32 %v7991_v35, %v11773_v16  ;;  %v3473_v31 = vmul.f32 %v11769_v20, %v3465_v27 }
 0x294   : > { %v3659_v39 = vadd.f32 %v3651_v59, %v3639_v11  ;;  %v3461_v62 = vadd.f32 %v3453_v30, %v10212_v47  ;;  %v3480_v10 = vadd.f32 %v3472_v24, %v10233_v38  ;;  %v3492_v46 = vmul.f32 %v11768_v21, %v3484_v2  ;;  %v10296_v11 = vld [vmem:[#allocation4] ss:$2 sm:$0xff]  ;;  %v10298_v47 = vld [vmem:[#allocation4 + $0x1] ss:$2 sm:$0xff] }
 0x295   : > { %v3519_v44 = vmax.f32 %v3511_v50, %v3515_v43  ;;  %v3462_v56 = vadd.f32 %v3454_v23, %v3442_v32  ;;  %v3493_v61 = vmul.f32 %v11768_v21, %v3485_v0  ;;  %v3577_v41 = vmul.f32 %v7992_v29, %v11776_v13 }
 0x296   : > { %v3481_v8 = vadd.f32 %v3473_v31, %v3461_v62  ;;  %v3500_v53 = vadd.f32 %v3492_v46, %v3480_v10  ;;  %v3592_v26 = vmul.f32 %v11775_v14, %v3464_v54  ;;  %v3593_v59 = vmul.f32 %v11775_v14, %v3465_v27 }
 0x297   : > { %v3642_v35 = vadd.f32 %v3634_v34, %v3622_v55  ;;  %v3616_v57 = vmul.f32 %v11774_v15, %v3484_v2  ;;  %v3633_v50 = vmul.f32 %v7992_v29, %v11773_v16  ;;  %v3652_v32 = vmul.f32 %v11772_v17, %v3464_v54  ;;  %3523 = vst [vmem:[#allocation4] sm:$0xff] %v3519_v44 }
 0x298   : > { %v10300_v38 = vld [vmem:[#allocation3 + $0x30] sm:$0xff]   ;;  %v3501_v23 = vadd.f32 %v3493_v61, %v3481_v8  ;;  %v3508_v30 = vadd.f32 %v11767_v22, %v3500_v53  ;;  %v3600_v24 = vadd.f32 %v3592_v26, %v10226_v3  ;;  %v3601_v43 = vadd.f32 %v3593_v59, %v3577_v41 }
 0x299   : > { %v4705_v31 = vshll.u32 %v10300_v38, 16  ;;  %v3641_v62 = vadd.f32 %v3633_v50, %v10236_v51  ;;  %v3653_v10 = vmul.f32 %v11772_v17, %v3465_v27  ;;  %v3660_v55 = vadd.f32 %v3652_v32, %v10242_v37  ;;  %v3466_v41 = vld [vmem:[#allocation2 + $0x2b9] sm:$0xff]  ;;  %v3647_v32 = vld [vmem:[#allocation2 + $0x2c1] sm:$0xff] }
 0x29a   : > { %v3679_v34 = vadd.f32 %v3671_v12, %v3659_v39  ;;  %v3509_v29 = vadd.f32 %v11767_v22, %v3501_v23  ;;  %v3516_v46 = vmax.f32 %v3508_v30, 0.0  ;;  %v3617_v54 = vmul.f32 %v11774_v15, %v3485_v0  ;;  %v3486_v12 = vld [vmem:[#allocation2 + $0x2ba] sm:$0xff] }
 0x29b   : > { %v10313_v44 = vrot.slane %v4705_v31, 1  ;;  %v3624_v61 = vadd.f32 %v3616_v57, %v3600_v24  ;;  %v3661_v8 = vadd.f32 %v3653_v10, %v3641_v62  ;;  %v3672_v3 = vmul.f32 %v11771_v18, %v3484_v2  ;;  %v7993_v57 = vld [vmem:[#allocation2 + $0x2c8] sm:$0xff]  ;;  %v7994_v62 = vld [vmem:[#allocation2 + $0x2c0] sm:$0xff] }
 0x29c   : > { %v3517_v53 = vmax.f32 %v3509_v29, 0.0  ;;  %v11810_v51 = vmax.f32 %v10223_v28, 0.0  ;;  %v10318_v27 = vadd.f32 %v3617_v54, %v3601_v43  ;;  %v3673_v37 = vmul.f32 %v11771_v18, %v3485_v0 }
 0x29d   : > { %v10324_v39 = vsel %vm4656_vm15, %v10245_v33, %v10313_v44  ;;  %v3680_v59 = vadd.f32 %v3672_v3, %v3660_v55  ;;  %v3636_v50 = vmul.f32 %v7993_v57, %v11773_v16  ;;  %v3692_v2 = vmul.f32 %v7993_v57, %v11770_v19  ;;  %v10343_v55 = vld [vmem:[#allocation4 + $0x11] ss:$2 sm:$0x3f] }
 0x29e   : > { %v3520_v26 = vmax.f32 %v11810_v51, %v3516_v46  ;;  %11811 = vst [vmem:[#allocation41_spill] sm:$0xff] %v10324_v39  ;;  %5179 = vmatprep.mubr.bf16.mxu0 %v10324_v39  ;;  %v11812_v28 = vmax.f32 %v10231_v45, 0.0  ;;  %v10331_v30 = vadd.f32 %v3673_v37, %v3661_v8  ;;  %v10334_v0 = vmul.f32 %v7993_v57, %v11776_v13  ;;  %v10341_v45 = vld [vmem:[#allocation4 + $0x10] ss:$2 sm:$0x3f]  ;;  %v854_v57 = vpop.permute.xlu0 %853 }
 0x29f   : > { %v3474_v33 = vmul.f32 %v11769_v20, %v3466_v41  ;;  %5180 = vmatmul.mubr.bf16.gmra.mrb[16].mxu0 %v10112_v49  ;;  %v3644_v24 = vadd.f32 %v3636_v50, %v3624_v61  ;;  %v3494_v43 = vmul.f32 %v11768_v21, %v3486_v12  ;;  %v3594_v31 = vmul.f32 %v11775_v14, %v3466_v41  ;;  %v3667_v49 = vld [vmem:[#allocation2 + $0x2c2] sm:$0xff]  ;;  %v859_v61 = vpop.permute.xlu1 %858 }
 0x2a0   : > { %v3521_v23 = vmax.f32 %v11812_v28, %v3517_v53  ;;  %3524 = vst [vmem:[#allocation4 + $0x8] sm:$0xff] %v3520_v26  ;;  %v3635_v10 = vmul.f32 %v7994_v62, %v11773_v16  ;;  %v10345_v29 = vadd.f32 %v3692_v2, %v3680_v59  ;;  %v3654_v54 = vmul.f32 %v11772_v17, %v3466_v41 }
 0x2a1   : > { %v3482_v46 = vadd.f32 %v3474_v33, %v3462_v56  ;;  %v3655_v8 = vmul.f32 %v11772_v17, %v3647_v32  ;;  %v3602_v3 = vadd.f32 %v3594_v31, %v10283_v7  ;;  %v3618_v53 = vmul.f32 %v11774_v15, %v3486_v12  ;;  %1025 = vst [vmem:[#allocation2 + $0x368] sm:$0xff] %v859_v61  ;;  %v7995_v61 = vld [vmem:[#allocation2 + $0x2d8] sm:$0xff] }
 0x2a2   : > { %3525 = vst [vmem:[#allocation4 + $0x10] sm:$0xff] %v3521_v23  ;;  %v3643_v51 = vadd.f32 %v3635_v10, %v10275_v36  ;;  %v3691_v26 = vmul.f32 %v7994_v62, %v11770_v19  ;;  %v3662_v59 = vadd.f32 %v3654_v54, %v3642_v35  ;;  %v3674_v56 = vmul.f32 %v11771_v18, %v3486_v12  ;;  %v3648_v35 = vld [vmem:[#allocation2 + $0x2c9] sm:$0xff] }
 0x2a3   : > { %v3502_v37 = vadd.f32 %v3494_v43, %v3482_v46  ;;  %v3711_v41 = vmul.f32 %v11769_v20, %v3647_v32  ;;  %v3675_v2 = vmul.f32 %v11771_v18, %v3667_v49  ;;  %v3731_v7 = vmul.f32 %v11768_v21, %v3667_v49  ;;  %1024 = vst [vmem:[#allocation2 + $0x360] sm:$0xff] %v854_v57  ;;  %v869_v31 = vpop.permute.xlu1 %868 }
 0x2a4   : > { %v3663_v50 = vadd.f32 %v3655_v8, %v3643_v51  ;;  %v3699_v28 = vadd.f32 %v3691_v26, %v3679_v34  ;;  %v3626_v36 = vadd.f32 %v3618_v53, %v3602_v3  ;;  %v3815_v33 = vmul.f32 %v7994_v62, %v11776_v13  ;;  %v3649_v8 = vld [vmem:[#allocation2 + $0x2d1] sm:$0xff]  ;;  %1027 = vst [vmem:[#allocation2 + $0x378] sm:$0xff] %v869_v31  ;;  %v864_v26 = vpop.permute.xlu0 %863 }
 0x2a5   : > { %v3510_v23 = vadd.f32 %v11767_v22, %v3502_v37  ;;  %v3831_v43 = vmul.f32 %v11775_v14, %v3647_v32  ;;  %v3682_v12 = vadd.f32 %v3674_v56, %v3662_v59  ;;  %v3855_v54 = vmul.f32 %v11774_v15, %v3667_v49  ;;  %v7996_v53 = vld [vmem:[#allocation2 + $0x2d0] sm:$0xff]  ;;  %1026 = vst [vmem:[#allocation2 + $0x370] sm:$0xff] %v864_v26 }
 0x2a6   : > { %v10360_v10 = vadd.f32 %v3675_v2, %v3663_v50  ;;  %v3719_v46 = vadd.f32 %v3711_v41, %v3699_v28  ;;  %v3638_v51 = vmul.f32 %v7995_v61, %v11773_v16  ;;  %v3694_v3 = vmul.f32 %v7995_v61, %v11770_v19  ;;  %v3668_v32 = vld [vmem:[#allocation2 + $0x2ca] sm:$0xff]  ;;  %v3669_v28 = vld [vmem:[#allocation2 + $0x2d2] sm:$0xff] }
 0x2a7   : > { %v3518_v34 = vmax.f32 %v3510_v23, 0.0  ;;  %v3637_v62 = vmul.f32 %v7996_v53, %v11773_v16  ;;  %v3839_v59 = vadd.f32 %v3831_v43, %v3815_v33  ;;  %v10367_v56 = vmul.f32 %v7995_v61, %v11776_v13  ;;  %v879_v23 = vpop.permute.xlu1 %878 }
 0x2a8   : > { %v3739_v37 = vadd.f32 %v3731_v7, %v3719_v46  ;;  %v3656_v49 = vmul.f32 %v11772_v17, %v3648_v35  ;;  %v10372_v57 = vadd.f32 %v3638_v51, %v3626_v36  ;;  %v3657_v2 = vmul.f32 %v11772_v17, %v3649_v8  ;;  %1029 = vst [vmem:[#allocation2 + $0x388] sm:$0xff] %v879_v23  ;;  %v874_v36 = vpop.permute.xlu0 %873 }
 0x2a9   : > { %v3522_v41 = vmax.f32 %v3514_v4, %v3518_v34  ;;  %v3645_v50 = vadd.f32 %v3637_v62, %v10318_v27  ;;  %v10379_v33 = vadd.f32 %v3694_v3, %v3682_v12  ;;  %v3676_v31 = vmul.f32 %v11771_v18, %v3668_v32  ;;  %1028 = vst [vmem:[#allocation2 + $0x380] sm:$0xff] %v874_v36 }
 0x2aa   : > { %v10377_v7 = vadd.f32 %v11767_v22, %v3739_v37  ;;  %v3664_v43 = vadd.f32 %v3656_v49, %v3644_v24  ;;  %v3693_v1 = vmul.f32 %v7996_v53, %v11770_v19  ;;  %v3712_v4 = vmul.f32 %v11769_v20, %v3648_v35 }
 0x2ab   : > { %v3665_v46 = vadd.f32 %v3657_v2, %v3645_v50  ;;  %v3713_v27 = vmul.f32 %v11769_v20, %v3649_v8  ;;  %3526 = vst [vmem:[#allocation4 + $0x18] sm:$0xff] %v3522_v41  ;;  %v10386_v61 = vadd.f32 %v3855_v54, %v3839_v59  ;;  %v3677_v12 = vmul.f32 %v11771_v18, %v3669_v28 }
 0x2ac   : > { %v3684_v51 = vadd.f32 %v3676_v31, %v3664_v43  ;;  %v3701_v24 = vadd.f32 %v3693_v1, %v10331_v30  ;;  %v3720_v3 = vadd.f32 %v3712_v4, %v10345_v29  ;;  %v3732_v62 = vmul.f32 %v11768_v21, %v3668_v32  ;;  %v7997_v43 = vld [vmem:[#allocation2 + $0x2e8] sm:$0xff] }
 0x2ad   : > { %v3733_v26 = vmul.f32 %v11768_v21, %v3669_v28  ;;  %v10393_v37 = vadd.f32 %v3677_v12, %v3665_v46  ;;  %v3817_v49 = vmul.f32 %v7996_v53, %v11776_v13  ;;  %v3832_v41 = vmul.f32 %v11775_v14, %v3648_v35  ;;  %v3650_v53 = vld [vmem:[#allocation2 + $0x2d9] sm:$0xff]  ;;  %v889_v12 = vpop.permute.xlu1 %888 }
 0x2ae   : > { %v3833_v54 = vmul.f32 %v11775_v14, %v3649_v8  ;;  %v3721_v59 = vadd.f32 %v3713_v27, %v3701_v24  ;;  %v3740_v50 = vadd.f32 %v3732_v62, %v3720_v3  ;;  %v3856_v2 = vmul.f32 %v11774_v15, %v3668_v32  ;;  %v11813_v32 = vld [vmem:[#allocation39_spill] sm:$0xff]  ;;  %v884_v24 = vpop.permute.xlu0 %883  ;;  %1031 = vst [vmem:[#allocation2 + $0x398] sm:$0xff] %v889_v12 }
 0x2af   : > { %v3857_v30 = vmul.f32 %v11774_v15, %v3669_v28  ;;  %v3840_v29 = vadd.f32 %v3832_v41, %v10334_v0  ;;  %v3696_v31 = vmul.f32 %v7997_v43, %v11770_v19  ;;  %v2799_v46 = vmax.f32 %v9910_v40, %v9912_v5  ;;  %1030 = vst [vmem:[#allocation2 + $0x390] sm:$0xff] %v884_v24  ;;  %v3670_v41 = vld [vmem:[#allocation2 + $0x2da] sm:$0xff] }
 0x2b0   : > { %v3841_v23 = vadd.f32 %v3833_v54, %v3817_v49  ;;  %v3741_v1 = vadd.f32 %v3733_v26, %v3721_v59  ;;  %v10405_v35 = vadd.f32 %v11767_v22, %v3740_v50  ;;  %v10408_v8 = vmul.f32 %v7997_v43, %v11776_v13  ;;  %v3707_v54 = vld [vmem:[#allocation2 + $0x2e1] sm:$0xff] }
 0x2b1   : > { %v2800_v28 = vmax.f32 %v11813_v32, %v9968_v58  ;;  %v3864_v4 = vadd.f32 %v3856_v2, %v3840_v29  ;;  %v10412_v0 = vadd.f32 %v3696_v31, %v3684_v51  ;;  %v3876_v27 = vmul.f32 %v7997_v43, %v11773_v16  ;;  %v3727_v43 = vld [vmem:[#allocation2 + $0x2e2] sm:$0xff] }
 0x2b2   : > { %v7107_v36 = vpack.c.bf16 %v2799_v46, %v2799_v46  ;;  %v10416_v40 = vadd.f32 %v11767_v22, %v3741_v1  ;;  %v4709_v3 = vshrl.u32 %v10300_v38, 16  ;;  %v3658_v62 = vmul.f32 %v11772_v17, %v3650_v53  ;;  %v7998_v1 = vld [vmem:[#allocation2 + $0x2e0] sm:$0xff] }
 0x2b3   : > { %v7108_v5 = vpack.c.bf16 %v2800_v28, %v2800_v28  ;;  %v10421_v26 = vadd.f32 %v3857_v30, %v3841_v23  ;;  %v10423_v51 = vadd.f32 %v3876_v27, %v3864_v4  ;;  %v3695_v32 = vmul.f32 %v7998_v1, %v11770_v19  ;;  %v2825_v28 = vld [vmem:[#allocation3 + $0x38] sm:$0xf]  ;;  %v2828_v59 = vld [vmem:[#allocation3 + $0x3c] sm:$0xf] }
 0x2b4   : > { %v2808_v49 = vshrl.u32 %v7107_v36, 16  ;;  %v2811_v50 = vshll.u32 %v7107_v36, 16  ;;  %v10427_v29 = vor.u32 %v4709_v3, %v10313_v44  ;;  %v3714_v30 = vmul.f32 %v11769_v20, %v3650_v53 }
 0x2b5   : > { %v2816_v2 = vshrl.u32 %v7108_v5, 16  ;;  %v2819_v46 = vshll.u32 %v7108_v5, 16  ;;  %v3666_v4 = vadd.f32 %v3658_v62, %v10372_v57  ;;  %v3678_v27 = vmul.f32 %v11771_v18, %v3670_v41 }
 0x2b6   : > { %v2810_v31 = vrot.slane %v2808_v49, 7  ;;  %v3715_v36 = vmul.f32 %v11769_v20, %v3707_v54  ;;  %v3703_v44 = vadd.f32 %v3695_v32, %v10360_v10  ;;  %v3734_v24 = vmul.f32 %v11768_v21, %v3670_v41 }
 0x2b7   : > { %v2818_v23 = vrot.slane %v2816_v2, 7  ;;  %v3735_v5 = vmul.f32 %v11768_v21, %v3727_v43  ;;  %v3722_v58 = vadd.f32 %v3714_v30, %v10379_v33  ;;  %v3834_v2 = vmul.f32 %v11775_v14, %v3650_v53 }
 0x2b8   : > { %v2813_v12 = vor.u32 %v2811_v50, %v2810_v31  ;;  %v2814_v3 = vrot.slane %v2810_v31, 4  ;;  %v3723_v62 = vadd.f32 %v3715_v36, %v3703_v44  ;;  %v3819_v34 = vmul.f32 %v7998_v1, %v11776_v13  ;;  %v3708_v44 = vld [vmem:[#allocation2 + $0x2e9] sm:$0xff] }
 0x2b9   : > { %v2821_v49 = vor.u32 %v2819_v46, %v2818_v23  ;;  %v3835_v50 = vmul.f32 %v11775_v14, %v3707_v54  ;;  %v3742_v32 = vadd.f32 %v3734_v24, %v3722_v58  ;;  %v3842_v31 = vadd.f32 %v3834_v2, %v10367_v56  ;;  %v3729_v2 = vld [vmem:[#allocation2 + $0x2f2] sm:$0xff] }
 0x2ba   : > { %v2826_v57 = vsel %vm9469_vm12, %v2813_v12, %v2825_v28  ;;  %v3858_v46 = vmul.f32 %v11774_v15, %v3670_v41  ;;  %v3743_v53 = vadd.f32 %v3735_v5, %v3723_v62  ;;  %v3859_v23 = vmul.f32 %v11774_v15, %v3727_v43 }
 0x2bb   : > { %v2822_v10 = vsel %vm9476_vm13, %v2814_v3, %v2821_v49  ;;  %2827 = vst [vmem:[#allocation3 + $0x38] sm:$0xf] %v2826_v57  ;;  %v3843_v30 = vadd.f32 %v3835_v50, %v3819_v34  ;;  %v3686_v28 = vadd.f32 %v3678_v27, %v3666_v4  ;;  %v10451_v36 = vadd.f32 %v11767_v22, %v3742_v32  ;;  %v3709_v34 = vld [vmem:[#allocation2 + $0x2f1] sm:$0xff] }
 0x2bc   : > { %v2829_v33 = vsel %vm9483_vm14, %v2822_v10, %v2828_v59  ;;  %v3875_v12 = vmul.f32 %v7998_v1, %v11773_v16  ;;  %v3895_v58 = vmul.f32 %v11772_v17, %v3707_v54  ;;  %v3751_v56 = vadd.f32 %v11767_v22, %v3743_v53  ;;  %v7999_v27 = vld [vmem:[#allocation2 + $0x2f8] sm:$0xff]  ;;  %v8000_v49 = vld [vmem:[#allocation2 + $0x2f0] sm:$0xff] }
 0x2bd   : > { %2830 = vst [vmem:[#allocation3 + $0x3c] sm:$0xf] %v2829_v33  ;;  %v3866_v41 = vadd.f32 %v3858_v46, %v3842_v31  ;;  %v10456_v24 = vadd.f32 %v3859_v23, %v3843_v30  ;;  %v3915_v59 = vmul.f32 %v11771_v18, %v3727_v43  ;;  %v3698_v3 = vmul.f32 %v7999_v27, %v11770_v19  ;;  %v3728_v54 = vld [vmem:[#allocation2 + $0x2ea] sm:$0xff] }
 0x2be   : > { %v3883_v4 = vadd.f32 %v3875_v12, %v10386_v61  ;;  %v3697_v1 = vmul.f32 %v8000_v49, %v11770_v19  ;;  %v3759_v57 = vmax.f32 %v3751_v56, 0.0  ;;  %v10464_v62 = vmul.f32 %v7999_v27, %v11776_v13 }
 0x2bf   : > { %v3878_v50 = vmul.f32 %v7999_v27, %v11773_v16  ;;  %v3716_v43 = vmul.f32 %v11769_v20, %v3708_v44  ;;  %v10468_v32 = vadd.f32 %v3698_v3, %v3686_v28  ;;  %v3717_v31 = vmul.f32 %v11769_v20, %v3709_v34 }
 0x2c0   : > { %v3903_v10 = vadd.f32 %v3895_v58, %v3883_v4  ;;  %v3705_v61 = vadd.f32 %v3697_v1, %v10393_v37  ;;  %v11814_v46 = vmax.f32 %v10377_v7, 0.0  ;;  %v3736_v30 = vmul.f32 %v11768_v21, %v3728_v54  ;;  %v10480_v4 = vld [vmem:[#allocation4] ss:$2 sm:$0xff]  ;;  %v10482_v37 = vld [vmem:[#allocation4 + $0x1] ss:$2 sm:$0xff] }
 0x2c1   : > { %v3724_v53 = vadd.f32 %v3716_v43, %v10412_v0  ;;  %v3737_v23 = vmul.f32 %v11768_v21, %v3729_v2  ;;  %v3821_v56 = vmul.f32 %v8000_v49, %v11776_v13  ;;  %v3836_v58 = vmul.f32 %v11775_v14, %v3708_v44 }
 0x2c2   : > { %v3763_v33 = vmax.f32 %v11814_v46, %v3759_v57  ;;  %v3725_v12 = vadd.f32 %v3717_v31, %v3705_v61  ;;  %v3837_v28 = vmul.f32 %v11775_v14, %v3709_v34  ;;  %v10486_v7 = vadd.f32 %v3878_v50, %v3866_v41 }
 0x2c3   : > { %v3744_v0 = vadd.f32 %v3736_v30, %v3724_v53  ;;  %v3860_v3 = vmul.f32 %v11774_v15, %v3728_v54  ;;  %v3877_v1 = vmul.f32 %v8000_v49, %v11773_v16  ;;  %v3844_v43 = vadd.f32 %v3836_v58, %v10408_v8 }
 0x2c4   : > { %v10484_v27 = vld [vmem:[#allocation3 + $0x38] sm:$0xff]   ;;  %3767 = vst [vmem:[#allocation4] sm:$0xff] %v3763_v33  ;;  %v3745_v57 = vadd.f32 %v3737_v23, %v3725_v12  ;;  %v3845_v61 = vadd.f32 %v3837_v28, %v3821_v56  ;;  %v3896_v31 = vmul.f32 %v11772_v17, %v3708_v44  ;;  %v3897_v41 = vmul.f32 %v11772_v17, %v3709_v34 }
 0x2c5   : > { %11815 = vst [vmem:[#allocation39_spill] sm:$0xff] %v10484_v27  ;;  %v4713_v46 = vshll.u32 %v10484_v27, 16  ;;  %v3752_v5 = vadd.f32 %v11767_v22, %v3744_v0  ;;  %v3885_v39 = vadd.f32 %v3877_v1, %v10421_v26  ;;  %v3861_v53 = vmul.f32 %v11774_v15, %v3729_v2  ;;  %v3710_v12 = vld [vmem:[#allocation2 + $0x2f9] sm:$0xff]  ;;  %v3891_v1 = vld [vmem:[#allocation2 + $0x301] sm:$0xff] }
 0x2c6   : > { %v3753_v50 = vadd.f32 %v11767_v22, %v3745_v57  ;;  %v3868_v49 = vadd.f32 %v3860_v3, %v3844_v43  ;;  %v3904_v33 = vadd.f32 %v3896_v31, %v10423_v51  ;;  %v3916_v44 = vmul.f32 %v11771_v18, %v3728_v54  ;;  %v3730_v34 = vld [vmem:[#allocation2 + $0x2fa] sm:$0xff] }
 0x2c7   : > { %v10499_v30 = vrot.slane %v4713_v46, 1  ;;  %v3760_v8 = vmax.f32 %v3752_v5, 0.0  ;;  %v3905_v23 = vadd.f32 %v3897_v41, %v3885_v39  ;;  %v3923_v56 = vadd.f32 %v3915_v59, %v3903_v10  ;;  %v8001_v39 = vld [vmem:[#allocation2 + $0x308] sm:$0xff]  ;;  %v899_v59 = vpop.permute.xlu1 %898  ;;  %v10530_v41 = vld [vmem:[#allocation4 + $0x11] ss:$2 sm:$0x3f] }
 0x2c8   : > { %v3761_v58 = vmax.f32 %v3753_v50, 0.0  ;;  %v10502_v28 = vadd.f32 %v3861_v53, %v3845_v61  ;;  %v3917_v26 = vmul.f32 %v11771_v18, %v3729_v2  ;;  %v11817_v51 = vmax.f32 %v10405_v35, 0.0  ;;  %1033 = vst [vmem:[#allocation2 + $0x3a8] sm:$0xff] %v899_v59  ;;  %v894_v50 = vpop.permute.xlu0 %893 }
 0x2c9   : > { %v10508_v0 = vsel %vm4656_vm15, %v10427_v29, %v10499_v30  ;;  %v3924_v5 = vadd.f32 %v3916_v44, %v3904_v33  ;;  %v3880_v54 = vmul.f32 %v8001_v39, %v11773_v16  ;;  %v11818_v10 = vmax.f32 %v10416_v40, 0.0  ;;  %v10528_v40 = vld [vmem:[#allocation4 + $0x10] ss:$2 sm:$0x3f]  ;;  %1032 = vst [vmem:[#allocation2 + $0x3a0] sm:$0xff] %v894_v50 }
 0x2ca   : > { %11816 = vst [vmem:[#allocation42_spill] sm:$0xff] %v10508_v0  ;;  %v3764_v3 = vmax.f32 %v11817_v51, %v3760_v8  ;;  %5187 = vmatprep.mubr.bf16.mxu0 %v10508_v0  ;;  %v3936_v57 = vmul.f32 %v8001_v39, %v11770_v19  ;;  %v10518_v43 = vmul.f32 %v8001_v39, %v11776_v13  ;;  %v8002_v33 = vld [vmem:[#allocation2 + $0x300] sm:$0xff] }
 0x2cb   : > { %v3765_v2 = vmax.f32 %v11818_v10, %v3761_v58  ;;  %v3718_v29 = vmul.f32 %v11769_v20, %v3710_v12  ;;  %5188 = vmatmul.mubr.bf16.gmra.mrb[20].mxu0 %v10300_v38  ;;  %v10522_v35 = vadd.f32 %v3917_v26, %v3905_v23  ;;  %v10524_v61 = vadd.f32 %v3880_v54, %v3868_v49  ;;  %v3911_v23 = vld [vmem:[#allocation2 + $0x302] sm:$0xff] }
 0x2cc   : > { %v3738_v31 = vmul.f32 %v11768_v21, %v3730_v34  ;;  %v3838_v46 = vmul.f32 %v11775_v14, %v3710_v12  ;;  %3768 = vst [vmem:[#allocation4 + $0x8] sm:$0xff] %v3764_v3  ;;  %v3879_v8 = vmul.f32 %v8002_v33, %v11773_v16  ;;  %v3898_v38 = vmul.f32 %v11772_v17, %v3710_v12  ;;  %v909_v3 = vpop.permute.xlu1 %908 }
 0x2cd   : > { %v3726_v53 = vadd.f32 %v3718_v29, %v10468_v32  ;;  %v3899_v49 = vmul.f32 %v11772_v17, %v3891_v1  ;;  %3769 = vst [vmem:[#allocation4 + $0x10] sm:$0xff] %v3765_v2  ;;  %v3944_v44 = vadd.f32 %v3936_v57, %v3924_v5  ;;  %v3862_v26 = vmul.f32 %v11774_v15, %v3730_v34 }
 0x2ce   : > { %v3846_v58 = vadd.f32 %v3838_v46, %v10464_v62  ;;  %v3935_v51 = vmul.f32 %v8002_v33, %v11770_v19  ;;  %v3887_v32 = vadd.f32 %v3879_v8, %v10456_v24  ;;  %v3906_v54 = vadd.f32 %v3898_v38, %v10486_v7  ;;  %1035 = vst [vmem:[#allocation2 + $0x3b8] sm:$0xff] %v909_v3  ;;  %v904_v62 = vpop.permute.xlu0 %903  ;;  %v3892_v8 = vld [vmem:[#allocation2 + $0x309] sm:$0xff] }
 0x2cf   : > { %v3746_v39 = vadd.f32 %v3738_v31, %v3726_v53  ;;  %v3955_v12 = vmul.f32 %v11769_v20, %v3891_v1  ;;  %v3918_v10 = vmul.f32 %v11771_v18, %v3730_v34  ;;  %v3919_v5 = vmul.f32 %v11771_v18, %v3911_v23  ;;  %1034 = vst [vmem:[#allocation2 + $0x3b0] sm:$0xff] %v904_v62  ;;  %v3893_v34 = vld [vmem:[#allocation2 + $0x311] sm:$0xff] }
 0x2d0   : > { %v3870_v59 = vadd.f32 %v3862_v26, %v3846_v58  ;;  %v3943_v2 = vadd.f32 %v3935_v51, %v3923_v56  ;;  %v3907_v29 = vadd.f32 %v3899_v49, %v3887_v32  ;;  %v4059_v46 = vmul.f32 %v8002_v33, %v11776_v13  ;;  %v8003_v56 = vld [vmem:[#allocation2 + $0x318] sm:$0xff]  ;;  %v8004_v3 = vld [vmem:[#allocation2 + $0x310] sm:$0xff] }
 0x2d1   : > { %v3754_v57 = vadd.f32 %v11767_v22, %v3746_v39  ;;  %v4075_v31 = vmul.f32 %v11775_v14, %v3891_v1  ;;  %v3926_v24 = vadd.f32 %v3918_v10, %v3906_v54  ;;  %v3975_v50 = vmul.f32 %v11768_v21, %v3911_v23  ;;  %v3912_v62 = vld [vmem:[#allocation2 + $0x30a] sm:$0xff] }
 0x2d2   : > { %v3963_v7 = vadd.f32 %v3955_v12, %v3943_v2  ;;  %v4099_v53 = vmul.f32 %v11774_v15, %v3911_v23  ;;  %v3882_v26 = vmul.f32 %v8003_v56, %v11773_v16  ;;  %v3938_v49 = vmul.f32 %v8003_v56, %v11770_v19  ;;  %v914_v32 = vpop.permute.xlu0 %913 }
 0x2d3   : > { %v3762_v38 = vmax.f32 %v3754_v57, 0.0  ;;  %v4083_v58 = vadd.f32 %v4075_v31, %v4059_v46  ;;  %v10551_v51 = vadd.f32 %v3919_v5, %v3907_v29  ;;  %v10554_v1 = vmul.f32 %v8003_v56, %v11776_v13  ;;  %v3913_v5 = vld [vmem:[#allocation2 + $0x312] sm:$0xff]  ;;  %1036 = vst [vmem:[#allocation2 + $0x3c0] sm:$0xff] %v914_v32 }
 0x2d4   : > { %v3983_v33 = vadd.f32 %v3975_v50, %v3963_v7  ;;  %v3881_v39 = vmul.f32 %v8004_v3, %v11773_v16  ;;  %v11819_v23 = vmax.f32 %v10451_v36, 0.0  ;;  %v10559_v12 = vadd.f32 %v3882_v26, %v3870_v59 }
 0x2d5   : > { %v3900_v10 = vmul.f32 %v11772_v17, %v3892_v8  ;;  %v3901_v2 = vmul.f32 %v11772_v17, %v3893_v34  ;;  %v10566_v29 = vadd.f32 %v4099_v53, %v4083_v58  ;;  %v10568_v46 = vadd.f32 %v3938_v49, %v3926_v24 }
 0x2d6   : > { %v3766_v54 = vmax.f32 %v11819_v23, %v3762_v38  ;;  %v10564_v57 = vadd.f32 %v11767_v22, %v3983_v33  ;;  %v3889_v31 = vadd.f32 %v3881_v39, %v10502_v28  ;;  %v3937_v59 = vmul.f32 %v8004_v3, %v11770_v19 }
 0x2d7   : > { %v3908_v36 = vadd.f32 %v3900_v10, %v10524_v61  ;;  %v3956_v7 = vmul.f32 %v11769_v20, %v3892_v8  ;;  %v3957_v50 = vmul.f32 %v11769_v20, %v3893_v34  ;;  %v3920_v26 = vmul.f32 %v11771_v18, %v3912_v62 }
 0x2d8   : > { %3770 = vst [vmem:[#allocation4 + $0x18] sm:$0xff] %v3766_v54  ;;  %v3999_v38 = vmax.f32 %v10564_v57, 0.0  ;;  %v3909_v56 = vadd.f32 %v3901_v2, %v3889_v31  ;;  %v3921_v53 = vmul.f32 %v11771_v18, %v3913_v5  ;;  %v3945_v24 = vadd.f32 %v3937_v59, %v10522_v35 }
 0x2d9   : > { %v3964_v58 = vadd.f32 %v3956_v7, %v3944_v44  ;;  %v3976_v28 = vmul.f32 %v11768_v21, %v3912_v62  ;;  %v3977_v61 = vmul.f32 %v11768_v21, %v3913_v5  ;;  %v3928_v49 = vadd.f32 %v3920_v26, %v3908_v36  ;;  %v3894_v26 = vld [vmem:[#allocation2 + $0x319] sm:$0xff] }
 0x2da   : > { %v4061_v33 = vmul.f32 %v8004_v3, %v11776_v13  ;;  %v4076_v39 = vmul.f32 %v11775_v14, %v3892_v8  ;;  %v4077_v32 = vmul.f32 %v11775_v14, %v3893_v34  ;;  %v10584_v23 = vadd.f32 %v3921_v53, %v3909_v56  ;;  %v3914_v53 = vld [vmem:[#allocation2 + $0x31a] sm:$0xff] }
 0x2db   : > { %v3965_v54 = vadd.f32 %v3957_v50, %v3945_v24  ;;  %v3984_v10 = vadd.f32 %v3976_v28, %v3964_v58  ;;  %v3043_v2 = vmax.f32 %v10101_v42, %v10103_v25  ;;  %v4100_v31 = vmul.f32 %v11774_v15, %v3912_v62  ;;  %v8005_v42 = vld [vmem:[#allocation2 + $0x328] sm:$0xff] }
 0x2dc   : > { %v4084_v35 = vadd.f32 %v4076_v39, %v10518_v43  ;;  %v4085_v44 = vadd.f32 %v4077_v32, %v4061_v33  ;;  %v3044_v36 = vmax.f32 %v10158_v48, %v10160_v60  ;;  %v4101_v34 = vmul.f32 %v11774_v15, %v3913_v5 }
 0x2dd   : > { %v3985_v3 = vadd.f32 %v3977_v61, %v3965_v54  ;;  %v10593_v8 = vadd.f32 %v11767_v22, %v3984_v10  ;;  %v7109_v59 = vpack.c.bf16 %v3043_v2, %v3043_v2  ;;  %v11719_v56 = vrot.slane %v10484_v27, 1  ;;  %v3069_v10 = vld [vmem:[#allocation3 + $0x40] sm:$0xf] }
 0x2de   : > { %v4108_v7 = vadd.f32 %v4100_v31, %v4084_v35  ;;  %v7110_v50 = vpack.c.bf16 %v3044_v36, %v3044_v36  ;;  %v3940_v25 = vmul.f32 %v8005_v42, %v11770_v19  ;;  %v10602_v48 = vadd.f32 %v4101_v34, %v4085_v44  ;;  %v3951_v31 = vld [vmem:[#allocation2 + $0x321] sm:$0xff] }
 0x2df   : > { %v10599_v43 = vadd.f32 %v11767_v22, %v3985_v3  ;;  %v3052_v60 = vshrl.u32 %v7109_v59, 16  ;;  %v3055_v24 = vshll.u32 %v7109_v59, 16  ;;  %v10608_v39 = vmul.f32 %v8005_v42, %v11776_v13  ;;  %v8006_v34 = vld [vmem:[#allocation2 + $0x320] sm:$0xff] }
 0x2e0   : > { %v3060_v5 = vshrl.u32 %v7110_v50, 16  ;;  %v3063_v58 = vshll.u32 %v7110_v50, 16  ;;  %v10604_v28 = vadd.f32 %v3940_v25, %v3928_v49  ;;  %v4120_v32 = vmul.f32 %v8005_v42, %v11773_v16  ;;  %v3971_v50 = vld [vmem:[#allocation2 + $0x322] sm:$0xff]  ;;  %v7857_v25 = vld [vmem:[#allocation10 + $0x40] sm:$0xff]  }
 0x2e1   : > { %v3054_v33 = vrot.slane %v3052_v60, 7  ;;  %v4717_v2 = vshrl.u32 %v10484_v27, 16  ;;  %v3902_v35 = vmul.f32 %v11772_v17, %v3894_v26  ;;  %v3922_v44 = vmul.f32 %v11771_v18, %v3914_v53  ;;  %v3072_v42 = vld [vmem:[#allocation3 + $0x44] sm:$0xf]  ;;  %7270 = vmatprep.subr.bf16.mxu1 %v7857_v25 }
 0x2e2   : > { %v3062_v54 = vrot.slane %v3060_v5, 7  ;;  %v10614_v3 = vadd.f32 %v4120_v32, %v4108_v7  ;;  %v3939_v59 = vmul.f32 %v8006_v34, %v11770_v19  ;;  %v3958_v62 = vmul.f32 %v11769_v20, %v3894_v26 }
 0x2e3   : > { %v3057_v36 = vor.u32 %v3055_v24, %v3054_v33  ;;  %v3058_v49 = vrot.slane %v3054_v33, 4  ;;  %v10618_v5 = vor.u32 %v4717_v2, %v10499_v30  ;;  %v3910_v61 = vadd.f32 %v3902_v35, %v10559_v12 }
 0x2e4   : > { %v3065_v60 = vor.u32 %v3063_v58, %v3062_v54  ;;  %v3947_v7 = vadd.f32 %v3939_v59, %v10551_v51  ;;  %v3959_v33 = vmul.f32 %v11769_v20, %v3951_v31  ;;  %v3978_v32 = vmul.f32 %v11768_v21, %v3914_v53 }
 0x2e5   : > { %v3070_v24 = vsel %vm9469_vm12, %v3057_v36, %v3069_v10  ;;  %v3966_v30 = vadd.f32 %v3958_v62, %v10568_v46  ;;  %v3979_v12 = vmul.f32 %v11768_v21, %v3971_v50  ;;  %v4063_v54 = vmul.f32 %v8006_v34, %v11776_v13 }
 0x2e6   : > { %v3066_v58 = vsel %vm9476_vm13, %v3058_v49, %v3065_v60  ;;  %3071 = vst [vmem:[#allocation3 + $0x40] sm:$0xf] %v3070_v24  ;;  %v3967_v2 = vadd.f32 %v3959_v33, %v3947_v7  ;;  %v4078_v51 = vmul.f32 %v11775_v14, %v3894_v26  ;;  %v4079_v35 = vmul.f32 %v11775_v14, %v3951_v31 }
 0x2e7   : > { %v3073_v10 = vsel %vm9483_vm14, %v3066_v58, %v3072_v42  ;;  %v3986_v36 = vadd.f32 %v3978_v32, %v3966_v30  ;;  %v4102_v59 = vmul.f32 %v11774_v15, %v3914_v53  ;;  %v4103_v49 = vmul.f32 %v11774_v15, %v3971_v50  ;;  %v3952_v53 = vld [vmem:[#allocation2 + $0x329] sm:$0xff]  ;;  %v3953_v32 = vld [vmem:[#allocation2 + $0x331] sm:$0xff] }
 0x2e8   : > { %3074 = vst [vmem:[#allocation3 + $0x44] sm:$0xf] %v3073_v10  ;;  %v4119_v46 = vmul.f32 %v8006_v34, %v11773_v16  ;;  %v3987_v62 = vadd.f32 %v3979_v12, %v3967_v2  ;;  %v4086_v25 = vadd.f32 %v4078_v51, %v10554_v1  ;;  %v4087_v60 = vadd.f32 %v4079_v35, %v4063_v54  ;;  %v8007_v1 = vld [vmem:[#allocation2 + $0x338] sm:$0xff]  ;;  %v8008_v2 = vld [vmem:[#allocation2 + $0x330] sm:$0xff] }
 0x2e9   : > { %v4139_v24 = vmul.f32 %v11772_v17, %v3951_v31  ;;  %v3930_v42 = vadd.f32 %v3922_v44, %v3910_v61  ;;  %v10642_v26 = vadd.f32 %v11767_v22, %v3986_v36  ;;  %v4159_v33 = vmul.f32 %v11771_v18, %v3971_v50  ;;  %v3972_v31 = vld [vmem:[#allocation2 + $0x32a] sm:$0xff]  ;;  %v3973_v50 = vld [vmem:[#allocation2 + $0x332] sm:$0xff] }
 0x2ea   : > { %v4127_v7 = vadd.f32 %v4119_v46, %v10566_v29  ;;  %v3995_v58 = vadd.f32 %v11767_v22, %v3987_v62  ;;  %v4110_v34 = vadd.f32 %v4102_v59, %v4086_v25  ;;  %v10647_v30 = vadd.f32 %v4103_v49, %v4087_v60 }
 0x2eb   : > { %v3942_v12 = vmul.f32 %v8007_v1, %v11770_v19  ;;  %v10652_v54 = vmul.f32 %v8007_v1, %v11776_v13  ;;  %v4122_v29 = vmul.f32 %v8007_v1, %v11773_v16  ;;  %v3941_v51 = vmul.f32 %v8008_v2, %v11770_v19 }
 0x2ec   : > { %v4147_v44 = vadd.f32 %v4139_v24, %v4127_v7  ;;  %v4003_v10 = vmax.f32 %v3995_v58, 0.0  ;;  %v3960_v35 = vmul.f32 %v11769_v20, %v3952_v53  ;;  %v3961_v36 = vmul.f32 %v11769_v20, %v3953_v32 }
 0x2ed   : > { %v3950_v49 = vadd.f32 %v3942_v12, %v3930_v42  ;;  %v10660_v46 = vadd.f32 %v4122_v29, %v4110_v34  ;;  %v3980_v62 = vmul.f32 %v11768_v21, %v3972_v31  ;;  %v3949_v24 = vadd.f32 %v3941_v51, %v10584_v23  ;;  %v10674_v12 = vld [vmem:[#allocation4] ss:$2 sm:$0xff] }
 0x2ee   : > { %v10658_v59 = vadd.f32 %v4159_v33, %v4147_v44  ;;  %v4007_v60 = vmax.f32 %v3999_v38, %v4003_v10  ;;  %v3968_v7 = vadd.f32 %v3960_v35, %v10604_v28  ;;  %v3981_v58 = vmul.f32 %v11768_v21, %v3973_v50  ;;  %v10676_v44 = vld [vmem:[#allocation4 + $0x1] ss:$2 sm:$0xff] }
 0x2ef   : > { %v10663_v25 = vld [vmem:[#allocation3 + $0x40] sm:$0xff]   ;;  %v4065_v1 = vmul.f32 %v8008_v2, %v11776_v13  ;;  %v4080_v33 = vmul.f32 %v11775_v14, %v3952_v53  ;;  %v4081_v42 = vmul.f32 %v11775_v14, %v3953_v32  ;;  %v4104_v34 = vmul.f32 %v11774_v15, %v3972_v31 }
 0x2f0   : > { %v11720_v57 = vrot.slane %v10663_v25, 1  ;;  %v4721_v38 = vshll.u32 %v10663_v25, 16  ;;  %v3969_v23 = vadd.f32 %v3961_v36, %v3949_v24  ;;  %v3988_v28 = vadd.f32 %v3980_v62, %v3968_v7  ;;  %4011 = vst [vmem:[#allocation4] sm:$0xff] %v4007_v60 }
 0x2f1   : > { %v4088_v29 = vadd.f32 %v4080_v33, %v10608_v39  ;;  %v4089_v10 = vadd.f32 %v4081_v42, %v4065_v1  ;;  %v4121_v51 = vmul.f32 %v8008_v2, %v11773_v16  ;;  %v4140_v35 = vmul.f32 %v11772_v17, %v3952_v53  ;;  %v3954_v1 = vld [vmem:[#allocation2 + $0x339] sm:$0xff] }
 0x2f2   : > { %v10688_v61 = vsel %vm4790_vm7, %v11719_v56, %v11720_v57  ;;  %v10690_v0 = vrot.slane %v4721_v38, 1  ;;  %v3989_v63 = vadd.f32 %v3981_v58, %v3969_v23  ;;  %v3996_v36 = vadd.f32 %v11767_v22, %v3988_v28  ;;  %v8009_v23 = vld [vmem:[#allocation2 + $0x348] sm:$0xff] }
 0x2f3   : > { %11820 = vst [vmem:[#allocation43_spill] sm:$0xff] %v10688_v61  ;;  %7542 = vmatprep.mubr.bf16.mxu1 %v10688_v61  ;;  %v4105_v39 = vmul.f32 %v11774_v15, %v3973_v50  ;;  %v4112_v62 = vadd.f32 %v4104_v34, %v4088_v29  ;;  %v4129_v2 = vadd.f32 %v4121_v51, %v10602_v48  ;;  %v3974_v34 = vld [vmem:[#allocation2 + $0x33a] sm:$0xff]  ;;  %v11822_v38 = vmax.f32 %v10593_v8, 0.0 }
 0x2f4   : > { %v4141_v53 = vmul.f32 %v11772_v17, %v3953_v32  ;;  %v10700_v60 = vsel %vm4656_vm15, %v10618_v5, %v10690_v0  ;;  %v3997_v24 = vadd.f32 %v11767_v22, %v3989_v63  ;;  %v4004_v7 = vmax.f32 %v3996_v36, 0.0 }
 0x2f5   : > { %11821 = vst [vmem:[#allocation44_spill] sm:$0xff] %v10700_v60  ;;  %v4148_v58 = vadd.f32 %v4140_v35, %v10614_v3  ;;  %5195 = vmatprep.mubr.bf16.mxu0 %v10700_v60  ;;  %v10705_v33 = vadd.f32 %v4105_v39, %v4089_v10  ;;  %v4160_v48 = vmul.f32 %v11771_v18, %v3972_v31  ;;  %v11823_v35 = vmax.f32 %v10599_v43, 0.0 }
 0x2f6   : > { %v4149_v42 = vadd.f32 %v4141_v53, %v4129_v2  ;;  %v4161_v32 = vmul.f32 %v11771_v18, %v3973_v50  ;;  %5196 = vmatmul.mubr.bf16.gmra.mrb[24].mxu0 %v10484_v27  ;;  %v4005_v5 = vmax.f32 %v3997_v24, 0.0  ;;  %v4008_v63 = vmax.f32 %v11822_v38, %v4004_v7  ;;  %v4135_v50 = vld [vmem:[#allocation2 + $0x341] sm:$0xff] }
 0x2f7   : > { %v4124_v3 = vmul.f32 %v8009_v23, %v11773_v16  ;;  %v4180_v28 = vmul.f32 %v8009_v23, %v11770_v19  ;;  %v4168_v29 = vadd.f32 %v4160_v48, %v4148_v58  ;;  %v10717_v51 = vmul.f32 %v8009_v23, %v11776_v13  ;;  %v4155_v53 = vld [vmem:[#allocation2 + $0x342] sm:$0xff] }
 0x2f8   : > { %v10714_v10 = vadd.f32 %v4161_v32, %v4149_v42  ;;  %v3962_v31 = vmul.f32 %v11769_v20, %v3954_v1  ;;  %v4009_v36 = vmax.f32 %v11823_v35, %v4005_v5  ;;  %v3982_v8 = vmul.f32 %v11768_v21, %v3974_v34  ;;  %4012 = vst [vmem:[#allocation4 + $0x8] sm:$0xff] %v4008_v63  ;;  %v8010_v58 = vld [vmem:[#allocation2 + $0x340] sm:$0xff] }
 0x2f9   : > { %v4132_v39 = vadd.f32 %v4124_v3, %v4112_v62  ;;  %v4082_v2 = vmul.f32 %v11775_v14, %v3954_v1  ;;  %v4106_v7 = vmul.f32 %v11774_v15, %v3974_v34  ;;  %v4123_v42 = vmul.f32 %v8010_v58, %v11773_v16  ;;  %v10727_v32 = vld [vmem:[#allocation4 + $0x10] ss:$2 sm:$0x3f]  ;;  %v10729_v38 = vld [vmem:[#allocation4 + $0x11] ss:$2 sm:$0x3f] }
 0x2fa   : > { %v3970_v24 = vadd.f32 %v3962_v31, %v3950_v49  ;;  %v4142_v48 = vmul.f32 %v11772_v17, %v3954_v1  ;;  %v4188_v43 = vadd.f32 %v4180_v28, %v4168_v29  ;;  %v4143_v5 = vmul.f32 %v11772_v17, %v4135_v50  ;;  %4013 = vst [vmem:[#allocation4 + $0x10] sm:$0xff] %v4009_v36 }
 0x2fb   : > { %v4090_v62 = vadd.f32 %v4082_v2, %v10652_v54  ;;  %v4162_v23 = vmul.f32 %v11771_v18, %v3974_v34  ;;  %v4131_v63 = vadd.f32 %v4123_v42, %v10647_v30  ;;  %v4179_v31 = vmul.f32 %v8010_v58, %v11770_v19  ;;  %v8011_v2 = vld [vmem:[#allocation2 + $0x358] sm:$0xff] }
 0x2fc   : > { %v3990_v49 = vadd.f32 %v3982_v8, %v3970_v24  ;;  %v4150_v3 = vadd.f32 %v4142_v48, %v10660_v46  ;;  %v4163_v35 = vmul.f32 %v11771_v18, %v4155_v53  ;;  %v4199_v56 = vmul.f32 %v11769_v20, %v4135_v50  ;;  %v4137_v42 = vld [vmem:[#allocation2 + $0x351] sm:$0xff] }
 0x2fd   : > { %v4114_v1 = vadd.f32 %v4106_v7, %v4090_v62  ;;  %v4219_v28 = vmul.f32 %v11768_v21, %v4155_v53  ;;  %v4151_v29 = vadd.f32 %v4143_v5, %v4131_v63  ;;  %v4187_v34 = vadd.f32 %v4179_v31, %v10658_v59  ;;  %v4136_v7 = vld [vmem:[#allocation2 + $0x349] sm:$0xff] }
 0x2fe   : > { %v3998_v54 = vadd.f32 %v11767_v22, %v3990_v49  ;;  %v4303_v36 = vmul.f32 %v8010_v58, %v11776_v13  ;;  %v4170_v8 = vadd.f32 %v4162_v23, %v4150_v3  ;;  %v4319_v30 = vmul.f32 %v11775_v14, %v4135_v50  ;;  %v4156_v49 = vld [vmem:[#allocation2 + $0x34a] sm:$0xff] }
 0x2ff   : > { %v4343_v46 = vmul.f32 %v11774_v15, %v4155_v53  ;;  %v4126_v24 = vmul.f32 %v8011_v2, %v11773_v16  ;;  %v10746_v62 = vadd.f32 %v4163_v35, %v4151_v29  ;;  %v4207_v57 = vadd.f32 %v4199_v56, %v4187_v34  ;;  %v7879_v59 = vld [vmem:[#allocation10 + $0x1c0] sm:$0xff]  }
 0x300   : > { %v4006_v48 = vmax.f32 %v3998_v54, 0.0  ;;  %v4182_v5 = vmul.f32 %v8011_v2, %v11770_v19  ;;  %v4327_v63 = vadd.f32 %v4319_v30, %v4303_v36  ;;  %v10752_v50 = vmul.f32 %v8011_v2, %v11776_v13  ;;  %v8012_v53 = vld [vmem:[#allocation2 + $0x350] sm:$0xff]  ;;  %7392 = vmatprep.subr.bf16.mxu0 %v7879_v59 }
 0x301   : > { %v10749_v58 = vadd.f32 %v4126_v24, %v4114_v1  ;;  %v4125_v23 = vmul.f32 %v8012_v53, %v11773_v16  ;;  %v11824_v3 = vmax.f32 %v10642_v26, 0.0  ;;  %v4227_v54 = vadd.f32 %v4219_v28, %v4207_v57  ;;  %v4157_v29 = vld [vmem:[#allocation2 + $0x352] sm:$0xff]  ;;  %v10770_v24 = vpop.f32.mrb[0].mxu0 }
 0x302   : > { %v4144_v35 = vmul.f32 %v11772_v17, %v4136_v7  ;;  %v4145_v56 = vmul.f32 %v11772_v17, %v4137_v42  ;;  %v10759_v34 = vadd.f32 %v4343_v46, %v4327_v63  ;;  %v10761_v1 = vadd.f32 %v4182_v5, %v4170_v8  ;;  %11825 = vst [vmem:[#allocation45_spill] sm:$0xff] %v10770_v24  ;;  %v10775_v5 = vpop.f32.mrb[1].mxu0 }
 0x303   : > { %v4010_v31 = vmax.f32 %v11824_v3, %v4006_v48  ;;  %v4133_v36 = vadd.f32 %v4125_v23, %v10705_v33  ;;  %v4164_v30 = vmul.f32 %v11771_v18, %v4156_v49  ;;  %v10766_v2 = vadd.f32 %v11767_v22, %v4227_v54  ;;  %11826 = vst [vmem:[#allocation46_spill] sm:$0xff] %v10775_v5  ;;  %v10786_v27 = vpop.f32.mrb[2].mxu0 }
 0x304   : > { %v4152_v26 = vadd.f32 %v4144_v35, %v4132_v39  ;;  %v4181_v57 = vmul.f32 %v8012_v53, %v11770_v19  ;;  %v4200_v28 = vmul.f32 %v11769_v20, %v4136_v7  ;;  %v4165_v46 = vmul.f32 %v11771_v18, %v4157_v29  ;;  %11827 = vst [vmem:[#allocation47_spill] sm:$0xff] %v10786_v27 }
 0x305   : > { %4014 = vst [vmem:[#allocation4 + $0x18] sm:$0xff] %v4010_v31  ;;  %v4153_v48 = vadd.f32 %v4145_v56, %v4133_v36  ;;  %v4201_v8 = vmul.f32 %v11769_v20, %v4137_v42  ;;  %v4220_v33 = vmul.f32 %v11768_v21, %v4156_v49  ;;  %v4221_v23 = vmul.f32 %v11768_v21, %v4157_v29 }
 0x306   : > { %v4189_v39 = vadd.f32 %v4181_v57, %v10714_v10  ;;  %v4208_v63 = vadd.f32 %v4200_v28, %v4188_v43  ;;  %v4172_v3 = vadd.f32 %v4164_v30, %v4152_v26  ;;  %v4305_v31 = vmul.f32 %v8012_v53, %v11776_v13 }
 0x307   : > { %v4320_v54 = vmul.f32 %v11775_v14, %v4136_v7  ;;  %v4321_v35 = vmul.f32 %v11775_v14, %v4137_v42  ;;  %v10783_v56 = vadd.f32 %v4165_v46, %v4153_v48  ;;  %v4344_v60 = vmul.f32 %v11774_v15, %v4156_v49  ;;  %v10793_v7 = vpop.f32.mrb[3].mxu0  ;;  %v8013_v49 = vld [vmem:[#allocation2 + $0x368] sm:$0xff] }
 0x308   : > { %v4209_v36 = vadd.f32 %v4201_v8, %v4189_v39  ;;  %v4228_v61 = vadd.f32 %v4220_v33, %v4208_v63  ;;  %v3287_v30 = vmax.f32 %v10296_v11, %v10298_v47  ;;  %v3288_v53 = vmax.f32 %v10341_v45, %v10343_v55  ;;  %11828 = vst [vmem:[#allocation48_spill] sm:$0xff] %v10793_v7  ;;  %v4138_v11 = vld [vmem:[#allocation2 + $0x359] sm:$0xff] }
 0x309   : > { %v4328_v10 = vadd.f32 %v4320_v54, %v10717_v51  ;;  %v4329_v43 = vadd.f32 %v4321_v35, %v4305_v31  ;;  %v4345_v57 = vmul.f32 %v11774_v15, %v4157_v29  ;;  %v4184_v28 = vmul.f32 %v8013_v49, %v11770_v19 }
 0x30a   : > { %v4229_v42 = vadd.f32 %v4221_v23, %v4209_v36  ;;  %v10796_v26 = vadd.f32 %v11767_v22, %v4228_v61  ;;  %v7111_v51 = vpack.c.bf16 %v3287_v30, %v3287_v30  ;;  %v7112_v46 = vpack.c.bf16 %v3288_v53, %v3288_v53  ;;  %v4195_v23 = vld [vmem:[#allocation2 + $0x361] sm:$0xff] }
 0x30b   : > { %v4352_v48 = vadd.f32 %v4344_v60, %v4328_v10  ;;  %v10801_v8 = vmul.f32 %v8013_v49, %v11776_v13  ;;  %v10807_v55 = vadd.f32 %v4345_v57, %v4329_v43  ;;  %v4364_v61 = vmul.f32 %v8013_v49, %v11773_v16  ;;  %v4158_v60 = vld [vmem:[#allocation2 + $0x35a] sm:$0xff]  ;;  %v4215_v57 = vld [vmem:[#allocation2 + $0x362] sm:$0xff]  ;;  %v3313_v49 = vld [vmem:[#allocation3 + $0x48] sm:$0xf] }
 0x30c   : > { %v10804_v47 = vadd.f32 %v11767_v22, %v4229_v42  ;;  %v3296_v29 = vshrl.u32 %v7111_v51, 16  ;;  %v3299_v33 = vshll.u32 %v7111_v51, 16  ;;  %v3304_v39 = vshrl.u32 %v7112_v46, 16  ;;  %v8014_v53 = vld [vmem:[#allocation2 + $0x360] sm:$0xff] }
 0x30d   : > { %v10810_v63 = vadd.f32 %v4184_v28, %v4172_v3  ;;  %v3307_v54 = vshll.u32 %v7112_v46, 16  ;;  %v10813_v35 = vadd.f32 %v4364_v61, %v4352_v48  ;;  %v4146_v36 = vmul.f32 %v11772_v17, %v4138_v11 }
 0x30e   : > { %v3298_v10 = vrot.slane %v3296_v29, 7  ;;  %v3306_v30 = vrot.slane %v3304_v39, 7  ;;  %v4725_v43 = vshrl.u32 %v10663_v25, 16  ;;  %v4183_v42 = vmul.f32 %v8014_v53, %v11770_v19  ;;  %v3316_v29 = vld [vmem:[#allocation3 + $0x4c] sm:$0xf] }
 0x30f   : > { %v4154_v3 = vadd.f32 %v4146_v36, %v10749_v58  ;;  %v4166_v28 = vmul.f32 %v11771_v18, %v4158_v60  ;;  %v4202_v51 = vmul.f32 %v11769_v20, %v4138_v11  ;;  %v4203_v48 = vmul.f32 %v11769_v20, %v4195_v23 }
 0x310   : > { %v3301_v46 = vor.u32 %v3299_v33, %v3298_v10  ;;  %v3302_v61 = vrot.slane %v3298_v10, 4  ;;  %v3309_v31 = vor.u32 %v3307_v54, %v3306_v30  ;;  %v4191_v39 = vadd.f32 %v4183_v42, %v10746_v62  ;;  %v10835_v30 = vpop.f32.mrb[4].mxu0 }
 0x311   : > { %v4174_v45 = vadd.f32 %v4166_v28, %v4154_v3  ;;  %v4210_v59 = vadd.f32 %v4202_v51, %v10761_v1  ;;  %v4222_v7 = vmul.f32 %v11768_v21, %v4158_v60  ;;  %v4223_v27 = vmul.f32 %v11768_v21, %v4215_v57  ;;  %11829 = vst [vmem:[#allocation49_spill] sm:$0xff] %v10835_v30  ;;  %v10840_v28 = vpop.f32.mrb[5].mxu0 }
 0x312   : > { %v3310_v58 = vsel %vm9476_vm13, %v3302_v61, %v3309_v31  ;;  %v3314_v36 = vsel %vm9469_vm12, %v3301_v46, %v3313_v49  ;;  %v4211_v5 = vadd.f32 %v4203_v48, %v4191_v39  ;;  %v4307_v33 = vmul.f32 %v8014_v53, %v11776_v13  ;;  %11830 = vst [vmem:[#allocation50_spill] sm:$0xff] %v10840_v28  ;;  %v4196_v46 = vld [vmem:[#allocation2 + $0x369] sm:$0xff] }
 0x313   : > { %3315 = vst [vmem:[#allocation3 + $0x48] sm:$0xf] %v3314_v36  ;;  %v3317_v62 = vsel %vm9483_vm14, %v3310_v58, %v3316_v29  ;;  %v4230_v54 = vadd.f32 %v4222_v7, %v4210_v59  ;;  %v4322_v1 = vmul.f32 %v11775_v14, %v4138_v11  ;;  %v4323_v10 = vmul.f32 %v11775_v14, %v4195_v23  ;;  %v8015_v58 = vld [vmem:[#allocation2 + $0x378] sm:$0xff]  ;;  %v4216_v36 = vld [vmem:[#allocation2 + $0x36a] sm:$0xff] }
 0x314   : > { %3318 = vst [vmem:[#allocation3 + $0x4c] sm:$0xf] %v3317_v62  ;;  %v4231_v42 = vadd.f32 %v4223_v27, %v4211_v5  ;;  %v4346_v31 = vmul.f32 %v11774_v15, %v4158_v60  ;;  %v4347_v49 = vmul.f32 %v11774_v15, %v4215_v57  ;;  %v4363_v3 = vmul.f32 %v8014_v53, %v11773_v16  ;;  %v4197_v53 = vld [vmem:[#allocation2 + $0x371] sm:$0xff] }
 0x315   : > { %v10843_v51 = vadd.f32 %v11767_v22, %v4230_v54  ;;  %v4330_v59 = vadd.f32 %v4322_v1, %v10752_v50  ;;  %v4331_v7 = vadd.f32 %v4323_v10, %v4307_v33  ;;  %v4383_v11 = vmul.f32 %v11772_v17, %v4195_v23  ;;  %v10855_v23 = vpop.f32.mrb[6].mxu0  ;;  %v8016_v1 = vld [vmem:[#allocation2 + $0x370] sm:$0xff] }
 0x316   : > { %v4727_v48 = vor.u32 %v4725_v43, %v10690_v0  ;;  %v4239_v27 = vadd.f32 %v11767_v22, %v4231_v42  ;;  %v4371_v5 = vadd.f32 %v4363_v3, %v10759_v34  ;;  %v4403_v60 = vmul.f32 %v11771_v18, %v4215_v57  ;;  %11831 = vst [vmem:[#allocation51_spill] sm:$0xff] %v10855_v23  ;;  %v4217_v57 = vld [vmem:[#allocation2 + $0x372] sm:$0xff]  ;;  %v10861_v62 = vpop.f32.mrb[7].mxu0 }
 0x317   : > { %v4354_v29 = vadd.f32 %v4346_v31, %v4330_v59  ;;  %v10852_v39 = vadd.f32 %v4347_v49, %v4331_v7  ;;  %v4186_v50 = vmul.f32 %v8015_v58, %v11770_v19  ;;  %v10858_v33 = vmul.f32 %v8015_v58, %v11776_v13  ;;  %11832 = vst [vmem:[#allocation52_spill] sm:$0xff] %v10861_v62  ;;  %v10868_v49 = vld [vmem:[#allocation4] ss:$2 sm:$0xff]  ;;  %v10883_v62 = vld [vmem:[#allocation4 + $0x1] ss:$2 sm:$0xff] }
 0x318   : > { %v4247_v0 = vmax.f32 %v4239_v27, 0.0  ;;  %v4391_v43 = vadd.f32 %v4383_v11, %v4371_v5  ;;  %v4366_v34 = vmul.f32 %v8015_v58, %v11773_v16  ;;  %v4185_v10 = vmul.f32 %v8016_v1, %v11770_v19 }
 0x319   : > { %v10863_v54 = vadd.f32 %v4186_v50, %v4174_v45  ;;  %v4204_v42 = vmul.f32 %v11769_v20, %v4196_v46  ;;  %v4205_v31 = vmul.f32 %v11769_v20, %v4197_v53  ;;  %v11833_v3 = vmax.f32 %v10766_v2, 0.0 }
 0x31a   : > { %v10872_v7 = vadd.f32 %v4403_v60, %v4391_v43  ;;  %v10874_v11 = vadd.f32 %v4366_v34, %v4354_v29  ;;  %v4224_v27 = vmul.f32 %v11768_v21, %v4216_v36  ;;  %v4193_v5 = vadd.f32 %v4185_v10, %v10783_v56  ;;  %v7858_v10 = vld [vmem:[#allocation10] sm:$0xff]  }
 0x31b   : > { %v4251_v59 = vmax.f32 %v11833_v3, %v4247_v0  ;;  %v10877_v45 = vld [vmem:[#allocation3 + $0x48] sm:$0xff]   ;;  %v4212_v58 = vadd.f32 %v4204_v42, %v10810_v63  ;;  %v4225_v50 = vmul.f32 %v11768_v21, %v4217_v57  ;;  %v4324_v61 = vmul.f32 %v11775_v14, %v4196_v46 }
 0x31c   : > { %v4309_v2 = vmul.f32 %v8016_v1, %v11776_v13  ;;  %v4325_v60 = vmul.f32 %v11775_v14, %v4197_v53  ;;  %v4348_v29 = vmul.f32 %v11774_v15, %v4216_v36  ;;  %v4349_v0 = vmul.f32 %v11774_v15, %v4217_v57 }
 0x31d   : > { %4255 = vst [vmem:[#allocation4] sm:$0xff] %v4251_v59  ;;  %v11725_v43 = vrot.slane %v10877_v45, 1  ;;  %v4729_v56 = vshll.u32 %v10877_v45, 16  ;;  %v4213_v63 = vadd.f32 %v4205_v31, %v4193_v5  ;;  %v4232_v34 = vadd.f32 %v4224_v27, %v4212_v58  ;;  %v7859_v27 = vld [vmem:[#allocation10 + $0x48] sm:$0xff]  }
 0x31e   : > { %v4332_v42 = vadd.f32 %v4324_v61, %v10801_v8  ;;  %v4333_v3 = vadd.f32 %v4325_v60, %v4309_v2  ;;  %v4365_v23 = vmul.f32 %v8016_v1, %v11773_v16  ;;  %v4384_v13 = vmul.f32 %v11772_v17, %v4196_v46  ;;  %v4198_v5 = vld [vmem:[#allocation2 + $0x379] sm:$0xff] }
 0x31f   : > { %v11834_v28 = vrot.slane %v10663_v25, 1  ;;  %v10901_v30 = vrot.slane %v4729_v56, 1  ;;  %v4233_v24 = vadd.f32 %v4225_v50, %v4213_v63  ;;  %v4240_v31 = vadd.f32 %v11767_v22, %v4232_v34  ;;  %v7860_v60 = vld [vmem:[#allocation10 + $0x8] sm:$0xff]  }
 0x320   : > { %v4356_v8 = vadd.f32 %v4348_v29, %v4332_v42  ;;  %v4373_v61 = vadd.f32 %v4365_v23, %v10807_v55  ;;  %v4385_v46 = vmul.f32 %v11772_v17, %v4197_v53  ;;  %v4392_v1 = vadd.f32 %v4384_v13, %v10813_v35  ;;  %v8017_v13 = vld [vmem:[#allocation2 + $0x388] sm:$0xff]  ;;  %v4218_v23 = vld [vmem:[#allocation2 + $0x37a] sm:$0xff] }
 0x321   : > { %v10899_v59 = vsel %vm4790_vm7, %v11834_v28, %v11725_v43  ;;  %v10910_v28 = vsel %vm4656_vm15, %v4727_v48, %v10901_v30  ;;  %v4241_v58 = vadd.f32 %v11767_v22, %v4233_v24  ;;  %v4248_v50 = vmax.f32 %v4240_v31, 0.0  ;;  %v7862_v48 = vld [vmem:[#allocation10 + $0x50] sm:$0xff]  }
 0x322   : > { %7543 = vmatmul.mubr.bf16.vlgmr.msra.gmra.mrb[0].mxu1 %v10899_v59  ;;  %v4404_v2 = vmul.f32 %v11771_v18, %v4216_v36  ;;  %5203 = vmatprep.mubr.bf16.mxu0 %v10910_v28  ;;  %v10915_v29 = vadd.f32 %v4349_v0, %v4333_v3  ;;  %v4393_v55 = vadd.f32 %v4385_v46, %v4373_v61  ;;  %v11835_v56 = vmax.f32 %v10796_v26, 0.0  ;;  %v10923_v0 = vpop.f32.mrb[8].mxu0 }
 0x323   : > { %7271 = vmatpush3.bf16.msra.mxu1 %v7858_v10  ;;  %v4405_v53 = vmul.f32 %v11771_v18, %v4217_v57  ;;  %v4368_v35 = vmul.f32 %v8017_v13, %v11773_v16  ;;  %5204 = vmatmul.mubr.bf16.gmra.mrb[28].mxu0 %v10663_v25  ;;  %v4249_v24 = vmax.f32 %v4241_v58, 0.0  ;;  %v4206_v34 = vmul.f32 %v11769_v20, %v4198_v5  ;;  %v4379_v10 = vld [vmem:[#allocation2 + $0x381] sm:$0xff]  ;;  %v10929_v61 = vpop.f32.mrb[9].mxu0 }
 0x324   : > { %v4252_v36 = vmax.f32 %v11835_v56, %v4248_v50  ;;  %v4412_v63 = vadd.f32 %v4404_v2, %v4392_v1  ;;  %7272 = vmatprep.subr.bf16.mxu1 %v7859_v27  ;;  %v4424_v3 = vmul.f32 %v8017_v13, %v11770_v19  ;;  %v4326_v31 = vmul.f32 %v11775_v14, %v4198_v5  ;;  %v10936_v58 = vld [vmem:[#allocation4 + $0x10] ss:$2 sm:$0x3f]  ;;  %v10938_v50 = vpop.f32.mrb[10].mxu0  ;;  %v4380_v14 = vld [vmem:[#allocation2 + $0x389] sm:$0xff] }
 0x325   : > { %v10925_v42 = vadd.f32 %v4405_v53, %v4393_v55  ;;  %v4376_v57 = vadd.f32 %v4368_v35, %v4356_v8  ;;  %v11836_v25 = vmax.f32 %v10804_v47, 0.0  ;;  %v4214_v46 = vadd.f32 %v4206_v34, %v10863_v54  ;;  %v7863_v8 = vld [vmem:[#allocation10 + $0x10] sm:$0xff]   ;;  %v10946_v56 = vpop.f32.mrb[11].mxu0 }
 0x326   : > { %v4226_v1 = vmul.f32 %v11768_v21, %v4218_v23  ;;  %v4350_v27 = vmul.f32 %v11774_v15, %v4218_v23  ;;  %4256 = vst [vmem:[#allocation4 + $0x8] sm:$0xff] %v4252_v36  ;;  %v4334_v2 = vadd.f32 %v4326_v31, %v10858_v33  ;;  %v8018_v55 = vld [vmem:[#allocation2 + $0x380] sm:$0xff]  ;;  %v4386_v47 = vmul.f32 %v11772_v17, %v4198_v5 }
 0x327   : > { %v4253_v26 = vmax.f32 %v11836_v25, %v4249_v24  ;;  %7273 = vmatpush3.bf16.msra.mxu1 %v7860_v60  ;;  %v4367_v53 = vmul.f32 %v8018_v55, %v11773_v16  ;;  %v4387_v54 = vmul.f32 %v11772_v17, %v4379_v10  ;;  %v4399_v13 = vld [vmem:[#allocation2 + $0x382] sm:$0xff]  ;;  %v4432_v60 = vadd.f32 %v4424_v3, %v4412_v63 }
 0x328   : > { %v10944_v35 = vld [vmem:[#allocation4 + $0x11] ss:$2 sm:$0x3f]  ;;  %7274 = vmatprep.subr.bf16.mxu1 %v7862_v48  ;;  %v4234_v36 = vadd.f32 %v4226_v1, %v4214_v46  ;;  %v4406_v34 = vmul.f32 %v11771_v18, %v4218_v23  ;;  %v4423_v33 = vmul.f32 %v8018_v55, %v11770_v19  ;;  %v4358_v31 = vadd.f32 %v4350_v27, %v4334_v2  ;;  %v4381_v23 = vld [vmem:[#allocation2 + $0x391] sm:$0xff] }
 0x329   : > { %v7864_v24 = vld [vmem:[#allocation10 + $0x58] sm:$0xff]   ;;  %4257 = vst [vmem:[#allocation4 + $0x10] sm:$0xff] %v4253_v26  ;;  %v4375_v25 = vadd.f32 %v4367_v53, %v10852_v39  ;;  %v4394_v5 = vadd.f32 %v4386_v47, %v10874_v11  ;;  %v4443_v43 = vmul.f32 %v11769_v20, %v4379_v10  ;;  %v4407_v15 = vmul.f32 %v11771_v18, %v4399_v13  ;;  %v8019_v27 = vld [vmem:[#allocation2 + $0x398] sm:$0xff]  ;;  %v8020_v11 = vld [vmem:[#allocation2 + $0x390] sm:$0xff] }
 0x32a   : > { %v4242_v48 = vadd.f32 %v11767_v22, %v4234_v36  ;;  %v4431_v63 = vadd.f32 %v4423_v33, %v10872_v7  ;;  %v4463_v3 = vmul.f32 %v11768_v21, %v4399_v13  ;;  %v7865_v46 = vld [vmem:[#allocation10 + $0x18] sm:$0xff]   ;;  %v4370_v39 = vmul.f32 %v8019_v27, %v11773_v16  ;;  %v7866_v55 = vld [vmem:[#allocation10 + $0x60] sm:$0xff]  }
 0x32b   : > { %7275 = vmatpush3.bf16.msra.mxu1 %v7863_v8  ;;  %v4395_v26 = vadd.f32 %v4387_v54, %v4375_v25  ;;  %v4414_v1 = vadd.f32 %v4406_v34, %v4394_v5  ;;  %v4369_v10 = vmul.f32 %v8020_v11, %v11773_v16  ;;  %v4400_v2 = vld [vmem:[#allocation2 + $0x38a] sm:$0xff]  ;;  %v4426_v7 = vmul.f32 %v8019_v27, %v11770_v19  ;;  %v4401_v36 = vld [vmem:[#allocation2 + $0x392] sm:$0xff] }
 0x32c   : > { %7276 = vmatprep.subr.bf16.mxu1 %v7864_v24  ;;  %v4250_v53 = vmax.f32 %v4242_v48, 0.0  ;;  %v4451_v47 = vadd.f32 %v4443_v43, %v4431_v63  ;;  %v4388_v13 = vmul.f32 %v11772_v17, %v4380_v14  ;;  %v4378_v54 = vadd.f32 %v4370_v39, %v4358_v31  ;;  %v7867_v43 = vld [vmem:[#allocation10 + $0x20] sm:$0xff]  }
 0x32d   : > { %v10961_v8 = vadd.f32 %v4407_v15, %v4395_v26  ;;  %v4377_v34 = vadd.f32 %v4369_v10, %v10915_v29  ;;  %v4389_v33 = vmul.f32 %v11772_v17, %v4381_v23  ;;  %v11837_v25 = vmax.f32 %v10843_v51, 0.0  ;;  %v7868_v29 = vld [vmem:[#allocation10 + $0x68] sm:$0xff]  }
 0x32e   : > { %v4471_v16 = vadd.f32 %v4463_v3, %v4451_v47  ;;  %v4396_v24 = vadd.f32 %v4388_v13, %v4376_v57  ;;  %v4408_v48 = vmul.f32 %v11771_v18, %v4400_v2  ;;  %v4409_v27 = vmul.f32 %v11771_v18, %v4401_v36  ;;  %v4382_v3 = vld [vmem:[#allocation2 + $0x399] sm:$0xff] }
 0x32f   : > { %v4254_v5 = vmax.f32 %v11837_v25, %v4250_v53  ;;  %7277 = vmatpush3.bf16.msra.mxu1 %v7865_v46  ;;  %v4397_v63 = vadd.f32 %v4389_v33, %v4377_v34  ;;  %v4425_v15 = vmul.f32 %v8020_v11, %v11770_v19  ;;  %v4444_v31 = vmul.f32 %v11769_v20, %v4380_v14  ;;  %v4402_v47 = vld [vmem:[#allocation2 + $0x39a] sm:$0xff] }
 0x330   : > { %7278 = vmatprep.subr.bf16.mxu1 %v7866_v55  ;;  %v10972_v26 = vadd.f32 %v11767_v22, %v4471_v16  ;;  %v4434_v51 = vadd.f32 %v4426_v7, %v4414_v1  ;;  %v4416_v39 = vadd.f32 %v4408_v48, %v4396_v24  ;;  %v4445_v57 = vmul.f32 %v11769_v20, %v4381_v23  ;;  %v8021_v1 = vld [vmem:[#allocation2 + $0x3a8] sm:$0xff]  ;;  %v7869_v7 = vld [vmem:[#allocation10 + $0x28] sm:$0xff]  }
 0x331   : > { %4258 = vst [vmem:[#allocation4 + $0x18] sm:$0xff] %v4254_v5  ;;  %v10975_v46 = vadd.f32 %v4409_v27, %v4397_v63  ;;  %v4433_v10 = vadd.f32 %v4425_v15, %v10925_v42  ;;  %v4452_v53 = vadd.f32 %v4444_v31, %v4432_v60  ;;  %v4464_v11 = vmul.f32 %v11768_v21, %v4400_v2  ;;  %v4439_v24 = vld [vmem:[#allocation2 + $0x3a1] sm:$0xff] }
 0x332   : > { %v4465_v14 = vmul.f32 %v11768_v21, %v4401_v36  ;;  %v3531_v55 = vmax.f32 %v10480_v4, %v10482_v37  ;;  %v3532_v16 = vmax.f32 %v10528_v40, %v10530_v41  ;;  %v4428_v23 = vmul.f32 %v8021_v1, %v11770_v19  ;;  %v7871_v36 = vld [vmem:[#allocation10 + $0x70] sm:$0xff]   ;;  %v4440_v1 = vld [vmem:[#allocation2 + $0x3a9] sm:$0xff] }
 0x333   : > { %7279 = vmatpush3.bf16.msra.mxu1 %v7867_v43  ;;  %v4487_v13 = vmax.f32 %v10972_v26, 0.0  ;;  %v4453_v42 = vadd.f32 %v4445_v57, %v4433_v10  ;;  %v4472_v60 = vadd.f32 %v4464_v11, %v4452_v53  ;;  %v4390_v2 = vmul.f32 %v11772_v17, %v4382_v3  ;;  %v4459_v15 = vld [vmem:[#allocation2 + $0x3a2] sm:$0xff]  ;;  %v7904_v17 = vld [vmem:[#allocation10 + $0xa0] sm:$0xff]  }
 0x334   : > { %7280 = vmatprep.subr.bf16.mxu1 %v7868_v29  ;;  %v7113_v34 = vpack.c.bf16 %v3531_v55, %v3531_v55  ;;  %v7114_v33 = vpack.c.bf16 %v3532_v16, %v3532_v16  ;;  %v4436_v4 = vadd.f32 %v4428_v23, %v4416_v39  ;;  %v4410_v5 = vmul.f32 %v11771_v18, %v4402_v47  ;;  %v7873_v31 = vld [vmem:[#allocation10 + $0x30] sm:$0xff]  }
 0x335   : > { %v4473_v40 = vadd.f32 %v4465_v14, %v4453_v42  ;;  %v10989_v41 = vadd.f32 %v11767_v22, %v4472_v60  ;;  %v4398_v25 = vadd.f32 %v4390_v2, %v4378_v54  ;;  %v8022_v10 = vld [vmem:[#allocation2 + $0x3a0] sm:$0xff]  ;;  %v4446_v55 = vmul.f32 %v11769_v20, %v4382_v3 }
 0x336   : > { %v3540_v48 = vshrl.u32 %v7113_v34, 16  ;;  %v3543_v43 = vshll.u32 %v7113_v34, 16  ;;  %v3548_v63 = vshrl.u32 %v7114_v33, 16  ;;  %v3551_v27 = vshll.u32 %v7114_v33, 16  ;;  %v7875_v54 = vld [vmem:[#allocation10 + $0x78] sm:$0xff]   ;;  %v4441_v34 = vld [vmem:[#allocation2 + $0x3b1] sm:$0xff] }
 0x337   : > { %7281 = vmatpush3.bf16.msra.mxu1 %v7869_v7  ;;  %v10993_v29 = vadd.f32 %v11767_v22, %v4473_v40  ;;  %v4488_v39 = vmax.f32 %v10989_v41, 0.0  ;;  %v4418_v57 = vadd.f32 %v4410_v5, %v4398_v25  ;;  %v4427_v53 = vmul.f32 %v8022_v10, %v11770_v19  ;;  %v3557_v7 = vld [vmem:[#allocation3 + $0x50] sm:$0xf]  ;;  %v3560_v25 = vld [vmem:[#allocation3 + $0x54] sm:$0xf]  ;;  %v7876_v3 = vld [vmem:[#allocation10 + $0x38] sm:$0xff]  }
 0x338   : > { %7282 = vmatprep.subr.bf16.mxu1 %v7871_v36  ;;  %v3542_v11 = vrot.slane %v3540_v48, 7  ;;  %v3550_v14 = vrot.slane %v3548_v63, 7  ;;  %v4447_v16 = vmul.f32 %v11769_v20, %v4439_v24  ;;  %v4466_v60 = vmul.f32 %v11768_v21, %v4402_v47  ;;  %v8023_v24 = vld [vmem:[#allocation2 + $0x3b8] sm:$0xff]  ;;  %v8024_v10 = vld [vmem:[#allocation2 + $0x3b0] sm:$0xff] }
 0x339   : > { %v4489_v23 = vmax.f32 %v10993_v29, 0.0  ;;  %v4435_v42 = vadd.f32 %v4427_v53, %v10961_v8  ;;  %v4467_v2 = vmul.f32 %v11768_v21, %v4459_v15  ;;  %v4454_v5 = vadd.f32 %v4446_v55, %v4434_v51  ;;  %v4460_v47 = vld [vmem:[#allocation2 + $0x3aa] sm:$0xff]  ;;  %v4461_v53 = vld [vmem:[#allocation2 + $0x3b2] sm:$0xff] }
 0x33a   : > { %v3545_v33 = vor.u32 %v3543_v43, %v3542_v11  ;;  %v3546_v36 = vrot.slane %v3542_v11, 4  ;;  %v3553_v40 = vor.u32 %v3551_v27, %v3550_v14  ;;  %v4430_v63 = vmul.f32 %v8023_v24, %v11770_v19  ;;  %v11006_v15 = vld [vmem:[#allocation10 + $0x80] sm:$0xff]   ;;  %v4442_v11 = vld [vmem:[#allocation2 + $0x3b9] sm:$0xff] }
 0x33b   : > { %7283 = vmatpush3.bf16.msra.mxu1 %v7873_v31  ;;  %v4455_v48 = vadd.f32 %v4447_v16, %v4435_v42  ;;  %v4429_v37 = vmul.f32 %v8024_v10, %v11770_v19  ;;  %v4448_v8 = vmul.f32 %v11769_v20, %v4440_v1  ;;  %v4474_v27 = vadd.f32 %v4466_v60, %v4454_v5  ;;  %v4462_v14 = vld [vmem:[#allocation2 + $0x3ba] sm:$0xff] }
 0x33c   : > { %7284 = vmatprep.subr.bf16.mxu1 %v7875_v54  ;;  %v3554_v43 = vsel %vm9476_vm13, %v3546_v36, %v3553_v40  ;;  %v3558_v51 = vsel %vm9469_vm12, %v3545_v33, %v3557_v7  ;;  %v4449_v31 = vmul.f32 %v11769_v20, %v4441_v34  ;;  %v4438_v1 = vadd.f32 %v4430_v63, %v4418_v57 }
 0x33d   : > { %3559 = vst [vmem:[#allocation3 + $0x50] sm:$0xf] %v3558_v51  ;;  %v3561_v55 = vsel %vm9483_vm14, %v3554_v43, %v3560_v25  ;;  %v4475_v16 = vadd.f32 %v4467_v2, %v4455_v48  ;;  %v4437_v54 = vadd.f32 %v4429_v37, %v10975_v46  ;;  %v4482_v42 = vadd.f32 %v11767_v22, %v4474_v27 }
 0x33e   : > { %3562 = vst [vmem:[#allocation3 + $0x54] sm:$0xf] %v3561_v55  ;;  %v4456_v36 = vadd.f32 %v4448_v8, %v4436_v4  ;;  %v4468_v40 = vmul.f32 %v11768_v21, %v4460_v47  ;;  %v4469_v7 = vmul.f32 %v11768_v21, %v4461_v53  ;;  %v4450_v33 = vmul.f32 %v11769_v20, %v4442_v11  ;;  %v4261_v53 = vld [vmem:[#allocation4 + $0x1] ss:$2 sm:$0xff]  ;;  %v7884_v20 = vld [vmem:[#allocation10 + $0x1d0] sm:$0xff]  }
 0x33f   : > { %7285 = vmatpush3.bf16.msra.mxu1 %v7876_v3  ;;  %v4483_v60 = vadd.f32 %v11767_v22, %v4475_v16  ;;  %v4457_v34 = vadd.f32 %v4449_v31, %v4437_v54  ;;  %v4470_v25 = vmul.f32 %v11768_v21, %v4462_v14  ;;  %v4490_v57 = vmax.f32 %v4482_v42, 0.0  ;;  %v4262_v54 = vld [vmem:[#allocation4 + $0x11] ss:$2 sm:$0x3f] }
 0x340   : > { %7558 = vmatprep.subr.bf16.mxu1 %v11006_v15  ;;  %v4476_v46 = vadd.f32 %v4468_v40, %v4456_v36  ;;  %v3775_v37 = vmax.f32 %v10674_v12, %v10676_v44  ;;  %v3776_v4 = vmax.f32 %v10727_v32, %v10729_v38  ;;  %v4458_v3 = vadd.f32 %v4450_v33, %v4438_v1  ;;  %v4259_v38 = vld [vmem:[#allocation4] ss:$2 sm:$0xff]  ;;  %v4260_v1 = vld [vmem:[#allocation4 + $0x10] ss:$2 sm:$0x3f] }
 0x341   : > { %v4491_v2 = vmax.f32 %v4483_v60, 0.0  ;;  %v4477_v5 = vadd.f32 %v4469_v7, %v4457_v34  ;;  %v4019_v48 = vmax.f32 %v10868_v49, %v10883_v62  ;;  %v4020_v8 = vmax.f32 %v10936_v58, %v10944_v35  ;;  %v3801_v58 = vld [vmem:[#allocation3 + $0x58] sm:$0xf] }
 0x342   : > { %v4484_v24 = vadd.f32 %v11767_v22, %v4476_v46  ;;  %v7115_v63 = vpack.c.bf16 %v3775_v37, %v3775_v37  ;;  %v7116_v10 = vpack.c.bf16 %v3776_v4, %v3776_v4  ;;  %v4478_v44 = vadd.f32 %v4470_v25, %v4458_v3  ;;  %v3804_v46 = vld [vmem:[#allocation3 + $0x5c] sm:$0xf] }
 0x343   : > { %v4495_v47 = vmax.f32 %v4487_v13, %v4491_v2  ;;  %v4485_v12 = vadd.f32 %v11767_v22, %v4477_v5  ;;  %v7117_v32 = vpack.c.bf16 %v4019_v48, %v4019_v48  ;;  %v7118_v35 = vpack.c.bf16 %v4020_v8, %v4020_v8 }
 0x344   : > { %v4492_v43 = vmax.f32 %v4484_v24, 0.0  ;;  %v3784_v51 = vshrl.u32 %v7115_v63, 16  ;;  %v3787_v27 = vshll.u32 %v7115_v63, 16  ;;  %v3792_v62 = vshrl.u32 %v7116_v10, 16 }
 0x345   : > { %v11035_v49 = vld [vmem:[#allocation3 + $0x50] sm:$0xff]   ;;  %v4493_v31 = vmax.f32 %v4485_v12, 0.0  ;;  %v4486_v11 = vadd.f32 %v11767_v22, %v4478_v44  ;;  %v3795_v14 = vshll.u32 %v7116_v10, 16  ;;  %4499 = vst [vmem:[#allocation4] sm:$0xff] %v4495_v47  ;;  %v4028_v16 = vshrl.u32 %v7117_v32, 16  ;;  %v11277_v22 = vld [vmem:[#allocation3 + $0x28] sm:$0xff]  }
 0x346   : > { %v4496_v26 = vmax.f32 %v4488_v39, %v4492_v43  ;;  %v3786_v13 = vrot.slane %v3784_v51, 7  ;;  %v3794_v55 = vrot.slane %v3792_v62, 7  ;;  %v4810_v42 = vrot.slane %v11035_v49, 1  ;;  %v11044_v60 = vpop.f32.mrb[12].mxu0  ;;  %v4045_v47 = vld [vmem:[#allocation3 + $0x60] sm:$0xf] }
 0x347   : > { %v4737_v36 = vshll.u32 %v11035_v49, 16  ;;  %v4497_v40 = vmax.f32 %v4489_v23, %v4493_v31  ;;  %v4494_v7 = vmax.f32 %v4486_v11, 0.0  ;;  %v11838_v34 = vshrl.u32 %v10877_v45, 16  ;;  %v11049_v37 = vpop.f32.mrb[13].mxu0  ;;  %v4048_v11 = vld [vmem:[#allocation3 + $0x64] sm:$0xf] }
 0x348   : > { %v3789_v39 = vor.u32 %v3787_v27, %v3786_v13  ;;  %v3790_v33 = vrot.slane %v3786_v13, 4  ;;  %v3797_v25 = vor.u32 %v3795_v14, %v3794_v55  ;;  %4500 = vst [vmem:[#allocation4 + $0x8] sm:$0xff] %v4496_v26  ;;  %v11839_v4 = vrot.slane %v10877_v45, 1 }
 0x349   : > { %v4735_v41 = vor.u32 %v11838_v34, %v10901_v30  ;;  %v11058_v23 = vrot.slane %v4737_v36, 1  ;;  %v4498_v2 = vmax.f32 %v4490_v57, %v4494_v7  ;;  %v4030_v5 = vrot.slane %v4028_v16, 7  ;;  %4501 = vst [vmem:[#allocation4 + $0x10] sm:$0xff] %v4497_v40  ;;  %v11060_v30 = vpop.f32.mrb[14].mxu0  ;;  %v11840_v7 = vld [vmem:[#allocation45_spill] sm:$0xff]  ;;  %v11841_v34 = vld [vmem:[#allocation46_spill] sm:$0xff] }
 0x34a   : > { %v11056_v29 = vsel %vm4790_vm7, %v11839_v4, %v4810_v42  ;;  %v3798_v3 = vsel %vm9476_vm13, %v3790_v33, %v3797_v25  ;;  %v3802_v48 = vsel %vm9469_vm12, %v3789_v39, %v3801_v58  ;;  %v4031_v24 = vshll.u32 %v7117_v32, 16  ;;  %v11067_v10 = vpop.f32.mrb[15].mxu0  ;;  %v11843_v39 = vld [vmem:[#allocation47_spill] sm:$0xff]  ;;  %v11844_v33 = vld [vmem:[#allocation48_spill] sm:$0xff] }
 0x34b   : > { %7546 = vmatprep.mubr.bf16.mxu1 %v11056_v29  ;;  %v4036_v63 = vshrl.u32 %v7118_v35, 16  ;;  %v11071_v8 = vsel %vm4656_vm15, %v4735_v41, %v11058_v23  ;;  %3803 = vst [vmem:[#allocation3 + $0x58] sm:$0xf] %v3802_v48  ;;  %v3805_v57 = vsel %vm9483_vm14, %v3798_v3, %v3804_v46  ;;  %4502 = vst [vmem:[#allocation4 + $0x18] sm:$0xff] %v4498_v2  ;;  %v4039_v43 = vshll.u32 %v7118_v35, 16 }
 0x34c   : > { %5211 = vmatprep.mubr.bf16.mxu0 %v11071_v8  ;;  %3806 = vst [vmem:[#allocation3 + $0x5c] sm:$0xf] %v3805_v57  ;;  %v4033_v12 = vor.u32 %v4031_v24, %v4030_v5  ;;  %v4263_v32 = vmax.f32 %v4259_v38, %v4261_v53  ;;  %v4264_v51 = vmax.f32 %v4260_v1, %v4262_v54  ;;  %v4034_v27 = vrot.slane %v4030_v5, 4  ;;  %v4289_v1 = vld [vmem:[#allocation3 + $0x68] sm:$0xf] }
 0x34d   : > { %v4038_v44 = vrot.slane %v4036_v63, 7  ;;  %5212 = vmatmul.mubr.bf16.gmra.mrb[32].mxu0 %v10877_v45  ;;  %v11085_v41 = vadd.f32 %v11841_v34, %v11840_v7  ;;  %v11089_v25 = vadd.f32 %v11844_v33, %v11843_v39  ;;  %v4292_v5 = vld [vmem:[#allocation3 + $0x6c] sm:$0xf]  ;;  %v4741_v3 = vshrl.u32 %v11035_v49, 16  ;;  %v4536_v33 = vld [vmem:[#allocation3 + $0x74] sm:$0xf] }
 0x34e   : > { %v4046_v31 = vsel %vm9469_vm12, %v4033_v12, %v4045_v47  ;;  %v7119_v14 = vpack.c.bf16 %v4263_v32, %v4263_v32  ;;  %v7120_v58 = vpack.c.bf16 %v4264_v51, %v4264_v51  ;;  %v11161_v52 = vadd.f32 %v10946_v56, %v10938_v50 }
 0x34f   : > { %v4041_v62 = vor.u32 %v4039_v43, %v4038_v44  ;;  %4047 = vst [vmem:[#allocation3 + $0x60] sm:$0xf] %v4046_v31  ;;  %v4503_v26 = vld [vmem:[#allocation4] ss:$2 sm:$0xff]  ;;  %v4505_v13 = vld [vmem:[#allocation4 + $0x1] ss:$2 sm:$0xff] }
 0x350   : > { %v4272_v16 = vshrl.u32 %v7119_v14, 16  ;;  %v4507_v35 = vmax.f32 %v4503_v26, %v4505_v13  ;;  %v4275_v38 = vshll.u32 %v7119_v14, 16  ;;  %v4280_v53 = vshrl.u32 %v7120_v58, 16  ;;  %11842 = vst [vmem:[#allocation45_spill] sm:$0xff] %v11085_v41  ;;  %11845 = vst [vmem:[#allocation46_spill] sm:$0xff] %v11089_v25  ;;  %v7889_v25 = vld [vmem:[#allocation10 + $0x1a0] sm:$0xff]  }
 0x351   : > { %v4042_v55 = vsel %vm9476_vm13, %v4034_v27, %v4041_v62  ;;  %v4283_v2 = vshll.u32 %v7120_v58, 16  ;;  %v4533_v43 = vld [vmem:[#allocation3 + $0x70] sm:$0xf]  ;;  %v11864_v41 = vld [vmem:[#allocation39_spill] sm:$0xff] }
 0x352   : > { %v4049_v45 = vsel %vm9483_vm14, %v4042_v55, %v4048_v11  ;;  %v4274_v54 = vrot.slane %v4272_v16, 7  ;;  %v4504_v36 = vld [vmem:[#allocation4 + $0x10] ss:$2 sm:$0x3f]  ;;  %v7121_v40 = vpack.c.bf16 %v4507_v35, %v4507_v35  ;;  %v4282_v4 = vrot.slane %v4280_v53, 7 }
 0x353   : > { %4050 = vst [vmem:[#allocation3 + $0x64] sm:$0xf] %v4049_v45  ;;  %v11091_v46 = vld [vmem:[#allocation3 + $0x58] sm:$0xff]   ;;  %v4743_v11 = vor.u32 %v4741_v3, %v11058_v23 }
 0x354   : > { %v4277_v48 = vor.u32 %v4275_v38, %v4274_v54  ;;  %v4506_v24 = vld [vmem:[#allocation4 + $0x11] ss:$2 sm:$0x3f]  ;;  %v4516_v63 = vshrl.u32 %v7121_v40, 16  ;;  %v4812_v57 = vrot.slane %v11091_v46, 1  ;;  %v4745_v47 = vshll.u32 %v11091_v46, 16 }
 0x355   : > { %v4278_v12 = vrot.slane %v4274_v54, 4  ;;  %v4285_v44 = vor.u32 %v4283_v2, %v4282_v4  ;;  %v4508_v51 = vmax.f32 %v4504_v36, %v4506_v24  ;;  %v4519_v62 = vshll.u32 %v7121_v40, 16  ;;  %v4539_v36 = vld [vmem:[#allocation3] sm:$0xf]  ;;  %v11121_v40 = vld [vmem:[#allocation3 + $0x4] sm:$0xf] }
 0x356   : > { %v4290_v32 = vsel %vm9469_vm12, %v4277_v48, %v4289_v1  ;;  %v4518_v27 = vrot.slane %v4516_v63, 7  ;;  %v11101_v31 = vsel %vm4790_vm7, %v4810_v42, %v4812_v57  ;;  %v4747_v14 = vrot.slane %v4745_v47, 1  ;;  %v11846_v2 = vld [vmem:[#allocation49_spill] sm:$0xff]  ;;  %v11849_v47 = vld [vmem:[#allocation51_spill] sm:$0xff] }
 0x357   : > { %v4286_v58 = vsel %vm9476_vm13, %v4278_v12, %v4285_v44  ;;  %4291 = vst [vmem:[#allocation3 + $0x68] sm:$0xf] %v4290_v32  ;;  %7547 = vmatmul.mubr.bf16.gmra.mrb[4].mxu1 %v11101_v31  ;;  %v7122_v13 = vpack.c.bf16 %v4508_v51, %v4508_v51  ;;  %v4749_v38 = vshrl.u32 %v11091_v46, 16  ;;  %v11135_v24 = vcombine.low %v4539_v36, %v11121_v40  ;;  %v11850_v12 = vld [vmem:[#allocation52_spill] sm:$0xff] }
 0x358   : > { %v4293_v26 = vsel %vm9483_vm14, %v4286_v58, %v4292_v5  ;;  %v4521_v55 = vor.u32 %v4519_v62, %v4518_v27  ;;  %v11110_v16 = vsel %vm4656_vm15, %v4743_v11, %v4747_v14  ;;  %v4522_v39 = vrot.slane %v4518_v27, 4  ;;  %v11847_v5 = vld [vmem:[#allocation50_spill] sm:$0xff] }
 0x359   : > { %4294 = vst [vmem:[#allocation3 + $0x6c] sm:$0xf] %v4293_v26  ;;  %5219 = vmatprep.mubr.bf16.mxu0 %v11110_v16  ;;  %v4524_v42 = vshrl.u32 %v7122_v13, 16  ;;  %v4527_v54 = vshll.u32 %v7122_v13, 16  ;;  %v4751_v34 = vor.u32 %v4749_v38, %v4747_v14  ;;  %v11129_v3 = vadd.f32 %v11847_v5, %v11846_v2  ;;  %11853 = vst [vmem:[#allocation50_spill] sm:$0xff] %v11161_v52  ;;  %v7885_v52 = vld [vmem:[#allocation10 + $0x190] sm:$0xff]  }
 0x35a   : > { %v11112_v35 = vld [vmem:[#allocation3 + $0x60] sm:$0xff]   ;;  %v4534_v23 = vsel %vm9469_vm12, %v4521_v55, %v4533_v43  ;;  %5220 = vmatmul.mubr.bf16.gmra.mrb[36].mxu0 %v11035_v49  ;;  %v11144_v44 = vadd.f32 %v11850_v12, %v11849_v47  ;;  %v11150_v32 = vadd.f32 %v10929_v61, %v10923_v0  ;;  %v4660_v6 = vshll.u32 %v11135_v24, 16  ;;  %v7872_v14 = vld [vmem:[#allocation3 + $0x78] ss:$0 sps:$4 sm:$0x11]   ;;  %v11204_v47 = vld [vmem:[#allocation3 + $0x28] sm:$0xff]  }
 0x35b   : > { %v4814_v45 = vrot.slane %v11112_v35, 1  ;;  %v4753_v53 = vshll.u32 %v11112_v35, 16  ;;  %4535 = vst [vmem:[#allocation3 + $0x70] sm:$0xf] %v4534_v23  ;;  %v4526_v1 = vrot.slane %v4524_v42, 7  ;;  %11848 = vst [vmem:[#allocation47_spill] sm:$0xff] %v11129_v3  ;;  %v11173_v26 = vadd.f32 %v11049_v37, %v11044_v60 }
 0x35c   : > { %11851 = vst [vmem:[#allocation48_spill] sm:$0xff] %v11144_v44  ;;  %11852 = vst [vmem:[#allocation49_spill] sm:$0xff] %v11150_v32  ;;  %v4757_v27 = vshrl.u32 %v11112_v35, 16  ;;  %v4658_v50 = vshrl.u32 %v11135_v24, 16  ;;  %v4662_v56 = vrot.slane %v4660_v6, 1  ;;  %v11179_v13 = vadd.f32 %v11067_v10, %v11060_v30  ;;  %v11207_v6 = vld [vmem:[#allocation3 + $0x30] sm:$0xff]  }
 0x35d   : > { %v11124_v7 = vsel %vm4790_vm7, %v4812_v57, %v4814_v45  ;;  %v4755_v9 = vrot.slane %v4753_v53, 1  ;;  %v4529_v4 = vor.u32 %v4527_v54, %v4526_v1  ;;  %11854 = vst [vmem:[#allocation51_spill] sm:$0xff] %v11173_v26  ;;  %v4904_v55 = vshll.u32 %v7872_v14, 16  ;;  %v11200_v5 = vld [vmem:[#allocation3 + $0x14] sm:$0xf]  ;;  %v11302_v3 = vld [vmem:[#allocation10 + $0x200] sm:$0xff]  }
 0x35e   : > { %7550 = vmatprep.mubr.bf16.mxu1 %v11124_v7  ;;  %11855 = vst [vmem:[#allocation52_spill] sm:$0xff] %v11179_v13  ;;  %v4917_v23 = vrot.slane %v7872_v14, 1  ;;  %v4663_v38 = vor.u32 %v4662_v56, %v4658_v50  ;;  %v8025_v50 = vld [vmem:[#allocation3 + $0xc] sm:$0xf] }
 0x35f   : > { %v11132_v48 = vsel %vm4656_vm15, %v4751_v34, %v4755_v9  ;;  %v4530_v57 = vsel %vm9476_vm13, %v4522_v39, %v4529_v4  ;;  %v4759_v61 = vor.u32 %v4757_v27, %v4755_v9  ;;  %v4906_v1 = vrot.slane %v4904_v55, 1  ;;  %v11856_v9 = vld [vmem:[#allocation35_spill] sm:$0xff]  ;;  %v11197_v4 = vld [vmem:[#allocation3 + $0x18] sm:$0xff]   ;;  %v4885_v27 = vld [vmem:[#allocation3 + $0x8] sm:$0xe] }
 0x360   : > { %5227 = vmatprep.mubr.bf16.mxu0 %v11132_v48  ;;  %v11138_v63 = vld [vmem:[#allocation3 + $0x68] sm:$0xff]   ;;  %v4537_v43 = vsel %vm9483_vm14, %v4530_v57, %v4536_v33  ;;  %v4668_v39 = vsel %vm4656_vm15, %v4663_v38, %v11856_v9  ;;  %v11202_v57 = vld [vmem:[#allocation3 + $0x20] sm:$0xff]   ;;  %v6188_v14 = vrot.slane %v11197_v4, 1  ;;  %v6983_v56 = vcombine.low %v4885_v27, %v8025_v50  ;;  %v11211_v55 = vld [vmem:[#allocation3 + $0x38] sm:$0xff]  }
 0x361   : > { %v11153_v51 = vrot.slane %v11138_v63, 1  ;;  %v4761_v62 = vshll.u32 %v11138_v63, 16  ;;  %4538 = vst [vmem:[#allocation3 + $0x74] sm:$0xf] %v4537_v43  ;;  %v5896_v43 = vld [vmem:[#allocation3 + $0x10] sm:$0xe] }
 0x362   : > { %5228 = vmatmul.mubr.bf16.gmra.mrb[40].mxu0 %v11091_v46  ;;  %v6190_v38 = vrot.slane %v11202_v57, 1  ;;  %v6196_v27 = vrot.slane %v11211_v55, 1  ;;  %v7893_v44 = vld [vmem:[#allocation10 + $0x1e8] sm:$0xff]  }
 0x363   : > { %v11165_v0 = vsel %vm4790_vm7, %v4814_v45, %v11153_v51  ;;  %v4763_v11 = vrot.slane %v4761_v62, 1  ;;  %v4765_v45 = vshrl.u32 %v11138_v63, 16  ;;  %v7881_v62 = vld [vmem:[#allocation10 + $0x88] sm:$0xff]  }
 0x364   : > { %7551 = vmatmul.mubr.bf16.gmra.mrb[8].mxu1 %v11165_v0  ;;  %v11227_v9 = vsel %vm4790_vm7, %v6188_v14, %v6190_v38 }
 0x365   : > { %v11169_v58 = vsel %vm4656_vm15, %v4759_v61, %v4763_v11  ;;  %v11187_v53 = vor.u32 %v4765_v45, %v4763_v11  ;;  %v7061_v11 = vcombine.low %v5896_v43, %v11200_v5  ;;  %v7890_v43 = vld [vmem:[#allocation10 + $0x90] sm:$0xff]  }
 0x366   : > { %5235 = vmatprep.mubr.bf16.mxu0 %v11169_v58 }
 0x368   : > { %v11181_v42 = vld [vmem:[#allocation3 + $0x70] sm:$0xff]  }
 0x369   : > { %v4915_v60 = vrot.slane %v11181_v42, 1  ;;  %v4896_v37 = vshll.u32 %v11181_v42, 16  ;;  %v4900_v36 = vshrl.u32 %v11181_v42, 16 }
 0x36a   : > { %5236 = vmatmul.mubr.bf16.gmra.mrb[44].mxu0 %v11112_v35 }
 0x36b   : > { %v4916_v30 = vsel %vm4790_vm7, %v11153_v51, %v4915_v60  ;;  %v4918_v10 = vsel %vm4790_vm7, %v4915_v60, %v4917_v23  ;;  %v4898_v54 = vrot.slane %v4896_v37, 1  ;;  %v11213_v23 = vld [vmem:[#allocation3 + $0x40] sm:$0xff]   ;;  %v11217_v37 = vld [vmem:[#allocation3 + $0x48] sm:$0xff]  }
 0x36c   : > { %7554 = vmatprep.mubr.bf16.mxu1 %v4916_v30  ;;  %v6187_v30 = vrot.slane %v7061_v11, 1  ;;  %v6200_v11 = vrot.slane %v11217_v37, 1 }
 0x36d   : > { %7555 = vmatmul.mubr.bf16.gmra.mrb[12].mxu1 %v4918_v10  ;;  %v4899_v34 = vsel %vm4656_vm15, %v11187_v53, %v4898_v54  ;;  %v4902_v33 = vor.u32 %v4900_v36, %v4898_v54  ;;  %v6192_v10 = vrot.slane %v11204_v47, 1  ;;  %v8026_v54 = vld [vmem:[#allocation3 + $0x10] sm:$0xff]  }
 0x36e   : > { %5243 = vmatprep.mubr.bf16.mxu0 %v4899_v34  ;;  %5581 = vmatprep.mubr.bf16.mxu1 %v4668_v39  ;;  %v11222_v36 = vrot.slane %v8026_v54, 1  ;;  %v11859_v39 = vld [vmem:[#allocation36_spill] sm:$0xff] }
 0x36f   : > { %v4907_v2 = vsel %vm4656_vm15, %v4902_v33, %v4906_v1  ;;  %v11232_v33 = vsel %vm4790_vm7, %v6187_v30, %v6188_v14  ;;  %v8027_v30 = vld [vmem:[#allocation3 + $0x18] sm:$0xff]  }
 0x372   : > { %5244 = vmatmul.mubr.bf16.gmra.mrb[48].mxu0 %v11138_v63  ;;  %v7188_v12 = vpop.f32.mrb[16].mxu0 }
 0x373   : > { %5251 = vmatprep.mubr.bf16.mxu0 %v4907_v2  ;;  %v7189_v61 = vpop.f32.mrb[17].mxu0  ;;  %v11235_v2 = vsel %vm4790_vm7, %v6190_v38, %v6192_v10  ;;  %v7899_v38 = vld [vmem:[#allocation10 + $0x98] sm:$0xff]  }
 0x374   : > { %v11215_v45 = vadd.f32 %v7189_v61, %v7188_v12  ;;  %v7191_v60 = vpop.f32.mrb[18].mxu0  ;;  %v4913_v12 = vrot.slane %v6983_v56, 1  ;;  %v6198_v61 = vrot.slane %v11213_v23, 1 }
 0x375   : > { %v7192_v1 = vpop.f32.mrb[19].mxu0  ;;  %5582 = vmatmul.mubr.bf16.vlgmr.msra.gmra.mrb[16].mxu1 %v11135_v24  ;;  %v6194_v24 = vrot.slane %v11207_v6, 1 }
 0x376   : > { %11857 = vst [vmem:[#allocation35_spill] sm:$0xff] %v11215_v45  ;;  %v11224_v34 = vadd.f32 %v7192_v1, %v7191_v60  ;;  %7559 = vmatpush3.bf16.msra.mxu1 %v11006_v15  ;;  %5589 = vmatprep.mubr.bf16.mxu1 %v11859_v39  ;;  %v4914_v14 = vsel %vm4790_vm7, %v4913_v12, %v11222_v36  ;;  %v11256_v1 = vld [vmem:[#allocation3 + $0x50] sm:$0xff]   ;;  %v11259_v39 = vld [vmem:[#allocation3 + $0x20] sm:$0xff]  }
 0x377   : > { %7560 = vmatprep.subr.bf16.mxu1 %v7881_v62  ;;  %v11242_v15 = vsel %vm4790_vm7, %v6192_v10, %v6194_v24  ;;  %v11248_v50 = vsel %vm4790_vm7, %v6194_v24, %v6196_v27  ;;  %v11251_v56 = vsel %vm4790_vm7, %v6196_v27, %v6198_v61  ;;  %v11254_v60 = vsel %vm4790_vm7, %v6198_v61, %v6200_v11  ;;  %v11860_v10 = vld [vmem:[#allocation34_spill] sm:$0xff]  ;;  %v11861_v12 = vld [vmem:[#allocation37_spill] sm:$0xff]  ;;  %v7880_v27 = vld [vmem:[#allocation10 + $0x180] sm:$0xff]  }
 0x378   : > { %11858 = vst [vmem:[#allocation53_spill] sm:$0xff] %v11224_v34  ;;  %v4798_v24 = vrot.slane %v11259_v39, 1  ;;  %v7882_v61 = vld [vmem:[#allocation10 + $0x1c8] sm:$0xff]   ;;  %v4800_v34 = vrot.slane %v11277_v22, 1 }
 0x379   : > { %v11280_v45 = vld [vmem:[#allocation3 + $0x30] sm:$0xff]  }
 0x37a   : > { %5252 = vmatmul.mubr.bf16.gmra.mrb[52].mxu0 %v11181_v42  ;;  %7561 = vmatpush3.bf16.msra.mxu1 %v7881_v62  ;;  %v4796_v42 = vrot.slane %v8027_v30, 1  ;;  %v6202_v62 = vrot.slane %v11256_v1, 1 }
 0x37b   : > { %7530 = vmatprep.mubr.bf16.mxu0 %v4914_v14  ;;  %7562 = vmatprep.subr.bf16.mxu1 %v7890_v43 }
 0x37c   : > { %v11266_v14 = vsel %vm4790_vm7, %v11222_v36, %v4796_v42  ;;  %v11270_v18 = vsel %vm4790_vm7, %v4796_v42, %v4798_v24  ;;  %v11273_v19 = vsel %vm4790_vm7, %v6200_v11, %v6202_v62  ;;  %v7909_v42 = vld [vmem:[#allocation10 + $0xa8] sm:$0xff]   ;;  %v4802_v11 = vrot.slane %v11280_v45, 1 }
 0x37d   : > { %5590 = vmatmul.mubr.bf16.gmra.mrb[20].mxu1 %v11860_v10 }
 0x37e   : > { %5597 = vmatprep.mubr.bf16.mxu1 %v11861_v12  ;;  %7563 = vmatpush3.bf16.msra.mxu1 %v7890_v43  ;;  %v7883_v43 = vld [vmem:[#allocation10 + $0x188] sm:$0xff]  }
 0x37f   : > { %7564 = vmatprep.subr.bf16.mxu1 %v7899_v38  ;;  %v5867_v12 = vld [vmem:[#allocation3 + $0x10] sm:$0xf] }
 0x380   : > { %v7046_v21 = vcombine.low %v5867_v12, %v11200_v5  ;;  %v11285_v5 = vsel %vm4790_vm7, %v4798_v24, %v4800_v34  ;;  %v6062_v12 = vshll.u32 %v11197_v4, 16  ;;  %v7918_v24 = vld [vmem:[#allocation10 + $0xb8] sm:$0xff]  }
 0x382   : > { %7531 = vmatmul.mubr.bf16.vlgmr.msra.gmra.mrb[56].mxu0 %v11266_v14  ;;  %7565 = vmatpush3.bf16.msra.mxu1 %v7899_v38  ;;  %v6057_v13 = vshll.u32 %v7046_v21, 16  ;;  %v7914_v38 = vld [vmem:[#allocation10 + $0xb0] sm:$0xff]   ;;  %v6055_v32 = vshrl.u32 %v7046_v21, 16  ;;  %v6064_v26 = vrot.slane %v6062_v12, 1  ;;  %v7897_v12 = vld [vmem:[#allocation10 + $0x1f8] sm:$0xff]  }
 0x383   : > { %7393 = vmatpush3.bf16.msra.mxu0 %v7880_v27  ;;  %7534 = vmatprep.mubr.bf16.mxu0 %v11270_v18  ;;  %v11862_v27 = vld [vmem:[#allocation38_spill] sm:$0xff] }
 0x384   : > { %7394 = vmatprep.subr.bf16.mxu0 %v7882_v61  ;;  %7566 = vmatprep.subr.bf16.mxu1 %v7904_v17  ;;  %v7886_v61 = vld [vmem:[#allocation10 + $0x1d8] sm:$0xff]  }
 0x385   : > { %5598 = vmatmul.mubr.bf16.gmra.mrb[24].mxu1 %v8026_v54  ;;  %v11289_v54 = vsel %vm4790_vm7, %v4800_v34, %v4802_v11  ;;  %v11863_v34 = vld [vmem:[#allocation40_spill] sm:$0xff] }
 0x386   : > { %5605 = vmatprep.mubr.bf16.mxu1 %v11862_v27  ;;  %7567 = vmatpush3.bf16.msra.mxu1 %v7904_v17  ;;  %v6059_v27 = vrot.slane %v6057_v13, 1  ;;  %v11293_v17 = vld [vmem:[#allocation3 + $0x58] sm:$0xff]   ;;  %v11865_v13 = vrot.slane %v11864_v41, 1  ;;  %v11866_v41 = vld [vmem:[#allocation41_spill] sm:$0xff] }
 0x387   : > { %7395 = vmatpush3.bf16.msra.mxu0 %v7883_v43  ;;  %7568 = vmatprep.subr.bf16.mxu1 %v7909_v42  ;;  %v7887_v43 = vld [vmem:[#allocation10 + $0x198] sm:$0xff]  }
 0x388   : > { %7396 = vmatprep.subr.bf16.mxu0 %v7884_v20  ;;  %v7888_v20 = vld [vmem:[#allocation10 + $0x1e0] sm:$0xff]  }
 0x38a   : > { %7535 = vmatmul.mubr.bf16.gmra.mrb[60].mxu0 %v11285_v5  ;;  %7569 = vmatpush3.bf16.msra.mxu1 %v7909_v42  ;;  %v11300_v42 = vsel %vm4790_vm7, %v4802_v11, %v11865_v13  ;;  %v7896_v11 = vld [vmem:[#allocation10 + $0x1b0] sm:$0xff]  }
 0x38b   : > { %7397 = vmatpush3.bf16.msra.mxu0 %v7885_v52  ;;  %7538 = vmatprep.mubr.bf16.mxu0 %v11289_v54  ;;  %v6060_v52 = vor.u32 %v6059_v27, %v6055_v32  ;;  %v7894_v32 = vld [vmem:[#allocation10 + $0x1a8] sm:$0xff]  }
 0x38c   : > { %7398 = vmatprep.subr.bf16.mxu0 %v7886_v61  ;;  %7570 = vmatprep.subr.bf16.mxu1 %v7914_v38  ;;  %v6204_v61 = vrot.slane %v11293_v17, 1 }
 0x38d   : > { %5606 = vmatmul.mubr.bf16.gmra.mrb[28].mxu1 %v8027_v30  ;;  %v6065_v21 = vsel %vm4656_vm15, %v6060_v52, %v6064_v26 }
 0x38e   : > { %5613 = vmatprep.mubr.bf16.mxu1 %v11863_v34  ;;  %7571 = vmatpush3.bf16.msra.mxu1 %v7914_v38  ;;  %v11307_v30 = vsel %vm4790_vm7, %v6202_v62, %v6204_v61  ;;  %v7895_v38 = vld [vmem:[#allocation10 + $0x1f0] sm:$0xff]   ;;  %v7898_v62 = vld [vmem:[#allocation10 + $0x1b8] sm:$0xff]  }
 0x38f   : > { %7399 = vmatpush3.bf16.msra.mxu0 %v7887_v43  ;;  %7572 = vmatprep.subr.bf16.mxu1 %v7918_v24  ;;  %v6070_v43 = vshll.u32 %v11202_v57, 16  ;;  %v7900_v34 = vld [vmem:[#allocation3 + $0x10] sm:$0xff]  }
 0x390   : > { %7400 = vmatprep.subr.bf16.mxu0 %v7888_v20 }
 0x391   : > { %v6072_v20 = vrot.slane %v6070_v43, 1  ;;  %v11868_v43 = vld [vmem:[#allocation44_spill] sm:$0xff] }
 0x392   : > { %7539 = vmatmul.mubr.bf16.gmra.mrb[64].mxu0 %v11300_v42  ;;  %7573 = vmatpush3.bf16.msra.mxu1 %v7918_v24 }
 0x393   : > { %7401 = vmatpush3.bf16.msra.mxu0 %v7889_v25  ;;  %6455 = vmatprep.mubr.bf16.mxu0 %v6065_v21  ;;  %v11313_v25 = vld [vmem:[#allocation3 + $0x60] sm:$0xff]  }
 0x394   : > { %7402 = vmatprep.subr.bf16.mxu0 %v7893_v44  ;;  %7602 = vmatprep.subr.bf16.mxu1 %v11302_v3  ;;  %v6066_v44 = vshrl.u32 %v11197_v4, 16 }
 0x395   : > { %5614 = vmatmul.mubr.bf16.gmra.mrb[32].mxu1 %v11259_v39  ;;  %v11867_v39 = vld [vmem:[#allocation42_spill] sm:$0xff] }
 0x396   : > { %5621 = vmatprep.mubr.bf16.mxu1 %v11866_v41  ;;  %v6068_v52 = vor.u32 %v6066_v44, %v6064_v26  ;;  %v6074_v26 = vshrl.u32 %v11202_v57, 16  ;;  %v7905_v57 = vld [vmem:[#allocation3 + $0x20] sm:$0xff]  }
 0x397   : > { %7403 = vmatpush3.bf16.msra.mxu0 %v7894_v32  ;;  %v6206_v32 = vrot.slane %v11313_v25, 1 }
 0x398   : > { %7404 = vmatprep.subr.bf16.mxu0 %v7895_v38  ;;  %v6073_v41 = vsel %vm4656_vm15, %v6068_v52, %v6072_v20  ;;  %v6076_v44 = vor.u32 %v6074_v26, %v6072_v20  ;;  %v7907_v26 = vld [vmem:[#allocation3 + $0x28] sm:$0xff]  }
 0x39b   : > { %7405 = vmatpush3.bf16.msra.mxu0 %v7896_v11  ;;  %v11326_v11 = vsel %vm4790_vm7, %v6204_v61, %v6206_v32  ;;  %v8031_v61 = vld [vmem:[#allocation3 + $0x38] sm:$0xff]  }
 0x39c   : > { %7406 = vmatprep.subr.bf16.mxu0 %v7897_v12 }
 0x39d   : > { %5622 = vmatmul.mubr.bf16.gmra.mrb[36].mxu1 %v11277_v22  ;;  %v6078_v22 = vshll.u32 %v11204_v47, 16 }
 0x39e   : > { %v7194_v27 = vpop.f32.mrb[20].mxu0  ;;  %5629 = vmatprep.mubr.bf16.mxu1 %v11867_v39  ;;  %v6086_v39 = vshll.u32 %v11207_v6, 16 }
 0x39f   : > { %7407 = vmatpush3.bf16.msra.mxu0 %v7898_v62  ;;  %v7195_v24 = vpop.f32.mrb[21].mxu0  ;;  %v6080_v12 = vrot.slane %v6078_v22, 1  ;;  %v7902_v62 = vld [vmem:[#allocation3 + $0x18] sm:$0xff]   ;;  %v8032_v22 = vld [vmem:[#allocation3 + $0x40] sm:$0xff]  }
 0x3a0   : > { %v11318_v13 = vadd.f32 %v7195_v24, %v7194_v27  ;;  %v7197_v21 = vpop.f32.mrb[22].mxu0  ;;  %v11333_v24 = vld [vmem:[#allocation3 + $0x68] sm:$0xff]  }
 0x3a1   : > { %v7198_v38 = vpop.f32.mrb[23].mxu0  ;;  %v6081_v27 = vsel %vm4656_vm15, %v6076_v44, %v6080_v12  ;;  %v8033_v44 = vld [vmem:[#allocation3 + $0x48] sm:$0xff]  }
 0x3a2   : > { %6456 = vmatmul.mubr.bf16.vlgmr.msra.gmra.mrb[68].mxu0 %v7900_v34  ;;  %v11323_v4 = vadd.f32 %v7198_v38, %v7197_v21  ;;  %v6082_v34 = vshrl.u32 %v11204_v47, 16  ;;  %v6208_v21 = vrot.slane %v11333_v24, 1  ;;  %v6094_v38 = vshll.u32 %v11211_v55, 16 }
 0x3a3   : > { %6463 = vmatprep.mubr.bf16.mxu0 %v6073_v41  ;;  %v6090_v47 = vshrl.u32 %v11207_v6, 16 }
 0x3a4   : > { %v6084_v52 = vor.u32 %v6082_v34, %v6080_v12  ;;  %v11343_v41 = vsel %vm4790_vm7, %v6206_v32, %v6208_v21  ;;  %v6098_v32 = vshrl.u32 %v11211_v55, 16  ;;  %v6106_v34 = vshrl.u32 %v11213_v23, 16 }
 0x3a5   : > { %5630 = vmatmul.mubr.bf16.gmra.mrb[40].mxu1 %v11280_v45  ;;  %v6088_v45 = vrot.slane %v6086_v39, 1  ;;  %v7910_v39 = vld [vmem:[#allocation3 + $0x30] sm:$0xff]  }
 0x3a6   : > { %5637 = vmatprep.mubr.bf16.mxu1 %v11868_v43 }
 0x3a7   : > { %v6089_v20 = vsel %vm4656_vm15, %v6084_v52, %v6088_v45  ;;  %v6092_v12 = vor.u32 %v6090_v47, %v6088_v45 }
 0x3aa   : > { %6464 = vmatmul.mubr.bf16.gmra.mrb[72].mxu0 %v7902_v62  ;;  %v6102_v62 = vshll.u32 %v11213_v23, 16 }
 0x3ab   : > { %6471 = vmatprep.mubr.bf16.mxu0 %v6081_v27 }
 0x3ac   : > { %v6104_v27 = vrot.slane %v6102_v62, 1 }
 0x3ad   : > { %5638 = vmatmul.mubr.bf16.gmra.mrb[44].mxu1 %v8031_v61  ;;  %v6110_v61 = vshll.u32 %v11217_v37, 16 }
 0x3ae   : > { %5645 = vmatprep.mubr.bf16.mxu1 %v10910_v28  ;;  %v6096_v28 = vrot.slane %v6094_v38, 1  ;;  %v6108_v55 = vor.u32 %v6106_v34, %v6104_v27  ;;  %v11358_v38 = vld [vmem:[#allocation3 + $0x70] ss:$0 sps:$4 sm:$0x11]  }
 0x3af   : > { %v6112_v45 = vrot.slane %v6110_v61, 1 }
 0x3b0   : > { %v6097_v43 = vsel %vm4656_vm15, %v6092_v12, %v6096_v28  ;;  %v6100_v6 = vor.u32 %v6098_v32, %v6096_v28  ;;  %v4769_v12 = vshll.u32 %v11358_v38, 16 }
 0x3b2   : > { %6472 = vmatmul.mubr.bf16.gmra.mrb[76].mxu0 %v7905_v57  ;;  %v7912_v57 = vld [vmem:[#allocation3 + $0x38] sm:$0xff]   ;;  %v4771_v32 = vrot.slane %v4769_v12, 1 }
 0x3b3   : > { %6479 = vmatprep.mubr.bf16.mxu0 %v6089_v20  ;;  %v6118_v20 = vshll.u32 %v11256_v1, 16 }
 0x3b5   : > { %5646 = vmatmul.mubr.bf16.gmra.mrb[48].mxu1 %v8032_v22 }
 0x3b6   : > { %5653 = vmatprep.mubr.bf16.mxu1 %v11071_v8  ;;  %v6105_v8 = vsel %vm4656_vm15, %v6100_v6, %v6104_v27  ;;  %v6126_v27 = vshll.u32 %v11293_v17, 16 }
 0x3b8   : > { %v6128_v6 = vrot.slane %v6126_v27, 1 }
 0x3ba   : > { %6480 = vmatmul.mubr.bf16.gmra.mrb[80].mxu0 %v7907_v26  ;;  %v6120_v26 = vrot.slane %v6118_v20, 1  ;;  %v6142_v20 = vshll.u32 %v11333_v24, 16 }
 0x3bb   : > { %6487 = vmatprep.mubr.bf16.mxu0 %v6097_v43  ;;  %v7915_v43 = vld [vmem:[#allocation3 + $0x40] sm:$0xff]  }
 0x3bd   : > { %5654 = vmatmul.mubr.bf16.gmra.mrb[52].mxu1 %v8033_v44 }
 0x3be   : > { %5661 = vmatprep.mubr.bf16.mxu1 %v11110_v16  ;;  %v6113_v16 = vsel %vm4656_vm15, %v6108_v55, %v6112_v45  ;;  %v6134_v55 = vshll.u32 %v11313_v25, 16 }
 0x3c2   : > { %6488 = vmatmul.mubr.bf16.gmra.mrb[84].mxu0 %v7910_v39  ;;  %v4568_v39 = vld [vmem:[#allocation3] sm:$0xe] }
 0x3c3   : > { %6495 = vmatprep.mubr.bf16.mxu0 %v6105_v8  ;;  %v7919_v8 = vld [vmem:[#allocation3 + $0x48] sm:$0xff]  }
 0x3c5   : > { %5662 = vmatmul.mubr.bf16.gmra.mrb[56].mxu1 %v11035_v49 }
 0x3c6   : > { %5669 = vmatprep.mubr.bf16.mxu1 %v11132_v48  ;;  %v6114_v48 = vshrl.u32 %v11217_v37, 16  ;;  %v6122_v37 = vshrl.u32 %v11256_v1, 16  ;;  %v6136_v1 = vrot.slane %v6134_v55, 1 }
 0x3c8   : > { %v6116_v62 = vor.u32 %v6114_v48, %v6112_v45  ;;  %v6124_v61 = vor.u32 %v6122_v37, %v6120_v26 }
 0x3c9   : > { %v7200_v52 = vpop.f32.mrb[24].mxu0 }
 0x3ca   : > { %6496 = vmatmul.mubr.bf16.gmra.mrb[88].mxu0 %v7912_v57  ;;  %v7201_v22 = vpop.f32.mrb[25].mxu0  ;;  %v6121_v44 = vsel %vm4656_vm15, %v6116_v62, %v6120_v26  ;;  %v6129_v34 = vsel %vm4656_vm15, %v6124_v61, %v6128_v6  ;;  %v4792_v57 = vrot.slane %v11860_v10, 1  ;;  %v7927_v10 = vld [vmem:[#allocation10 + $0x208] sm:$0xff]   ;;  %v7930_v26 = vld [vmem:[#allocation10 + $0x210] sm:$0xff]  }
 0x3cb   : > { %6503 = vmatprep.mubr.bf16.mxu0 %v6113_v16  ;;  %v11360_v47 = vadd.f32 %v7201_v22, %v7200_v52  ;;  %v7203_v49 = vpop.f32.mrb[26].mxu0 }
 0x3cc   : > { %v7204_v28 = vpop.f32.mrb[27].mxu0  ;;  %v4795_v22 = vsel %vm4790_vm7, %v4792_v57, %v11222_v36  ;;  %v7933_v36 = vld [vmem:[#allocation10 + $0x218] sm:$0xff]  }
 0x3cd   : > { %v11362_v23 = vadd.f32 %v7204_v28, %v7203_v49  ;;  %5670 = vmatmul.mubr.bf16.gmra.mrb[60].mxu1 %v11091_v46  ;;  %v4772_v46 = vsel %vm4656_vm15, %v11187_v53, %v4771_v32  ;;  %v6130_v53 = vshrl.u32 %v11293_v17, 16  ;;  %v6144_v49 = vrot.slane %v6142_v20, 1  ;;  %v11386_v28 = vld [vmem:[#allocation3 + $0x70] sm:$0xff]   ;;  %v7925_v17 = vld [vmem:[#allocation3 + $0x58] sm:$0xff]   ;;  %v7935_v32 = vld [vmem:[#allocation10 + $0x220] sm:$0xff]  }
 0x3ce   : > { %5677 = vmatprep.mubr.bf16.mxu1 %v11169_v58  ;;  %v6980_v58 = vcombine.low %v4568_v39, %v11121_v40  ;;  %v7922_v40 = vld [vmem:[#allocation3 + $0x50] sm:$0xff]  }
 0x3cf   : > { %v6132_v52 = vor.u32 %v6130_v53, %v6128_v6  ;;  %v7934_v20 = vld [vmem:[#allocation3 + $0x70] sm:$0xff]  }
 0x3d0   : > { %v4791_v45 = vrot.slane %v6980_v58, 1 }
 0x3d1   : > { %v6137_v16 = vsel %vm4656_vm15, %v6132_v52, %v6136_v1  ;;  %v7940_v52 = vld [vmem:[#allocation10 + $0x238] sm:$0xff]  }
 0x3d2   : > { %6504 = vmatmul.mubr.bf16.gmra.mrb[92].mxu0 %v7915_v43  ;;  %v6150_v43 = vshll.u32 %v11386_v28, 16 }
 0x3d3   : > { %6511 = vmatprep.mubr.bf16.mxu0 %v6121_v44  ;;  %v11395_v44 = vld [vmem:[#allocation3 + $0x78] sm:$0xff]  }
 0x3d4   : > { %v6158_v39 = vshll.u32 %v11395_v44, 16 }
 0x3d5   : > { %5678 = vmatmul.mubr.bf16.gmra.mrb[64].mxu1 %v11112_v35  ;;  %v4793_v35 = vsel %vm4790_vm7, %v4791_v45, %v4792_v57  ;;  %v7931_v45 = vld [vmem:[#allocation3 + $0x68] sm:$0xff]   ;;  %v6162_v57 = vshrl.u32 %v11395_v44, 16 }
 0x3d6   : > { %5685 = vmatprep.mubr.bf16.mxu1 %v4772_v46  ;;  %v11400_v46 = vld [vmem:[#allocation3 + $0x80] ss:$0 sps:$4 sm:$0x11]   ;;  %v6160_v58 = vrot.slane %v6158_v39, 1 }
 0x3d7   : > { %v6166_v55 = vshll.u32 %v11400_v46, 16 }
 0x3da   : > { %6512 = vmatmul.mubr.bf16.gmra.mrb[96].mxu0 %v7919_v8 }
 0x3db   : > { %6519 = vmatprep.mubr.bf16.mxu0 %v6129_v34 }
 0x3dd   : > { %5686 = vmatmul.mubr.bf16.gmra.mrb[68].mxu1 %v11138_v63  ;;  %v6138_v63 = vshrl.u32 %v11313_v25, 16  ;;  %v6146_v25 = vshrl.u32 %v11333_v24, 16 }
 0x3de   : > { %7574 = vmatprep.mubr.bf16.mxu1 %v4793_v35  ;;  %v7939_v35 = vld [vmem:[#allocation10 + $0x230] sm:$0xff]  }
 0x3df   : > { %v6140_v48 = vor.u32 %v6138_v63, %v6136_v1  ;;  %v6148_v62 = vor.u32 %v6146_v25, %v6144_v49 }
 0x3e1   : > { %v6145_v12 = vsel %vm4656_vm15, %v6140_v48, %v6144_v49 }
 0x3e2   : > { %6520 = vmatmul.mubr.bf16.gmra.mrb[100].mxu0 %v7922_v40  ;;  %v6168_v40 = vrot.slane %v6166_v55, 1 }
 0x3e3   : > { %6527 = vmatprep.mubr.bf16.mxu0 %v6137_v16  ;;  %v11869_v16 = vld [vmem:[#allocation43_spill] sm:$0xff] }
 0x3e5   : > { %7575 = vmatmul.mubr.bf16.vlgmr.msra.gmra.mrb[72].mxu1 %v4795_v22  ;;  %v7937_v22 = vld [vmem:[#allocation3 + $0x78] sm:$0xff]  }
 0x3e6   : > { %7603 = vmatpush3.bf16.msra.mxu1 %v11302_v3  ;;  %7578 = vmatprep.mubr.bf16.mxu1 %v11266_v14  ;;  %v6152_v3 = vrot.slane %v6150_v43, 1  ;;  %v7928_v14 = vld [vmem:[#allocation3 + $0x60] sm:$0xff]  }
 0x3e7   : > { %7604 = vmatprep.subr.bf16.mxu1 %v7927_v10 }
 0x3e8   : > { %v6153_v27 = vsel %vm4656_vm15, %v6148_v62, %v6152_v3 }
 0x3ea   : > { %6528 = vmatmul.mubr.bf16.gmra.mrb[104].mxu0 %v7925_v17  ;;  %7605 = vmatpush3.bf16.msra.mxu1 %v7927_v10 }
 0x3eb   : > { %6535 = vmatprep.mubr.bf16.mxu0 %v6145_v12  ;;  %7606 = vmatprep.subr.bf16.mxu1 %v7930_v26 }
 0x3ed   : > { %7579 = vmatmul.mubr.bf16.gmra.mrb[76].mxu1 %v11270_v18  ;;  %v6154_v18 = vshrl.u32 %v11386_v28, 16 }
 0x3ee   : > { %7582 = vmatprep.mubr.bf16.mxu1 %v11285_v5  ;;  %7607 = vmatpush3.bf16.msra.mxu1 %v7930_v26  ;;  %v7938_v5 = vld [vmem:[#allocation10 + $0x228] sm:$0xff]  }
 0x3ef   : > { %7608 = vmatprep.subr.bf16.mxu1 %v7933_v36  ;;  %v6156_v6 = vor.u32 %v6154_v18, %v6152_v3 }
 0x3f2   : > { %6536 = vmatmul.mubr.bf16.gmra.mrb[108].mxu0 %v7928_v14  ;;  %7609 = vmatpush3.bf16.msra.mxu1 %v7933_v36 }
 0x3f3   : > { %6543 = vmatprep.mubr.bf16.mxu0 %v6153_v27  ;;  %7610 = vmatprep.subr.bf16.mxu1 %v7935_v32 }
 0x3f5   : > { %7583 = vmatmul.mubr.bf16.gmra.mrb[80].mxu1 %v11289_v54  ;;  %v6161_v54 = vsel %vm4656_vm15, %v6156_v6, %v6160_v58 }
 0x3f6   : > { %v7206_v37 = vpop.f32.mrb[28].mxu0  ;;  %7586 = vmatprep.mubr.bf16.mxu1 %v11300_v42  ;;  %7611 = vmatpush3.bf16.msra.mxu1 %v7935_v32  ;;  %v6164_v42 = vor.u32 %v6162_v57, %v6160_v58  ;;  %v6212_v32 = vrot.slane %v11395_v44, 1 }
 0x3f7   : > { %v7207_v8 = vpop.f32.mrb[29].mxu0  ;;  %7612 = vmatprep.subr.bf16.mxu1 %v7938_v5 }
 0x3f8   : > { %v11404_v61 = vadd.f32 %v7207_v8, %v7206_v37  ;;  %v7209_v34 = vpop.f32.mrb[30].mxu0  ;;  %v6169_v10 = vsel %vm4656_vm15, %v6164_v42, %v6168_v40 }
 0x3f9   : > { %v7210_v53 = vpop.f32.mrb[31].mxu0 }
 0x3fa   : > { %v11408_v1 = vadd.f32 %v7210_v53, %v7209_v34  ;;  %6544 = vmatmul.mubr.bf16.gmra.mrb[112].mxu0 %v7931_v45  ;;  %7613 = vmatpush3.bf16.msra.mxu1 %v7938_v5 }
 0x3fb   : > { %6551 = vmatprep.mubr.bf16.mxu0 %v6161_v54  ;;  %7614 = vmatprep.subr.bf16.mxu1 %v7939_v35 }
 0x3fd   : > { %7587 = vmatmul.mubr.bf16.gmra.mrb[0].mxu1 %v11869_v16 }
 0x3fe   : > { %7590 = vmatprep.mubr.bf16.mxu1 %v10899_v59  ;;  %7615 = vmatpush3.bf16.msra.mxu1 %v7939_v35  ;;  %v4818_v59 = vrot.slane %v11358_v38, 1 }
 0x3ff   : > { %7616 = vmatprep.subr.bf16.mxu1 %v7940_v52 }
 0x400   : > { %v4819_v63 = vsel %vm4790_vm7, %v11153_v51, %v4818_v59 }
 0x402   : > { %6552 = vmatmul.mubr.bf16.gmra.mrb[116].mxu0 %v7934_v20  ;;  %7617 = vmatpush3.bf16.msra.mxu1 %v7940_v52 }
 0x403   : > { %6559 = vmatprep.mubr.bf16.mxu0 %v6169_v10 }
 0x405   : > { %7591 = vmatmul.mubr.bf16.gmra.mrb[4].mxu1 %v11056_v29 }
 0x406   : > { %7594 = vmatprep.mubr.bf16.mxu1 %v11101_v31 }
 0x40a   : > { %6560 = vmatmul.mubr.bf16.gmra.mrb[120].mxu0 %v7937_v22  ;;  %v11870_v22 = vld [vmem:[#allocation47_spill] sm:$0xff] }
 0x40d   : > { %7595 = vmatmul.mubr.bf16.gmra.mrb[8].mxu1 %v11124_v7 }
 0x40e   : > { %7598 = vmatprep.mubr.bf16.mxu1 %v11165_v0 }
 0x415   : > { %7599 = vmatmul.mubr.bf16.gmra.mrb[12].mxu1 %v4819_v63 }
 0x416   : > { %7618 = vmatprep.mubr.bf16.mxu1 %v11232_v33 }
 0x41d   : > { %7619 = vmatmul.mubr.bf16.vlgmr.msra.gmra.mrb[72].mxu1 %v11227_v9 }
 0x41e   : > { %7622 = vmatprep.mubr.bf16.mxu1 %v11235_v2 }
 0x420   : > { %v7212_v49 = vpop.f32.mrb[32].mxu0 }
 0x421   : > { %v7213_v29 = vpop.f32.mrb[33].mxu0 }
 0x422   : > { %v11424_v31 = vadd.f32 %v7213_v29, %v7212_v49  ;;  %v7215_v17 = vpop.f32.mrb[34].mxu0  ;;  %v11871_v49 = vld [vmem:[#allocation45_spill] sm:$0xff] }
 0x423   : > { %v7216_v7 = vpop.f32.mrb[35].mxu0 }
 0x424   : > { %v11426_v48 = vadd.f32 %v7216_v7, %v7215_v17 }
 0x425   : > { %7623 = vmatmul.mubr.bf16.gmra.mrb[76].mxu1 %v11242_v15 }
 0x426   : > { %7626 = vmatprep.mubr.bf16.mxu1 %v11248_v50 }
 0x42d   : > { %v7218_v51 = vpop.f32.mrb[36].mxu0  ;;  %7627 = vmatmul.mubr.bf16.gmra.mrb[80].mxu1 %v11251_v56 }
 0x42e   : > { %v7219_v0 = vpop.f32.mrb[37].mxu0  ;;  %7630 = vmatprep.mubr.bf16.mxu1 %v11254_v60 }
 0x42f   : > { %v11431_v33 = vadd.f32 %v7219_v0, %v7218_v51  ;;  %v7221_v9 = vpop.f32.mrb[38].mxu0  ;;  %v11872_v51 = vld [vmem:[#allocation48_spill] sm:$0xff] }
 0x430   : > { %v7222_v2 = vpop.f32.mrb[39].mxu0 }
 0x431   : > { %v11434_v38 = vadd.f32 %v7222_v2, %v7221_v9 }
 0x435   : > { %v7224_v26 = vpop.f32.mrb[40].mxu0  ;;  %7631 = vmatmul.mubr.bf16.gmra.mrb[0].mxu1 %v11273_v19  ;;  %v6210_v19 = vrot.slane %v11386_v28, 1 }
 0x436   : > { %v7225_v12 = vpop.f32.mrb[41].mxu0  ;;  %7634 = vmatprep.mubr.bf16.mxu1 %v11307_v30 }
 0x437   : > { %v11437_v43 = vadd.f32 %v7225_v12, %v7224_v26  ;;  %v7227_v15 = vpop.f32.mrb[42].mxu0  ;;  %v6211_v27 = vsel %vm4790_vm7, %v6208_v21, %v6210_v19  ;;  %v11873_v26 = vld [vmem:[#allocation46_spill] sm:$0xff] }
 0x438   : > { %v7228_v50 = vpop.f32.mrb[43].mxu0 }
 0x439   : > { %v11440_v36 = vadd.f32 %v7228_v50, %v7227_v15 }
 0x43d   : > { %v7230_v56 = vpop.f32.mrb[44].mxu0  ;;  %7635 = vmatmul.mubr.bf16.gmra.mrb[4].mxu1 %v11326_v11  ;;  %v6213_v11 = vsel %vm4790_vm7, %v6210_v19, %v6212_v32 }
 0x43e   : > { %v7231_v25 = vpop.f32.mrb[45].mxu0  ;;  %7638 = vmatprep.mubr.bf16.mxu1 %v11343_v41  ;;  %v6214_v41 = vrot.slane %v11400_v46, 1 }
 0x43f   : > { %v11443_v60 = vadd.f32 %v7231_v25, %v7230_v56  ;;  %v7233_v3 = vpop.f32.mrb[46].mxu0 }
 0x440   : > { %v7234_v14 = vpop.f32.mrb[47].mxu0  ;;  %v6215_v24 = vsel %vm4790_vm7, %v6212_v32, %v6214_v41 }
 0x441   : > { %v11446_v62 = vadd.f32 %v7234_v14, %v7233_v3 }
 0x445   : > { %v7236_v30 = vpop.f32.mrb[48].mxu0  ;;  %7639 = vmatmul.mubr.bf16.gmra.mrb[8].mxu1 %v6211_v27  ;;  %v11874_v27 = vld [vmem:[#allocation51_spill] sm:$0xff] }
 0x446   : > { %v7237_v39 = vpop.f32.mrb[49].mxu0  ;;  %7642 = vmatprep.mubr.bf16.mxu1 %v6213_v11 }
 0x447   : > { %v11454_v18 = vadd.f32 %v7237_v39, %v7236_v30  ;;  %v7239_v5 = vpop.f32.mrb[50].mxu0 }
 0x448   : > { %v7240_v37 = vpop.f32.mrb[51].mxu0  ;;  %v7286_v28 = vpop.f32.mrb[16].mxu1 }
 0x449   : > { %v11457_v6 = vadd.f32 %v7240_v37, %v7239_v5  ;;  %v7287_v44 = vpop.f32.mrb[17].mxu1  ;;  %v11875_v5 = vld [vmem:[#allocation49_spill] sm:$0xff] }
 0x44a   : > { %v7288_v58 = vadd.f32 %v7287_v44, %v7286_v28  ;;  %v7289_v8 = vpop.f32.mrb[18].mxu1  ;;  %v11876_v28 = vld [vmem:[#allocation52_spill] sm:$0xff] }
 0x44b   : > { %v7290_v21 = vpop.f32.mrb[19].mxu1 }
 0x44c   : > { %v7291_v45 = vadd.f32 %v7290_v21, %v7289_v8 }
 0x44d   : > { %v7242_v34 = vpop.f32.mrb[52].mxu0  ;;  %7643 = vmatmul.mubr.bf16.gmra.mrb[12].mxu1 %v6215_v24  ;;  %v11877_v24 = vld [vmem:[#allocation50_spill] sm:$0xff] }
 0x44e   : > { %v7243_v57 = vpop.f32.mrb[53].mxu0 }
 0x44f   : > { %v11460_v55 = vadd.f32 %v7243_v57, %v7242_v34  ;;  %v7245_v35 = vpop.f32.mrb[54].mxu0 }
 0x450   : > { %v7246_v53 = vpop.f32.mrb[55].mxu0  ;;  %v7292_v46 = vpop.f32.mrb[20].mxu1 }
 0x451   : > { %v11462_v54 = vadd.f32 %v7246_v53, %v7245_v35  ;;  %v7293_v42 = vpop.f32.mrb[21].mxu1 }
 0x452   : > { %v7294_v40 = vadd.f32 %v7293_v42, %v7292_v46  ;;  %v7295_v52 = vpop.f32.mrb[22].mxu1 }
 0x453   : > { %v7296_v16 = vpop.f32.mrb[23].mxu1 }
 0x454   : > { %v7297_v10 = vadd.f32 %v7296_v16, %v7295_v52 }
 0x455   : > { %v7532_v20 = vpop.f32.mrb[56].mxu0 }
 0x456   : > { %v5303_v59 = vadd.f32 %v7532_v20, %v11870_v22  ;;  %v5294_v63 = vpop.f32.mrb[57].mxu0 }
 0x457   : > { %v5295_v29 = vadd.f32 %v11871_v49, %v5294_v63  ;;  %v7533_v17 = vpop.f32.mrb[58].mxu0 }
 0x458   : > { %v11466_v7 = vadd.f32 %v7294_v40, %v5303_v59  ;;  %v5306_v0 = vadd.f32 %v7533_v17, %v11872_v51  ;;  %v5297_v9 = vpop.f32.mrb[59].mxu0  ;;  %v7298_v15 = vpop.f32.mrb[24].mxu1  ;;  %v11879_v17 = vld [vmem:[#allocation53_spill] sm:$0xff] }
 0x459   : > { %v5584_v2 = vadd.f32 %v7288_v58, %v5295_v29  ;;  %v5298_v12 = vadd.f32 %v11873_v26, %v5297_v9  ;;  %v7299_v56 = vpop.f32.mrb[25].mxu1 }
 0x45a   : > { %v11470_v50 = vadd.f32 %v7297_v10, %v5306_v0  ;;  %v7300_v3 = vadd.f32 %v7299_v56, %v7298_v15  ;;  %v7301_v14 = vpop.f32.mrb[26].mxu1  ;;  %v11878_v10 = vld [vmem:[#allocation35_spill] sm:$0xff] }
 0x45b   : > { %v5587_v25 = vadd.f32 %v7291_v45, %v5298_v12  ;;  %v7302_v19 = vpop.f32.mrb[27].mxu1 }
 0x45c   : > { %v7303_v30 = vadd.f32 %v7302_v19, %v7301_v14 }
 0x45d   : > { %v7536_v32 = vpop.f32.mrb[60].mxu0 }
 0x45e   : > { %v5319_v39 = vadd.f32 %v7536_v32, %v11874_v27  ;;  %v5310_v11 = vpop.f32.mrb[61].mxu0 }
 0x45f   : > { %v5311_v41 = vadd.f32 %v11875_v5, %v5310_v11  ;;  %v7537_v37 = vpop.f32.mrb[62].mxu0 }
 0x460   : > { %v5322_v44 = vadd.f32 %v7537_v37, %v11876_v28  ;;  %v5313_v58 = vpop.f32.mrb[63].mxu0  ;;  %v7304_v34 = vpop.f32.mrb[28].mxu1 }
 0x461   : > { %v11475_v8 = vadd.f32 %v7300_v3, %v5311_v41  ;;  %v5314_v21 = vadd.f32 %v11877_v24, %v5313_v58  ;;  %v7305_v45 = vpop.f32.mrb[29].mxu1 }
 0x462   : > { %v7306_v35 = vadd.f32 %v7305_v45, %v7304_v34  ;;  %v7307_v53 = vpop.f32.mrb[30].mxu1 }
 0x463   : > { %v11478_v57 = vadd.f32 %v7303_v30, %v5314_v21  ;;  %v7308_v46 = vpop.f32.mrb[31].mxu1 }
 0x464   : > { %v11480_v42 = vadd.f32 %v7306_v35, %v5319_v39  ;;  %v7309_v52 = vadd.f32 %v7308_v46, %v7307_v53 }
 0x465   : > { %v7540_v40 = vpop.f32.mrb[64].mxu0 }
 0x466   : > { %v5335_v16 = vadd.f32 %v7540_v40, %v11318_v13  ;;  %v5326_v20 = vpop.f32.mrb[65].mxu0  ;;  %v11484_v59 = vadd.f32 %v7309_v52, %v5322_v44 }
 0x467   : > { %v5327_v22 = vadd.f32 %v11878_v10, %v5326_v20  ;;  %v7541_v63 = vpop.f32.mrb[66].mxu0 }
 0x468   : > { %v5338_v49 = vadd.f32 %v7541_v63, %v11323_v4  ;;  %v5329_v29 = vpop.f32.mrb[67].mxu0  ;;  %v7310_v0 = vpop.f32.mrb[32].mxu1 }
 0x469   : > { %v5330_v51 = vadd.f32 %v11879_v17, %v5329_v29  ;;  %v7311_v9 = vpop.f32.mrb[33].mxu1 }
 0x46a   : > { %v7312_v26 = vadd.f32 %v7311_v9, %v7310_v0  ;;  %v7313_v12 = vpop.f32.mrb[34].mxu1 }
 0x46b   : > { %v7314_v15 = vpop.f32.mrb[35].mxu1 }
 0x46c   : > { %v11488_v56 = vadd.f32 %v7312_v26, %v5327_v22  ;;  %v7315_v3 = vadd.f32 %v7314_v15, %v7313_v12 }
 0x46e   : > { %v11490_v13 = vadd.f32 %v7315_v3, %v5330_v51 }
 0x470   : > { %v7316_v14 = vpop.f32.mrb[36].mxu1 }
 0x471   : > { %v7317_v19 = vpop.f32.mrb[37].mxu1 }
 0x472   : > { %v7318_v32 = vadd.f32 %v7317_v19, %v7316_v14  ;;  %v7319_v30 = vpop.f32.mrb[38].mxu1 }
 0x473   : > { %v7320_v27 = vpop.f32.mrb[39].mxu1 }
 0x474   : > { %v11492_v39 = vadd.f32 %v7318_v32, %v5335_v16  ;;  %v7321_v11 = vadd.f32 %v7320_v27, %v7319_v30 }
 0x475   : > { %v7408_v4 = vpop.f32.mrb[68].mxu0 }
 0x476   : > { %v7409_v5 = vpop.f32.mrb[69].mxu0  ;;  %v11494_v37 = vadd.f32 %v7321_v11, %v5338_v49 }
 0x477   : > { %v7410_v41 = vadd.f32 %v7409_v5, %v7408_v4  ;;  %v7411_v28 = vpop.f32.mrb[70].mxu0 }
 0x478   : > { %v7412_v44 = vpop.f32.mrb[71].mxu0  ;;  %v7322_v24 = vpop.f32.mrb[40].mxu1 }
 0x479   : > { %v7413_v58 = vadd.f32 %v7412_v44, %v7411_v28  ;;  %v11496_v21 = vadd.f32 %v7410_v41, %v5584_v2  ;;  %v7323_v34 = vpop.f32.mrb[41].mxu1 }
 0x47a   : > { %v7324_v45 = vadd.f32 %v7323_v34, %v7322_v24  ;;  %v7325_v35 = vpop.f32.mrb[42].mxu1 }
 0x47b   : > { %v11498_v53 = vadd.f32 %v7413_v58, %v5587_v25  ;;  %v7326_v46 = vpop.f32.mrb[43].mxu1 }
 0x47c   : > { %v11501_v40 = vadd.f32 %v7324_v45, %v11360_v47  ;;  %v7327_v16 = vadd.f32 %v7326_v46, %v7325_v35 }
 0x47d   : > { %v7414_v52 = vpop.f32.mrb[72].mxu0 }
 0x47e   : > { %v7415_v20 = vpop.f32.mrb[73].mxu0  ;;  %v11504_v22 = vadd.f32 %v7327_v16, %v11362_v23 }
 0x47f   : > { %v7416_v10 = vadd.f32 %v7415_v20, %v7414_v52  ;;  %v7417_v63 = vpop.f32.mrb[74].mxu0 }
 0x480   : > { %v7418_v49 = vpop.f32.mrb[75].mxu0  ;;  %v7328_v29 = vpop.f32.mrb[44].mxu1 }
 0x481   : > { %v7419_v2 = vadd.f32 %v7418_v49, %v7417_v63  ;;  %v11507_v17 = vadd.f32 %v7416_v10, %v11466_v7  ;;  %v7329_v25 = vpop.f32.mrb[45].mxu1 }
 0x482   : > { %v7330_v51 = vadd.f32 %v7329_v25, %v7328_v29  ;;  %v7331_v0 = vpop.f32.mrb[46].mxu1 }
 0x483   : > { %v11510_v47 = vadd.f32 %v7419_v2, %v11470_v50  ;;  %v7332_v9 = vpop.f32.mrb[47].mxu1 }
 0x484   : > { %v11513_v26 = vadd.f32 %v7330_v51, %v11404_v61  ;;  %v7333_v23 = vadd.f32 %v7332_v9, %v7331_v0 }
 0x485   : > { %v7420_v12 = vpop.f32.mrb[76].mxu0 }
 0x486   : > { %v7421_v15 = vpop.f32.mrb[77].mxu0  ;;  %v11516_v14 = vadd.f32 %v7333_v23, %v11408_v1 }
 0x487   : > { %v7422_v3 = vadd.f32 %v7421_v15, %v7420_v12  ;;  %v7423_v19 = vpop.f32.mrb[78].mxu0 }
 0x488   : > { %v7424_v7 = vpop.f32.mrb[79].mxu0  ;;  %v7334_v30 = vpop.f32.mrb[48].mxu1 }
 0x489   : > { %v7425_v32 = vadd.f32 %v7424_v7, %v7423_v19  ;;  %v11519_v27 = vadd.f32 %v7422_v3, %v11475_v8  ;;  %v7335_v50 = vpop.f32.mrb[49].mxu1 }
 0x48a   : > { %v7336_v4 = vadd.f32 %v7335_v50, %v7334_v30  ;;  %v7337_v11 = vpop.f32.mrb[50].mxu1 }
 0x48b   : > { %v11522_v61 = vadd.f32 %v7425_v32, %v11478_v57  ;;  %v7338_v5 = vpop.f32.mrb[51].mxu1 }
 0x48c   : > { %v11525_v41 = vadd.f32 %v7336_v4, %v11424_v31  ;;  %v7339_v1 = vadd.f32 %v7338_v5, %v7337_v11 }
 0x48d   : > { %v7426_v28 = vpop.f32.mrb[80].mxu0 }
 0x48e   : > { %v7427_v44 = vpop.f32.mrb[81].mxu0  ;;  %v11528_v24 = vadd.f32 %v7339_v1, %v11426_v48 }
 0x48f   : > { %v7428_v58 = vadd.f32 %v7427_v44, %v7426_v28  ;;  %v7429_v34 = vpop.f32.mrb[82].mxu0 }
 0x490   : > { %v7430_v8 = vpop.f32.mrb[83].mxu0  ;;  %v7340_v35 = vpop.f32.mrb[52].mxu1 }
 0x491   : > { %v7431_v45 = vadd.f32 %v7430_v8, %v7429_v34  ;;  %v11531_v46 = vadd.f32 %v7428_v58, %v11480_v42  ;;  %v7341_v57 = vpop.f32.mrb[53].mxu1 }
 0x492   : > { %v7342_v52 = vadd.f32 %v7341_v57, %v7340_v35  ;;  %v7343_v16 = vpop.f32.mrb[54].mxu1 }
 0x493   : > { %v11534_v31 = vadd.f32 %v7431_v45, %v11484_v59  ;;  %v7344_v20 = vpop.f32.mrb[55].mxu1 }
 0x494   : > { %v11537_v10 = vadd.f32 %v7342_v52, %v11431_v33  ;;  %v7345_v48 = vadd.f32 %v7344_v20, %v7343_v16 }
 0x495   : > { %v7432_v63 = vpop.f32.mrb[84].mxu0 }
 0x496   : > { %v7433_v49 = vpop.f32.mrb[85].mxu0  ;;  %v11540_v29 = vadd.f32 %v7345_v48, %v11434_v38 }
 0x497   : > { %v7434_v2 = vadd.f32 %v7433_v49, %v7432_v63  ;;  %v7435_v25 = vpop.f32.mrb[86].mxu0 }
 0x498   : > { %v7436_v42 = vpop.f32.mrb[87].mxu0  ;;  %v7346_v0 = vpop.f32.mrb[56].mxu1 }
 0x499   : > { %v7437_v51 = vadd.f32 %v7436_v42, %v7435_v25  ;;  %v11543_v9 = vadd.f32 %v7434_v2, %v11488_v56  ;;  %v7347_v59 = vpop.f32.mrb[57].mxu1 }
 0x49a   : > { %v7348_v12 = vadd.f32 %v7347_v59, %v7346_v0  ;;  %v7349_v23 = vpop.f32.mrb[58].mxu1 }
 0x49b   : > { %v11546_v33 = vadd.f32 %v7437_v51, %v11490_v13  ;;  %v7350_v15 = vpop.f32.mrb[59].mxu1 }
 0x49c   : > { %v11549_v3 = vadd.f32 %v7348_v12, %v11437_v43  ;;  %v7351_v38 = vadd.f32 %v7350_v15, %v7349_v23 }
 0x49d   : > { %v7438_v19 = vpop.f32.mrb[88].mxu0 }
 0x49e   : > { %v7439_v7 = vpop.f32.mrb[89].mxu0  ;;  %v11552_v30 = vadd.f32 %v7351_v38, %v11440_v36 }
 0x49f   : > { %v7440_v32 = vadd.f32 %v7439_v7, %v7438_v19  ;;  %v7441_v50 = vpop.f32.mrb[90].mxu0 }
 0x4a0   : > { %v7442_v56 = vpop.f32.mrb[91].mxu0  ;;  %v7352_v11 = vpop.f32.mrb[60].mxu1 }
 0x4a1   : > { %v7443_v4 = vadd.f32 %v7442_v56, %v7441_v50  ;;  %v11555_v5 = vadd.f32 %v7440_v32, %v11492_v39  ;;  %v7353_v13 = vpop.f32.mrb[61].mxu1 }
 0x4a2   : > { %v7354_v28 = vadd.f32 %v7353_v13, %v7352_v11  ;;  %v7355_v1 = vpop.f32.mrb[62].mxu1 }
 0x4a3   : > { %v11558_v43 = vadd.f32 %v7443_v4, %v11494_v37  ;;  %v7356_v44 = vpop.f32.mrb[63].mxu1 }
 0x4a4   : > { %v11561_v58 = vadd.f32 %v7354_v28, %v11443_v60  ;;  %v7357_v36 = vadd.f32 %v7356_v44, %v7355_v1 }
 0x4a5   : > { %v7444_v34 = vpop.f32.mrb[92].mxu0 }
 0x4a6   : > { %v7445_v8 = vpop.f32.mrb[93].mxu0  ;;  %v7740_v35 = vadd.f32 %v7357_v36, %v11446_v62 }
 0x4a7   : > { %v7446_v45 = vadd.f32 %v7445_v8, %v7444_v34  ;;  %v7447_v57 = vpop.f32.mrb[94].mxu0 }
 0x4a8   : > { %v7448_v52 = vpop.f32.mrb[95].mxu0  ;;  %v7358_v16 = vpop.f32.mrb[64].mxu1 }
 0x4a9   : > { %v7449_v39 = vadd.f32 %v7448_v52, %v7447_v57  ;;  %v11565_v20 = vadd.f32 %v11501_v40, %v7446_v45  ;;  %v7359_v63 = vpop.f32.mrb[65].mxu1 }
 0x4aa   : > { %v7360_v37 = vadd.f32 %v7359_v63, %v7358_v16  ;;  %v7361_v48 = vpop.f32.mrb[66].mxu1 }
 0x4ab   : > { %v11568_v49 = vadd.f32 %v11504_v22, %v7449_v39  ;;  %v7362_v60 = vpop.f32.mrb[67].mxu1 }
 0x4ac   : > { %v7749_v2 = vadd.f32 %v7360_v37, %v11454_v18  ;;  %v7363_v42 = vadd.f32 %v7362_v60, %v7361_v48 }
 0x4ad   : > { %v7450_v25 = vpop.f32.mrb[96].mxu0 }
 0x4ae   : > { %v7451_v51 = vpop.f32.mrb[97].mxu0  ;;  %v7755_v0 = vadd.f32 %v7363_v42, %v11457_v6 }
 0x4af   : > { %v7452_v62 = vadd.f32 %v7451_v51, %v7450_v25  ;;  %v7453_v59 = vpop.f32.mrb[98].mxu0 }
 0x4b0   : > { %v7454_v12 = vpop.f32.mrb[99].mxu0  ;;  %v7364_v40 = vpop.f32.mrb[68].mxu1 }
 0x4b1   : > { %v7455_v23 = vadd.f32 %v7454_v12, %v7453_v59  ;;  %v11573_v15 = vadd.f32 %v11513_v26, %v7452_v62  ;;  %v7365_v19 = vpop.f32.mrb[69].mxu1 }
 0x4b2   : > { %v7366_v38 = vadd.f32 %v7365_v19, %v7364_v40  ;;  %v7367_v22 = vpop.f32.mrb[70].mxu1 }
 0x4b3   : > { %v11576_v7 = vadd.f32 %v11516_v14, %v7455_v23  ;;  %v7368_v18 = vpop.f32.mrb[71].mxu1 }
 0x4b4   : > { %v7746_v32 = vadd.f32 %v7366_v38, %v11460_v55  ;;  %v7369_v56 = vadd.f32 %v7368_v18, %v7367_v22 }
 0x4b5   : > { %v7456_v50 = vpop.f32.mrb[100].mxu0 }
 0x4b6   : > { %v7457_v4 = vpop.f32.mrb[101].mxu0  ;;  %v7752_v11 = vadd.f32 %v7369_v56, %v11462_v54 }
 0x4b7   : > { %v7458_v6 = vadd.f32 %v7457_v4, %v7456_v50  ;;  %v7459_v13 = vpop.f32.mrb[102].mxu0 }
 0x4b8   : > { %v7460_v28 = vpop.f32.mrb[103].mxu0 }
 0x4b9   : > { %v7461_v1 = vadd.f32 %v7460_v28, %v7459_v13  ;;  %v11581_v26 = vadd.f32 %v11525_v41, %v7458_v6 }
 0x4bb   : > { %v11584_v44 = vadd.f32 %v11528_v24, %v7461_v1 }
 0x4bd   : > { %v7462_v14 = vpop.f32.mrb[104].mxu0 }
 0x4be   : > { %v7463_v34 = vpop.f32.mrb[105].mxu0 }
 0x4bf   : > { %v7464_v36 = vadd.f32 %v7463_v34, %v7462_v14  ;;  %v7465_v8 = vpop.f32.mrb[106].mxu0 }
 0x4c0   : > { %v7466_v55 = vpop.f32.mrb[107].mxu0 }
 0x4c1   : > { %v7467_v45 = vadd.f32 %v7466_v55, %v7465_v8  ;;  %v11587_v57 = vadd.f32 %v11537_v10, %v7464_v36  ;;  %v11880_v36 = vld [vmem:[#allocation26_spill] sm:$0xff] }
 0x4c3   : > { %v11590_v54 = vadd.f32 %v11540_v29, %v7467_v45 }
 0x4c5   : > { %v7468_v52 = vpop.f32.mrb[108].mxu0 }
 0x4c6   : > { %v7469_v39 = vpop.f32.mrb[109].mxu0 }
 0x4c7   : > { %v7470_v16 = vadd.f32 %v7469_v39, %v7468_v52  ;;  %v7471_v41 = vpop.f32.mrb[110].mxu0 }
 0x4c8   : > { %v7472_v63 = vpop.f32.mrb[111].mxu0 }
 0x4c9   : > { %v7473_v37 = vadd.f32 %v7472_v63, %v7471_v41  ;;  %v11593_v24 = vadd.f32 %v11549_v3, %v7470_v16 }
 0x4cb   : > { %v11596_v48 = vadd.f32 %v11552_v30, %v7473_v37 }
 0x4cd   : > { %v7474_v60 = vpop.f32.mrb[112].mxu0 }
 0x4ce   : > { %v7475_v25 = vpop.f32.mrb[113].mxu0 }
 0x4cf   : > { %v7476_v42 = vadd.f32 %v7475_v25, %v7474_v60  ;;  %v7477_v10 = vpop.f32.mrb[114].mxu0 }
 0x4d0   : > { %v7478_v51 = vpop.f32.mrb[115].mxu0 }
 0x4d1   : > { %v7479_v62 = vadd.f32 %v7478_v51, %v7477_v10  ;;  %v11599_v29 = vadd.f32 %v11561_v58, %v7476_v42 }
 0x4d3   : > { %v11601_v59 = vadd.f32 %v7740_v35, %v7479_v62 }
 0x4d5   : > { %v7480_v12 = vpop.f32.mrb[116].mxu0 }
 0x4d6   : > { %v7481_v23 = vpop.f32.mrb[117].mxu0 }
 0x4d7   : > { %v7482_v40 = vadd.f32 %v7481_v23, %v7480_v12  ;;  %v7483_v19 = vpop.f32.mrb[118].mxu0 }
 0x4d8   : > { %v7484_v3 = vpop.f32.mrb[119].mxu0 }
 0x4d9   : > { %v7485_v38 = vadd.f32 %v7484_v3, %v7483_v19  ;;  %v11603_v22 = vadd.f32 %v7749_v2, %v7482_v40 }
 0x4db   : > { %v11605_v30 = vadd.f32 %v7755_v0, %v7485_v38 }
 0x4dd   : > { %v7486_v18 = vpop.f32.mrb[120].mxu0 }
 0x4de   : > { %v7487_v50 = vpop.f32.mrb[121].mxu0 }
 0x4df   : > { %v7488_v56 = vadd.f32 %v7487_v50, %v7486_v18  ;;  %v7489_v4 = vpop.f32.mrb[122].mxu0 }
 0x4e0   : > { %v7490_v6 = vpop.f32.mrb[123].mxu0 }
 0x4e1   : > { %v7491_v13 = vadd.f32 %v7490_v6, %v7489_v4  ;;  %v11607_v58 = vadd.f32 %v7746_v32, %v7488_v56 }
 0x4e3   : > { %v11609_v35 = vadd.f32 %v7752_v11, %v7491_v13 }
 0x4f0   : > { %v7620_v28 = vpop.f32.mrb[72].mxu1 }
 0x4f1   : > { %v7665_v1 = vadd.f32 %v11507_v17, %v7620_v28  ;;  %v6602_v14 = vpop.f32.mrb[73].mxu1 }
 0x4f2   : > { %v7669_v34 = vadd.f32 %v11496_v21, %v6602_v14  ;;  %v7621_v2 = vpop.f32.mrb[74].mxu1 }
 0x4f3   : > { %v6749_v0 = vadd.f32 %v7665_v1, %v11880_v36  ;;  %v7673_v8 = vadd.f32 %v11510_v47, %v7621_v2  ;;  %v6605_v55 = vpop.f32.mrb[75].mxu1 }
 0x4f4   : > { %v6747_v45 = vadd.f32 %v7669_v34, %v11880_v36  ;;  %v7677_v52 = vadd.f32 %v11498_v53, %v6605_v55 }
 0x4f5   : > { %v6777_v32 = vmax.f32 %v6749_v0, 0.0  ;;  %v6750_v11 = vadd.f32 %v7673_v8, %v11880_v36 }
 0x4f6   : > { %v6775_v39 = vmax.f32 %v6747_v45, 0.0  ;;  %v6748_v16 = vadd.f32 %v7677_v52, %v11880_v36 }
 0x4f7   : > { %v6778_v17 = vmax.f32 %v6750_v11, 0.0 }
 0x4f8   : > { %v6803_v41 = vmax.f32 %v6775_v39, %v6777_v32  ;;  %v6776_v63 = vmax.f32 %v6748_v16, 0.0  ;;  %v7624_v21 = vpop.f32.mrb[76].mxu1 }
 0x4f9   : > { %v7681_v37 = vadd.f32 %v11531_v46, %v7624_v21  ;;  %v6618_v60 = vpop.f32.mrb[77].mxu1 }
 0x4fa   : > { %6817 = vst [vmem:[#allocation5] sm:$0xff] %v6803_v41  ;;  %v6804_v47 = vmax.f32 %v6776_v63, %v6778_v17  ;;  %v7685_v25 = vadd.f32 %v11519_v27, %v6618_v60  ;;  %v7625_v42 = vpop.f32.mrb[78].mxu1 }
 0x4fb   : > { %v6753_v53 = vadd.f32 %v7681_v37, %v11880_v36  ;;  %v7689_v10 = vadd.f32 %v11534_v31, %v7625_v42  ;;  %v6621_v51 = vpop.f32.mrb[79].mxu1 }
 0x4fc   : > { %6818 = vst [vmem:[#allocation5 + $0x8] sm:$0xff] %v6804_v47  ;;  %v6751_v62 = vadd.f32 %v7685_v25, %v11880_v36  ;;  %v7693_v12 = vadd.f32 %v11522_v61, %v6621_v51 }
 0x4fd   : > { %v6781_v23 = vmax.f32 %v6753_v53, 0.0  ;;  %v6754_v40 = vadd.f32 %v7689_v10, %v11880_v36 }
 0x4fe   : > { %v6779_v46 = vmax.f32 %v6751_v62, 0.0  ;;  %v6752_v19 = vadd.f32 %v7693_v12, %v11880_v36 }
 0x4ff   : > { %v6782_v3 = vmax.f32 %v6754_v40, 0.0 }
 0x500   : > { %v6805_v38 = vmax.f32 %v6779_v46, %v6781_v23  ;;  %v6780_v27 = vmax.f32 %v6752_v19, 0.0  ;;  %v7628_v18 = vpop.f32.mrb[80].mxu1 }
 0x501   : > { %v7697_v50 = vadd.f32 %v11555_v5, %v7628_v18  ;;  %v6634_v56 = vpop.f32.mrb[81].mxu1 }
 0x502   : > { %6819 = vst [vmem:[#allocation5 + $0x10] sm:$0xff] %v6805_v38  ;;  %v6806_v31 = vmax.f32 %v6780_v27, %v6782_v3  ;;  %v7701_v4 = vadd.f32 %v11543_v9, %v6634_v56  ;;  %v7629_v6 = vpop.f32.mrb[82].mxu1 }
 0x503   : > { %v6757_v61 = vadd.f32 %v7697_v50, %v11880_v36  ;;  %v7705_v13 = vadd.f32 %v11558_v43, %v7629_v6  ;;  %v6637_v28 = vpop.f32.mrb[83].mxu1  ;;  %v6831_v8 = vld [vmem:[#allocation5] ss:$2 sm:$0xff]  ;;  %v6845_v9 = vld [vmem:[#allocation5 + $0x1] ss:$2 sm:$0xff] }
 0x504   : > { %6820 = vst [vmem:[#allocation5 + $0x18] sm:$0xff] %v6806_v31  ;;  %v6755_v1 = vadd.f32 %v7701_v4, %v11880_v36  ;;  %v7709_v14 = vadd.f32 %v11546_v33, %v6637_v28  ;;  %v6858_v39 = vmax.f32 %v6831_v8, %v6845_v9 }
 0x505   : > { %v6785_v34 = vmax.f32 %v6757_v61, 0.0  ;;  %v6758_v5 = vadd.f32 %v7705_v13, %v11880_v36 }
 0x506   : > { %v6783_v2 = vmax.f32 %v6755_v1, 0.0  ;;  %v6756_v0 = vadd.f32 %v7709_v14, %v11880_v36 }
 0x507   : > { %v6786_v55 = vmax.f32 %v6758_v5, 0.0 }
 0x508   : > { %v6807_v45 = vmax.f32 %v6783_v2, %v6785_v34  ;;  %v6784_v52 = vmax.f32 %v6756_v0, 0.0  ;;  %v7632_v32 = vpop.f32.mrb[0].mxu1 }
 0x509   : > { %v7712_v43 = vadd.f32 %v11573_v15, %v7632_v32  ;;  %v6650_v11 = vpop.f32.mrb[1].mxu1 }
 0x50a   : > { %6821 = vst [vmem:[#allocation5 + $0x20] sm:$0xff] %v6807_v45  ;;  %v6808_v16 = vmax.f32 %v6784_v52, %v6786_v55  ;;  %v7715_v33 = vadd.f32 %v11565_v20, %v6650_v11  ;;  %v7633_v17 = vpop.f32.mrb[2].mxu1  ;;  %v6865_v20 = vsel %vm8252_vm0, %v6858_v39, 0.0 }
 0x50b   : > { %v6833_v41 = vld [vmem:[#allocation5 + $0x10] ss:$2 sm:$0xff]  ;;  %v6847_v63 = vld [vmem:[#allocation5 + $0x11] ss:$2 sm:$0xff]  ;;  %v6761_v21 = vadd.f32 %v7712_v43, %v11880_v36  ;;  %v7718_v37 = vadd.f32 %v11576_v7, %v7633_v17  ;;  %v6653_v60 = vpop.f32.mrb[3].mxu1 }
 0x50c   : > { %v6859_v47 = vmax.f32 %v6833_v41, %v6847_v63  ;;  %6822 = vst [vmem:[#allocation5 + $0x28] sm:$0xff] %v6808_v16  ;;  %v6759_v25 = vadd.f32 %v7715_v33, %v11880_v36  ;;  %v7721_v15 = vadd.f32 %v11568_v49, %v6653_v60 }
 0x50d   : > { %v6789_v42 = vmax.f32 %v6761_v21, 0.0  ;;  %v6762_v53 = vadd.f32 %v7718_v37, %v11880_v36 }
 0x50e   : > { %v6866_v62 = vsel %vm8256_vm1, %v6859_v47, 0.0  ;;  %v6787_v7 = vmax.f32 %v6759_v25, 0.0  ;;  %v6760_v12 = vadd.f32 %v7721_v15, %v11880_v36 }
 0x50f   : > { %v7134_v23 = vpack.c.bf16 %v6866_v62, %v6865_v20  ;;  %v6790_v49 = vmax.f32 %v6762_v53, 0.0 }
 0x510   : > { %v6809_v40 = vmax.f32 %v6787_v7, %v6789_v42  ;;  %v6788_v46 = vmax.f32 %v6760_v12, 0.0  ;;  %v7636_v19 = vpop.f32.mrb[4].mxu1 }
 0x511   : > { %7135 = vst [vmem:[%s11650_s26] sm:$0xff] %v7134_v23   ;;  %v7724_v3 = vadd.f32 %v11587_v57, %v7636_v19  ;;  %v6666_v38 = vpop.f32.mrb[5].mxu1 }
 0x512   : > { %6823 = vst [vmem:[#allocation5 + $0x30] sm:$0xff] %v6809_v40  ;;  %v6810_v27 = vmax.f32 %v6788_v46, %v6790_v49  ;;  %v7727_v18 = vadd.f32 %v11581_v26, %v6666_v38  ;;  %v7637_v50 = vpop.f32.mrb[6].mxu1 }
 0x513   : > { %v6765_v56 = vadd.f32 %v7724_v3, %v11880_v36  ;;  %v7730_v31 = vadd.f32 %v11590_v54, %v7637_v50  ;;  %v6669_v4 = vpop.f32.mrb[7].mxu1  ;;  %v6835_v14 = vld [vmem:[#allocation5 + $0x20] ss:$2 sm:$0xff]  ;;  %v6849_v34 = vld [vmem:[#allocation5 + $0x21] ss:$2 sm:$0xff] }
 0x514   : > { %6824 = vst [vmem:[#allocation5 + $0x38] sm:$0xff] %v6810_v27  ;;  %v6763_v6 = vadd.f32 %v7727_v18, %v11880_v36  ;;  %v7733_v61 = vadd.f32 %v11584_v44, %v6669_v4  ;;  %v6860_v9 = vmax.f32 %v6835_v14, %v6849_v34 }
 0x515   : > { %v6793_v13 = vmax.f32 %v6765_v56, 0.0  ;;  %v6766_v28 = vadd.f32 %v7730_v31, %v11880_v36 }
 0x516   : > { %v6791_v57 = vmax.f32 %v6763_v6, 0.0  ;;  %v6764_v1 = vadd.f32 %v7733_v61, %v11880_v36 }
 0x517   : > { %v6794_v26 = vmax.f32 %v6766_v28, 0.0 }
 0x518   : > { %v6811_v5 = vmax.f32 %v6791_v57, %v6793_v13  ;;  %v6792_v2 = vmax.f32 %v6764_v1, 0.0  ;;  %v7640_v0 = vpop.f32.mrb[8].mxu1 }
 0x519   : > { %v7736_v54 = vadd.f32 %v11599_v29, %v7640_v0  ;;  %v6682_v8 = vpop.f32.mrb[9].mxu1 }
 0x51a   : > { %6825 = vst [vmem:[#allocation5 + $0x40] sm:$0xff] %v6811_v5  ;;  %v6812_v55 = vmax.f32 %v6792_v2, %v6794_v26  ;;  %v7739_v44 = vadd.f32 %v11593_v24, %v6682_v8  ;;  %v7641_v45 = vpop.f32.mrb[10].mxu1  ;;  %v6867_v24 = vsel %vm8260_vm2, %v6860_v9, 0.0 }
 0x51b   : > { %v6837_v52 = vld [vmem:[#allocation5 + $0x30] ss:$2 sm:$0xff]  ;;  %v6851_v32 = vld [vmem:[#allocation5 + $0x31] ss:$2 sm:$0xff]  ;;  %v6769_v43 = vadd.f32 %v7736_v54, %v11880_v36  ;;  %v7742_v11 = vadd.f32 %v11601_v59, %v7641_v45  ;;  %v6685_v39 = vpop.f32.mrb[11].mxu1 }
 0x51c   : > { %v6861_v16 = vmax.f32 %v6837_v52, %v6851_v32  ;;  %6826 = vst [vmem:[#allocation5 + $0x48] sm:$0xff] %v6812_v55  ;;  %v6767_v33 = vadd.f32 %v7739_v44, %v11880_v36  ;;  %v7745_v29 = vadd.f32 %v11596_v48, %v6685_v39 }
 0x51d   : > { %v6797_v17 = vmax.f32 %v6769_v43, 0.0  ;;  %v6770_v41 = vadd.f32 %v7742_v11, %v11880_v36 }
 0x51e   : > { %v6868_v37 = vsel %vm8264_vm3, %v6861_v16, 0.0  ;;  %v6795_v60 = vmax.f32 %v6767_v33, 0.0  ;;  %v6768_v59 = vadd.f32 %v7745_v29, %v11880_v36 }
 0x51f   : > { %v7139_v47 = vpack.c.bf16 %v6868_v37, %v6867_v24  ;;  %v6798_v25 = vmax.f32 %v6770_v41, 0.0 }
 0x520   : > { %v6813_v15 = vmax.f32 %v6795_v60, %v6797_v17  ;;  %v6796_v42 = vmax.f32 %v6768_v59, 0.0  ;;  %v7644_v53 = vpop.f32.mrb[12].mxu1 }
 0x521   : > { %7146 = vst [vmem:[%s11650_s26 + $0x8] sm:$0xff] %v7139_v47   ;;  %v7748_v48 = vadd.f32 %v11607_v58, %v7644_v53  ;;  %v6698_v10 = vpop.f32.mrb[13].mxu1 }
 0x522   : > { %6827 = vst [vmem:[#allocation5 + $0x50] sm:$0xff] %v6813_v15  ;;  %v6814_v20 = vmax.f32 %v6796_v42, %v6798_v25  ;;  %v7751_v51 = vadd.f32 %v11603_v22, %v6698_v10  ;;  %v7645_v62 = vpop.f32.mrb[14].mxu1 }
 0x523   : > { %v6773_v7 = vadd.f32 %v7748_v48, %v11880_v36  ;;  %v7754_v12 = vadd.f32 %v11609_v35, %v7645_v62  ;;  %v6701_v23 = vpop.f32.mrb[15].mxu1  ;;  %v6839_v38 = vld [vmem:[#allocation5 + $0x40] ss:$2 sm:$0xff]  ;;  %v6853_v22 = vld [vmem:[#allocation5 + $0x41] ss:$2 sm:$0xff] }
 0x524   : > { %6828 = vst [vmem:[#allocation5 + $0x58] sm:$0xff] %v6814_v20  ;;  %v6771_v49 = vadd.f32 %v7751_v51, %v11880_v36  ;;  %v7757_v40 = vadd.f32 %v11605_v30, %v6701_v23  ;;  %v6862_v56 = vmax.f32 %v6839_v38, %v6853_v22 }
 0x525   : > { %v6801_v46 = vmax.f32 %v6773_v7, 0.0  ;;  %v6774_v19 = vadd.f32 %v7754_v12, %v11880_v36 }
 0x526   : > { %v6799_v58 = vmax.f32 %v6771_v49, 0.0  ;;  %v6772_v3 = vadd.f32 %v7757_v40, %v11880_v36  ;;  %v6869_v61 = vsel %vm8268_vm4, %v6862_v56, 0.0 }
 0x527   : > { %v6802_v27 = vmax.f32 %v6774_v19, 0.0 }
 0x528   : > { %v6815_v18 = vmax.f32 %v6799_v58, %v6801_v46  ;;  %v6800_v50 = vmax.f32 %v6772_v3, 0.0 }
 0x52a   : > { %6829 = vst [vmem:[#allocation5 + $0x60] sm:$0xff] %v6815_v18  ;;  %v6816_v35 = vmax.f32 %v6800_v50, %v6802_v27 }
 0x52b   : > { %v6841_v31 = vld [vmem:[#allocation5 + $0x50] ss:$2 sm:$0xff]  ;;  %v6855_v4 = vld [vmem:[#allocation5 + $0x51] ss:$2 sm:$0xff] }
 0x52c   : > { %v6863_v6 = vmax.f32 %v6841_v31, %v6855_v4  ;;  %6830 = vst [vmem:[#allocation5 + $0x68] sm:$0xff] %v6816_v35 }
 0x52e   : > { %v6870_v28 = vsel %vm8272_vm5, %v6863_v6, 0.0 }
 0x52f   : > { %v7144_v57 = vpack.c.bf16 %v6870_v28, %v6869_v61 }
 0x531   : > { %7147 = vst [vmem:[%s11650_s26 + $0x10] sm:$0xff] %v7144_v57  }
 0x533   : > { %v6843_v1 = vld [vmem:[#allocation5 + $0x60] ss:$2 sm:$0xff]  ;;  %v6857_v14 = vld [vmem:[#allocation5 + $0x61] ss:$2 sm:$0xff]  ;;  %186 = sbr.rel (!%p184_p4) target bundleno = 90 (0x5a), region = 83 }
 0x534   : > { %v6864_v34 = vmax.f32 %v6843_v1, %v6857_v14 }
 0x536   : > { %v6871_v5 = vsel %vm8276_vm6, %v6864_v34, 0.0 }
 0x537   : > { %v7129_v2 = vpack.c.bf16 %v6871_v5, %v6871_v5 }
 0x539   : > { %6910 = vst [vmem:[%s11650_s26 + $0x18] sm:$0xf] %v7129_v2 }
 0x53a   :  { %6915 = vsyncpa [#allocation7], 1 }
 0x53b   :  { %6916 = vsyncpa [#allocation9], 1 }
 0x53c   :  { %6917 = vsyncpa [#allocation12], 1 }

</bundles_post_ra>
